<compile_context>
chip_gen: v6e
topology: v6e:2x2x1
jax: 0.10.0
libtpu: 0.0.40
codegen_flags: <defaults>
</compile_context>

<pallas_src>
import jax
import jax.numpy as jnp
from jax import lax
from jax.experimental import pallas as pl
from jax.experimental.pallas import tpu as pltpu


# ---------------------------------------------------------------------------
# Shared bidirectional LSTM recurrence (PyTorch gate order i, f, g, o)
# ---------------------------------------------------------------------------

def _bilstm_recurrence(gx_f_ref, gx_b_ref, whh_f_ref, whh_b_ref,
                       hseq_f_ref, hseq_b_ref):
    """Serial bi-LSTM recurrence over hoisted input projections.

    gx_f_ref / gx_b_ref:     (T, Bt, 4H) f32   precomputed x @ W_ih + b per dir
    whh_f_ref / whh_b_ref:   (H, 4H)     bf16  recurrent weights per direction
    hseq_f_ref / hseq_b_ref: (T, Bt, H)  f32   per-direction hidden sequences
    """
    T, Bt, H = hseq_f_ref.shape

    def cell(gates, c_prev):
        # TODO(synk): pad H to a multiple of 128 at production shapes so these
        # gate slices are free lane-aligned vreg views instead of masked selects.
        i = jax.nn.sigmoid(gates[:, 0 * H:1 * H])
        f = jax.nn.sigmoid(gates[:, 1 * H:2 * H])
        g = jnp.tanh(gates[:, 2 * H:3 * H])
        o = jax.nn.sigmoid(gates[:, 3 * H:4 * H])
        c_new = f * c_prev + i * g
        return c_new, o * jnp.tanh(c_new)

    def step(t, carry):
        h_f, c_f, h_b, c_b = carry
        tb = T - 1 - t                      # backward-direction time index
        # Two per-direction dots instead of one block-diagonal (2H, 8H) matmul:
        # the MXU never multiplies the zero blocks on the serial critical path.
        # TODO(synk): hold W_hh resident across the loop with
        # pltpu.matmul_push_rhs / matmul_acc_lhs / matmul_pop for small tiles.
        rec_f = jnp.dot(h_f.astype(jnp.bfloat16), whh_f_ref[...],
                        preferred_element_type=jnp.float32)
        rec_b = jnp.dot(h_b.astype(jnp.bfloat16), whh_b_ref[...],
                        preferred_element_type=jnp.float32)
        c_f, h_f = cell(rec_f + gx_f_ref[t], c_f)
        c_b, h_b = cell(rec_b + gx_b_ref[tb], c_b)
        # Lane-dense, leading-axis-indexed stores (one buffer per direction).
        hseq_f_ref[t] = h_f
        hseq_b_ref[tb] = h_b
        return (h_f, c_f, h_b, c_b)

    z = jnp.zeros((Bt, H), jnp.float32)
    lax.fori_loop(0, T, step, (z, z, z, z), unroll=True)


# ---------------------------------------------------------------------------
# Fully fused kernel: bi-LSTM x2 + attention pooling + lin1/ReLU/lin2
# ---------------------------------------------------------------------------

def _lstm_attn_kernel(
        # layer-1 input / weights
        x_ref,
        wih1_f_ref, wih1_b_ref, whh1_f_ref, whh1_b_ref, bg1_f_ref, bg1_b_ref,
        # layer-2 weights (W_ih split by the fwd/bwd halves of the layer-1 out)
        wih2_ff_ref, wih2_fb_ref, wih2_bf_ref, wih2_bb_ref,
        whh2_f_ref, whh2_b_ref, bg2_f_ref, bg2_b_ref,
        # attention + head
        aw_f_ref, aw_b_ref, ab_ref,
        w1_f_ref, w1_b_ref, b1_ref, w2_ref, b2_ref,
        # output
        out_ref,
        # scratch
        gx1_f, gx1_b, h1_f, h1_b, gx2_f, gx2_b, h2_f, h2_b):
    T, Bt, _ = x_ref.shape
    G1 = gx1_f.shape[-1]
    G2 = gx2_f.shape[-1]

    # ---- layer-1 input projection, hoisted off the recurrent chain ---------
    bias1_f = jnp.broadcast_to(bg1_f_ref[...], (Bt, G1))   # hoisted broadcast
    bias1_b = jnp.broadcast_to(bg1_b_ref[...], (Bt, G1))

    def proj1(t, carry):
        xt = x_ref[t].astype(jnp.bfloat16)                  # (Bt, D)
        gx1_f[t] = jnp.dot(xt, wih1_f_ref[...],
                           preferred_element_type=jnp.float32) + bias1_f
        gx1_b[t] = jnp.dot(xt, wih1_b_ref[...],
                           preferred_element_type=jnp.float32) + bias1_b
        return carry

    # TODO(synk): at production T, time-chunk gx (and store it in bf16) to
    # bound VMEM on v7x instead of keeping the full (T, Bt, 4H) buffer.
    lax.fori_loop(0, T, proj1, 0, unroll=True)

    # ---- layer-1 bidirectional recurrence ----------------------------------
    _bilstm_recurrence(gx1_f, gx1_b, whh1_f_ref, whh1_b_ref, h1_f, h1_b)

    # ---- layer-2 input projection (consumes h1 straight from VMEM) ---------
    bias2_f = jnp.broadcast_to(bg2_f_ref[...], (Bt, G2))
    bias2_b = jnp.broadcast_to(bg2_b_ref[...], (Bt, G2))

    def proj2(t, carry):
        hf = h1_f[t].astype(jnp.bfloat16)                    # (Bt, H1)
        hb = h1_b[t].astype(jnp.bfloat16)
        gx2_f[t] = (jnp.dot(hf, wih2_ff_ref[...],
                            preferred_element_type=jnp.float32)
                    + jnp.dot(hb, wih2_fb_ref[...],
                              preferred_element_type=jnp.float32) + bias2_f)
        gx2_b[t] = (jnp.dot(hf, wih2_bf_ref[...],
                            preferred_element_type=jnp.float32)
                    + jnp.dot(hb, wih2_bb_ref[...],
                              preferred_element_type=jnp.float32) + bias2_b)
        return carry

    lax.fori_loop(0, T, proj2, 0, unroll=True)

    # ---- layer-2 bidirectional recurrence ----------------------------------
    _bilstm_recurrence(gx2_f, gx2_b, whh2_f_ref, whh2_b_ref, h2_f, h2_b)

    # ---- attention pooling + lin1 / ReLU / lin2 head (all in VMEM) ---------
    hf = h2_f[...]                                           # (T, Bt, H2)
    hb = h2_b[...]
    # TODO(synk): at production T*B compute the scores as one lane-padded MXU
    # matmul instead of this VPU multiply + lane reduction.
    s = (jnp.sum(hf * aw_f_ref[...], axis=-1, keepdims=True)
         + jnp.sum(hb * aw_b_ref[...], axis=-1, keepdims=True))  # (T, Bt, 1)
    e = jnp.tanh(s + ab_ref[...])                                 # ab: (T,1,1)
    a = jnp.exp(e)
    a = a / (jnp.sum(a, axis=0, keepdims=True) + 1e-10)  # exact normalization
    ctx_f = jnp.sum(hf * a, axis=0)                               # (Bt, H2)
    ctx_b = jnp.sum(hb * a, axis=0)
    lin = (jnp.dot(ctx_f.astype(jnp.bfloat16), w1_f_ref[...],
                   preferred_element_type=jnp.float32)
           + jnp.dot(ctx_b.astype(jnp.bfloat16), w1_b_ref[...],
                     preferred_element_type=jnp.float32) + b1_ref[...])
    lin = jnp.maximum(lin, 0.0)                                   # ReLU
    out_ref[...] = (jnp.dot(lin.astype(jnp.bfloat16), w2_ref[...],
                            preferred_element_type=jnp.float32) + b2_ref[...])


# ---------------------------------------------------------------------------
# Wrapper
# ---------------------------------------------------------------------------

def _batch_spec(shape, batch_axis, batch_tile):
    rank = len(shape)
    block = tuple(batch_tile if d == batch_axis else s
                  for d, s in enumerate(shape))

    def imap(i):
        return tuple(i if d == batch_axis else 0 for d in range(rank))

    return pl.BlockSpec(block, imap)


def _resident_spec(shape):
    rank = len(shape)
    return pl.BlockSpec(tuple(shape), lambda i: (0,) * rank)


def lstm_attention_net(x, params, *, batch_tile=None):
    """Fused bi-LSTM x2 + attention + MLP head. x: (B, T, D) f32 -> (B, 1)."""
    B, T, D = x.shape
    H1 = params["lstm1_fwd"][1].shape[0]          # w_hh: (H, 4H)
    H2 = params["lstm2_fwd"][1].shape[0]
    L = params["lin1_w"].shape[1]
    bt = B if batch_tile is None else batch_tile
    assert B % bt == 0, "batch_tile must divide the batch"
    # TODO(synk): for production pick a batch tile that is a multiple of 8
    # (sublane alignment) and small enough that the per-tile scratch fits
    # v7x's 64 MiB VMEM.

    bf16 = jnp.bfloat16
    x_tm = jnp.transpose(x, (1, 0, 2))            # time-major (T, B, D)

    wih1_f, whh1_f, bg1_f = params["lstm1_fwd"]
    wih1_b, whh1_b, bg1_b = params["lstm1_bwd"]
    wih2_f, whh2_f, bg2_f = params["lstm2_fwd"]
    wih2_b, whh2_b, bg2_b = params["lstm2_bwd"]

    # bf16 MXU operands (f32 accumulation via preferred_element_type). The
    # layer-2 / head weights are row-split so every in-kernel dot pairs a
    # lane-dense per-direction activation with its own weight block.
    inputs = [
        x_tm,
        wih1_f.astype(bf16), wih1_b.astype(bf16),
        whh1_f.astype(bf16), whh1_b.astype(bf16),
        bg1_f, bg1_b,
        wih2_f[:H1].astype(bf16), wih2_f[H1:].astype(bf16),
        wih2_b[:H1].astype(bf16), wih2_b[H1:].astype(bf16),
        whh2_f.astype(bf16), whh2_b.astype(bf16),
        bg2_f, bg2_b,
        params["attn_w"][..., :H2], params["attn_w"][..., H2:],
        params["attn_b"],
        params["lin1_w"][:H2].astype(bf16), params["lin1_w"][H2:].astype(bf16),
        params["lin1_b"],
        params["lin2_w"].astype(bf16), params["lin2_b"],
    ]

    in_specs = [_batch_spec((T, B, D), 1, bt)]
    in_specs += [_resident_spec(a.shape) for a in inputs[1:]]

    g1, g2 = 4 * H1, 4 * H2
    flops = 2 * T * B * (2 * D * g1 + 4 * H1 * g2 + 2 * H1 * g1 + 2 * H2 * g2)
    flops += 2 * B * (2 * H2 * L + L)
    transcendentals = T * B * (10 * H1 + 10 * H2 + 2)
    bytes_accessed = sum(int(a.size) * a.dtype.itemsize for a in inputs) + 4 * B

    return pl.pallas_call(
        _lstm_attn_kernel,
        out_shape=jax.ShapeDtypeStruct((B, 1), jnp.float32),
        grid=(B // bt,),
        in_specs=in_specs,
        out_specs=_batch_spec((B, 1), 0, bt),
        scratch_shapes=[
            pltpu.VMEM((T, bt, 4 * H1), jnp.float32),   # gx1 fwd
            pltpu.VMEM((T, bt, 4 * H1), jnp.float32),   # gx1 bwd
            pltpu.VMEM((T, bt, H1), jnp.float32),       # h1 seq fwd
            pltpu.VMEM((T, bt, H1), jnp.float32),       # h1 seq bwd
            pltpu.VMEM((T, bt, 4 * H2), jnp.float32),   # gx2 fwd
            pltpu.VMEM((T, bt, 4 * H2), jnp.float32),   # gx2 bwd
            pltpu.VMEM((T, bt, H2), jnp.float32),       # h2 seq fwd
            pltpu.VMEM((T, bt, H2), jnp.float32),       # h2 seq bwd
        ],
        compiler_params=pltpu.CompilerParams(
            dimension_semantics=("parallel",),
            vmem_limit_bytes=48 * 1024 * 1024),
        cost_estimate=pl.CostEstimate(
            flops=flops, transcendentals=transcendentals,
            bytes_accessed=bytes_accessed),
    )(*inputs)


# ---------------------------------------------------------------------------
# Deterministic parameter construction (synthetic, PyTorch-shaped)
# ---------------------------------------------------------------------------

def _uniform(key, shape, bound):
    return jax.random.uniform(key, shape, jnp.float32, -bound, bound)


def make_lstm_dir_params(key, input_dim, hidden):
    k = 1.0 / float(hidden) ** 0.5
    k1, k2, k3, k4 = jax.random.split(key, 4)
    w_ih = _uniform(k1, (input_dim, 4 * hidden), k)   # transposed vs PyTorch
    w_hh = _uniform(k2, (hidden, 4 * hidden), k)
    b = _uniform(k3, (1, 4 * hidden), k) + _uniform(k4, (1, 4 * hidden), k)
    return (w_ih, w_hh, b)


def make_params(key, input_dim, maxlen, hidden_size, linear_size):
    hidden1 = hidden_size
    hidden2 = hidden_size // 2
    feat = 2 * hidden2
    keys = jax.random.split(key, 9)
    return {
        "lstm1_fwd": make_lstm_dir_params(keys[0], input_dim, hidden1),
        "lstm1_bwd": make_lstm_dir_params(keys[1], input_dim, hidden1),
        "lstm2_fwd": make_lstm_dir_params(keys[2], 2 * hidden1, hidden2),
        "lstm2_bwd": make_lstm_dir_params(keys[3], 2 * hidden1, hidden2),
        # TODO(synk): the Attention submodule source was not provided with the
        # model; this uses the canonical tanh/exp attention pooling (weight
        # (F,), per-timestep bias (maxlen,), a/(sum+1e-10) normalization);
        # the n_attention args are unused.
        "attn_w": _uniform(keys[4], (1, 1, feat), (6.0 / (feat + 1)) ** 0.5),
        "attn_b": jnp.zeros((maxlen, 1, 1), jnp.float32),
        "lin1_w": _uniform(keys[5], (feat, linear_size), 1.0 / feat ** 0.5),
        "lin1_b": _uniform(keys[6], (1, linear_size), 1.0 / feat ** 0.5),
        "lin2_w": _uniform(keys[7], (linear_size, 1),
                           1.0 / float(linear_size) ** 0.5),
        "lin2_b": _uniform(keys[8], (1, 1), 1.0 / float(linear_size) ** 0.5),
    }


if __name__ == "__main__":
    B, maxlen, input_dim = 2, 8, 16            # input_shape = (B, maxlen, dim)
    hidden_size, linear_size, n_attention = 32, 32, 4

    key = jax.random.PRNGKey(0)
    kp, kx = jax.random.split(key)
    params = make_params(kp, input_dim, maxlen, hidden_size, linear_size)
    x = jax.random.normal(kx, (B, maxlen, input_dim), jnp.float32)

    fwd = jax.jit(lstm_attention_net)
    out = jax.block_until_ready(fwd(x, params))
    assert out.shape == (B, 1) and out.dtype == jnp.float32
    assert bool(jnp.all(jnp.isfinite(out)))
    print("KERNEL_OK")
</pallas_src>

<mosaic_0001>
module attributes {stable_mosaic.version = 11 : i64} {
  func.func @_lstm_attn_kernel(%arg0: i32, %arg1: memref<8x2x16xf32, #tpu.memory_space<vmem>>, %arg2: memref<16x128xbf16, #tpu.memory_space<vmem>>, %arg3: memref<16x128xbf16, #tpu.memory_space<vmem>>, %arg4: memref<32x128xbf16, #tpu.memory_space<vmem>>, %arg5: memref<32x128xbf16, #tpu.memory_space<vmem>>, %arg6: memref<1x128xf32, #tpu.memory_space<vmem>>, %arg7: memref<1x128xf32, #tpu.memory_space<vmem>>, %arg8: memref<32x64xbf16, #tpu.memory_space<vmem>>, %arg9: memref<32x64xbf16, #tpu.memory_space<vmem>>, %arg10: memref<32x64xbf16, #tpu.memory_space<vmem>>, %arg11: memref<32x64xbf16, #tpu.memory_space<vmem>>, %arg12: memref<16x64xbf16, #tpu.memory_space<vmem>>, %arg13: memref<16x64xbf16, #tpu.memory_space<vmem>>, %arg14: memref<1x64xf32, #tpu.memory_space<vmem>>, %arg15: memref<1x64xf32, #tpu.memory_space<vmem>>, %arg16: memref<1x1x16xf32, #tpu.memory_space<vmem>>, %arg17: memref<1x1x16xf32, #tpu.memory_space<vmem>>, %arg18: memref<8x1x1xf32, #tpu.memory_space<vmem>>, %arg19: memref<16x32xbf16, #tpu.memory_space<vmem>>, %arg20: memref<16x32xbf16, #tpu.memory_space<vmem>>, %arg21: memref<1x32xf32, #tpu.memory_space<vmem>>, %arg22: memref<32x1xbf16, #tpu.memory_space<vmem>>, %arg23: memref<1x1xf32, #tpu.memory_space<vmem>>, %arg24: memref<2x1xf32, #tpu.memory_space<vmem>>, %arg25: memref<8x2x128xf32, #tpu.memory_space<vmem>>, %arg26: memref<8x2x128xf32, #tpu.memory_space<vmem>>, %arg27: memref<8x2x32xf32, #tpu.memory_space<vmem>>, %arg28: memref<8x2x32xf32, #tpu.memory_space<vmem>>, %arg29: memref<8x2x64xf32, #tpu.memory_space<vmem>>, %arg30: memref<8x2x64xf32, #tpu.memory_space<vmem>>, %arg31: memref<8x2x16xf32, #tpu.memory_space<vmem>>, %arg32: memref<8x2x16xf32, #tpu.memory_space<vmem>>) attributes {dimension_semantics = [#tpu.dimension_semantics<parallel>], iteration_bounds = array<i64: 1>, scalar_prefetch = 0 : i64, scratch_operands = 8 : i64, tpu.core_type = #tpu.core_type<tc>, window_params = [{transform_indices = @transform_0, window_bounds = array<i64: 8, 2, 16>}, {pipeline_mode = #tpu.pipeline_mode<synchronous>, transform_indices = @transform_1, window_bounds = array<i64: 16, 128>}, {pipeline_mode = #tpu.pipeline_mode<synchronous>, transform_indices = @transform_2, window_bounds = array<i64: 16, 128>}, {pipeline_mode = #tpu.pipeline_mode<synchronous>, transform_indices = @transform_3, window_bounds = array<i64: 32, 128>}, {pipeline_mode = #tpu.pipeline_mode<synchronous>, transform_indices = @transform_4, window_bounds = array<i64: 32, 128>}, {pipeline_mode = #tpu.pipeline_mode<synchronous>, transform_indices = @transform_5, window_bounds = array<i64: 1, 128>}, {pipeline_mode = #tpu.pipeline_mode<synchronous>, transform_indices = @transform_6, window_bounds = array<i64: 1, 128>}, {pipeline_mode = #tpu.pipeline_mode<synchronous>, transform_indices = @transform_7, window_bounds = array<i64: 32, 64>}, {pipeline_mode = #tpu.pipeline_mode<synchronous>, transform_indices = @transform_8, window_bounds = array<i64: 32, 64>}, {pipeline_mode = #tpu.pipeline_mode<synchronous>, transform_indices = @transform_9, window_bounds = array<i64: 32, 64>}, {pipeline_mode = #tpu.pipeline_mode<synchronous>, transform_indices = @transform_10, window_bounds = array<i64: 32, 64>}, {pipeline_mode = #tpu.pipeline_mode<synchronous>, transform_indices = @transform_11, window_bounds = array<i64: 16, 64>}, {pipeline_mode = #tpu.pipeline_mode<synchronous>, transform_indices = @transform_12, window_bounds = array<i64: 16, 64>}, {pipeline_mode = #tpu.pipeline_mode<synchronous>, transform_indices = @transform_13, window_bounds = array<i64: 1, 64>}, {pipeline_mode = #tpu.pipeline_mode<synchronous>, transform_indices = @transform_14, window_bounds = array<i64: 1, 64>}, {pipeline_mode = #tpu.pipeline_mode<synchronous>, transform_indices = @transform_15, window_bounds = array<i64: 1, 1, 16>}, {pipeline_mode = #tpu.pipeline_mode<synchronous>, transform_indices = @transform_16, window_bounds = array<i64: 1, 1, 16>}, {pipeline_mode = #tpu.pipeline_mode<synchronous>, transform_indices = @transform_17, window_bounds = array<i64: 8, 1, 1>}, {pipeline_mode = #tpu.pipeline_mode<synchronous>, transform_indices = @transform_18, window_bounds = array<i64: 16, 32>}, {pipeline_mode = #tpu.pipeline_mode<synchronous>, transform_indices = @transform_19, window_bounds = array<i64: 16, 32>}, {pipeline_mode = #tpu.pipeline_mode<synchronous>, transform_indices = @transform_20, window_bounds = array<i64: 1, 32>}, {pipeline_mode = #tpu.pipeline_mode<synchronous>, transform_indices = @transform_21, window_bounds = array<i64: 32, 1>}, {pipeline_mode = #tpu.pipeline_mode<synchronous>, transform_indices = @transform_22, window_bounds = array<i64: 1, 1>}, {transform_indices = @transform_23, window_bounds = array<i64: 2, 1>}]} {
    %c0 = arith.constant 0 : index
    %c0_0 = arith.constant 0 : index
    %0 = vector.load %arg6[%c0, %c0_0] : memref<1x128xf32, #tpu.memory_space<vmem>>, vector<1x128xf32>
    %1 = vector.shape_cast %0 : vector<1x128xf32> to vector<1x128xf32>
    %2 = vector.broadcast %1 : vector<1x128xf32> to vector<2x128xf32>
    %c0_1 = arith.constant 0 : index
    %c0_2 = arith.constant 0 : index
    %3 = vector.load %arg7[%c0_1, %c0_2] : memref<1x128xf32, #tpu.memory_space<vmem>>, vector<1x128xf32>
    %4 = vector.shape_cast %3 : vector<1x128xf32> to vector<1x128xf32>
    %5 = vector.broadcast %4 : vector<1x128xf32> to vector<2x128xf32>
    %c0_i32 = arith.constant 0 : i32
    %6 = arith.index_cast %c0_i32 : i32 to index
    %c0_3 = arith.constant 0 : index
    %c0_4 = arith.constant 0 : index
    %7 = vector.load %arg1[%6, %c0_3, %c0_4] : memref<8x2x16xf32, #tpu.memory_space<vmem>>, vector<1x2x16xf32>
    %8 = vector.shape_cast %7 : vector<1x2x16xf32> to vector<2x16xf32>
    %9 = arith.truncf %8 : vector<2x16xf32> to vector<2x16xbf16>
    %c0_5 = arith.constant 0 : index
    %c0_6 = arith.constant 0 : index
    %10 = vector.load %arg2[%c0_5, %c0_6] : memref<16x128xbf16, #tpu.memory_space<vmem>>, vector<16x128xbf16>
    %cst = arith.constant dense<0.000000e+00> : vector<2x128xf32>
    %11 = tpu.matmul %9, %10, %cst {dimension_numbers = #tpu.dot_dimension_numbers<[1], [0], [0], [1], [0, 0, 1, 1], [], []>} : vector<2x16xbf16>, vector<16x128xbf16>, vector<2x128xf32> -> vector<2x128xf32>
    %12 = arith.addf %11, %2 : vector<2x128xf32>
    %13 = arith.index_cast %c0_i32 : i32 to index
    %c0_7 = arith.constant 0 : index
    %c0_8 = arith.constant 0 : index
    %14 = vector.load %arg25[%13, %c0_7, %c0_8] : memref<8x2x128xf32, #tpu.memory_space<vmem>>, vector<1x2x128xf32>
    %15 = vector.shape_cast %14 : vector<1x2x128xf32> to vector<2x128xf32>
    %16 = vector.shape_cast %12 : vector<2x128xf32> to vector<1x2x128xf32>
    tpu.vector_store %arg25[%13, %c0_7, %c0_8], %16 {strides = array<i32>} : memref<8x2x128xf32, #tpu.memory_space<vmem>>, vector<1x2x128xf32>,
    %c0_9 = arith.constant 0 : index
    %c0_10 = arith.constant 0 : index
    %17 = vector.load %arg3[%c0_9, %c0_10] : memref<16x128xbf16, #tpu.memory_space<vmem>>, vector<16x128xbf16>
    %cst_11 = arith.constant dense<0.000000e+00> : vector<2x128xf32>
    %18 = tpu.matmul %9, %17, %cst_11 {dimension_numbers = #tpu.dot_dimension_numbers<[1], [0], [0], [1], [0, 0, 1, 1], [], []>} : vector<2x16xbf16>, vector<16x128xbf16>, vector<2x128xf32> -> vector<2x128xf32>
    %19 = arith.addf %18, %5 : vector<2x128xf32>
    %20 = arith.index_cast %c0_i32 : i32 to index
    %c0_12 = arith.constant 0 : index
    %c0_13 = arith.constant 0 : index
    %21 = vector.load %arg26[%20, %c0_12, %c0_13] : memref<8x2x128xf32, #tpu.memory_space<vmem>>, vector<1x2x128xf32>
    %22 = vector.shape_cast %21 : vector<1x2x128xf32> to vector<2x128xf32>
    %23 = vector.shape_cast %19 : vector<2x128xf32> to vector<1x2x128xf32>
    tpu.vector_store %arg26[%20, %c0_12, %c0_13], %23 {strides = array<i32>} : memref<8x2x128xf32, #tpu.memory_space<vmem>>, vector<1x2x128xf32>,
    %c1_i32 = arith.constant 1 : i32
    %24 = arith.index_cast %c1_i32 : i32 to index
    %c0_14 = arith.constant 0 : index
    %c0_15 = arith.constant 0 : index
    %25 = vector.load %arg1[%24, %c0_14, %c0_15] : memref<8x2x16xf32, #tpu.memory_space<vmem>>, vector<1x2x16xf32>
    %26 = vector.shape_cast %25 : vector<1x2x16xf32> to vector<2x16xf32>
    %27 = arith.truncf %26 : vector<2x16xf32> to vector<2x16xbf16>
    %c0_16 = arith.constant 0 : index
    %c0_17 = arith.constant 0 : index
    %28 = vector.load %arg2[%c0_16, %c0_17] : memref<16x128xbf16, #tpu.memory_space<vmem>>, vector<16x128xbf16>
    %cst_18 = arith.constant dense<0.000000e+00> : vector<2x128xf32>
    %29 = tpu.matmul %27, %28, %cst_18 {dimension_numbers = #tpu.dot_dimension_numbers<[1], [0], [0], [1], [0, 0, 1, 1], [], []>} : vector<2x16xbf16>, vector<16x128xbf16>, vector<2x128xf32> -> vector<2x128xf32>
    %30 = arith.addf %29, %2 : vector<2x128xf32>
    %31 = arith.index_cast %c1_i32 : i32 to index
    %c0_19 = arith.constant 0 : index
    %c0_20 = arith.constant 0 : index
    %32 = vector.load %arg25[%31, %c0_19, %c0_20] : memref<8x2x128xf32, #tpu.memory_space<vmem>>, vector<1x2x128xf32>
    %33 = vector.shape_cast %32 : vector<1x2x128xf32> to vector<2x128xf32>
    %34 = vector.shape_cast %30 : vector<2x128xf32> to vector<1x2x128xf32>
    tpu.vector_store %arg25[%31, %c0_19, %c0_20], %34 {strides = array<i32>} : memref<8x2x128xf32, #tpu.memory_space<vmem>>, vector<1x2x128xf32>,
    %c0_21 = arith.constant 0 : index
    %c0_22 = arith.constant 0 : index
    %35 = vector.load %arg3[%c0_21, %c0_22] : memref<16x128xbf16, #tpu.memory_space<vmem>>, vector<16x128xbf16>
    %cst_23 = arith.constant dense<0.000000e+00> : vector<2x128xf32>
    %36 = tpu.matmul %27, %35, %cst_23 {dimension_numbers = #tpu.dot_dimension_numbers<[1], [0], [0], [1], [0, 0, 1, 1], [], []>} : vector<2x16xbf16>, vector<16x128xbf16>, vector<2x128xf32> -> vector<2x128xf32>
    %37 = arith.addf %36, %5 : vector<2x128xf32>
    %38 = arith.index_cast %c1_i32 : i32 to index
    %c0_24 = arith.constant 0 : index
    %c0_25 = arith.constant 0 : index
    %39 = vector.load %arg26[%38, %c0_24, %c0_25] : memref<8x2x128xf32, #tpu.memory_space<vmem>>, vector<1x2x128xf32>
    %40 = vector.shape_cast %39 : vector<1x2x128xf32> to vector<2x128xf32>
    %41 = vector.shape_cast %37 : vector<2x128xf32> to vector<1x2x128xf32>
    tpu.vector_store %arg26[%38, %c0_24, %c0_25], %41 {strides = array<i32>} : memref<8x2x128xf32, #tpu.memory_space<vmem>>, vector<1x2x128xf32>,
    %c2_i32 = arith.constant 2 : i32
    %42 = arith.index_cast %c2_i32 : i32 to index
    %c0_26 = arith.constant 0 : index
    %c0_27 = arith.constant 0 : index
    %43 = vector.load %arg1[%42, %c0_26, %c0_27] : memref<8x2x16xf32, #tpu.memory_space<vmem>>, vector<1x2x16xf32>
    %44 = vector.shape_cast %43 : vector<1x2x16xf32> to vector<2x16xf32>
    %45 = arith.truncf %44 : vector<2x16xf32> to vector<2x16xbf16>
    %c0_28 = arith.constant 0 : index
    %c0_29 = arith.constant 0 : index
    %46 = vector.load %arg2[%c0_28, %c0_29] : memref<16x128xbf16, #tpu.memory_space<vmem>>, vector<16x128xbf16>
    %cst_30 = arith.constant dense<0.000000e+00> : vector<2x128xf32>
    %47 = tpu.matmul %45, %46, %cst_30 {dimension_numbers = #tpu.dot_dimension_numbers<[1], [0], [0], [1], [0, 0, 1, 1], [], []>} : vector<2x16xbf16>, vector<16x128xbf16>, vector<2x128xf32> -> vector<2x128xf32>
    %48 = arith.addf %47, %2 : vector<2x128xf32>
    %49 = arith.index_cast %c2_i32 : i32 to index
    %c0_31 = arith.constant 0 : index
    %c0_32 = arith.constant 0 : index
    %50 = vector.load %arg25[%49, %c0_31, %c0_32] : memref<8x2x128xf32, #tpu.memory_space<vmem>>, vector<1x2x128xf32>
    %51 = vector.shape_cast %50 : vector<1x2x128xf32> to vector<2x128xf32>
    %52 = vector.shape_cast %48 : vector<2x128xf32> to vector<1x2x128xf32>
    tpu.vector_store %arg25[%49, %c0_31, %c0_32], %52 {strides = array<i32>} : memref<8x2x128xf32, #tpu.memory_space<vmem>>, vector<1x2x128xf32>,
    %c0_33 = arith.constant 0 : index
    %c0_34 = arith.constant 0 : index
    %53 = vector.load %arg3[%c0_33, %c0_34] : memref<16x128xbf16, #tpu.memory_space<vmem>>, vector<16x128xbf16>
    %cst_35 = arith.constant dense<0.000000e+00> : vector<2x128xf32>
    %54 = tpu.matmul %45, %53, %cst_35 {dimension_numbers = #tpu.dot_dimension_numbers<[1], [0], [0], [1], [0, 0, 1, 1], [], []>} : vector<2x16xbf16>, vector<16x128xbf16>, vector<2x128xf32> -> vector<2x128xf32>
    %55 = arith.addf %54, %5 : vector<2x128xf32>
    %56 = arith.index_cast %c2_i32 : i32 to index
    %c0_36 = arith.constant 0 : index
    %c0_37 = arith.constant 0 : index
    %57 = vector.load %arg26[%56, %c0_36, %c0_37] : memref<8x2x128xf32, #tpu.memory_space<vmem>>, vector<1x2x128xf32>
    %58 = vector.shape_cast %57 : vector<1x2x128xf32> to vector<2x128xf32>
    %59 = vector.shape_cast %55 : vector<2x128xf32> to vector<1x2x128xf32>
    tpu.vector_store %arg26[%56, %c0_36, %c0_37], %59 {strides = array<i32>} : memref<8x2x128xf32, #tpu.memory_space<vmem>>, vector<1x2x128xf32>,
    %c3_i32 = arith.constant 3 : i32
    %60 = arith.index_cast %c3_i32 : i32 to index
    %c0_38 = arith.constant 0 : index
    %c0_39 = arith.constant 0 : index
    %61 = vector.load %arg1[%60, %c0_38, %c0_39] : memref<8x2x16xf32, #tpu.memory_space<vmem>>, vector<1x2x16xf32>
    %62 = vector.shape_cast %61 : vector<1x2x16xf32> to vector<2x16xf32>
    %63 = arith.truncf %62 : vector<2x16xf32> to vector<2x16xbf16>
    %c0_40 = arith.constant 0 : index
    %c0_41 = arith.constant 0 : index
    %64 = vector.load %arg2[%c0_40, %c0_41] : memref<16x128xbf16, #tpu.memory_space<vmem>>, vector<16x128xbf16>
    %cst_42 = arith.constant dense<0.000000e+00> : vector<2x128xf32>
    %65 = tpu.matmul %63, %64, %cst_42 {dimension_numbers = #tpu.dot_dimension_numbers<[1], [0], [0], [1], [0, 0, 1, 1], [], []>} : vector<2x16xbf16>, vector<16x128xbf16>, vector<2x128xf32> -> vector<2x128xf32>
    %66 = arith.addf %65, %2 : vector<2x128xf32>
    %67 = arith.index_cast %c3_i32 : i32 to index
    %c0_43 = arith.constant 0 : index
    %c0_44 = arith.constant 0 : index
    %68 = vector.load %arg25[%67, %c0_43, %c0_44] : memref<8x2x128xf32, #tpu.memory_space<vmem>>, vector<1x2x128xf32>
    %69 = vector.shape_cast %68 : vector<1x2x128xf32> to vector<2x128xf32>
    %70 = vector.shape_cast %66 : vector<2x128xf32> to vector<1x2x128xf32>
    tpu.vector_store %arg25[%67, %c0_43, %c0_44], %70 {strides = array<i32>} : memref<8x2x128xf32, #tpu.memory_space<vmem>>, vector<1x2x128xf32>,
    %c0_45 = arith.constant 0 : index
    %c0_46 = arith.constant 0 : index
    %71 = vector.load %arg3[%c0_45, %c0_46] : memref<16x128xbf16, #tpu.memory_space<vmem>>, vector<16x128xbf16>
    %cst_47 = arith.constant dense<0.000000e+00> : vector<2x128xf32>
    %72 = tpu.matmul %63, %71, %cst_47 {dimension_numbers = #tpu.dot_dimension_numbers<[1], [0], [0], [1], [0, 0, 1, 1], [], []>} : vector<2x16xbf16>, vector<16x128xbf16>, vector<2x128xf32> -> vector<2x128xf32>
    %73 = arith.addf %72, %5 : vector<2x128xf32>
    %74 = arith.index_cast %c3_i32 : i32 to index
    %c0_48 = arith.constant 0 : index
    %c0_49 = arith.constant 0 : index
    %75 = vector.load %arg26[%74, %c0_48, %c0_49] : memref<8x2x128xf32, #tpu.memory_space<vmem>>, vector<1x2x128xf32>
    %76 = vector.shape_cast %75 : vector<1x2x128xf32> to vector<2x128xf32>
    %77 = vector.shape_cast %73 : vector<2x128xf32> to vector<1x2x128xf32>
    tpu.vector_store %arg26[%74, %c0_48, %c0_49], %77 {strides = array<i32>} : memref<8x2x128xf32, #tpu.memory_space<vmem>>, vector<1x2x128xf32>,
    %c4_i32 = arith.constant 4 : i32
    %78 = arith.index_cast %c4_i32 : i32 to index
    %c0_50 = arith.constant 0 : index
    %c0_51 = arith.constant 0 : index
    %79 = vector.load %arg1[%78, %c0_50, %c0_51] : memref<8x2x16xf32, #tpu.memory_space<vmem>>, vector<1x2x16xf32>
    %80 = vector.shape_cast %79 : vector<1x2x16xf32> to vector<2x16xf32>
    %81 = arith.truncf %80 : vector<2x16xf32> to vector<2x16xbf16>
    %c0_52 = arith.constant 0 : index
    %c0_53 = arith.constant 0 : index
    %82 = vector.load %arg2[%c0_52, %c0_53] : memref<16x128xbf16, #tpu.memory_space<vmem>>, vector<16x128xbf16>
    %cst_54 = arith.constant dense<0.000000e+00> : vector<2x128xf32>
    %83 = tpu.matmul %81, %82, %cst_54 {dimension_numbers = #tpu.dot_dimension_numbers<[1], [0], [0], [1], [0, 0, 1, 1], [], []>} : vector<2x16xbf16>, vector<16x128xbf16>, vector<2x128xf32> -> vector<2x128xf32>
    %84 = arith.addf %83, %2 : vector<2x128xf32>
    %85 = arith.index_cast %c4_i32 : i32 to index
    %c0_55 = arith.constant 0 : index
    %c0_56 = arith.constant 0 : index
    %86 = vector.load %arg25[%85, %c0_55, %c0_56] : memref<8x2x128xf32, #tpu.memory_space<vmem>>, vector<1x2x128xf32>
    %87 = vector.shape_cast %86 : vector<1x2x128xf32> to vector<2x128xf32>
    %88 = vector.shape_cast %84 : vector<2x128xf32> to vector<1x2x128xf32>
    tpu.vector_store %arg25[%85, %c0_55, %c0_56], %88 {strides = array<i32>} : memref<8x2x128xf32, #tpu.memory_space<vmem>>, vector<1x2x128xf32>,
    %c0_57 = arith.constant 0 : index
    %c0_58 = arith.constant 0 : index
    %89 = vector.load %arg3[%c0_57, %c0_58] : memref<16x128xbf16, #tpu.memory_space<vmem>>, vector<16x128xbf16>
    %cst_59 = arith.constant dense<0.000000e+00> : vector<2x128xf32>
    %90 = tpu.matmul %81, %89, %cst_59 {dimension_numbers = #tpu.dot_dimension_numbers<[1], [0], [0], [1], [0, 0, 1, 1], [], []>} : vector<2x16xbf16>, vector<16x128xbf16>, vector<2x128xf32> -> vector<2x128xf32>
    %91 = arith.addf %90, %5 : vector<2x128xf32>
    %92 = arith.index_cast %c4_i32 : i32 to index
    %c0_60 = arith.constant 0 : index
    %c0_61 = arith.constant 0 : index
    %93 = vector.load %arg26[%92, %c0_60, %c0_61] : memref<8x2x128xf32, #tpu.memory_space<vmem>>, vector<1x2x128xf32>
    %94 = vector.shape_cast %93 : vector<1x2x128xf32> to vector<2x128xf32>
    %95 = vector.shape_cast %91 : vector<2x128xf32> to vector<1x2x128xf32>
    tpu.vector_store %arg26[%92, %c0_60, %c0_61], %95 {strides = array<i32>} : memref<8x2x128xf32, #tpu.memory_space<vmem>>, vector<1x2x128xf32>,
    %c5_i32 = arith.constant 5 : i32
    %96 = arith.index_cast %c5_i32 : i32 to index
    %c0_62 = arith.constant 0 : index
    %c0_63 = arith.constant 0 : index
    %97 = vector.load %arg1[%96, %c0_62, %c0_63] : memref<8x2x16xf32, #tpu.memory_space<vmem>>, vector<1x2x16xf32>
    %98 = vector.shape_cast %97 : vector<1x2x16xf32> to vector<2x16xf32>
    %99 = arith.truncf %98 : vector<2x16xf32> to vector<2x16xbf16>
    %c0_64 = arith.constant 0 : index
    %c0_65 = arith.constant 0 : index
    %100 = vector.load %arg2[%c0_64, %c0_65] : memref<16x128xbf16, #tpu.memory_space<vmem>>, vector<16x128xbf16>
    %cst_66 = arith.constant dense<0.000000e+00> : vector<2x128xf32>
    %101 = tpu.matmul %99, %100, %cst_66 {dimension_numbers = #tpu.dot_dimension_numbers<[1], [0], [0], [1], [0, 0, 1, 1], [], []>} : vector<2x16xbf16>, vector<16x128xbf16>, vector<2x128xf32> -> vector<2x128xf32>
    %102 = arith.addf %101, %2 : vector<2x128xf32>
    %103 = arith.index_cast %c5_i32 : i32 to index
    %c0_67 = arith.constant 0 : index
    %c0_68 = arith.constant 0 : index
    %104 = vector.load %arg25[%103, %c0_67, %c0_68] : memref<8x2x128xf32, #tpu.memory_space<vmem>>, vector<1x2x128xf32>
    %105 = vector.shape_cast %104 : vector<1x2x128xf32> to vector<2x128xf32>
    %106 = vector.shape_cast %102 : vector<2x128xf32> to vector<1x2x128xf32>
    tpu.vector_store %arg25[%103, %c0_67, %c0_68], %106 {strides = array<i32>} : memref<8x2x128xf32, #tpu.memory_space<vmem>>, vector<1x2x128xf32>,
    %c0_69 = arith.constant 0 : index
    %c0_70 = arith.constant 0 : index
    %107 = vector.load %arg3[%c0_69, %c0_70] : memref<16x128xbf16, #tpu.memory_space<vmem>>, vector<16x128xbf16>
    %cst_71 = arith.constant dense<0.000000e+00> : vector<2x128xf32>
    %108 = tpu.matmul %99, %107, %cst_71 {dimension_numbers = #tpu.dot_dimension_numbers<[1], [0], [0], [1], [0, 0, 1, 1], [], []>} : vector<2x16xbf16>, vector<16x128xbf16>, vector<2x128xf32> -> vector<2x128xf32>
    %109 = arith.addf %108, %5 : vector<2x128xf32>
    %110 = arith.index_cast %c5_i32 : i32 to index
    %c0_72 = arith.constant 0 : index
    %c0_73 = arith.constant 0 : index
    %111 = vector.load %arg26[%110, %c0_72, %c0_73] : memref<8x2x128xf32, #tpu.memory_space<vmem>>, vector<1x2x128xf32>
    %112 = vector.shape_cast %111 : vector<1x2x128xf32> to vector<2x128xf32>
    %113 = vector.shape_cast %109 : vector<2x128xf32> to vector<1x2x128xf32>
    tpu.vector_store %arg26[%110, %c0_72, %c0_73], %113 {strides = array<i32>} : memref<8x2x128xf32, #tpu.memory_space<vmem>>, vector<1x2x128xf32>,
    %c6_i32 = arith.constant 6 : i32
    %114 = arith.index_cast %c6_i32 : i32 to index
    %c0_74 = arith.constant 0 : index
    %c0_75 = arith.constant 0 : index
    %115 = vector.load %arg1[%114, %c0_74, %c0_75] : memref<8x2x16xf32, #tpu.memory_space<vmem>>, vector<1x2x16xf32>
    %116 = vector.shape_cast %115 : vector<1x2x16xf32> to vector<2x16xf32>
    %117 = arith.truncf %116 : vector<2x16xf32> to vector<2x16xbf16>
    %c0_76 = arith.constant 0 : index
    %c0_77 = arith.constant 0 : index
    %118 = vector.load %arg2[%c0_76, %c0_77] : memref<16x128xbf16, #tpu.memory_space<vmem>>, vector<16x128xbf16>
    %cst_78 = arith.constant dense<0.000000e+00> : vector<2x128xf32>
    %119 = tpu.matmul %117, %118, %cst_78 {dimension_numbers = #tpu.dot_dimension_numbers<[1], [0], [0], [1], [0, 0, 1, 1], [], []>} : vector<2x16xbf16>, vector<16x128xbf16>, vector<2x128xf32> -> vector<2x128xf32>
    %120 = arith.addf %119, %2 : vector<2x128xf32>
    %121 = arith.index_cast %c6_i32 : i32 to index
    %c0_79 = arith.constant 0 : index
    %c0_80 = arith.constant 0 : index
    %122 = vector.load %arg25[%121, %c0_79, %c0_80] : memref<8x2x128xf32, #tpu.memory_space<vmem>>, vector<1x2x128xf32>
    %123 = vector.shape_cast %122 : vector<1x2x128xf32> to vector<2x128xf32>
    %124 = vector.shape_cast %120 : vector<2x128xf32> to vector<1x2x128xf32>
    tpu.vector_store %arg25[%121, %c0_79, %c0_80], %124 {strides = array<i32>} : memref<8x2x128xf32, #tpu.memory_space<vmem>>, vector<1x2x128xf32>,
    %c0_81 = arith.constant 0 : index
    %c0_82 = arith.constant 0 : index
    %125 = vector.load %arg3[%c0_81, %c0_82] : memref<16x128xbf16, #tpu.memory_space<vmem>>, vector<16x128xbf16>
    %cst_83 = arith.constant dense<0.000000e+00> : vector<2x128xf32>
    %126 = tpu.matmul %117, %125, %cst_83 {dimension_numbers = #tpu.dot_dimension_numbers<[1], [0], [0], [1], [0, 0, 1, 1], [], []>} : vector<2x16xbf16>, vector<16x128xbf16>, vector<2x128xf32> -> vector<2x128xf32>
    %127 = arith.addf %126, %5 : vector<2x128xf32>
    %128 = arith.index_cast %c6_i32 : i32 to index
    %c0_84 = arith.constant 0 : index
    %c0_85 = arith.constant 0 : index
    %129 = vector.load %arg26[%128, %c0_84, %c0_85] : memref<8x2x128xf32, #tpu.memory_space<vmem>>, vector<1x2x128xf32>
    %130 = vector.shape_cast %129 : vector<1x2x128xf32> to vector<2x128xf32>
    %131 = vector.shape_cast %127 : vector<2x128xf32> to vector<1x2x128xf32>
    tpu.vector_store %arg26[%128, %c0_84, %c0_85], %131 {strides = array<i32>} : memref<8x2x128xf32, #tpu.memory_space<vmem>>, vector<1x2x128xf32>,
    %c7_i32 = arith.constant 7 : i32
    %132 = arith.index_cast %c7_i32 : i32 to index
    %c0_86 = arith.constant 0 : index
    %c0_87 = arith.constant 0 : index
    %133 = vector.load %arg1[%132, %c0_86, %c0_87] : memref<8x2x16xf32, #tpu.memory_space<vmem>>, vector<1x2x16xf32>
    %134 = vector.shape_cast %133 : vector<1x2x16xf32> to vector<2x16xf32>
    %135 = arith.truncf %134 : vector<2x16xf32> to vector<2x16xbf16>
    %c0_88 = arith.constant 0 : index
    %c0_89 = arith.constant 0 : index
    %136 = vector.load %arg2[%c0_88, %c0_89] : memref<16x128xbf16, #tpu.memory_space<vmem>>, vector<16x128xbf16>
    %cst_90 = arith.constant dense<0.000000e+00> : vector<2x128xf32>
    %137 = tpu.matmul %135, %136, %cst_90 {dimension_numbers = #tpu.dot_dimension_numbers<[1], [0], [0], [1], [0, 0, 1, 1], [], []>} : vector<2x16xbf16>, vector<16x128xbf16>, vector<2x128xf32> -> vector<2x128xf32>
    %138 = arith.addf %137, %2 : vector<2x128xf32>
    %139 = arith.index_cast %c7_i32 : i32 to index
    %c0_91 = arith.constant 0 : index
    %c0_92 = arith.constant 0 : index
    %140 = vector.load %arg25[%139, %c0_91, %c0_92] : memref<8x2x128xf32, #tpu.memory_space<vmem>>, vector<1x2x128xf32>
    %141 = vector.shape_cast %140 : vector<1x2x128xf32> to vector<2x128xf32>
    %142 = vector.shape_cast %138 : vector<2x128xf32> to vector<1x2x128xf32>
    tpu.vector_store %arg25[%139, %c0_91, %c0_92], %142 {strides = array<i32>} : memref<8x2x128xf32, #tpu.memory_space<vmem>>, vector<1x2x128xf32>,
    %c0_93 = arith.constant 0 : index
    %c0_94 = arith.constant 0 : index
    %143 = vector.load %arg3[%c0_93, %c0_94] : memref<16x128xbf16, #tpu.memory_space<vmem>>, vector<16x128xbf16>
    %cst_95 = arith.constant dense<0.000000e+00> : vector<2x128xf32>
    %144 = tpu.matmul %135, %143, %cst_95 {dimension_numbers = #tpu.dot_dimension_numbers<[1], [0], [0], [1], [0, 0, 1, 1], [], []>} : vector<2x16xbf16>, vector<16x128xbf16>, vector<2x128xf32> -> vector<2x128xf32>
    %145 = arith.addf %144, %5 : vector<2x128xf32>
    %146 = arith.index_cast %c7_i32 : i32 to index
    %c0_96 = arith.constant 0 : index
    %c0_97 = arith.constant 0 : index
    %147 = vector.load %arg26[%146, %c0_96, %c0_97] : memref<8x2x128xf32, #tpu.memory_space<vmem>>, vector<1x2x128xf32>
    %148 = vector.shape_cast %147 : vector<1x2x128xf32> to vector<2x128xf32>
    %149 = vector.shape_cast %145 : vector<2x128xf32> to vector<1x2x128xf32>
    tpu.vector_store %arg26[%146, %c0_96, %c0_97], %149 {strides = array<i32>} : memref<8x2x128xf32, #tpu.memory_space<vmem>>, vector<1x2x128xf32>,
    %c8_i32 = arith.constant 8 : i32
    %cst_98 = arith.constant 0.000000e+00 : f32
    %150 = vector.broadcast %cst_98 : f32 to vector<2x32xf32>
    %c0_i32_99 = arith.constant 0 : i32
    %c7_i32_100 = arith.constant 7 : i32
    %151 = arith.subi %c7_i32_100, %c0_i32_99 : i32
    %152 = arith.truncf %150 : vector<2x32xf32> to vector<2x32xbf16>
    %c0_101 = arith.constant 0 : index
    %c0_102 = arith.constant 0 : index
    %153 = vector.load %arg4[%c0_101, %c0_102] : memref<32x128xbf16, #tpu.memory_space<vmem>>, vector<32x128xbf16>
    %cst_103 = arith.constant dense<0.000000e+00> : vector<2x128xf32>
    %154 = tpu.matmul %152, %153, %cst_103 {dimension_numbers = #tpu.dot_dimension_numbers<[1], [0], [0], [1], [0, 0, 1, 1], [], []>} : vector<2x32xbf16>, vector<32x128xbf16>, vector<2x128xf32> -> vector<2x128xf32>
    %155 = arith.truncf %150 : vector<2x32xf32> to vector<2x32xbf16>
    %c0_104 = arith.constant 0 : index
    %c0_105 = arith.constant 0 : index
    %156 = vector.load %arg5[%c0_104, %c0_105] : memref<32x128xbf16, #tpu.memory_space<vmem>>, vector<32x128xbf16>
    %cst_106 = arith.constant dense<0.000000e+00> : vector<2x128xf32>
    %157 = tpu.matmul %155, %156, %cst_106 {dimension_numbers = #tpu.dot_dimension_numbers<[1], [0], [0], [1], [0, 0, 1, 1], [], []>} : vector<2x32xbf16>, vector<32x128xbf16>, vector<2x128xf32> -> vector<2x128xf32>
    %158 = arith.index_cast %c0_i32_99 : i32 to index
    %c0_107 = arith.constant 0 : index
    %c0_108 = arith.constant 0 : index
    %159 = vector.load %arg25[%158, %c0_107, %c0_108] : memref<8x2x128xf32, #tpu.memory_space<vmem>>, vector<1x2x128xf32>
    %160 = vector.shape_cast %159 : vector<1x2x128xf32> to vector<2x128xf32>
    %161 = arith.addf %154, %160 : vector<2x128xf32>
    %162 = vector.extract_strided_slice %161 {offsets = [0, 0], sizes = [2, 32], strides = [1, 1]} : vector<2x128xf32> to vector<2x32xf32>
    %163 = arith.negf %162 : vector<2x32xf32>
    %164 = math.exp %163 : vector<2x32xf32>
    %cst_109 = arith.constant 1.000000e+00 : f32
    %165 = vector.broadcast %cst_109 : f32 to vector<2x32xf32>
    %166 = arith.addf %165, %164 : vector<2x32xf32>
    %167 = arith.divf %165, %166 : vector<2x32xf32>
    %168 = vector.extract_strided_slice %161 {offsets = [0, 32], sizes = [2, 32], strides = [1, 1]} : vector<2x128xf32> to vector<2x32xf32>
    %169 = arith.negf %168 : vector<2x32xf32>
    %170 = math.exp %169 : vector<2x32xf32>
    %cst_110 = arith.constant 1.000000e+00 : f32
    %171 = vector.broadcast %cst_110 : f32 to vector<2x32xf32>
    %172 = arith.addf %171, %170 : vector<2x32xf32>
    %173 = arith.divf %171, %172 : vector<2x32xf32>
    %174 = vector.extract_strided_slice %161 {offsets = [0, 64], sizes = [2, 32], strides = [1, 1]} : vector<2x128xf32> to vector<2x32xf32>
    %175 = math.tanh %174 : vector<2x32xf32>
    %176 = vector.extract_strided_slice %161 {offsets = [0, 96], sizes = [2, 32], strides = [1, 1]} : vector<2x128xf32> to vector<2x32xf32>
    %177 = arith.negf %176 : vector<2x32xf32>
    %178 = math.exp %177 : vector<2x32xf32>
    %cst_111 = arith.constant 1.000000e+00 : f32
    %179 = vector.broadcast %cst_111 : f32 to vector<2x32xf32>
    %180 = arith.addf %179, %178 : vector<2x32xf32>
    %181 = arith.divf %179, %180 : vector<2x32xf32>
    %182 = arith.mulf %173, %150 : vector<2x32xf32>
    %183 = arith.mulf %167, %175 : vector<2x32xf32>
    %184 = arith.addf %182, %183 : vector<2x32xf32>
    %185 = math.tanh %184 : vector<2x32xf32>
    %186 = arith.mulf %181, %185 : vector<2x32xf32>
    %187 = arith.index_cast %151 : i32 to index
    %c0_112 = arith.constant 0 : index
    %c0_113 = arith.constant 0 : index
    %188 = vector.load %arg26[%187, %c0_112, %c0_113] : memref<8x2x128xf32, #tpu.memory_space<vmem>>, vector<1x2x128xf32>
    %189 = vector.shape_cast %188 : vector<1x2x128xf32> to vector<2x128xf32>
    %190 = arith.addf %157, %189 : vector<2x128xf32>
    %191 = vector.extract_strided_slice %190 {offsets = [0, 0], sizes = [2, 32], strides = [1, 1]} : vector<2x128xf32> to vector<2x32xf32>
    %192 = arith.negf %191 : vector<2x32xf32>
    %193 = math.exp %192 : vector<2x32xf32>
    %cst_114 = arith.constant 1.000000e+00 : f32
    %194 = vector.broadcast %cst_114 : f32 to vector<2x32xf32>
    %195 = arith.addf %194, %193 : vector<2x32xf32>
    %196 = arith.divf %194, %195 : vector<2x32xf32>
    %197 = vector.extract_strided_slice %190 {offsets = [0, 32], sizes = [2, 32], strides = [1, 1]} : vector<2x128xf32> to vector<2x32xf32>
    %198 = arith.negf %197 : vector<2x32xf32>
    %199 = math.exp %198 : vector<2x32xf32>
    %cst_115 = arith.constant 1.000000e+00 : f32
    %200 = vector.broadcast %cst_115 : f32 to vector<2x32xf32>
    %201 = arith.addf %200, %199 : vector<2x32xf32>
    %202 = arith.divf %200, %201 : vector<2x32xf32>
    %203 = vector.extract_strided_slice %190 {offsets = [0, 64], sizes = [2, 32], strides = [1, 1]} : vector<2x128xf32> to vector<2x32xf32>
    %204 = math.tanh %203 : vector<2x32xf32>
    %205 = vector.extract_strided_slice %190 {offsets = [0, 96], sizes = [2, 32], strides = [1, 1]} : vector<2x128xf32> to vector<2x32xf32>
    %206 = arith.negf %205 : vector<2x32xf32>
    %207 = math.exp %206 : vector<2x32xf32>
    %cst_116 = arith.constant 1.000000e+00 : f32
    %208 = vector.broadcast %cst_116 : f32 to vector<2x32xf32>
    %209 = arith.addf %208, %207 : vector<2x32xf32>
    %210 = arith.divf %208, %209 : vector<2x32xf32>
    %211 = arith.mulf %202, %150 : vector<2x32xf32>
    %212 = arith.mulf %196, %204 : vector<2x32xf32>
    %213 = arith.addf %211, %212 : vector<2x32xf32>
    %214 = math.tanh %213 : vector<2x32xf32>
    %215 = arith.mulf %210, %214 : vector<2x32xf32>
    %216 = arith.index_cast %c0_i32_99 : i32 to index
    %c0_117 = arith.constant 0 : index
    %c0_118 = arith.constant 0 : index
    %217 = vector.load %arg27[%216, %c0_117, %c0_118] : memref<8x2x32xf32, #tpu.memory_space<vmem>>, vector<1x2x32xf32>
    %218 = vector.shape_cast %217 : vector<1x2x32xf32> to vector<2x32xf32>
    %219 = vector.shape_cast %186 : vector<2x32xf32> to vector<1x2x32xf32>
    tpu.vector_store %arg27[%216, %c0_117, %c0_118], %219 {strides = array<i32>} : memref<8x2x32xf32, #tpu.memory_space<vmem>>, vector<1x2x32xf32>,
    %220 = arith.index_cast %151 : i32 to index
    %c0_119 = arith.constant 0 : index
    %c0_120 = arith.constant 0 : index
    %221 = vector.load %arg28[%220, %c0_119, %c0_120] : memref<8x2x32xf32, #tpu.memory_space<vmem>>, vector<1x2x32xf32>
    %222 = vector.shape_cast %221 : vector<1x2x32xf32> to vector<2x32xf32>
    %223 = vector.shape_cast %215 : vector<2x32xf32> to vector<1x2x32xf32>
    tpu.vector_store %arg28[%220, %c0_119, %c0_120], %223 {strides = array<i32>} : memref<8x2x32xf32, #tpu.memory_space<vmem>>, vector<1x2x32xf32>,
    %c1_i32_121 = arith.constant 1 : i32
    %c7_i32_122 = arith.constant 7 : i32
    %224 = arith.subi %c7_i32_122, %c1_i32_121 : i32
    %225 = arith.truncf %186 : vector<2x32xf32> to vector<2x32xbf16>
    %c0_123 = arith.constant 0 : index
    %c0_124 = arith.constant 0 : index
    %226 = vector.load %arg4[%c0_123, %c0_124] : memref<32x128xbf16, #tpu.memory_space<vmem>>, vector<32x128xbf16>
    %cst_125 = arith.constant dense<0.000000e+00> : vector<2x128xf32>
    %227 = tpu.matmul %225, %226, %cst_125 {dimension_numbers = #tpu.dot_dimension_numbers<[1], [0], [0], [1], [0, 0, 1, 1], [], []>} : vector<2x32xbf16>, vector<32x128xbf16>, vector<2x128xf32> -> vector<2x128xf32>
    %228 = arith.truncf %215 : vector<2x32xf32> to vector<2x32xbf16>
    %c0_126 = arith.constant 0 : index
    %c0_127 = arith.constant 0 : index
    %229 = vector.load %arg5[%c0_126, %c0_127] : memref<32x128xbf16, #tpu.memory_space<vmem>>, vector<32x128xbf16>
    %cst_128 = arith.constant dense<0.000000e+00> : vector<2x128xf32>
    %230 = tpu.matmul %228, %229, %cst_128 {dimension_numbers = #tpu.dot_dimension_numbers<[1], [0], [0], [1], [0, 0, 1, 1], [], []>} : vector<2x32xbf16>, vector<32x128xbf16>, vector<2x128xf32> -> vector<2x128xf32>
    %231 = arith.index_cast %c1_i32_121 : i32 to index
    %c0_129 = arith.constant 0 : index
    %c0_130 = arith.constant 0 : index
    %232 = vector.load %arg25[%231, %c0_129, %c0_130] : memref<8x2x128xf32, #tpu.memory_space<vmem>>, vector<1x2x128xf32>
    %233 = vector.shape_cast %232 : vector<1x2x128xf32> to vector<2x128xf32>
    %234 = arith.addf %227, %233 : vector<2x128xf32>
    %235 = vector.extract_strided_slice %234 {offsets = [0, 0], sizes = [2, 32], strides = [1, 1]} : vector<2x128xf32> to vector<2x32xf32>
    %236 = arith.negf %235 : vector<2x32xf32>
    %237 = math.exp %236 : vector<2x32xf32>
    %cst_131 = arith.constant 1.000000e+00 : f32
    %238 = vector.broadcast %cst_131 : f32 to vector<2x32xf32>
    %239 = arith.addf %238, %237 : vector<2x32xf32>
    %240 = arith.divf %238, %239 : vector<2x32xf32>
    %241 = vector.extract_strided_slice %234 {offsets = [0, 32], sizes = [2, 32], strides = [1, 1]} : vector<2x128xf32> to vector<2x32xf32>
    %242 = arith.negf %241 : vector<2x32xf32>
    %243 = math.exp %242 : vector<2x32xf32>
    %cst_132 = arith.constant 1.000000e+00 : f32
    %244 = vector.broadcast %cst_132 : f32 to vector<2x32xf32>
    %245 = arith.addf %244, %243 : vector<2x32xf32>
    %246 = arith.divf %244, %245 : vector<2x32xf32>
    %247 = vector.extract_strided_slice %234 {offsets = [0, 64], sizes = [2, 32], strides = [1, 1]} : vector<2x128xf32> to vector<2x32xf32>
    %248 = math.tanh %247 : vector<2x32xf32>
    %249 = vector.extract_strided_slice %234 {offsets = [0, 96], sizes = [2, 32], strides = [1, 1]} : vector<2x128xf32> to vector<2x32xf32>
    %250 = arith.negf %249 : vector<2x32xf32>
    %251 = math.exp %250 : vector<2x32xf32>
    %cst_133 = arith.constant 1.000000e+00 : f32
    %252 = vector.broadcast %cst_133 : f32 to vector<2x32xf32>
    %253 = arith.addf %252, %251 : vector<2x32xf32>
    %254 = arith.divf %252, %253 : vector<2x32xf32>
    %255 = arith.mulf %246, %184 : vector<2x32xf32>
    %256 = arith.mulf %240, %248 : vector<2x32xf32>
    %257 = arith.addf %255, %256 : vector<2x32xf32>
    %258 = math.tanh %257 : vector<2x32xf32>
    %259 = arith.mulf %254, %258 : vector<2x32xf32>
    %260 = arith.index_cast %224 : i32 to index
    %c0_134 = arith.constant 0 : index
    %c0_135 = arith.constant 0 : index
    %261 = vector.load %arg26[%260, %c0_134, %c0_135] : memref<8x2x128xf32, #tpu.memory_space<vmem>>, vector<1x2x128xf32>
    %262 = vector.shape_cast %261 : vector<1x2x128xf32> to vector<2x128xf32>
    %263 = arith.addf %230, %262 : vector<2x128xf32>
    %264 = vector.extract_strided_slice %263 {offsets = [0, 0], sizes = [2, 32], strides = [1, 1]} : vector<2x128xf32> to vector<2x32xf32>
    %265 = arith.negf %264 : vector<2x32xf32>
    %266 = math.exp %265 : vector<2x32xf32>
    %cst_136 = arith.constant 1.000000e+00 : f32
    %267 = vector.broadcast %cst_136 : f32 to vector<2x32xf32>
    %268 = arith.addf %267, %266 : vector<2x32xf32>
    %269 = arith.divf %267, %268 : vector<2x32xf32>
    %270 = vector.extract_strided_slice %263 {offsets = [0, 32], sizes = [2, 32], strides = [1, 1]} : vector<2x128xf32> to vector<2x32xf32>
    %271 = arith.negf %270 : vector<2x32xf32>
    %272 = math.exp %271 : vector<2x32xf32>
    %cst_137 = arith.constant 1.000000e+00 : f32
    %273 = vector.broadcast %cst_137 : f32 to vector<2x32xf32>
    %274 = arith.addf %273, %272 : vector<2x32xf32>
    %275 = arith.divf %273, %274 : vector<2x32xf32>
    %276 = vector.extract_strided_slice %263 {offsets = [0, 64], sizes = [2, 32], strides = [1, 1]} : vector<2x128xf32> to vector<2x32xf32>
    %277 = math.tanh %276 : vector<2x32xf32>
    %278 = vector.extract_strided_slice %263 {offsets = [0, 96], sizes = [2, 32], strides = [1, 1]} : vector<2x128xf32> to vector<2x32xf32>
    %279 = arith.negf %278 : vector<2x32xf32>
    %280 = math.exp %279 : vector<2x32xf32>
    %cst_138 = arith.constant 1.000000e+00 : f32
    %281 = vector.broadcast %cst_138 : f32 to vector<2x32xf32>
    %282 = arith.addf %281, %280 : vector<2x32xf32>
    %283 = arith.divf %281, %282 : vector<2x32xf32>
    %284 = arith.mulf %275, %213 : vector<2x32xf32>
    %285 = arith.mulf %269, %277 : vector<2x32xf32>
    %286 = arith.addf %284, %285 : vector<2x32xf32>
    %287 = math.tanh %286 : vector<2x32xf32>
    %288 = arith.mulf %283, %287 : vector<2x32xf32>
    %289 = arith.index_cast %c1_i32_121 : i32 to index
    %c0_139 = arith.constant 0 : index
    %c0_140 = arith.constant 0 : index
    %290 = vector.load %arg27[%289, %c0_139, %c0_140] : memref<8x2x32xf32, #tpu.memory_space<vmem>>, vector<1x2x32xf32>
    %291 = vector.shape_cast %290 : vector<1x2x32xf32> to vector<2x32xf32>
    %292 = vector.shape_cast %259 : vector<2x32xf32> to vector<1x2x32xf32>
    tpu.vector_store %arg27[%289, %c0_139, %c0_140], %292 {strides = array<i32>} : memref<8x2x32xf32, #tpu.memory_space<vmem>>, vector<1x2x32xf32>,
    %293 = arith.index_cast %224 : i32 to index
    %c0_141 = arith.constant 0 : index
    %c0_142 = arith.constant 0 : index
    %294 = vector.load %arg28[%293, %c0_141, %c0_142] : memref<8x2x32xf32, #tpu.memory_space<vmem>>, vector<1x2x32xf32>
    %295 = vector.shape_cast %294 : vector<1x2x32xf32> to vector<2x32xf32>
    %296 = vector.shape_cast %288 : vector<2x32xf32> to vector<1x2x32xf32>
    tpu.vector_store %arg28[%293, %c0_141, %c0_142], %296 {strides = array<i32>} : memref<8x2x32xf32, #tpu.memory_space<vmem>>, vector<1x2x32xf32>,
    %c2_i32_143 = arith.constant 2 : i32
    %c7_i32_144 = arith.constant 7 : i32
    %297 = arith.subi %c7_i32_144, %c2_i32_143 : i32
    %298 = arith.truncf %259 : vector<2x32xf32> to vector<2x32xbf16>
    %c0_145 = arith.constant 0 : index
    %c0_146 = arith.constant 0 : index
    %299 = vector.load %arg4[%c0_145, %c0_146] : memref<32x128xbf16, #tpu.memory_space<vmem>>, vector<32x128xbf16>
    %cst_147 = arith.constant dense<0.000000e+00> : vector<2x128xf32>
    %300 = tpu.matmul %298, %299, %cst_147 {dimension_numbers = #tpu.dot_dimension_numbers<[1], [0], [0], [1], [0, 0, 1, 1], [], []>} : vector<2x32xbf16>, vector<32x128xbf16>, vector<2x128xf32> -> vector<2x128xf32>
    %301 = arith.truncf %288 : vector<2x32xf32> to vector<2x32xbf16>
    %c0_148 = arith.constant 0 : index
    %c0_149 = arith.constant 0 : index
    %302 = vector.load %arg5[%c0_148, %c0_149] : memref<32x128xbf16, #tpu.memory_space<vmem>>, vector<32x128xbf16>
    %cst_150 = arith.constant dense<0.000000e+00> : vector<2x128xf32>
    %303 = tpu.matmul %301, %302, %cst_150 {dimension_numbers = #tpu.dot_dimension_numbers<[1], [0], [0], [1], [0, 0, 1, 1], [], []>} : vector<2x32xbf16>, vector<32x128xbf16>, vector<2x128xf32> -> vector<2x128xf32>
    %304 = arith.index_cast %c2_i32_143 : i32 to index
    %c0_151 = arith.constant 0 : index
    %c0_152 = arith.constant 0 : index
    %305 = vector.load %arg25[%304, %c0_151, %c0_152] : memref<8x2x128xf32, #tpu.memory_space<vmem>>, vector<1x2x128xf32>
    %306 = vector.shape_cast %305 : vector<1x2x128xf32> to vector<2x128xf32>
    %307 = arith.addf %300, %306 : vector<2x128xf32>
    %308 = vector.extract_strided_slice %307 {offsets = [0, 0], sizes = [2, 32], strides = [1, 1]} : vector<2x128xf32> to vector<2x32xf32>
    %309 = arith.negf %308 : vector<2x32xf32>
    %310 = math.exp %309 : vector<2x32xf32>
    %cst_153 = arith.constant 1.000000e+00 : f32
    %311 = vector.broadcast %cst_153 : f32 to vector<2x32xf32>
    %312 = arith.addf %311, %310 : vector<2x32xf32>
    %313 = arith.divf %311, %312 : vector<2x32xf32>
    %314 = vector.extract_strided_slice %307 {offsets = [0, 32], sizes = [2, 32], strides = [1, 1]} : vector<2x128xf32> to vector<2x32xf32>
    %315 = arith.negf %314 : vector<2x32xf32>
    %316 = math.exp %315 : vector<2x32xf32>
    %cst_154 = arith.constant 1.000000e+00 : f32
    %317 = vector.broadcast %cst_154 : f32 to vector<2x32xf32>
    %318 = arith.addf %317, %316 : vector<2x32xf32>
    %319 = arith.divf %317, %318 : vector<2x32xf32>
    %320 = vector.extract_strided_slice %307 {offsets = [0, 64], sizes = [2, 32], strides = [1, 1]} : vector<2x128xf32> to vector<2x32xf32>
    %321 = math.tanh %320 : vector<2x32xf32>
    %322 = vector.extract_strided_slice %307 {offsets = [0, 96], sizes = [2, 32], strides = [1, 1]} : vector<2x128xf32> to vector<2x32xf32>
    %323 = arith.negf %322 : vector<2x32xf32>
    %324 = math.exp %323 : vector<2x32xf32>
    %cst_155 = arith.constant 1.000000e+00 : f32
    %325 = vector.broadcast %cst_155 : f32 to vector<2x32xf32>
    %326 = arith.addf %325, %324 : vector<2x32xf32>
    %327 = arith.divf %325, %326 : vector<2x32xf32>
    %328 = arith.mulf %319, %257 : vector<2x32xf32>
    %329 = arith.mulf %313, %321 : vector<2x32xf32>
    %330 = arith.addf %328, %329 : vector<2x32xf32>
    %331 = math.tanh %330 : vector<2x32xf32>
    %332 = arith.mulf %327, %331 : vector<2x32xf32>
    %333 = arith.index_cast %297 : i32 to index
    %c0_156 = arith.constant 0 : index
    %c0_157 = arith.constant 0 : index
    %334 = vector.load %arg26[%333, %c0_156, %c0_157] : memref<8x2x128xf32, #tpu.memory_space<vmem>>, vector<1x2x128xf32>
    %335 = vector.shape_cast %334 : vector<1x2x128xf32> to vector<2x128xf32>
    %336 = arith.addf %303, %335 : vector<2x128xf32>
    %337 = vector.extract_strided_slice %336 {offsets = [0, 0], sizes = [2, 32], strides = [1, 1]} : vector<2x128xf32> to vector<2x32xf32>
    %338 = arith.negf %337 : vector<2x32xf32>
    %339 = math.exp %338 : vector<2x32xf32>
    %cst_158 = arith.constant 1.000000e+00 : f32
    %340 = vector.broadcast %cst_158 : f32 to vector<2x32xf32>
    %341 = arith.addf %340, %339 : vector<2x32xf32>
    %342 = arith.divf %340, %341 : vector<2x32xf32>
    %343 = vector.extract_strided_slice %336 {offsets = [0, 32], sizes = [2, 32], strides = [1, 1]} : vector<2x128xf32> to vector<2x32xf32>
    %344 = arith.negf %343 : vector<2x32xf32>
    %345 = math.exp %344 : vector<2x32xf32>
    %cst_159 = arith.constant 1.000000e+00 : f32
    %346 = vector.broadcast %cst_159 : f32 to vector<2x32xf32>
    %347 = arith.addf %346, %345 : vector<2x32xf32>
    %348 = arith.divf %346, %347 : vector<2x32xf32>
    %349 = vector.extract_strided_slice %336 {offsets = [0, 64], sizes = [2, 32], strides = [1, 1]} : vector<2x128xf32> to vector<2x32xf32>
    %350 = math.tanh %349 : vector<2x32xf32>
    %351 = vector.extract_strided_slice %336 {offsets = [0, 96], sizes = [2, 32], strides = [1, 1]} : vector<2x128xf32> to vector<2x32xf32>
    %352 = arith.negf %351 : vector<2x32xf32>
    %353 = math.exp %352 : vector<2x32xf32>
    %cst_160 = arith.constant 1.000000e+00 : f32
    %354 = vector.broadcast %cst_160 : f32 to vector<2x32xf32>
    %355 = arith.addf %354, %353 : vector<2x32xf32>
    %356 = arith.divf %354, %355 : vector<2x32xf32>
    %357 = arith.mulf %348, %286 : vector<2x32xf32>
    %358 = arith.mulf %342, %350 : vector<2x32xf32>
    %359 = arith.addf %357, %358 : vector<2x32xf32>
    %360 = math.tanh %359 : vector<2x32xf32>
    %361 = arith.mulf %356, %360 : vector<2x32xf32>
    %362 = arith.index_cast %c2_i32_143 : i32 to index
    %c0_161 = arith.constant 0 : index
    %c0_162 = arith.constant 0 : index
    %363 = vector.load %arg27[%362, %c0_161, %c0_162] : memref<8x2x32xf32, #tpu.memory_space<vmem>>, vector<1x2x32xf32>
    %364 = vector.shape_cast %363 : vector<1x2x32xf32> to vector<2x32xf32>
    %365 = vector.shape_cast %332 : vector<2x32xf32> to vector<1x2x32xf32>
    tpu.vector_store %arg27[%362, %c0_161, %c0_162], %365 {strides = array<i32>} : memref<8x2x32xf32, #tpu.memory_space<vmem>>, vector<1x2x32xf32>,
    %366 = arith.index_cast %297 : i32 to index
    %c0_163 = arith.constant 0 : index
    %c0_164 = arith.constant 0 : index
    %367 = vector.load %arg28[%366, %c0_163, %c0_164] : memref<8x2x32xf32, #tpu.memory_space<vmem>>, vector<1x2x32xf32>
    %368 = vector.shape_cast %367 : vector<1x2x32xf32> to vector<2x32xf32>
    %369 = vector.shape_cast %361 : vector<2x32xf32> to vector<1x2x32xf32>
    tpu.vector_store %arg28[%366, %c0_163, %c0_164], %369 {strides = array<i32>} : memref<8x2x32xf32, #tpu.memory_space<vmem>>, vector<1x2x32xf32>,
    %c3_i32_165 = arith.constant 3 : i32
    %c7_i32_166 = arith.constant 7 : i32
    %370 = arith.subi %c7_i32_166, %c3_i32_165 : i32
    %371 = arith.truncf %332 : vector<2x32xf32> to vector<2x32xbf16>
    %c0_167 = arith.constant 0 : index
    %c0_168 = arith.constant 0 : index
    %372 = vector.load %arg4[%c0_167, %c0_168] : memref<32x128xbf16, #tpu.memory_space<vmem>>, vector<32x128xbf16>
    %cst_169 = arith.constant dense<0.000000e+00> : vector<2x128xf32>
    %373 = tpu.matmul %371, %372, %cst_169 {dimension_numbers = #tpu.dot_dimension_numbers<[1], [0], [0], [1], [0, 0, 1, 1], [], []>} : vector<2x32xbf16>, vector<32x128xbf16>, vector<2x128xf32> -> vector<2x128xf32>
    %374 = arith.truncf %361 : vector<2x32xf32> to vector<2x32xbf16>
    %c0_170 = arith.constant 0 : index
    %c0_171 = arith.constant 0 : index
    %375 = vector.load %arg5[%c0_170, %c0_171] : memref<32x128xbf16, #tpu.memory_space<vmem>>, vector<32x128xbf16>
    %cst_172 = arith.constant dense<0.000000e+00> : vector<2x128xf32>
    %376 = tpu.matmul %374, %375, %cst_172 {dimension_numbers = #tpu.dot_dimension_numbers<[1], [0], [0], [1], [0, 0, 1, 1], [], []>} : vector<2x32xbf16>, vector<32x128xbf16>, vector<2x128xf32> -> vector<2x128xf32>
    %377 = arith.index_cast %c3_i32_165 : i32 to index
    %c0_173 = arith.constant 0 : index
    %c0_174 = arith.constant 0 : index
    %378 = vector.load %arg25[%377, %c0_173, %c0_174] : memref<8x2x128xf32, #tpu.memory_space<vmem>>, vector<1x2x128xf32>
    %379 = vector.shape_cast %378 : vector<1x2x128xf32> to vector<2x128xf32>
    %380 = arith.addf %373, %379 : vector<2x128xf32>
    %381 = vector.extract_strided_slice %380 {offsets = [0, 0], sizes = [2, 32], strides = [1, 1]} : vector<2x128xf32> to vector<2x32xf32>
    %382 = arith.negf %381 : vector<2x32xf32>
    %383 = math.exp %382 : vector<2x32xf32>
    %cst_175 = arith.constant 1.000000e+00 : f32
    %384 = vector.broadcast %cst_175 : f32 to vector<2x32xf32>
    %385 = arith.addf %384, %383 : vector<2x32xf32>
    %386 = arith.divf %384, %385 : vector<2x32xf32>
    %387 = vector.extract_strided_slice %380 {offsets = [0, 32], sizes = [2, 32], strides = [1, 1]} : vector<2x128xf32> to vector<2x32xf32>
    %388 = arith.negf %387 : vector<2x32xf32>
    %389 = math.exp %388 : vector<2x32xf32>
    %cst_176 = arith.constant 1.000000e+00 : f32
    %390 = vector.broadcast %cst_176 : f32 to vector<2x32xf32>
    %391 = arith.addf %390, %389 : vector<2x32xf32>
    %392 = arith.divf %390, %391 : vector<2x32xf32>
    %393 = vector.extract_strided_slice %380 {offsets = [0, 64], sizes = [2, 32], strides = [1, 1]} : vector<2x128xf32> to vector<2x32xf32>
    %394 = math.tanh %393 : vector<2x32xf32>
    %395 = vector.extract_strided_slice %380 {offsets = [0, 96], sizes = [2, 32], strides = [1, 1]} : vector<2x128xf32> to vector<2x32xf32>
    %396 = arith.negf %395 : vector<2x32xf32>
    %397 = math.exp %396 : vector<2x32xf32>
    %cst_177 = arith.constant 1.000000e+00 : f32
    %398 = vector.broadcast %cst_177 : f32 to vector<2x32xf32>
    %399 = arith.addf %398, %397 : vector<2x32xf32>
    %400 = arith.divf %398, %399 : vector<2x32xf32>
    %401 = arith.mulf %392, %330 : vector<2x32xf32>
    %402 = arith.mulf %386, %394 : vector<2x32xf32>
    %403 = arith.addf %401, %402 : vector<2x32xf32>
    %404 = math.tanh %403 : vector<2x32xf32>
    %405 = arith.mulf %400, %404 : vector<2x32xf32>
    %406 = arith.index_cast %370 : i32 to index
    %c0_178 = arith.constant 0 : index
    %c0_179 = arith.constant 0 : index
    %407 = vector.load %arg26[%406, %c0_178, %c0_179] : memref<8x2x128xf32, #tpu.memory_space<vmem>>, vector<1x2x128xf32>
    %408 = vector.shape_cast %407 : vector<1x2x128xf32> to vector<2x128xf32>
    %409 = arith.addf %376, %408 : vector<2x128xf32>
    %410 = vector.extract_strided_slice %409 {offsets = [0, 0], sizes = [2, 32], strides = [1, 1]} : vector<2x128xf32> to vector<2x32xf32>
    %411 = arith.negf %410 : vector<2x32xf32>
    %412 = math.exp %411 : vector<2x32xf32>
    %cst_180 = arith.constant 1.000000e+00 : f32
    %413 = vector.broadcast %cst_180 : f32 to vector<2x32xf32>
    %414 = arith.addf %413, %412 : vector<2x32xf32>
    %415 = arith.divf %413, %414 : vector<2x32xf32>
    %416 = vector.extract_strided_slice %409 {offsets = [0, 32], sizes = [2, 32], strides = [1, 1]} : vector<2x128xf32> to vector<2x32xf32>
    %417 = arith.negf %416 : vector<2x32xf32>
    %418 = math.exp %417 : vector<2x32xf32>
    %cst_181 = arith.constant 1.000000e+00 : f32
    %419 = vector.broadcast %cst_181 : f32 to vector<2x32xf32>
    %420 = arith.addf %419, %418 : vector<2x32xf32>
    %421 = arith.divf %419, %420 : vector<2x32xf32>
    %422 = vector.extract_strided_slice %409 {offsets = [0, 64], sizes = [2, 32], strides = [1, 1]} : vector<2x128xf32> to vector<2x32xf32>
    %423 = math.tanh %422 : vector<2x32xf32>
    %424 = vector.extract_strided_slice %409 {offsets = [0, 96], sizes = [2, 32], strides = [1, 1]} : vector<2x128xf32> to vector<2x32xf32>
    %425 = arith.negf %424 : vector<2x32xf32>
    %426 = math.exp %425 : vector<2x32xf32>
    %cst_182 = arith.constant 1.000000e+00 : f32
    %427 = vector.broadcast %cst_182 : f32 to vector<2x32xf32>
    %428 = arith.addf %427, %426 : vector<2x32xf32>
    %429 = arith.divf %427, %428 : vector<2x32xf32>
    %430 = arith.mulf %421, %359 : vector<2x32xf32>
    %431 = arith.mulf %415, %423 : vector<2x32xf32>
    %432 = arith.addf %430, %431 : vector<2x32xf32>
    %433 = math.tanh %432 : vector<2x32xf32>
    %434 = arith.mulf %429, %433 : vector<2x32xf32>
    %435 = arith.index_cast %c3_i32_165 : i32 to index
    %c0_183 = arith.constant 0 : index
    %c0_184 = arith.constant 0 : index
    %436 = vector.load %arg27[%435, %c0_183, %c0_184] : memref<8x2x32xf32, #tpu.memory_space<vmem>>, vector<1x2x32xf32>
    %437 = vector.shape_cast %436 : vector<1x2x32xf32> to vector<2x32xf32>
    %438 = vector.shape_cast %405 : vector<2x32xf32> to vector<1x2x32xf32>
    tpu.vector_store %arg27[%435, %c0_183, %c0_184], %438 {strides = array<i32>} : memref<8x2x32xf32, #tpu.memory_space<vmem>>, vector<1x2x32xf32>,
    %439 = arith.index_cast %370 : i32 to index
    %c0_185 = arith.constant 0 : index
    %c0_186 = arith.constant 0 : index
    %440 = vector.load %arg28[%439, %c0_185, %c0_186] : memref<8x2x32xf32, #tpu.memory_space<vmem>>, vector<1x2x32xf32>
    %441 = vector.shape_cast %440 : vector<1x2x32xf32> to vector<2x32xf32>
    %442 = vector.shape_cast %434 : vector<2x32xf32> to vector<1x2x32xf32>
    tpu.vector_store %arg28[%439, %c0_185, %c0_186], %442 {strides = array<i32>} : memref<8x2x32xf32, #tpu.memory_space<vmem>>, vector<1x2x32xf32>,
    %c4_i32_187 = arith.constant 4 : i32
    %c7_i32_188 = arith.constant 7 : i32
    %443 = arith.subi %c7_i32_188, %c4_i32_187 : i32
    %444 = arith.truncf %405 : vector<2x32xf32> to vector<2x32xbf16>
    %c0_189 = arith.constant 0 : index
    %c0_190 = arith.constant 0 : index
    %445 = vector.load %arg4[%c0_189, %c0_190] : memref<32x128xbf16, #tpu.memory_space<vmem>>, vector<32x128xbf16>
    %cst_191 = arith.constant dense<0.000000e+00> : vector<2x128xf32>
    %446 = tpu.matmul %444, %445, %cst_191 {dimension_numbers = #tpu.dot_dimension_numbers<[1], [0], [0], [1], [0, 0, 1, 1], [], []>} : vector<2x32xbf16>, vector<32x128xbf16>, vector<2x128xf32> -> vector<2x128xf32>
    %447 = arith.truncf %434 : vector<2x32xf32> to vector<2x32xbf16>
    %c0_192 = arith.constant 0 : index
    %c0_193 = arith.constant 0 : index
    %448 = vector.load %arg5[%c0_192, %c0_193] : memref<32x128xbf16, #tpu.memory_space<vmem>>, vector<32x128xbf16>
    %cst_194 = arith.constant dense<0.000000e+00> : vector<2x128xf32>
    %449 = tpu.matmul %447, %448, %cst_194 {dimension_numbers = #tpu.dot_dimension_numbers<[1], [0], [0], [1], [0, 0, 1, 1], [], []>} : vector<2x32xbf16>, vector<32x128xbf16>, vector<2x128xf32> -> vector<2x128xf32>
    %450 = arith.index_cast %c4_i32_187 : i32 to index
    %c0_195 = arith.constant 0 : index
    %c0_196 = arith.constant 0 : index
    %451 = vector.load %arg25[%450, %c0_195, %c0_196] : memref<8x2x128xf32, #tpu.memory_space<vmem>>, vector<1x2x128xf32>
    %452 = vector.shape_cast %451 : vector<1x2x128xf32> to vector<2x128xf32>
    %453 = arith.addf %446, %452 : vector<2x128xf32>
    %454 = vector.extract_strided_slice %453 {offsets = [0, 0], sizes = [2, 32], strides = [1, 1]} : vector<2x128xf32> to vector<2x32xf32>
    %455 = arith.negf %454 : vector<2x32xf32>
    %456 = math.exp %455 : vector<2x32xf32>
    %cst_197 = arith.constant 1.000000e+00 : f32
    %457 = vector.broadcast %cst_197 : f32 to vector<2x32xf32>
    %458 = arith.addf %457, %456 : vector<2x32xf32>
    %459 = arith.divf %457, %458 : vector<2x32xf32>
    %460 = vector.extract_strided_slice %453 {offsets = [0, 32], sizes = [2, 32], strides = [1, 1]} : vector<2x128xf32> to vector<2x32xf32>
    %461 = arith.negf %460 : vector<2x32xf32>
    %462 = math.exp %461 : vector<2x32xf32>
    %cst_198 = arith.constant 1.000000e+00 : f32
    %463 = vector.broadcast %cst_198 : f32 to vector<2x32xf32>
    %464 = arith.addf %463, %462 : vector<2x32xf32>
    %465 = arith.divf %463, %464 : vector<2x32xf32>
    %466 = vector.extract_strided_slice %453 {offsets = [0, 64], sizes = [2, 32], strides = [1, 1]} : vector<2x128xf32> to vector<2x32xf32>
    %467 = math.tanh %466 : vector<2x32xf32>
    %468 = vector.extract_strided_slice %453 {offsets = [0, 96], sizes = [2, 32], strides = [1, 1]} : vector<2x128xf32> to vector<2x32xf32>
    %469 = arith.negf %468 : vector<2x32xf32>
    %470 = math.exp %469 : vector<2x32xf32>
    %cst_199 = arith.constant 1.000000e+00 : f32
    %471 = vector.broadcast %cst_199 : f32 to vector<2x32xf32>
    %472 = arith.addf %471, %470 : vector<2x32xf32>
    %473 = arith.divf %471, %472 : vector<2x32xf32>
    %474 = arith.mulf %465, %403 : vector<2x32xf32>
    %475 = arith.mulf %459, %467 : vector<2x32xf32>
    %476 = arith.addf %474, %475 : vector<2x32xf32>
    %477 = math.tanh %476 : vector<2x32xf32>
    %478 = arith.mulf %473, %477 : vector<2x32xf32>
    %479 = arith.index_cast %443 : i32 to index
    %c0_200 = arith.constant 0 : index
    %c0_201 = arith.constant 0 : index
    %480 = vector.load %arg26[%479, %c0_200, %c0_201] : memref<8x2x128xf32, #tpu.memory_space<vmem>>, vector<1x2x128xf32>
    %481 = vector.shape_cast %480 : vector<1x2x128xf32> to vector<2x128xf32>
    %482 = arith.addf %449, %481 : vector<2x128xf32>
    %483 = vector.extract_strided_slice %482 {offsets = [0, 0], sizes = [2, 32], strides = [1, 1]} : vector<2x128xf32> to vector<2x32xf32>
    %484 = arith.negf %483 : vector<2x32xf32>
    %485 = math.exp %484 : vector<2x32xf32>
    %cst_202 = arith.constant 1.000000e+00 : f32
    %486 = vector.broadcast %cst_202 : f32 to vector<2x32xf32>
    %487 = arith.addf %486, %485 : vector<2x32xf32>
    %488 = arith.divf %486, %487 : vector<2x32xf32>
    %489 = vector.extract_strided_slice %482 {offsets = [0, 32], sizes = [2, 32], strides = [1, 1]} : vector<2x128xf32> to vector<2x32xf32>
    %490 = arith.negf %489 : vector<2x32xf32>
    %491 = math.exp %490 : vector<2x32xf32>
    %cst_203 = arith.constant 1.000000e+00 : f32
    %492 = vector.broadcast %cst_203 : f32 to vector<2x32xf32>
    %493 = arith.addf %492, %491 : vector<2x32xf32>
    %494 = arith.divf %492, %493 : vector<2x32xf32>
    %495 = vector.extract_strided_slice %482 {offsets = [0, 64], sizes = [2, 32], strides = [1, 1]} : vector<2x128xf32> to vector<2x32xf32>
    %496 = math.tanh %495 : vector<2x32xf32>
    %497 = vector.extract_strided_slice %482 {offsets = [0, 96], sizes = [2, 32], strides = [1, 1]} : vector<2x128xf32> to vector<2x32xf32>
    %498 = arith.negf %497 : vector<2x32xf32>
    %499 = math.exp %498 : vector<2x32xf32>
    %cst_204 = arith.constant 1.000000e+00 : f32
    %500 = vector.broadcast %cst_204 : f32 to vector<2x32xf32>
    %501 = arith.addf %500, %499 : vector<2x32xf32>
    %502 = arith.divf %500, %501 : vector<2x32xf32>
    %503 = arith.mulf %494, %432 : vector<2x32xf32>
    %504 = arith.mulf %488, %496 : vector<2x32xf32>
    %505 = arith.addf %503, %504 : vector<2x32xf32>
    %506 = math.tanh %505 : vector<2x32xf32>
    %507 = arith.mulf %502, %506 : vector<2x32xf32>
    %508 = arith.index_cast %c4_i32_187 : i32 to index
    %c0_205 = arith.constant 0 : index
    %c0_206 = arith.constant 0 : index
    %509 = vector.load %arg27[%508, %c0_205, %c0_206] : memref<8x2x32xf32, #tpu.memory_space<vmem>>, vector<1x2x32xf32>
    %510 = vector.shape_cast %509 : vector<1x2x32xf32> to vector<2x32xf32>
    %511 = vector.shape_cast %478 : vector<2x32xf32> to vector<1x2x32xf32>
    tpu.vector_store %arg27[%508, %c0_205, %c0_206], %511 {strides = array<i32>} : memref<8x2x32xf32, #tpu.memory_space<vmem>>, vector<1x2x32xf32>,
    %512 = arith.index_cast %443 : i32 to index
    %c0_207 = arith.constant 0 : index
    %c0_208 = arith.constant 0 : index
    %513 = vector.load %arg28[%512, %c0_207, %c0_208] : memref<8x2x32xf32, #tpu.memory_space<vmem>>, vector<1x2x32xf32>
    %514 = vector.shape_cast %513 : vector<1x2x32xf32> to vector<2x32xf32>
    %515 = vector.shape_cast %507 : vector<2x32xf32> to vector<1x2x32xf32>
    tpu.vector_store %arg28[%512, %c0_207, %c0_208], %515 {strides = array<i32>} : memref<8x2x32xf32, #tpu.memory_space<vmem>>, vector<1x2x32xf32>,
    %c5_i32_209 = arith.constant 5 : i32
    %c7_i32_210 = arith.constant 7 : i32
    %516 = arith.subi %c7_i32_210, %c5_i32_209 : i32
    %517 = arith.truncf %478 : vector<2x32xf32> to vector<2x32xbf16>
    %c0_211 = arith.constant 0 : index
    %c0_212 = arith.constant 0 : index
    %518 = vector.load %arg4[%c0_211, %c0_212] : memref<32x128xbf16, #tpu.memory_space<vmem>>, vector<32x128xbf16>
    %cst_213 = arith.constant dense<0.000000e+00> : vector<2x128xf32>
    %519 = tpu.matmul %517, %518, %cst_213 {dimension_numbers = #tpu.dot_dimension_numbers<[1], [0], [0], [1], [0, 0, 1, 1], [], []>} : vector<2x32xbf16>, vector<32x128xbf16>, vector<2x128xf32> -> vector<2x128xf32>
    %520 = arith.truncf %507 : vector<2x32xf32> to vector<2x32xbf16>
    %c0_214 = arith.constant 0 : index
    %c0_215 = arith.constant 0 : index
    %521 = vector.load %arg5[%c0_214, %c0_215] : memref<32x128xbf16, #tpu.memory_space<vmem>>, vector<32x128xbf16>
    %cst_216 = arith.constant dense<0.000000e+00> : vector<2x128xf32>
    %522 = tpu.matmul %520, %521, %cst_216 {dimension_numbers = #tpu.dot_dimension_numbers<[1], [0], [0], [1], [0, 0, 1, 1], [], []>} : vector<2x32xbf16>, vector<32x128xbf16>, vector<2x128xf32> -> vector<2x128xf32>
    %523 = arith.index_cast %c5_i32_209 : i32 to index
    %c0_217 = arith.constant 0 : index
    %c0_218 = arith.constant 0 : index
    %524 = vector.load %arg25[%523, %c0_217, %c0_218] : memref<8x2x128xf32, #tpu.memory_space<vmem>>, vector<1x2x128xf32>
    %525 = vector.shape_cast %524 : vector<1x2x128xf32> to vector<2x128xf32>
    %526 = arith.addf %519, %525 : vector<2x128xf32>
    %527 = vector.extract_strided_slice %526 {offsets = [0, 0], sizes = [2, 32], strides = [1, 1]} : vector<2x128xf32> to vector<2x32xf32>
    %528 = arith.negf %527 : vector<2x32xf32>
    %529 = math.exp %528 : vector<2x32xf32>
    %cst_219 = arith.constant 1.000000e+00 : f32
    %530 = vector.broadcast %cst_219 : f32 to vector<2x32xf32>
    %531 = arith.addf %530, %529 : vector<2x32xf32>
    %532 = arith.divf %530, %531 : vector<2x32xf32>
    %533 = vector.extract_strided_slice %526 {offsets = [0, 32], sizes = [2, 32], strides = [1, 1]} : vector<2x128xf32> to vector<2x32xf32>
    %534 = arith.negf %533 : vector<2x32xf32>
    %535 = math.exp %534 : vector<2x32xf32>
    %cst_220 = arith.constant 1.000000e+00 : f32
    %536 = vector.broadcast %cst_220 : f32 to vector<2x32xf32>
    %537 = arith.addf %536, %535 : vector<2x32xf32>
    %538 = arith.divf %536, %537 : vector<2x32xf32>
    %539 = vector.extract_strided_slice %526 {offsets = [0, 64], sizes = [2, 32], strides = [1, 1]} : vector<2x128xf32> to vector<2x32xf32>
    %540 = math.tanh %539 : vector<2x32xf32>
    %541 = vector.extract_strided_slice %526 {offsets = [0, 96], sizes = [2, 32], strides = [1, 1]} : vector<2x128xf32> to vector<2x32xf32>
    %542 = arith.negf %541 : vector<2x32xf32>
    %543 = math.exp %542 : vector<2x32xf32>
    %cst_221 = arith.constant 1.000000e+00 : f32
    %544 = vector.broadcast %cst_221 : f32 to vector<2x32xf32>
    %545 = arith.addf %544, %543 : vector<2x32xf32>
    %546 = arith.divf %544, %545 : vector<2x32xf32>
    %547 = arith.mulf %538, %476 : vector<2x32xf32>
    %548 = arith.mulf %532, %540 : vector<2x32xf32>
    %549 = arith.addf %547, %548 : vector<2x32xf32>
    %550 = math.tanh %549 : vector<2x32xf32>
    %551 = arith.mulf %546, %550 : vector<2x32xf32>
    %552 = arith.index_cast %516 : i32 to index
    %c0_222 = arith.constant 0 : index
    %c0_223 = arith.constant 0 : index
    %553 = vector.load %arg26[%552, %c0_222, %c0_223] : memref<8x2x128xf32, #tpu.memory_space<vmem>>, vector<1x2x128xf32>
    %554 = vector.shape_cast %553 : vector<1x2x128xf32> to vector<2x128xf32>
    %555 = arith.addf %522, %554 : vector<2x128xf32>
    %556 = vector.extract_strided_slice %555 {offsets = [0, 0], sizes = [2, 32], strides = [1, 1]} : vector<2x128xf32> to vector<2x32xf32>
    %557 = arith.negf %556 : vector<2x32xf32>
    %558 = math.exp %557 : vector<2x32xf32>
    %cst_224 = arith.constant 1.000000e+00 : f32
    %559 = vector.broadcast %cst_224 : f32 to vector<2x32xf32>
    %560 = arith.addf %559, %558 : vector<2x32xf32>
    %561 = arith.divf %559, %560 : vector<2x32xf32>
    %562 = vector.extract_strided_slice %555 {offsets = [0, 32], sizes = [2, 32], strides = [1, 1]} : vector<2x128xf32> to vector<2x32xf32>
    %563 = arith.negf %562 : vector<2x32xf32>
    %564 = math.exp %563 : vector<2x32xf32>
    %cst_225 = arith.constant 1.000000e+00 : f32
    %565 = vector.broadcast %cst_225 : f32 to vector<2x32xf32>
    %566 = arith.addf %565, %564 : vector<2x32xf32>
    %567 = arith.divf %565, %566 : vector<2x32xf32>
    %568 = vector.extract_strided_slice %555 {offsets = [0, 64], sizes = [2, 32], strides = [1, 1]} : vector<2x128xf32> to vector<2x32xf32>
    %569 = math.tanh %568 : vector<2x32xf32>
    %570 = vector.extract_strided_slice %555 {offsets = [0, 96], sizes = [2, 32], strides = [1, 1]} : vector<2x128xf32> to vector<2x32xf32>
    %571 = arith.negf %570 : vector<2x32xf32>
    %572 = math.exp %571 : vector<2x32xf32>
    %cst_226 = arith.constant 1.000000e+00 : f32
    %573 = vector.broadcast %cst_226 : f32 to vector<2x32xf32>
    %574 = arith.addf %573, %572 : vector<2x32xf32>
    %575 = arith.divf %573, %574 : vector<2x32xf32>
    %576 = arith.mulf %567, %505 : vector<2x32xf32>
    %577 = arith.mulf %561, %569 : vector<2x32xf32>
    %578 = arith.addf %576, %577 : vector<2x32xf32>
    %579 = math.tanh %578 : vector<2x32xf32>
    %580 = arith.mulf %575, %579 : vector<2x32xf32>
    %581 = arith.index_cast %c5_i32_209 : i32 to index
    %c0_227 = arith.constant 0 : index
    %c0_228 = arith.constant 0 : index
    %582 = vector.load %arg27[%581, %c0_227, %c0_228] : memref<8x2x32xf32, #tpu.memory_space<vmem>>, vector<1x2x32xf32>
    %583 = vector.shape_cast %582 : vector<1x2x32xf32> to vector<2x32xf32>
    %584 = vector.shape_cast %551 : vector<2x32xf32> to vector<1x2x32xf32>
    tpu.vector_store %arg27[%581, %c0_227, %c0_228], %584 {strides = array<i32>} : memref<8x2x32xf32, #tpu.memory_space<vmem>>, vector<1x2x32xf32>,
    %585 = arith.index_cast %516 : i32 to index
    %c0_229 = arith.constant 0 : index
    %c0_230 = arith.constant 0 : index
    %586 = vector.load %arg28[%585, %c0_229, %c0_230] : memref<8x2x32xf32, #tpu.memory_space<vmem>>, vector<1x2x32xf32>
    %587 = vector.shape_cast %586 : vector<1x2x32xf32> to vector<2x32xf32>
    %588 = vector.shape_cast %580 : vector<2x32xf32> to vector<1x2x32xf32>
    tpu.vector_store %arg28[%585, %c0_229, %c0_230], %588 {strides = array<i32>} : memref<8x2x32xf32, #tpu.memory_space<vmem>>, vector<1x2x32xf32>,
    %c6_i32_231 = arith.constant 6 : i32
    %c7_i32_232 = arith.constant 7 : i32
    %589 = arith.subi %c7_i32_232, %c6_i32_231 : i32
    %590 = arith.truncf %551 : vector<2x32xf32> to vector<2x32xbf16>
    %c0_233 = arith.constant 0 : index
    %c0_234 = arith.constant 0 : index
    %591 = vector.load %arg4[%c0_233, %c0_234] : memref<32x128xbf16, #tpu.memory_space<vmem>>, vector<32x128xbf16>
    %cst_235 = arith.constant dense<0.000000e+00> : vector<2x128xf32>
    %592 = tpu.matmul %590, %591, %cst_235 {dimension_numbers = #tpu.dot_dimension_numbers<[1], [0], [0], [1], [0, 0, 1, 1], [], []>} : vector<2x32xbf16>, vector<32x128xbf16>, vector<2x128xf32> -> vector<2x128xf32>
    %593 = arith.truncf %580 : vector<2x32xf32> to vector<2x32xbf16>
    %c0_236 = arith.constant 0 : index
    %c0_237 = arith.constant 0 : index
    %594 = vector.load %arg5[%c0_236, %c0_237] : memref<32x128xbf16, #tpu.memory_space<vmem>>, vector<32x128xbf16>
    %cst_238 = arith.constant dense<0.000000e+00> : vector<2x128xf32>
    %595 = tpu.matmul %593, %594, %cst_238 {dimension_numbers = #tpu.dot_dimension_numbers<[1], [0], [0], [1], [0, 0, 1, 1], [], []>} : vector<2x32xbf16>, vector<32x128xbf16>, vector<2x128xf32> -> vector<2x128xf32>
    %596 = arith.index_cast %c6_i32_231 : i32 to index
    %c0_239 = arith.constant 0 : index
    %c0_240 = arith.constant 0 : index
    %597 = vector.load %arg25[%596, %c0_239, %c0_240] : memref<8x2x128xf32, #tpu.memory_space<vmem>>, vector<1x2x128xf32>
    %598 = vector.shape_cast %597 : vector<1x2x128xf32> to vector<2x128xf32>
    %599 = arith.addf %592, %598 : vector<2x128xf32>
    %600 = vector.extract_strided_slice %599 {offsets = [0, 0], sizes = [2, 32], strides = [1, 1]} : vector<2x128xf32> to vector<2x32xf32>
    %601 = arith.negf %600 : vector<2x32xf32>
    %602 = math.exp %601 : vector<2x32xf32>
    %cst_241 = arith.constant 1.000000e+00 : f32
    %603 = vector.broadcast %cst_241 : f32 to vector<2x32xf32>
    %604 = arith.addf %603, %602 : vector<2x32xf32>
    %605 = arith.divf %603, %604 : vector<2x32xf32>
    %606 = vector.extract_strided_slice %599 {offsets = [0, 32], sizes = [2, 32], strides = [1, 1]} : vector<2x128xf32> to vector<2x32xf32>
    %607 = arith.negf %606 : vector<2x32xf32>
    %608 = math.exp %607 : vector<2x32xf32>
    %cst_242 = arith.constant 1.000000e+00 : f32
    %609 = vector.broadcast %cst_242 : f32 to vector<2x32xf32>
    %610 = arith.addf %609, %608 : vector<2x32xf32>
    %611 = arith.divf %609, %610 : vector<2x32xf32>
    %612 = vector.extract_strided_slice %599 {offsets = [0, 64], sizes = [2, 32], strides = [1, 1]} : vector<2x128xf32> to vector<2x32xf32>
    %613 = math.tanh %612 : vector<2x32xf32>
    %614 = vector.extract_strided_slice %599 {offsets = [0, 96], sizes = [2, 32], strides = [1, 1]} : vector<2x128xf32> to vector<2x32xf32>
    %615 = arith.negf %614 : vector<2x32xf32>
    %616 = math.exp %615 : vector<2x32xf32>
    %cst_243 = arith.constant 1.000000e+00 : f32
    %617 = vector.broadcast %cst_243 : f32 to vector<2x32xf32>
    %618 = arith.addf %617, %616 : vector<2x32xf32>
    %619 = arith.divf %617, %618 : vector<2x32xf32>
    %620 = arith.mulf %611, %549 : vector<2x32xf32>
    %621 = arith.mulf %605, %613 : vector<2x32xf32>
    %622 = arith.addf %620, %621 : vector<2x32xf32>
    %623 = math.tanh %622 : vector<2x32xf32>
    %624 = arith.mulf %619, %623 : vector<2x32xf32>
    %625 = arith.index_cast %589 : i32 to index
    %c0_244 = arith.constant 0 : index
    %c0_245 = arith.constant 0 : index
    %626 = vector.load %arg26[%625, %c0_244, %c0_245] : memref<8x2x128xf32, #tpu.memory_space<vmem>>, vector<1x2x128xf32>
    %627 = vector.shape_cast %626 : vector<1x2x128xf32> to vector<2x128xf32>
    %628 = arith.addf %595, %627 : vector<2x128xf32>
    %629 = vector.extract_strided_slice %628 {offsets = [0, 0], sizes = [2, 32], strides = [1, 1]} : vector<2x128xf32> to vector<2x32xf32>
    %630 = arith.negf %629 : vector<2x32xf32>
    %631 = math.exp %630 : vector<2x32xf32>
    %cst_246 = arith.constant 1.000000e+00 : f32
    %632 = vector.broadcast %cst_246 : f32 to vector<2x32xf32>
    %633 = arith.addf %632, %631 : vector<2x32xf32>
    %634 = arith.divf %632, %633 : vector<2x32xf32>
    %635 = vector.extract_strided_slice %628 {offsets = [0, 32], sizes = [2, 32], strides = [1, 1]} : vector<2x128xf32> to vector<2x32xf32>
    %636 = arith.negf %635 : vector<2x32xf32>
    %637 = math.exp %636 : vector<2x32xf32>
    %cst_247 = arith.constant 1.000000e+00 : f32
    %638 = vector.broadcast %cst_247 : f32 to vector<2x32xf32>
    %639 = arith.addf %638, %637 : vector<2x32xf32>
    %640 = arith.divf %638, %639 : vector<2x32xf32>
    %641 = vector.extract_strided_slice %628 {offsets = [0, 64], sizes = [2, 32], strides = [1, 1]} : vector<2x128xf32> to vector<2x32xf32>
    %642 = math.tanh %641 : vector<2x32xf32>
    %643 = vector.extract_strided_slice %628 {offsets = [0, 96], sizes = [2, 32], strides = [1, 1]} : vector<2x128xf32> to vector<2x32xf32>
    %644 = arith.negf %643 : vector<2x32xf32>
    %645 = math.exp %644 : vector<2x32xf32>
    %cst_248 = arith.constant 1.000000e+00 : f32
    %646 = vector.broadcast %cst_248 : f32 to vector<2x32xf32>
    %647 = arith.addf %646, %645 : vector<2x32xf32>
    %648 = arith.divf %646, %647 : vector<2x32xf32>
    %649 = arith.mulf %640, %578 : vector<2x32xf32>
    %650 = arith.mulf %634, %642 : vector<2x32xf32>
    %651 = arith.addf %649, %650 : vector<2x32xf32>
    %652 = math.tanh %651 : vector<2x32xf32>
    %653 = arith.mulf %648, %652 : vector<2x32xf32>
    %654 = arith.index_cast %c6_i32_231 : i32 to index
    %c0_249 = arith.constant 0 : index
    %c0_250 = arith.constant 0 : index
    %655 = vector.load %arg27[%654, %c0_249, %c0_250] : memref<8x2x32xf32, #tpu.memory_space<vmem>>, vector<1x2x32xf32>
    %656 = vector.shape_cast %655 : vector<1x2x32xf32> to vector<2x32xf32>
    %657 = vector.shape_cast %624 : vector<2x32xf32> to vector<1x2x32xf32>
    tpu.vector_store %arg27[%654, %c0_249, %c0_250], %657 {strides = array<i32>} : memref<8x2x32xf32, #tpu.memory_space<vmem>>, vector<1x2x32xf32>,
    %658 = arith.index_cast %589 : i32 to index
    %c0_251 = arith.constant 0 : index
    %c0_252 = arith.constant 0 : index
    %659 = vector.load %arg28[%658, %c0_251, %c0_252] : memref<8x2x32xf32, #tpu.memory_space<vmem>>, vector<1x2x32xf32>
    %660 = vector.shape_cast %659 : vector<1x2x32xf32> to vector<2x32xf32>
    %661 = vector.shape_cast %653 : vector<2x32xf32> to vector<1x2x32xf32>
    tpu.vector_store %arg28[%658, %c0_251, %c0_252], %661 {strides = array<i32>} : memref<8x2x32xf32, #tpu.memory_space<vmem>>, vector<1x2x32xf32>,
    %c7_i32_253 = arith.constant 7 : i32
    %c7_i32_254 = arith.constant 7 : i32
    %662 = arith.subi %c7_i32_254, %c7_i32_253 : i32
    %663 = arith.truncf %624 : vector<2x32xf32> to vector<2x32xbf16>
    %c0_255 = arith.constant 0 : index
    %c0_256 = arith.constant 0 : index
    %664 = vector.load %arg4[%c0_255, %c0_256] : memref<32x128xbf16, #tpu.memory_space<vmem>>, vector<32x128xbf16>
    %cst_257 = arith.constant dense<0.000000e+00> : vector<2x128xf32>
    %665 = tpu.matmul %663, %664, %cst_257 {dimension_numbers = #tpu.dot_dimension_numbers<[1], [0], [0], [1], [0, 0, 1, 1], [], []>} : vector<2x32xbf16>, vector<32x128xbf16>, vector<2x128xf32> -> vector<2x128xf32>
    %666 = arith.truncf %653 : vector<2x32xf32> to vector<2x32xbf16>
    %c0_258 = arith.constant 0 : index
    %c0_259 = arith.constant 0 : index
    %667 = vector.load %arg5[%c0_258, %c0_259] : memref<32x128xbf16, #tpu.memory_space<vmem>>, vector<32x128xbf16>
    %cst_260 = arith.constant dense<0.000000e+00> : vector<2x128xf32>
    %668 = tpu.matmul %666, %667, %cst_260 {dimension_numbers = #tpu.dot_dimension_numbers<[1], [0], [0], [1], [0, 0, 1, 1], [], []>} : vector<2x32xbf16>, vector<32x128xbf16>, vector<2x128xf32> -> vector<2x128xf32>
    %669 = arith.index_cast %c7_i32_253 : i32 to index
    %c0_261 = arith.constant 0 : index
    %c0_262 = arith.constant 0 : index
    %670 = vector.load %arg25[%669, %c0_261, %c0_262] : memref<8x2x128xf32, #tpu.memory_space<vmem>>, vector<1x2x128xf32>
    %671 = vector.shape_cast %670 : vector<1x2x128xf32> to vector<2x128xf32>
    %672 = arith.addf %665, %671 : vector<2x128xf32>
    %673 = vector.extract_strided_slice %672 {offsets = [0, 0], sizes = [2, 32], strides = [1, 1]} : vector<2x128xf32> to vector<2x32xf32>
    %674 = arith.negf %673 : vector<2x32xf32>
    %675 = math.exp %674 : vector<2x32xf32>
    %cst_263 = arith.constant 1.000000e+00 : f32
    %676 = vector.broadcast %cst_263 : f32 to vector<2x32xf32>
    %677 = arith.addf %676, %675 : vector<2x32xf32>
    %678 = arith.divf %676, %677 : vector<2x32xf32>
    %679 = vector.extract_strided_slice %672 {offsets = [0, 32], sizes = [2, 32], strides = [1, 1]} : vector<2x128xf32> to vector<2x32xf32>
    %680 = arith.negf %679 : vector<2x32xf32>
    %681 = math.exp %680 : vector<2x32xf32>
    %cst_264 = arith.constant 1.000000e+00 : f32
    %682 = vector.broadcast %cst_264 : f32 to vector<2x32xf32>
    %683 = arith.addf %682, %681 : vector<2x32xf32>
    %684 = arith.divf %682, %683 : vector<2x32xf32>
    %685 = vector.extract_strided_slice %672 {offsets = [0, 64], sizes = [2, 32], strides = [1, 1]} : vector<2x128xf32> to vector<2x32xf32>
    %686 = math.tanh %685 : vector<2x32xf32>
    %687 = vector.extract_strided_slice %672 {offsets = [0, 96], sizes = [2, 32], strides = [1, 1]} : vector<2x128xf32> to vector<2x32xf32>
    %688 = arith.negf %687 : vector<2x32xf32>
    %689 = math.exp %688 : vector<2x32xf32>
    %cst_265 = arith.constant 1.000000e+00 : f32
    %690 = vector.broadcast %cst_265 : f32 to vector<2x32xf32>
    %691 = arith.addf %690, %689 : vector<2x32xf32>
    %692 = arith.divf %690, %691 : vector<2x32xf32>
    %693 = arith.mulf %684, %622 : vector<2x32xf32>
    %694 = arith.mulf %678, %686 : vector<2x32xf32>
    %695 = arith.addf %693, %694 : vector<2x32xf32>
    %696 = math.tanh %695 : vector<2x32xf32>
    %697 = arith.mulf %692, %696 : vector<2x32xf32>
    %698 = arith.index_cast %662 : i32 to index
    %c0_266 = arith.constant 0 : index
    %c0_267 = arith.constant 0 : index
    %699 = vector.load %arg26[%698, %c0_266, %c0_267] : memref<8x2x128xf32, #tpu.memory_space<vmem>>, vector<1x2x128xf32>
    %700 = vector.shape_cast %699 : vector<1x2x128xf32> to vector<2x128xf32>
    %701 = arith.addf %668, %700 : vector<2x128xf32>
    %702 = vector.extract_strided_slice %701 {offsets = [0, 0], sizes = [2, 32], strides = [1, 1]} : vector<2x128xf32> to vector<2x32xf32>
    %703 = arith.negf %702 : vector<2x32xf32>
    %704 = math.exp %703 : vector<2x32xf32>
    %cst_268 = arith.constant 1.000000e+00 : f32
    %705 = vector.broadcast %cst_268 : f32 to vector<2x32xf32>
    %706 = arith.addf %705, %704 : vector<2x32xf32>
    %707 = arith.divf %705, %706 : vector<2x32xf32>
    %708 = vector.extract_strided_slice %701 {offsets = [0, 32], sizes = [2, 32], strides = [1, 1]} : vector<2x128xf32> to vector<2x32xf32>
    %709 = arith.negf %708 : vector<2x32xf32>
    %710 = math.exp %709 : vector<2x32xf32>
    %cst_269 = arith.constant 1.000000e+00 : f32
    %711 = vector.broadcast %cst_269 : f32 to vector<2x32xf32>
    %712 = arith.addf %711, %710 : vector<2x32xf32>
    %713 = arith.divf %711, %712 : vector<2x32xf32>
    %714 = vector.extract_strided_slice %701 {offsets = [0, 64], sizes = [2, 32], strides = [1, 1]} : vector<2x128xf32> to vector<2x32xf32>
    %715 = math.tanh %714 : vector<2x32xf32>
    %716 = vector.extract_strided_slice %701 {offsets = [0, 96], sizes = [2, 32], strides = [1, 1]} : vector<2x128xf32> to vector<2x32xf32>
    %717 = arith.negf %716 : vector<2x32xf32>
    %718 = math.exp %717 : vector<2x32xf32>
    %cst_270 = arith.constant 1.000000e+00 : f32
    %719 = vector.broadcast %cst_270 : f32 to vector<2x32xf32>
    %720 = arith.addf %719, %718 : vector<2x32xf32>
    %721 = arith.divf %719, %720 : vector<2x32xf32>
    %722 = arith.mulf %713, %651 : vector<2x32xf32>
    %723 = arith.mulf %707, %715 : vector<2x32xf32>
    %724 = arith.addf %722, %723 : vector<2x32xf32>
    %725 = math.tanh %724 : vector<2x32xf32>
    %726 = arith.mulf %721, %725 : vector<2x32xf32>
    %727 = arith.index_cast %c7_i32_253 : i32 to index
    %c0_271 = arith.constant 0 : index
    %c0_272 = arith.constant 0 : index
    %728 = vector.load %arg27[%727, %c0_271, %c0_272] : memref<8x2x32xf32, #tpu.memory_space<vmem>>, vector<1x2x32xf32>
    %729 = vector.shape_cast %728 : vector<1x2x32xf32> to vector<2x32xf32>
    %730 = vector.shape_cast %697 : vector<2x32xf32> to vector<1x2x32xf32>
    tpu.vector_store %arg27[%727, %c0_271, %c0_272], %730 {strides = array<i32>} : memref<8x2x32xf32, #tpu.memory_space<vmem>>, vector<1x2x32xf32>,
    %731 = arith.index_cast %662 : i32 to index
    %c0_273 = arith.constant 0 : index
    %c0_274 = arith.constant 0 : index
    %732 = vector.load %arg28[%731, %c0_273, %c0_274] : memref<8x2x32xf32, #tpu.memory_space<vmem>>, vector<1x2x32xf32>
    %733 = vector.shape_cast %732 : vector<1x2x32xf32> to vector<2x32xf32>
    %734 = vector.shape_cast %726 : vector<2x32xf32> to vector<1x2x32xf32>
    tpu.vector_store %arg28[%731, %c0_273, %c0_274], %734 {strides = array<i32>} : memref<8x2x32xf32, #tpu.memory_space<vmem>>, vector<1x2x32xf32>,
    %c8_i32_275 = arith.constant 8 : i32
    %c0_276 = arith.constant 0 : index
    %c0_277 = arith.constant 0 : index
    %735 = vector.load %arg14[%c0_276, %c0_277] : memref<1x64xf32, #tpu.memory_space<vmem>>, vector<1x64xf32>
    %736 = vector.shape_cast %735 : vector<1x64xf32> to vector<1x64xf32>
    %737 = vector.broadcast %736 : vector<1x64xf32> to vector<2x64xf32>
    %c0_278 = arith.constant 0 : index
    %c0_279 = arith.constant 0 : index
    %738 = vector.load %arg15[%c0_278, %c0_279] : memref<1x64xf32, #tpu.memory_space<vmem>>, vector<1x64xf32>
    %739 = vector.shape_cast %738 : vector<1x64xf32> to vector<1x64xf32>
    %740 = vector.broadcast %739 : vector<1x64xf32> to vector<2x64xf32>
    %c0_i32_280 = arith.constant 0 : i32
    %741 = arith.index_cast %c0_i32_280 : i32 to index
    %c0_281 = arith.constant 0 : index
    %c0_282 = arith.constant 0 : index
    %742 = vector.load %arg27[%741, %c0_281, %c0_282] : memref<8x2x32xf32, #tpu.memory_space<vmem>>, vector<1x2x32xf32>
    %743 = vector.shape_cast %742 : vector<1x2x32xf32> to vector<2x32xf32>
    %744 = arith.truncf %743 : vector<2x32xf32> to vector<2x32xbf16>
    %745 = arith.index_cast %c0_i32_280 : i32 to index
    %c0_283 = arith.constant 0 : index
    %c0_284 = arith.constant 0 : index
    %746 = vector.load %arg28[%745, %c0_283, %c0_284] : memref<8x2x32xf32, #tpu.memory_space<vmem>>, vector<1x2x32xf32>
    %747 = vector.shape_cast %746 : vector<1x2x32xf32> to vector<2x32xf32>
    %748 = arith.truncf %747 : vector<2x32xf32> to vector<2x32xbf16>
    %c0_285 = arith.constant 0 : index
    %c0_286 = arith.constant 0 : index
    %749 = vector.load %arg8[%c0_285, %c0_286] : memref<32x64xbf16, #tpu.memory_space<vmem>>, vector<32x64xbf16>
    %cst_287 = arith.constant dense<0.000000e+00> : vector<2x64xf32>
    %750 = tpu.matmul %744, %749, %cst_287 {dimension_numbers = #tpu.dot_dimension_numbers<[1], [0], [0], [1], [0, 0, 1, 1], [], []>} : vector<2x32xbf16>, vector<32x64xbf16>, vector<2x64xf32> -> vector<2x64xf32>
    %c0_288 = arith.constant 0 : index
    %c0_289 = arith.constant 0 : index
    %751 = vector.load %arg9[%c0_288, %c0_289] : memref<32x64xbf16, #tpu.memory_space<vmem>>, vector<32x64xbf16>
    %cst_290 = arith.constant dense<0.000000e+00> : vector<2x64xf32>
    %752 = tpu.matmul %748, %751, %cst_290 {dimension_numbers = #tpu.dot_dimension_numbers<[1], [0], [0], [1], [0, 0, 1, 1], [], []>} : vector<2x32xbf16>, vector<32x64xbf16>, vector<2x64xf32> -> vector<2x64xf32>
    %753 = arith.addf %750, %752 : vector<2x64xf32>
    %754 = arith.addf %753, %737 : vector<2x64xf32>
    %755 = arith.index_cast %c0_i32_280 : i32 to index
    %c0_291 = arith.constant 0 : index
    %c0_292 = arith.constant 0 : index
    %756 = vector.load %arg29[%755, %c0_291, %c0_292] : memref<8x2x64xf32, #tpu.memory_space<vmem>>, vector<1x2x64xf32>
    %757 = vector.shape_cast %756 : vector<1x2x64xf32> to vector<2x64xf32>
    %758 = vector.shape_cast %754 : vector<2x64xf32> to vector<1x2x64xf32>
    tpu.vector_store %arg29[%755, %c0_291, %c0_292], %758 {strides = array<i32>} : memref<8x2x64xf32, #tpu.memory_space<vmem>>, vector<1x2x64xf32>,
    %c0_293 = arith.constant 0 : index
    %c0_294 = arith.constant 0 : index
    %759 = vector.load %arg10[%c0_293, %c0_294] : memref<32x64xbf16, #tpu.memory_space<vmem>>, vector<32x64xbf16>
    %cst_295 = arith.constant dense<0.000000e+00> : vector<2x64xf32>
    %760 = tpu.matmul %744, %759, %cst_295 {dimension_numbers = #tpu.dot_dimension_numbers<[1], [0], [0], [1], [0, 0, 1, 1], [], []>} : vector<2x32xbf16>, vector<32x64xbf16>, vector<2x64xf32> -> vector<2x64xf32>
    %c0_296 = arith.constant 0 : index
    %c0_297 = arith.constant 0 : index
    %761 = vector.load %arg11[%c0_296, %c0_297] : memref<32x64xbf16, #tpu.memory_space<vmem>>, vector<32x64xbf16>
    %cst_298 = arith.constant dense<0.000000e+00> : vector<2x64xf32>
    %762 = tpu.matmul %748, %761, %cst_298 {dimension_numbers = #tpu.dot_dimension_numbers<[1], [0], [0], [1], [0, 0, 1, 1], [], []>} : vector<2x32xbf16>, vector<32x64xbf16>, vector<2x64xf32> -> vector<2x64xf32>
    %763 = arith.addf %760, %762 : vector<2x64xf32>
    %764 = arith.addf %763, %740 : vector<2x64xf32>
    %765 = arith.index_cast %c0_i32_280 : i32 to index
    %c0_299 = arith.constant 0 : index
    %c0_300 = arith.constant 0 : index
    %766 = vector.load %arg30[%765, %c0_299, %c0_300] : memref<8x2x64xf32, #tpu.memory_space<vmem>>, vector<1x2x64xf32>
    %767 = vector.shape_cast %766 : vector<1x2x64xf32> to vector<2x64xf32>
    %768 = vector.shape_cast %764 : vector<2x64xf32> to vector<1x2x64xf32>
    tpu.vector_store %arg30[%765, %c0_299, %c0_300], %768 {strides = array<i32>} : memref<8x2x64xf32, #tpu.memory_space<vmem>>, vector<1x2x64xf32>,
    %c1_i32_301 = arith.constant 1 : i32
    %769 = arith.index_cast %c1_i32_301 : i32 to index
    %c0_302 = arith.constant 0 : index
    %c0_303 = arith.constant 0 : index
    %770 = vector.load %arg27[%769, %c0_302, %c0_303] : memref<8x2x32xf32, #tpu.memory_space<vmem>>, vector<1x2x32xf32>
    %771 = vector.shape_cast %770 : vector<1x2x32xf32> to vector<2x32xf32>
    %772 = arith.truncf %771 : vector<2x32xf32> to vector<2x32xbf16>
    %773 = arith.index_cast %c1_i32_301 : i32 to index
    %c0_304 = arith.constant 0 : index
    %c0_305 = arith.constant 0 : index
    %774 = vector.load %arg28[%773, %c0_304, %c0_305] : memref<8x2x32xf32, #tpu.memory_space<vmem>>, vector<1x2x32xf32>
    %775 = vector.shape_cast %774 : vector<1x2x32xf32> to vector<2x32xf32>
    %776 = arith.truncf %775 : vector<2x32xf32> to vector<2x32xbf16>
    %c0_306 = arith.constant 0 : index
    %c0_307 = arith.constant 0 : index
    %777 = vector.load %arg8[%c0_306, %c0_307] : memref<32x64xbf16, #tpu.memory_space<vmem>>, vector<32x64xbf16>
    %cst_308 = arith.constant dense<0.000000e+00> : vector<2x64xf32>
    %778 = tpu.matmul %772, %777, %cst_308 {dimension_numbers = #tpu.dot_dimension_numbers<[1], [0], [0], [1], [0, 0, 1, 1], [], []>} : vector<2x32xbf16>, vector<32x64xbf16>, vector<2x64xf32> -> vector<2x64xf32>
    %c0_309 = arith.constant 0 : index
    %c0_310 = arith.constant 0 : index
    %779 = vector.load %arg9[%c0_309, %c0_310] : memref<32x64xbf16, #tpu.memory_space<vmem>>, vector<32x64xbf16>
    %cst_311 = arith.constant dense<0.000000e+00> : vector<2x64xf32>
    %780 = tpu.matmul %776, %779, %cst_311 {dimension_numbers = #tpu.dot_dimension_numbers<[1], [0], [0], [1], [0, 0, 1, 1], [], []>} : vector<2x32xbf16>, vector<32x64xbf16>, vector<2x64xf32> -> vector<2x64xf32>
    %781 = arith.addf %778, %780 : vector<2x64xf32>
    %782 = arith.addf %781, %737 : vector<2x64xf32>
    %783 = arith.index_cast %c1_i32_301 : i32 to index
    %c0_312 = arith.constant 0 : index
    %c0_313 = arith.constant 0 : index
    %784 = vector.load %arg29[%783, %c0_312, %c0_313] : memref<8x2x64xf32, #tpu.memory_space<vmem>>, vector<1x2x64xf32>
    %785 = vector.shape_cast %784 : vector<1x2x64xf32> to vector<2x64xf32>
    %786 = vector.shape_cast %782 : vector<2x64xf32> to vector<1x2x64xf32>
    tpu.vector_store %arg29[%783, %c0_312, %c0_313], %786 {strides = array<i32>} : memref<8x2x64xf32, #tpu.memory_space<vmem>>, vector<1x2x64xf32>,
    %c0_314 = arith.constant 0 : index
    %c0_315 = arith.constant 0 : index
    %787 = vector.load %arg10[%c0_314, %c0_315] : memref<32x64xbf16, #tpu.memory_space<vmem>>, vector<32x64xbf16>
    %cst_316 = arith.constant dense<0.000000e+00> : vector<2x64xf32>
    %788 = tpu.matmul %772, %787, %cst_316 {dimension_numbers = #tpu.dot_dimension_numbers<[1], [0], [0], [1], [0, 0, 1, 1], [], []>} : vector<2x32xbf16>, vector<32x64xbf16>, vector<2x64xf32> -> vector<2x64xf32>
    %c0_317 = arith.constant 0 : index
    %c0_318 = arith.constant 0 : index
    %789 = vector.load %arg11[%c0_317, %c0_318] : memref<32x64xbf16, #tpu.memory_space<vmem>>, vector<32x64xbf16>
    %cst_319 = arith.constant dense<0.000000e+00> : vector<2x64xf32>
    %790 = tpu.matmul %776, %789, %cst_319 {dimension_numbers = #tpu.dot_dimension_numbers<[1], [0], [0], [1], [0, 0, 1, 1], [], []>} : vector<2x32xbf16>, vector<32x64xbf16>, vector<2x64xf32> -> vector<2x64xf32>
    %791 = arith.addf %788, %790 : vector<2x64xf32>
    %792 = arith.addf %791, %740 : vector<2x64xf32>
    %793 = arith.index_cast %c1_i32_301 : i32 to index
    %c0_320 = arith.constant 0 : index
    %c0_321 = arith.constant 0 : index
    %794 = vector.load %arg30[%793, %c0_320, %c0_321] : memref<8x2x64xf32, #tpu.memory_space<vmem>>, vector<1x2x64xf32>
    %795 = vector.shape_cast %794 : vector<1x2x64xf32> to vector<2x64xf32>
    %796 = vector.shape_cast %792 : vector<2x64xf32> to vector<1x2x64xf32>
    tpu.vector_store %arg30[%793, %c0_320, %c0_321], %796 {strides = array<i32>} : memref<8x2x64xf32, #tpu.memory_space<vmem>>, vector<1x2x64xf32>,
    %c2_i32_322 = arith.constant 2 : i32
    %797 = arith.index_cast %c2_i32_322 : i32 to index
    %c0_323 = arith.constant 0 : index
    %c0_324 = arith.constant 0 : index
    %798 = vector.load %arg27[%797, %c0_323, %c0_324] : memref<8x2x32xf32, #tpu.memory_space<vmem>>, vector<1x2x32xf32>
    %799 = vector.shape_cast %798 : vector<1x2x32xf32> to vector<2x32xf32>
    %800 = arith.truncf %799 : vector<2x32xf32> to vector<2x32xbf16>
    %801 = arith.index_cast %c2_i32_322 : i32 to index
    %c0_325 = arith.constant 0 : index
    %c0_326 = arith.constant 0 : index
    %802 = vector.load %arg28[%801, %c0_325, %c0_326] : memref<8x2x32xf32, #tpu.memory_space<vmem>>, vector<1x2x32xf32>
    %803 = vector.shape_cast %802 : vector<1x2x32xf32> to vector<2x32xf32>
    %804 = arith.truncf %803 : vector<2x32xf32> to vector<2x32xbf16>
    %c0_327 = arith.constant 0 : index
    %c0_328 = arith.constant 0 : index
    %805 = vector.load %arg8[%c0_327, %c0_328] : memref<32x64xbf16, #tpu.memory_space<vmem>>, vector<32x64xbf16>
    %cst_329 = arith.constant dense<0.000000e+00> : vector<2x64xf32>
    %806 = tpu.matmul %800, %805, %cst_329 {dimension_numbers = #tpu.dot_dimension_numbers<[1], [0], [0], [1], [0, 0, 1, 1], [], []>} : vector<2x32xbf16>, vector<32x64xbf16>, vector<2x64xf32> -> vector<2x64xf32>
    %c0_330 = arith.constant 0 : index
    %c0_331 = arith.constant 0 : index
    %807 = vector.load %arg9[%c0_330, %c0_331] : memref<32x64xbf16, #tpu.memory_space<vmem>>, vector<32x64xbf16>
    %cst_332 = arith.constant dense<0.000000e+00> : vector<2x64xf32>
    %808 = tpu.matmul %804, %807, %cst_332 {dimension_numbers = #tpu.dot_dimension_numbers<[1], [0], [0], [1], [0, 0, 1, 1], [], []>} : vector<2x32xbf16>, vector<32x64xbf16>, vector<2x64xf32> -> vector<2x64xf32>
    %809 = arith.addf %806, %808 : vector<2x64xf32>
    %810 = arith.addf %809, %737 : vector<2x64xf32>
    %811 = arith.index_cast %c2_i32_322 : i32 to index
    %c0_333 = arith.constant 0 : index
    %c0_334 = arith.constant 0 : index
    %812 = vector.load %arg29[%811, %c0_333, %c0_334] : memref<8x2x64xf32, #tpu.memory_space<vmem>>, vector<1x2x64xf32>
    %813 = vector.shape_cast %812 : vector<1x2x64xf32> to vector<2x64xf32>
    %814 = vector.shape_cast %810 : vector<2x64xf32> to vector<1x2x64xf32>
    tpu.vector_store %arg29[%811, %c0_333, %c0_334], %814 {strides = array<i32>} : memref<8x2x64xf32, #tpu.memory_space<vmem>>, vector<1x2x64xf32>,
    %c0_335 = arith.constant 0 : index
    %c0_336 = arith.constant 0 : index
    %815 = vector.load %arg10[%c0_335, %c0_336] : memref<32x64xbf16, #tpu.memory_space<vmem>>, vector<32x64xbf16>
    %cst_337 = arith.constant dense<0.000000e+00> : vector<2x64xf32>
    %816 = tpu.matmul %800, %815, %cst_337 {dimension_numbers = #tpu.dot_dimension_numbers<[1], [0], [0], [1], [0, 0, 1, 1], [], []>} : vector<2x32xbf16>, vector<32x64xbf16>, vector<2x64xf32> -> vector<2x64xf32>
    %c0_338 = arith.constant 0 : index
    %c0_339 = arith.constant 0 : index
    %817 = vector.load %arg11[%c0_338, %c0_339] : memref<32x64xbf16, #tpu.memory_space<vmem>>, vector<32x64xbf16>
    %cst_340 = arith.constant dense<0.000000e+00> : vector<2x64xf32>
    %818 = tpu.matmul %804, %817, %cst_340 {dimension_numbers = #tpu.dot_dimension_numbers<[1], [0], [0], [1], [0, 0, 1, 1], [], []>} : vector<2x32xbf16>, vector<32x64xbf16>, vector<2x64xf32> -> vector<2x64xf32>
    %819 = arith.addf %816, %818 : vector<2x64xf32>
    %820 = arith.addf %819, %740 : vector<2x64xf32>
    %821 = arith.index_cast %c2_i32_322 : i32 to index
    %c0_341 = arith.constant 0 : index
    %c0_342 = arith.constant 0 : index
    %822 = vector.load %arg30[%821, %c0_341, %c0_342] : memref<8x2x64xf32, #tpu.memory_space<vmem>>, vector<1x2x64xf32>
    %823 = vector.shape_cast %822 : vector<1x2x64xf32> to vector<2x64xf32>
    %824 = vector.shape_cast %820 : vector<2x64xf32> to vector<1x2x64xf32>
    tpu.vector_store %arg30[%821, %c0_341, %c0_342], %824 {strides = array<i32>} : memref<8x2x64xf32, #tpu.memory_space<vmem>>, vector<1x2x64xf32>,
    %c3_i32_343 = arith.constant 3 : i32
    %825 = arith.index_cast %c3_i32_343 : i32 to index
    %c0_344 = arith.constant 0 : index
    %c0_345 = arith.constant 0 : index
    %826 = vector.load %arg27[%825, %c0_344, %c0_345] : memref<8x2x32xf32, #tpu.memory_space<vmem>>, vector<1x2x32xf32>
    %827 = vector.shape_cast %826 : vector<1x2x32xf32> to vector<2x32xf32>
    %828 = arith.truncf %827 : vector<2x32xf32> to vector<2x32xbf16>
    %829 = arith.index_cast %c3_i32_343 : i32 to index
    %c0_346 = arith.constant 0 : index
    %c0_347 = arith.constant 0 : index
    %830 = vector.load %arg28[%829, %c0_346, %c0_347] : memref<8x2x32xf32, #tpu.memory_space<vmem>>, vector<1x2x32xf32>
    %831 = vector.shape_cast %830 : vector<1x2x32xf32> to vector<2x32xf32>
    %832 = arith.truncf %831 : vector<2x32xf32> to vector<2x32xbf16>
    %c0_348 = arith.constant 0 : index
    %c0_349 = arith.constant 0 : index
    %833 = vector.load %arg8[%c0_348, %c0_349] : memref<32x64xbf16, #tpu.memory_space<vmem>>, vector<32x64xbf16>
    %cst_350 = arith.constant dense<0.000000e+00> : vector<2x64xf32>
    %834 = tpu.matmul %828, %833, %cst_350 {dimension_numbers = #tpu.dot_dimension_numbers<[1], [0], [0], [1], [0, 0, 1, 1], [], []>} : vector<2x32xbf16>, vector<32x64xbf16>, vector<2x64xf32> -> vector<2x64xf32>
    %c0_351 = arith.constant 0 : index
    %c0_352 = arith.constant 0 : index
    %835 = vector.load %arg9[%c0_351, %c0_352] : memref<32x64xbf16, #tpu.memory_space<vmem>>, vector<32x64xbf16>
    %cst_353 = arith.constant dense<0.000000e+00> : vector<2x64xf32>
    %836 = tpu.matmul %832, %835, %cst_353 {dimension_numbers = #tpu.dot_dimension_numbers<[1], [0], [0], [1], [0, 0, 1, 1], [], []>} : vector<2x32xbf16>, vector<32x64xbf16>, vector<2x64xf32> -> vector<2x64xf32>
    %837 = arith.addf %834, %836 : vector<2x64xf32>
    %838 = arith.addf %837, %737 : vector<2x64xf32>
    %839 = arith.index_cast %c3_i32_343 : i32 to index
    %c0_354 = arith.constant 0 : index
    %c0_355 = arith.constant 0 : index
    %840 = vector.load %arg29[%839, %c0_354, %c0_355] : memref<8x2x64xf32, #tpu.memory_space<vmem>>, vector<1x2x64xf32>
    %841 = vector.shape_cast %840 : vector<1x2x64xf32> to vector<2x64xf32>
    %842 = vector.shape_cast %838 : vector<2x64xf32> to vector<1x2x64xf32>
    tpu.vector_store %arg29[%839, %c0_354, %c0_355], %842 {strides = array<i32>} : memref<8x2x64xf32, #tpu.memory_space<vmem>>, vector<1x2x64xf32>,
    %c0_356 = arith.constant 0 : index
    %c0_357 = arith.constant 0 : index
    %843 = vector.load %arg10[%c0_356, %c0_357] : memref<32x64xbf16, #tpu.memory_space<vmem>>, vector<32x64xbf16>
    %cst_358 = arith.constant dense<0.000000e+00> : vector<2x64xf32>
    %844 = tpu.matmul %828, %843, %cst_358 {dimension_numbers = #tpu.dot_dimension_numbers<[1], [0], [0], [1], [0, 0, 1, 1], [], []>} : vector<2x32xbf16>, vector<32x64xbf16>, vector<2x64xf32> -> vector<2x64xf32>
    %c0_359 = arith.constant 0 : index
    %c0_360 = arith.constant 0 : index
    %845 = vector.load %arg11[%c0_359, %c0_360] : memref<32x64xbf16, #tpu.memory_space<vmem>>, vector<32x64xbf16>
    %cst_361 = arith.constant dense<0.000000e+00> : vector<2x64xf32>
    %846 = tpu.matmul %832, %845, %cst_361 {dimension_numbers = #tpu.dot_dimension_numbers<[1], [0], [0], [1], [0, 0, 1, 1], [], []>} : vector<2x32xbf16>, vector<32x64xbf16>, vector<2x64xf32> -> vector<2x64xf32>
    %847 = arith.addf %844, %846 : vector<2x64xf32>
    %848 = arith.addf %847, %740 : vector<2x64xf32>
    %849 = arith.index_cast %c3_i32_343 : i32 to index
    %c0_362 = arith.constant 0 : index
    %c0_363 = arith.constant 0 : index
    %850 = vector.load %arg30[%849, %c0_362, %c0_363] : memref<8x2x64xf32, #tpu.memory_space<vmem>>, vector<1x2x64xf32>
    %851 = vector.shape_cast %850 : vector<1x2x64xf32> to vector<2x64xf32>
    %852 = vector.shape_cast %848 : vector<2x64xf32> to vector<1x2x64xf32>
    tpu.vector_store %arg30[%849, %c0_362, %c0_363], %852 {strides = array<i32>} : memref<8x2x64xf32, #tpu.memory_space<vmem>>, vector<1x2x64xf32>,
    %c4_i32_364 = arith.constant 4 : i32
    %853 = arith.index_cast %c4_i32_364 : i32 to index
    %c0_365 = arith.constant 0 : index
    %c0_366 = arith.constant 0 : index
    %854 = vector.load %arg27[%853, %c0_365, %c0_366] : memref<8x2x32xf32, #tpu.memory_space<vmem>>, vector<1x2x32xf32>
    %855 = vector.shape_cast %854 : vector<1x2x32xf32> to vector<2x32xf32>
    %856 = arith.truncf %855 : vector<2x32xf32> to vector<2x32xbf16>
    %857 = arith.index_cast %c4_i32_364 : i32 to index
    %c0_367 = arith.constant 0 : index
    %c0_368 = arith.constant 0 : index
    %858 = vector.load %arg28[%857, %c0_367, %c0_368] : memref<8x2x32xf32, #tpu.memory_space<vmem>>, vector<1x2x32xf32>
    %859 = vector.shape_cast %858 : vector<1x2x32xf32> to vector<2x32xf32>
    %860 = arith.truncf %859 : vector<2x32xf32> to vector<2x32xbf16>
    %c0_369 = arith.constant 0 : index
    %c0_370 = arith.constant 0 : index
    %861 = vector.load %arg8[%c0_369, %c0_370] : memref<32x64xbf16, #tpu.memory_space<vmem>>, vector<32x64xbf16>
    %cst_371 = arith.constant dense<0.000000e+00> : vector<2x64xf32>
    %862 = tpu.matmul %856, %861, %cst_371 {dimension_numbers = #tpu.dot_dimension_numbers<[1], [0], [0], [1], [0, 0, 1, 1], [], []>} : vector<2x32xbf16>, vector<32x64xbf16>, vector<2x64xf32> -> vector<2x64xf32>
    %c0_372 = arith.constant 0 : index
    %c0_373 = arith.constant 0 : index
    %863 = vector.load %arg9[%c0_372, %c0_373] : memref<32x64xbf16, #tpu.memory_space<vmem>>, vector<32x64xbf16>
    %cst_374 = arith.constant dense<0.000000e+00> : vector<2x64xf32>
    %864 = tpu.matmul %860, %863, %cst_374 {dimension_numbers = #tpu.dot_dimension_numbers<[1], [0], [0], [1], [0, 0, 1, 1], [], []>} : vector<2x32xbf16>, vector<32x64xbf16>, vector<2x64xf32> -> vector<2x64xf32>
    %865 = arith.addf %862, %864 : vector<2x64xf32>
    %866 = arith.addf %865, %737 : vector<2x64xf32>
    %867 = arith.index_cast %c4_i32_364 : i32 to index
    %c0_375 = arith.constant 0 : index
    %c0_376 = arith.constant 0 : index
    %868 = vector.load %arg29[%867, %c0_375, %c0_376] : memref<8x2x64xf32, #tpu.memory_space<vmem>>, vector<1x2x64xf32>
    %869 = vector.shape_cast %868 : vector<1x2x64xf32> to vector<2x64xf32>
    %870 = vector.shape_cast %866 : vector<2x64xf32> to vector<1x2x64xf32>
    tpu.vector_store %arg29[%867, %c0_375, %c0_376], %870 {strides = array<i32>} : memref<8x2x64xf32, #tpu.memory_space<vmem>>, vector<1x2x64xf32>,
    %c0_377 = arith.constant 0 : index
    %c0_378 = arith.constant 0 : index
    %871 = vector.load %arg10[%c0_377, %c0_378] : memref<32x64xbf16, #tpu.memory_space<vmem>>, vector<32x64xbf16>
    %cst_379 = arith.constant dense<0.000000e+00> : vector<2x64xf32>
    %872 = tpu.matmul %856, %871, %cst_379 {dimension_numbers = #tpu.dot_dimension_numbers<[1], [0], [0], [1], [0, 0, 1, 1], [], []>} : vector<2x32xbf16>, vector<32x64xbf16>, vector<2x64xf32> -> vector<2x64xf32>
    %c0_380 = arith.constant 0 : index
    %c0_381 = arith.constant 0 : index
    %873 = vector.load %arg11[%c0_380, %c0_381] : memref<32x64xbf16, #tpu.memory_space<vmem>>, vector<32x64xbf16>
    %cst_382 = arith.constant dense<0.000000e+00> : vector<2x64xf32>
    %874 = tpu.matmul %860, %873, %cst_382 {dimension_numbers = #tpu.dot_dimension_numbers<[1], [0], [0], [1], [0, 0, 1, 1], [], []>} : vector<2x32xbf16>, vector<32x64xbf16>, vector<2x64xf32> -> vector<2x64xf32>
    %875 = arith.addf %872, %874 : vector<2x64xf32>
    %876 = arith.addf %875, %740 : vector<2x64xf32>
    %877 = arith.index_cast %c4_i32_364 : i32 to index
    %c0_383 = arith.constant 0 : index
    %c0_384 = arith.constant 0 : index
    %878 = vector.load %arg30[%877, %c0_383, %c0_384] : memref<8x2x64xf32, #tpu.memory_space<vmem>>, vector<1x2x64xf32>
    %879 = vector.shape_cast %878 : vector<1x2x64xf32> to vector<2x64xf32>
    %880 = vector.shape_cast %876 : vector<2x64xf32> to vector<1x2x64xf32>
    tpu.vector_store %arg30[%877, %c0_383, %c0_384], %880 {strides = array<i32>} : memref<8x2x64xf32, #tpu.memory_space<vmem>>, vector<1x2x64xf32>,
    %c5_i32_385 = arith.constant 5 : i32
    %881 = arith.index_cast %c5_i32_385 : i32 to index
    %c0_386 = arith.constant 0 : index
    %c0_387 = arith.constant 0 : index
    %882 = vector.load %arg27[%881, %c0_386, %c0_387] : memref<8x2x32xf32, #tpu.memory_space<vmem>>, vector<1x2x32xf32>
    %883 = vector.shape_cast %882 : vector<1x2x32xf32> to vector<2x32xf32>
    %884 = arith.truncf %883 : vector<2x32xf32> to vector<2x32xbf16>
    %885 = arith.index_cast %c5_i32_385 : i32 to index
    %c0_388 = arith.constant 0 : index
    %c0_389 = arith.constant 0 : index
    %886 = vector.load %arg28[%885, %c0_388, %c0_389] : memref<8x2x32xf32, #tpu.memory_space<vmem>>, vector<1x2x32xf32>
    %887 = vector.shape_cast %886 : vector<1x2x32xf32> to vector<2x32xf32>
    %888 = arith.truncf %887 : vector<2x32xf32> to vector<2x32xbf16>
    %c0_390 = arith.constant 0 : index
    %c0_391 = arith.constant 0 : index
    %889 = vector.load %arg8[%c0_390, %c0_391] : memref<32x64xbf16, #tpu.memory_space<vmem>>, vector<32x64xbf16>
    %cst_392 = arith.constant dense<0.000000e+00> : vector<2x64xf32>
    %890 = tpu.matmul %884, %889, %cst_392 {dimension_numbers = #tpu.dot_dimension_numbers<[1], [0], [0], [1], [0, 0, 1, 1], [], []>} : vector<2x32xbf16>, vector<32x64xbf16>, vector<2x64xf32> -> vector<2x64xf32>
    %c0_393 = arith.constant 0 : index
    %c0_394 = arith.constant 0 : index
    %891 = vector.load %arg9[%c0_393, %c0_394] : memref<32x64xbf16, #tpu.memory_space<vmem>>, vector<32x64xbf16>
    %cst_395 = arith.constant dense<0.000000e+00> : vector<2x64xf32>
    %892 = tpu.matmul %888, %891, %cst_395 {dimension_numbers = #tpu.dot_dimension_numbers<[1], [0], [0], [1], [0, 0, 1, 1], [], []>} : vector<2x32xbf16>, vector<32x64xbf16>, vector<2x64xf32> -> vector<2x64xf32>
    %893 = arith.addf %890, %892 : vector<2x64xf32>
    %894 = arith.addf %893, %737 : vector<2x64xf32>
    %895 = arith.index_cast %c5_i32_385 : i32 to index
    %c0_396 = arith.constant 0 : index
    %c0_397 = arith.constant 0 : index
    %896 = vector.load %arg29[%895, %c0_396, %c0_397] : memref<8x2x64xf32, #tpu.memory_space<vmem>>, vector<1x2x64xf32>
    %897 = vector.shape_cast %896 : vector<1x2x64xf32> to vector<2x64xf32>
    %898 = vector.shape_cast %894 : vector<2x64xf32> to vector<1x2x64xf32>
    tpu.vector_store %arg29[%895, %c0_396, %c0_397], %898 {strides = array<i32>} : memref<8x2x64xf32, #tpu.memory_space<vmem>>, vector<1x2x64xf32>,
    %c0_398 = arith.constant 0 : index
    %c0_399 = arith.constant 0 : index
    %899 = vector.load %arg10[%c0_398, %c0_399] : memref<32x64xbf16, #tpu.memory_space<vmem>>, vector<32x64xbf16>
    %cst_400 = arith.constant dense<0.000000e+00> : vector<2x64xf32>
    %900 = tpu.matmul %884, %899, %cst_400 {dimension_numbers = #tpu.dot_dimension_numbers<[1], [0], [0], [1], [0, 0, 1, 1], [], []>} : vector<2x32xbf16>, vector<32x64xbf16>, vector<2x64xf32> -> vector<2x64xf32>
    %c0_401 = arith.constant 0 : index
    %c0_402 = arith.constant 0 : index
    %901 = vector.load %arg11[%c0_401, %c0_402] : memref<32x64xbf16, #tpu.memory_space<vmem>>, vector<32x64xbf16>
    %cst_403 = arith.constant dense<0.000000e+00> : vector<2x64xf32>
    %902 = tpu.matmul %888, %901, %cst_403 {dimension_numbers = #tpu.dot_dimension_numbers<[1], [0], [0], [1], [0, 0, 1, 1], [], []>} : vector<2x32xbf16>, vector<32x64xbf16>, vector<2x64xf32> -> vector<2x64xf32>
    %903 = arith.addf %900, %902 : vector<2x64xf32>
    %904 = arith.addf %903, %740 : vector<2x64xf32>
    %905 = arith.index_cast %c5_i32_385 : i32 to index
    %c0_404 = arith.constant 0 : index
    %c0_405 = arith.constant 0 : index
    %906 = vector.load %arg30[%905, %c0_404, %c0_405] : memref<8x2x64xf32, #tpu.memory_space<vmem>>, vector<1x2x64xf32>
    %907 = vector.shape_cast %906 : vector<1x2x64xf32> to vector<2x64xf32>
    %908 = vector.shape_cast %904 : vector<2x64xf32> to vector<1x2x64xf32>
    tpu.vector_store %arg30[%905, %c0_404, %c0_405], %908 {strides = array<i32>} : memref<8x2x64xf32, #tpu.memory_space<vmem>>, vector<1x2x64xf32>,
    %c6_i32_406 = arith.constant 6 : i32
    %909 = arith.index_cast %c6_i32_406 : i32 to index
    %c0_407 = arith.constant 0 : index
    %c0_408 = arith.constant 0 : index
    %910 = vector.load %arg27[%909, %c0_407, %c0_408] : memref<8x2x32xf32, #tpu.memory_space<vmem>>, vector<1x2x32xf32>
    %911 = vector.shape_cast %910 : vector<1x2x32xf32> to vector<2x32xf32>
    %912 = arith.truncf %911 : vector<2x32xf32> to vector<2x32xbf16>
    %913 = arith.index_cast %c6_i32_406 : i32 to index
    %c0_409 = arith.constant 0 : index
    %c0_410 = arith.constant 0 : index
    %914 = vector.load %arg28[%913, %c0_409, %c0_410] : memref<8x2x32xf32, #tpu.memory_space<vmem>>, vector<1x2x32xf32>
    %915 = vector.shape_cast %914 : vector<1x2x32xf32> to vector<2x32xf32>
    %916 = arith.truncf %915 : vector<2x32xf32> to vector<2x32xbf16>
    %c0_411 = arith.constant 0 : index
    %c0_412 = arith.constant 0 : index
    %917 = vector.load %arg8[%c0_411, %c0_412] : memref<32x64xbf16, #tpu.memory_space<vmem>>, vector<32x64xbf16>
    %cst_413 = arith.constant dense<0.000000e+00> : vector<2x64xf32>
    %918 = tpu.matmul %912, %917, %cst_413 {dimension_numbers = #tpu.dot_dimension_numbers<[1], [0], [0], [1], [0, 0, 1, 1], [], []>} : vector<2x32xbf16>, vector<32x64xbf16>, vector<2x64xf32> -> vector<2x64xf32>
    %c0_414 = arith.constant 0 : index
    %c0_415 = arith.constant 0 : index
    %919 = vector.load %arg9[%c0_414, %c0_415] : memref<32x64xbf16, #tpu.memory_space<vmem>>, vector<32x64xbf16>
    %cst_416 = arith.constant dense<0.000000e+00> : vector<2x64xf32>
    %920 = tpu.matmul %916, %919, %cst_416 {dimension_numbers = #tpu.dot_dimension_numbers<[1], [0], [0], [1], [0, 0, 1, 1], [], []>} : vector<2x32xbf16>, vector<32x64xbf16>, vector<2x64xf32> -> vector<2x64xf32>
    %921 = arith.addf %918, %920 : vector<2x64xf32>
    %922 = arith.addf %921, %737 : vector<2x64xf32>
    %923 = arith.index_cast %c6_i32_406 : i32 to index
    %c0_417 = arith.constant 0 : index
    %c0_418 = arith.constant 0 : index
    %924 = vector.load %arg29[%923, %c0_417, %c0_418] : memref<8x2x64xf32, #tpu.memory_space<vmem>>, vector<1x2x64xf32>
    %925 = vector.shape_cast %924 : vector<1x2x64xf32> to vector<2x64xf32>
    %926 = vector.shape_cast %922 : vector<2x64xf32> to vector<1x2x64xf32>
    tpu.vector_store %arg29[%923, %c0_417, %c0_418], %926 {strides = array<i32>} : memref<8x2x64xf32, #tpu.memory_space<vmem>>, vector<1x2x64xf32>,
    %c0_419 = arith.constant 0 : index
    %c0_420 = arith.constant 0 : index
    %927 = vector.load %arg10[%c0_419, %c0_420] : memref<32x64xbf16, #tpu.memory_space<vmem>>, vector<32x64xbf16>
    %cst_421 = arith.constant dense<0.000000e+00> : vector<2x64xf32>
    %928 = tpu.matmul %912, %927, %cst_421 {dimension_numbers = #tpu.dot_dimension_numbers<[1], [0], [0], [1], [0, 0, 1, 1], [], []>} : vector<2x32xbf16>, vector<32x64xbf16>, vector<2x64xf32> -> vector<2x64xf32>
    %c0_422 = arith.constant 0 : index
    %c0_423 = arith.constant 0 : index
    %929 = vector.load %arg11[%c0_422, %c0_423] : memref<32x64xbf16, #tpu.memory_space<vmem>>, vector<32x64xbf16>
    %cst_424 = arith.constant dense<0.000000e+00> : vector<2x64xf32>
    %930 = tpu.matmul %916, %929, %cst_424 {dimension_numbers = #tpu.dot_dimension_numbers<[1], [0], [0], [1], [0, 0, 1, 1], [], []>} : vector<2x32xbf16>, vector<32x64xbf16>, vector<2x64xf32> -> vector<2x64xf32>
    %931 = arith.addf %928, %930 : vector<2x64xf32>
    %932 = arith.addf %931, %740 : vector<2x64xf32>
    %933 = arith.index_cast %c6_i32_406 : i32 to index
    %c0_425 = arith.constant 0 : index
    %c0_426 = arith.constant 0 : index
    %934 = vector.load %arg30[%933, %c0_425, %c0_426] : memref<8x2x64xf32, #tpu.memory_space<vmem>>, vector<1x2x64xf32>
    %935 = vector.shape_cast %934 : vector<1x2x64xf32> to vector<2x64xf32>
    %936 = vector.shape_cast %932 : vector<2x64xf32> to vector<1x2x64xf32>
    tpu.vector_store %arg30[%933, %c0_425, %c0_426], %936 {strides = array<i32>} : memref<8x2x64xf32, #tpu.memory_space<vmem>>, vector<1x2x64xf32>,
    %c7_i32_427 = arith.constant 7 : i32
    %937 = arith.index_cast %c7_i32_427 : i32 to index
    %c0_428 = arith.constant 0 : index
    %c0_429 = arith.constant 0 : index
    %938 = vector.load %arg27[%937, %c0_428, %c0_429] : memref<8x2x32xf32, #tpu.memory_space<vmem>>, vector<1x2x32xf32>
    %939 = vector.shape_cast %938 : vector<1x2x32xf32> to vector<2x32xf32>
    %940 = arith.truncf %939 : vector<2x32xf32> to vector<2x32xbf16>
    %941 = arith.index_cast %c7_i32_427 : i32 to index
    %c0_430 = arith.constant 0 : index
    %c0_431 = arith.constant 0 : index
    %942 = vector.load %arg28[%941, %c0_430, %c0_431] : memref<8x2x32xf32, #tpu.memory_space<vmem>>, vector<1x2x32xf32>
    %943 = vector.shape_cast %942 : vector<1x2x32xf32> to vector<2x32xf32>
    %944 = arith.truncf %943 : vector<2x32xf32> to vector<2x32xbf16>
    %c0_432 = arith.constant 0 : index
    %c0_433 = arith.constant 0 : index
    %945 = vector.load %arg8[%c0_432, %c0_433] : memref<32x64xbf16, #tpu.memory_space<vmem>>, vector<32x64xbf16>
    %cst_434 = arith.constant dense<0.000000e+00> : vector<2x64xf32>
    %946 = tpu.matmul %940, %945, %cst_434 {dimension_numbers = #tpu.dot_dimension_numbers<[1], [0], [0], [1], [0, 0, 1, 1], [], []>} : vector<2x32xbf16>, vector<32x64xbf16>, vector<2x64xf32> -> vector<2x64xf32>
    %c0_435 = arith.constant 0 : index
    %c0_436 = arith.constant 0 : index
    %947 = vector.load %arg9[%c0_435, %c0_436] : memref<32x64xbf16, #tpu.memory_space<vmem>>, vector<32x64xbf16>
    %cst_437 = arith.constant dense<0.000000e+00> : vector<2x64xf32>
    %948 = tpu.matmul %944, %947, %cst_437 {dimension_numbers = #tpu.dot_dimension_numbers<[1], [0], [0], [1], [0, 0, 1, 1], [], []>} : vector<2x32xbf16>, vector<32x64xbf16>, vector<2x64xf32> -> vector<2x64xf32>
    %949 = arith.addf %946, %948 : vector<2x64xf32>
    %950 = arith.addf %949, %737 : vector<2x64xf32>
    %951 = arith.index_cast %c7_i32_427 : i32 to index
    %c0_438 = arith.constant 0 : index
    %c0_439 = arith.constant 0 : index
    %952 = vector.load %arg29[%951, %c0_438, %c0_439] : memref<8x2x64xf32, #tpu.memory_space<vmem>>, vector<1x2x64xf32>
    %953 = vector.shape_cast %952 : vector<1x2x64xf32> to vector<2x64xf32>
    %954 = vector.shape_cast %950 : vector<2x64xf32> to vector<1x2x64xf32>
    tpu.vector_store %arg29[%951, %c0_438, %c0_439], %954 {strides = array<i32>} : memref<8x2x64xf32, #tpu.memory_space<vmem>>, vector<1x2x64xf32>,
    %c0_440 = arith.constant 0 : index
    %c0_441 = arith.constant 0 : index
    %955 = vector.load %arg10[%c0_440, %c0_441] : memref<32x64xbf16, #tpu.memory_space<vmem>>, vector<32x64xbf16>
    %cst_442 = arith.constant dense<0.000000e+00> : vector<2x64xf32>
    %956 = tpu.matmul %940, %955, %cst_442 {dimension_numbers = #tpu.dot_dimension_numbers<[1], [0], [0], [1], [0, 0, 1, 1], [], []>} : vector<2x32xbf16>, vector<32x64xbf16>, vector<2x64xf32> -> vector<2x64xf32>
    %c0_443 = arith.constant 0 : index
    %c0_444 = arith.constant 0 : index
    %957 = vector.load %arg11[%c0_443, %c0_444] : memref<32x64xbf16, #tpu.memory_space<vmem>>, vector<32x64xbf16>
    %cst_445 = arith.constant dense<0.000000e+00> : vector<2x64xf32>
    %958 = tpu.matmul %944, %957, %cst_445 {dimension_numbers = #tpu.dot_dimension_numbers<[1], [0], [0], [1], [0, 0, 1, 1], [], []>} : vector<2x32xbf16>, vector<32x64xbf16>, vector<2x64xf32> -> vector<2x64xf32>
    %959 = arith.addf %956, %958 : vector<2x64xf32>
    %960 = arith.addf %959, %740 : vector<2x64xf32>
    %961 = arith.index_cast %c7_i32_427 : i32 to index
    %c0_446 = arith.constant 0 : index
    %c0_447 = arith.constant 0 : index
    %962 = vector.load %arg30[%961, %c0_446, %c0_447] : memref<8x2x64xf32, #tpu.memory_space<vmem>>, vector<1x2x64xf32>
    %963 = vector.shape_cast %962 : vector<1x2x64xf32> to vector<2x64xf32>
    %964 = vector.shape_cast %960 : vector<2x64xf32> to vector<1x2x64xf32>
    tpu.vector_store %arg30[%961, %c0_446, %c0_447], %964 {strides = array<i32>} : memref<8x2x64xf32, #tpu.memory_space<vmem>>, vector<1x2x64xf32>,
    %c8_i32_448 = arith.constant 8 : i32
    %cst_449 = arith.constant 0.000000e+00 : f32
    %965 = vector.broadcast %cst_449 : f32 to vector<2x16xf32>
    %c0_i32_450 = arith.constant 0 : i32
    %c7_i32_451 = arith.constant 7 : i32
    %966 = arith.subi %c7_i32_451, %c0_i32_450 : i32
    %967 = arith.truncf %965 : vector<2x16xf32> to vector<2x16xbf16>
    %c0_452 = arith.constant 0 : index
    %c0_453 = arith.constant 0 : index
    %968 = vector.load %arg12[%c0_452, %c0_453] : memref<16x64xbf16, #tpu.memory_space<vmem>>, vector<16x64xbf16>
    %cst_454 = arith.constant dense<0.000000e+00> : vector<2x64xf32>
    %969 = tpu.matmul %967, %968, %cst_454 {dimension_numbers = #tpu.dot_dimension_numbers<[1], [0], [0], [1], [0, 0, 1, 1], [], []>} : vector<2x16xbf16>, vector<16x64xbf16>, vector<2x64xf32> -> vector<2x64xf32>
    %970 = arith.truncf %965 : vector<2x16xf32> to vector<2x16xbf16>
    %c0_455 = arith.constant 0 : index
    %c0_456 = arith.constant 0 : index
    %971 = vector.load %arg13[%c0_455, %c0_456] : memref<16x64xbf16, #tpu.memory_space<vmem>>, vector<16x64xbf16>
    %cst_457 = arith.constant dense<0.000000e+00> : vector<2x64xf32>
    %972 = tpu.matmul %970, %971, %cst_457 {dimension_numbers = #tpu.dot_dimension_numbers<[1], [0], [0], [1], [0, 0, 1, 1], [], []>} : vector<2x16xbf16>, vector<16x64xbf16>, vector<2x64xf32> -> vector<2x64xf32>
    %973 = arith.index_cast %c0_i32_450 : i32 to index
    %c0_458 = arith.constant 0 : index
    %c0_459 = arith.constant 0 : index
    %974 = vector.load %arg29[%973, %c0_458, %c0_459] : memref<8x2x64xf32, #tpu.memory_space<vmem>>, vector<1x2x64xf32>
    %975 = vector.shape_cast %974 : vector<1x2x64xf32> to vector<2x64xf32>
    %976 = arith.addf %969, %975 : vector<2x64xf32>
    %977 = vector.extract_strided_slice %976 {offsets = [0, 0], sizes = [2, 16], strides = [1, 1]} : vector<2x64xf32> to vector<2x16xf32>
    %978 = arith.negf %977 : vector<2x16xf32>
    %979 = math.exp %978 : vector<2x16xf32>
    %cst_460 = arith.constant 1.000000e+00 : f32
    %980 = vector.broadcast %cst_460 : f32 to vector<2x16xf32>
    %981 = arith.addf %980, %979 : vector<2x16xf32>
    %982 = arith.divf %980, %981 : vector<2x16xf32>
    %983 = vector.extract_strided_slice %976 {offsets = [0, 16], sizes = [2, 16], strides = [1, 1]} : vector<2x64xf32> to vector<2x16xf32>
    %984 = arith.negf %983 : vector<2x16xf32>
    %985 = math.exp %984 : vector<2x16xf32>
    %cst_461 = arith.constant 1.000000e+00 : f32
    %986 = vector.broadcast %cst_461 : f32 to vector<2x16xf32>
    %987 = arith.addf %986, %985 : vector<2x16xf32>
    %988 = arith.divf %986, %987 : vector<2x16xf32>
    %989 = vector.extract_strided_slice %976 {offsets = [0, 32], sizes = [2, 16], strides = [1, 1]} : vector<2x64xf32> to vector<2x16xf32>
    %990 = math.tanh %989 : vector<2x16xf32>
    %991 = vector.extract_strided_slice %976 {offsets = [0, 48], sizes = [2, 16], strides = [1, 1]} : vector<2x64xf32> to vector<2x16xf32>
    %992 = arith.negf %991 : vector<2x16xf32>
    %993 = math.exp %992 : vector<2x16xf32>
    %cst_462 = arith.constant 1.000000e+00 : f32
    %994 = vector.broadcast %cst_462 : f32 to vector<2x16xf32>
    %995 = arith.addf %994, %993 : vector<2x16xf32>
    %996 = arith.divf %994, %995 : vector<2x16xf32>
    %997 = arith.mulf %988, %965 : vector<2x16xf32>
    %998 = arith.mulf %982, %990 : vector<2x16xf32>
    %999 = arith.addf %997, %998 : vector<2x16xf32>
    %1000 = math.tanh %999 : vector<2x16xf32>
    %1001 = arith.mulf %996, %1000 : vector<2x16xf32>
    %1002 = arith.index_cast %966 : i32 to index
    %c0_463 = arith.constant 0 : index
    %c0_464 = arith.constant 0 : index
    %1003 = vector.load %arg30[%1002, %c0_463, %c0_464] : memref<8x2x64xf32, #tpu.memory_space<vmem>>, vector<1x2x64xf32>
    %1004 = vector.shape_cast %1003 : vector<1x2x64xf32> to vector<2x64xf32>
    %1005 = arith.addf %972, %1004 : vector<2x64xf32>
    %1006 = vector.extract_strided_slice %1005 {offsets = [0, 0], sizes = [2, 16], strides = [1, 1]} : vector<2x64xf32> to vector<2x16xf32>
    %1007 = arith.negf %1006 : vector<2x16xf32>
    %1008 = math.exp %1007 : vector<2x16xf32>
    %cst_465 = arith.constant 1.000000e+00 : f32
    %1009 = vector.broadcast %cst_465 : f32 to vector<2x16xf32>
    %1010 = arith.addf %1009, %1008 : vector<2x16xf32>
    %1011 = arith.divf %1009, %1010 : vector<2x16xf32>
    %1012 = vector.extract_strided_slice %1005 {offsets = [0, 16], sizes = [2, 16], strides = [1, 1]} : vector<2x64xf32> to vector<2x16xf32>
    %1013 = arith.negf %1012 : vector<2x16xf32>
    %1014 = math.exp %1013 : vector<2x16xf32>
    %cst_466 = arith.constant 1.000000e+00 : f32
    %1015 = vector.broadcast %cst_466 : f32 to vector<2x16xf32>
    %1016 = arith.addf %1015, %1014 : vector<2x16xf32>
    %1017 = arith.divf %1015, %1016 : vector<2x16xf32>
    %1018 = vector.extract_strided_slice %1005 {offsets = [0, 32], sizes = [2, 16], strides = [1, 1]} : vector<2x64xf32> to vector<2x16xf32>
    %1019 = math.tanh %1018 : vector<2x16xf32>
    %1020 = vector.extract_strided_slice %1005 {offsets = [0, 48], sizes = [2, 16], strides = [1, 1]} : vector<2x64xf32> to vector<2x16xf32>
    %1021 = arith.negf %1020 : vector<2x16xf32>
    %1022 = math.exp %1021 : vector<2x16xf32>
    %cst_467 = arith.constant 1.000000e+00 : f32
    %1023 = vector.broadcast %cst_467 : f32 to vector<2x16xf32>
    %1024 = arith.addf %1023, %1022 : vector<2x16xf32>
    %1025 = arith.divf %1023, %1024 : vector<2x16xf32>
    %1026 = arith.mulf %1017, %965 : vector<2x16xf32>
    %1027 = arith.mulf %1011, %1019 : vector<2x16xf32>
    %1028 = arith.addf %1026, %1027 : vector<2x16xf32>
    %1029 = math.tanh %1028 : vector<2x16xf32>
    %1030 = arith.mulf %1025, %1029 : vector<2x16xf32>
    %1031 = arith.index_cast %c0_i32_450 : i32 to index
    %c0_468 = arith.constant 0 : index
    %c0_469 = arith.constant 0 : index
    %1032 = vector.load %arg31[%1031, %c0_468, %c0_469] : memref<8x2x16xf32, #tpu.memory_space<vmem>>, vector<1x2x16xf32>
    %1033 = vector.shape_cast %1032 : vector<1x2x16xf32> to vector<2x16xf32>
    %1034 = vector.shape_cast %1001 : vector<2x16xf32> to vector<1x2x16xf32>
    tpu.vector_store %arg31[%1031, %c0_468, %c0_469], %1034 {strides = array<i32>} : memref<8x2x16xf32, #tpu.memory_space<vmem>>, vector<1x2x16xf32>,
    %1035 = arith.index_cast %966 : i32 to index
    %c0_470 = arith.constant 0 : index
    %c0_471 = arith.constant 0 : index
    %1036 = vector.load %arg32[%1035, %c0_470, %c0_471] : memref<8x2x16xf32, #tpu.memory_space<vmem>>, vector<1x2x16xf32>
    %1037 = vector.shape_cast %1036 : vector<1x2x16xf32> to vector<2x16xf32>
    %1038 = vector.shape_cast %1030 : vector<2x16xf32> to vector<1x2x16xf32>
    tpu.vector_store %arg32[%1035, %c0_470, %c0_471], %1038 {strides = array<i32>} : memref<8x2x16xf32, #tpu.memory_space<vmem>>, vector<1x2x16xf32>,
    %c1_i32_472 = arith.constant 1 : i32
    %c7_i32_473 = arith.constant 7 : i32
    %1039 = arith.subi %c7_i32_473, %c1_i32_472 : i32
    %1040 = arith.truncf %1001 : vector<2x16xf32> to vector<2x16xbf16>
    %c0_474 = arith.constant 0 : index
    %c0_475 = arith.constant 0 : index
    %1041 = vector.load %arg12[%c0_474, %c0_475] : memref<16x64xbf16, #tpu.memory_space<vmem>>, vector<16x64xbf16>
    %cst_476 = arith.constant dense<0.000000e+00> : vector<2x64xf32>
    %1042 = tpu.matmul %1040, %1041, %cst_476 {dimension_numbers = #tpu.dot_dimension_numbers<[1], [0], [0], [1], [0, 0, 1, 1], [], []>} : vector<2x16xbf16>, vector<16x64xbf16>, vector<2x64xf32> -> vector<2x64xf32>
    %1043 = arith.truncf %1030 : vector<2x16xf32> to vector<2x16xbf16>
    %c0_477 = arith.constant 0 : index
    %c0_478 = arith.constant 0 : index
    %1044 = vector.load %arg13[%c0_477, %c0_478] : memref<16x64xbf16, #tpu.memory_space<vmem>>, vector<16x64xbf16>
    %cst_479 = arith.constant dense<0.000000e+00> : vector<2x64xf32>
    %1045 = tpu.matmul %1043, %1044, %cst_479 {dimension_numbers = #tpu.dot_dimension_numbers<[1], [0], [0], [1], [0, 0, 1, 1], [], []>} : vector<2x16xbf16>, vector<16x64xbf16>, vector<2x64xf32> -> vector<2x64xf32>
    %1046 = arith.index_cast %c1_i32_472 : i32 to index
    %c0_480 = arith.constant 0 : index
    %c0_481 = arith.constant 0 : index
    %1047 = vector.load %arg29[%1046, %c0_480, %c0_481] : memref<8x2x64xf32, #tpu.memory_space<vmem>>, vector<1x2x64xf32>
    %1048 = vector.shape_cast %1047 : vector<1x2x64xf32> to vector<2x64xf32>
    %1049 = arith.addf %1042, %1048 : vector<2x64xf32>
    %1050 = vector.extract_strided_slice %1049 {offsets = [0, 0], sizes = [2, 16], strides = [1, 1]} : vector<2x64xf32> to vector<2x16xf32>
    %1051 = arith.negf %1050 : vector<2x16xf32>
    %1052 = math.exp %1051 : vector<2x16xf32>
    %cst_482 = arith.constant 1.000000e+00 : f32
    %1053 = vector.broadcast %cst_482 : f32 to vector<2x16xf32>
    %1054 = arith.addf %1053, %1052 : vector<2x16xf32>
    %1055 = arith.divf %1053, %1054 : vector<2x16xf32>
    %1056 = vector.extract_strided_slice %1049 {offsets = [0, 16], sizes = [2, 16], strides = [1, 1]} : vector<2x64xf32> to vector<2x16xf32>
    %1057 = arith.negf %1056 : vector<2x16xf32>
    %1058 = math.exp %1057 : vector<2x16xf32>
    %cst_483 = arith.constant 1.000000e+00 : f32
    %1059 = vector.broadcast %cst_483 : f32 to vector<2x16xf32>
    %1060 = arith.addf %1059, %1058 : vector<2x16xf32>
    %1061 = arith.divf %1059, %1060 : vector<2x16xf32>
    %1062 = vector.extract_strided_slice %1049 {offsets = [0, 32], sizes = [2, 16], strides = [1, 1]} : vector<2x64xf32> to vector<2x16xf32>
    %1063 = math.tanh %1062 : vector<2x16xf32>
    %1064 = vector.extract_strided_slice %1049 {offsets = [0, 48], sizes = [2, 16], strides = [1, 1]} : vector<2x64xf32> to vector<2x16xf32>
    %1065 = arith.negf %1064 : vector<2x16xf32>
    %1066 = math.exp %1065 : vector<2x16xf32>
    %cst_484 = arith.constant 1.000000e+00 : f32
    %1067 = vector.broadcast %cst_484 : f32 to vector<2x16xf32>
    %1068 = arith.addf %1067, %1066 : vector<2x16xf32>
    %1069 = arith.divf %1067, %1068 : vector<2x16xf32>
    %1070 = arith.mulf %1061, %999 : vector<2x16xf32>
    %1071 = arith.mulf %1055, %1063 : vector<2x16xf32>
    %1072 = arith.addf %1070, %1071 : vector<2x16xf32>
    %1073 = math.tanh %1072 : vector<2x16xf32>
    %1074 = arith.mulf %1069, %1073 : vector<2x16xf32>
    %1075 = arith.index_cast %1039 : i32 to index
    %c0_485 = arith.constant 0 : index
    %c0_486 = arith.constant 0 : index
    %1076 = vector.load %arg30[%1075, %c0_485, %c0_486] : memref<8x2x64xf32, #tpu.memory_space<vmem>>, vector<1x2x64xf32>
    %1077 = vector.shape_cast %1076 : vector<1x2x64xf32> to vector<2x64xf32>
    %1078 = arith.addf %1045, %1077 : vector<2x64xf32>
    %1079 = vector.extract_strided_slice %1078 {offsets = [0, 0], sizes = [2, 16], strides = [1, 1]} : vector<2x64xf32> to vector<2x16xf32>
    %1080 = arith.negf %1079 : vector<2x16xf32>
    %1081 = math.exp %1080 : vector<2x16xf32>
    %cst_487 = arith.constant 1.000000e+00 : f32
    %1082 = vector.broadcast %cst_487 : f32 to vector<2x16xf32>
    %1083 = arith.addf %1082, %1081 : vector<2x16xf32>
    %1084 = arith.divf %1082, %1083 : vector<2x16xf32>
    %1085 = vector.extract_strided_slice %1078 {offsets = [0, 16], sizes = [2, 16], strides = [1, 1]} : vector<2x64xf32> to vector<2x16xf32>
    %1086 = arith.negf %1085 : vector<2x16xf32>
    %1087 = math.exp %1086 : vector<2x16xf32>
    %cst_488 = arith.constant 1.000000e+00 : f32
    %1088 = vector.broadcast %cst_488 : f32 to vector<2x16xf32>
    %1089 = arith.addf %1088, %1087 : vector<2x16xf32>
    %1090 = arith.divf %1088, %1089 : vector<2x16xf32>
    %1091 = vector.extract_strided_slice %1078 {offsets = [0, 32], sizes = [2, 16], strides = [1, 1]} : vector<2x64xf32> to vector<2x16xf32>
    %1092 = math.tanh %1091 : vector<2x16xf32>
    %1093 = vector.extract_strided_slice %1078 {offsets = [0, 48], sizes = [2, 16], strides = [1, 1]} : vector<2x64xf32> to vector<2x16xf32>
    %1094 = arith.negf %1093 : vector<2x16xf32>
    %1095 = math.exp %1094 : vector<2x16xf32>
    %cst_489 = arith.constant 1.000000e+00 : f32
    %1096 = vector.broadcast %cst_489 : f32 to vector<2x16xf32>
    %1097 = arith.addf %1096, %1095 : vector<2x16xf32>
    %1098 = arith.divf %1096, %1097 : vector<2x16xf32>
    %1099 = arith.mulf %1090, %1028 : vector<2x16xf32>
    %1100 = arith.mulf %1084, %1092 : vector<2x16xf32>
    %1101 = arith.addf %1099, %1100 : vector<2x16xf32>
    %1102 = math.tanh %1101 : vector<2x16xf32>
    %1103 = arith.mulf %1098, %1102 : vector<2x16xf32>
    %1104 = arith.index_cast %c1_i32_472 : i32 to index
    %c0_490 = arith.constant 0 : index
    %c0_491 = arith.constant 0 : index
    %1105 = vector.load %arg31[%1104, %c0_490, %c0_491] : memref<8x2x16xf32, #tpu.memory_space<vmem>>, vector<1x2x16xf32>
    %1106 = vector.shape_cast %1105 : vector<1x2x16xf32> to vector<2x16xf32>
    %1107 = vector.shape_cast %1074 : vector<2x16xf32> to vector<1x2x16xf32>
    tpu.vector_store %arg31[%1104, %c0_490, %c0_491], %1107 {strides = array<i32>} : memref<8x2x16xf32, #tpu.memory_space<vmem>>, vector<1x2x16xf32>,
    %1108 = arith.index_cast %1039 : i32 to index
    %c0_492 = arith.constant 0 : index
    %c0_493 = arith.constant 0 : index
    %1109 = vector.load %arg32[%1108, %c0_492, %c0_493] : memref<8x2x16xf32, #tpu.memory_space<vmem>>, vector<1x2x16xf32>
    %1110 = vector.shape_cast %1109 : vector<1x2x16xf32> to vector<2x16xf32>
    %1111 = vector.shape_cast %1103 : vector<2x16xf32> to vector<1x2x16xf32>
    tpu.vector_store %arg32[%1108, %c0_492, %c0_493], %1111 {strides = array<i32>} : memref<8x2x16xf32, #tpu.memory_space<vmem>>, vector<1x2x16xf32>,
    %c2_i32_494 = arith.constant 2 : i32
    %c7_i32_495 = arith.constant 7 : i32
    %1112 = arith.subi %c7_i32_495, %c2_i32_494 : i32
    %1113 = arith.truncf %1074 : vector<2x16xf32> to vector<2x16xbf16>
    %c0_496 = arith.constant 0 : index
    %c0_497 = arith.constant 0 : index
    %1114 = vector.load %arg12[%c0_496, %c0_497] : memref<16x64xbf16, #tpu.memory_space<vmem>>, vector<16x64xbf16>
    %cst_498 = arith.constant dense<0.000000e+00> : vector<2x64xf32>
    %1115 = tpu.matmul %1113, %1114, %cst_498 {dimension_numbers = #tpu.dot_dimension_numbers<[1], [0], [0], [1], [0, 0, 1, 1], [], []>} : vector<2x16xbf16>, vector<16x64xbf16>, vector<2x64xf32> -> vector<2x64xf32>
    %1116 = arith.truncf %1103 : vector<2x16xf32> to vector<2x16xbf16>
    %c0_499 = arith.constant 0 : index
    %c0_500 = arith.constant 0 : index
    %1117 = vector.load %arg13[%c0_499, %c0_500] : memref<16x64xbf16, #tpu.memory_space<vmem>>, vector<16x64xbf16>
    %cst_501 = arith.constant dense<0.000000e+00> : vector<2x64xf32>
    %1118 = tpu.matmul %1116, %1117, %cst_501 {dimension_numbers = #tpu.dot_dimension_numbers<[1], [0], [0], [1], [0, 0, 1, 1], [], []>} : vector<2x16xbf16>, vector<16x64xbf16>, vector<2x64xf32> -> vector<2x64xf32>
    %1119 = arith.index_cast %c2_i32_494 : i32 to index
    %c0_502 = arith.constant 0 : index
    %c0_503 = arith.constant 0 : index
    %1120 = vector.load %arg29[%1119, %c0_502, %c0_503] : memref<8x2x64xf32, #tpu.memory_space<vmem>>, vector<1x2x64xf32>
    %1121 = vector.shape_cast %1120 : vector<1x2x64xf32> to vector<2x64xf32>
    %1122 = arith.addf %1115, %1121 : vector<2x64xf32>
    %1123 = vector.extract_strided_slice %1122 {offsets = [0, 0], sizes = [2, 16], strides = [1, 1]} : vector<2x64xf32> to vector<2x16xf32>
    %1124 = arith.negf %1123 : vector<2x16xf32>
    %1125 = math.exp %1124 : vector<2x16xf32>
    %cst_504 = arith.constant 1.000000e+00 : f32
    %1126 = vector.broadcast %cst_504 : f32 to vector<2x16xf32>
    %1127 = arith.addf %1126, %1125 : vector<2x16xf32>
    %1128 = arith.divf %1126, %1127 : vector<2x16xf32>
    %1129 = vector.extract_strided_slice %1122 {offsets = [0, 16], sizes = [2, 16], strides = [1, 1]} : vector<2x64xf32> to vector<2x16xf32>
    %1130 = arith.negf %1129 : vector<2x16xf32>
    %1131 = math.exp %1130 : vector<2x16xf32>
    %cst_505 = arith.constant 1.000000e+00 : f32
    %1132 = vector.broadcast %cst_505 : f32 to vector<2x16xf32>
    %1133 = arith.addf %1132, %1131 : vector<2x16xf32>
    %1134 = arith.divf %1132, %1133 : vector<2x16xf32>
    %1135 = vector.extract_strided_slice %1122 {offsets = [0, 32], sizes = [2, 16], strides = [1, 1]} : vector<2x64xf32> to vector<2x16xf32>
    %1136 = math.tanh %1135 : vector<2x16xf32>
    %1137 = vector.extract_strided_slice %1122 {offsets = [0, 48], sizes = [2, 16], strides = [1, 1]} : vector<2x64xf32> to vector<2x16xf32>
    %1138 = arith.negf %1137 : vector<2x16xf32>
    %1139 = math.exp %1138 : vector<2x16xf32>
    %cst_506 = arith.constant 1.000000e+00 : f32
    %1140 = vector.broadcast %cst_506 : f32 to vector<2x16xf32>
    %1141 = arith.addf %1140, %1139 : vector<2x16xf32>
    %1142 = arith.divf %1140, %1141 : vector<2x16xf32>
    %1143 = arith.mulf %1134, %1072 : vector<2x16xf32>
    %1144 = arith.mulf %1128, %1136 : vector<2x16xf32>
    %1145 = arith.addf %1143, %1144 : vector<2x16xf32>
    %1146 = math.tanh %1145 : vector<2x16xf32>
    %1147 = arith.mulf %1142, %1146 : vector<2x16xf32>
    %1148 = arith.index_cast %1112 : i32 to index
    %c0_507 = arith.constant 0 : index
    %c0_508 = arith.constant 0 : index
    %1149 = vector.load %arg30[%1148, %c0_507, %c0_508] : memref<8x2x64xf32, #tpu.memory_space<vmem>>, vector<1x2x64xf32>
    %1150 = vector.shape_cast %1149 : vector<1x2x64xf32> to vector<2x64xf32>
    %1151 = arith.addf %1118, %1150 : vector<2x64xf32>
    %1152 = vector.extract_strided_slice %1151 {offsets = [0, 0], sizes = [2, 16], strides = [1, 1]} : vector<2x64xf32> to vector<2x16xf32>
    %1153 = arith.negf %1152 : vector<2x16xf32>
    %1154 = math.exp %1153 : vector<2x16xf32>
    %cst_509 = arith.constant 1.000000e+00 : f32
    %1155 = vector.broadcast %cst_509 : f32 to vector<2x16xf32>
    %1156 = arith.addf %1155, %1154 : vector<2x16xf32>
    %1157 = arith.divf %1155, %1156 : vector<2x16xf32>
    %1158 = vector.extract_strided_slice %1151 {offsets = [0, 16], sizes = [2, 16], strides = [1, 1]} : vector<2x64xf32> to vector<2x16xf32>
    %1159 = arith.negf %1158 : vector<2x16xf32>
    %1160 = math.exp %1159 : vector<2x16xf32>
    %cst_510 = arith.constant 1.000000e+00 : f32
    %1161 = vector.broadcast %cst_510 : f32 to vector<2x16xf32>
    %1162 = arith.addf %1161, %1160 : vector<2x16xf32>
    %1163 = arith.divf %1161, %1162 : vector<2x16xf32>
    %1164 = vector.extract_strided_slice %1151 {offsets = [0, 32], sizes = [2, 16], strides = [1, 1]} : vector<2x64xf32> to vector<2x16xf32>
    %1165 = math.tanh %1164 : vector<2x16xf32>
    %1166 = vector.extract_strided_slice %1151 {offsets = [0, 48], sizes = [2, 16], strides = [1, 1]} : vector<2x64xf32> to vector<2x16xf32>
    %1167 = arith.negf %1166 : vector<2x16xf32>
    %1168 = math.exp %1167 : vector<2x16xf32>
    %cst_511 = arith.constant 1.000000e+00 : f32
    %1169 = vector.broadcast %cst_511 : f32 to vector<2x16xf32>
    %1170 = arith.addf %1169, %1168 : vector<2x16xf32>
    %1171 = arith.divf %1169, %1170 : vector<2x16xf32>
    %1172 = arith.mulf %1163, %1101 : vector<2x16xf32>
    %1173 = arith.mulf %1157, %1165 : vector<2x16xf32>
    %1174 = arith.addf %1172, %1173 : vector<2x16xf32>
    %1175 = math.tanh %1174 : vector<2x16xf32>
    %1176 = arith.mulf %1171, %1175 : vector<2x16xf32>
    %1177 = arith.index_cast %c2_i32_494 : i32 to index
    %c0_512 = arith.constant 0 : index
    %c0_513 = arith.constant 0 : index
    %1178 = vector.load %arg31[%1177, %c0_512, %c0_513] : memref<8x2x16xf32, #tpu.memory_space<vmem>>, vector<1x2x16xf32>
    %1179 = vector.shape_cast %1178 : vector<1x2x16xf32> to vector<2x16xf32>
    %1180 = vector.shape_cast %1147 : vector<2x16xf32> to vector<1x2x16xf32>
    tpu.vector_store %arg31[%1177, %c0_512, %c0_513], %1180 {strides = array<i32>} : memref<8x2x16xf32, #tpu.memory_space<vmem>>, vector<1x2x16xf32>,
    %1181 = arith.index_cast %1112 : i32 to index
    %c0_514 = arith.constant 0 : index
    %c0_515 = arith.constant 0 : index
    %1182 = vector.load %arg32[%1181, %c0_514, %c0_515] : memref<8x2x16xf32, #tpu.memory_space<vmem>>, vector<1x2x16xf32>
    %1183 = vector.shape_cast %1182 : vector<1x2x16xf32> to vector<2x16xf32>
    %1184 = vector.shape_cast %1176 : vector<2x16xf32> to vector<1x2x16xf32>
    tpu.vector_store %arg32[%1181, %c0_514, %c0_515], %1184 {strides = array<i32>} : memref<8x2x16xf32, #tpu.memory_space<vmem>>, vector<1x2x16xf32>,
    %c3_i32_516 = arith.constant 3 : i32
    %c7_i32_517 = arith.constant 7 : i32
    %1185 = arith.subi %c7_i32_517, %c3_i32_516 : i32
    %1186 = arith.truncf %1147 : vector<2x16xf32> to vector<2x16xbf16>
    %c0_518 = arith.constant 0 : index
    %c0_519 = arith.constant 0 : index
    %1187 = vector.load %arg12[%c0_518, %c0_519] : memref<16x64xbf16, #tpu.memory_space<vmem>>, vector<16x64xbf16>
    %cst_520 = arith.constant dense<0.000000e+00> : vector<2x64xf32>
    %1188 = tpu.matmul %1186, %1187, %cst_520 {dimension_numbers = #tpu.dot_dimension_numbers<[1], [0], [0], [1], [0, 0, 1, 1], [], []>} : vector<2x16xbf16>, vector<16x64xbf16>, vector<2x64xf32> -> vector<2x64xf32>
    %1189 = arith.truncf %1176 : vector<2x16xf32> to vector<2x16xbf16>
    %c0_521 = arith.constant 0 : index
    %c0_522 = arith.constant 0 : index
    %1190 = vector.load %arg13[%c0_521, %c0_522] : memref<16x64xbf16, #tpu.memory_space<vmem>>, vector<16x64xbf16>
    %cst_523 = arith.constant dense<0.000000e+00> : vector<2x64xf32>
    %1191 = tpu.matmul %1189, %1190, %cst_523 {dimension_numbers = #tpu.dot_dimension_numbers<[1], [0], [0], [1], [0, 0, 1, 1], [], []>} : vector<2x16xbf16>, vector<16x64xbf16>, vector<2x64xf32> -> vector<2x64xf32>
    %1192 = arith.index_cast %c3_i32_516 : i32 to index
    %c0_524 = arith.constant 0 : index
    %c0_525 = arith.constant 0 : index
    %1193 = vector.load %arg29[%1192, %c0_524, %c0_525] : memref<8x2x64xf32, #tpu.memory_space<vmem>>, vector<1x2x64xf32>
    %1194 = vector.shape_cast %1193 : vector<1x2x64xf32> to vector<2x64xf32>
    %1195 = arith.addf %1188, %1194 : vector<2x64xf32>
    %1196 = vector.extract_strided_slice %1195 {offsets = [0, 0], sizes = [2, 16], strides = [1, 1]} : vector<2x64xf32> to vector<2x16xf32>
    %1197 = arith.negf %1196 : vector<2x16xf32>
    %1198 = math.exp %1197 : vector<2x16xf32>
    %cst_526 = arith.constant 1.000000e+00 : f32
    %1199 = vector.broadcast %cst_526 : f32 to vector<2x16xf32>
    %1200 = arith.addf %1199, %1198 : vector<2x16xf32>
    %1201 = arith.divf %1199, %1200 : vector<2x16xf32>
    %1202 = vector.extract_strided_slice %1195 {offsets = [0, 16], sizes = [2, 16], strides = [1, 1]} : vector<2x64xf32> to vector<2x16xf32>
    %1203 = arith.negf %1202 : vector<2x16xf32>
    %1204 = math.exp %1203 : vector<2x16xf32>
    %cst_527 = arith.constant 1.000000e+00 : f32
    %1205 = vector.broadcast %cst_527 : f32 to vector<2x16xf32>
    %1206 = arith.addf %1205, %1204 : vector<2x16xf32>
    %1207 = arith.divf %1205, %1206 : vector<2x16xf32>
    %1208 = vector.extract_strided_slice %1195 {offsets = [0, 32], sizes = [2, 16], strides = [1, 1]} : vector<2x64xf32> to vector<2x16xf32>
    %1209 = math.tanh %1208 : vector<2x16xf32>
    %1210 = vector.extract_strided_slice %1195 {offsets = [0, 48], sizes = [2, 16], strides = [1, 1]} : vector<2x64xf32> to vector<2x16xf32>
    %1211 = arith.negf %1210 : vector<2x16xf32>
    %1212 = math.exp %1211 : vector<2x16xf32>
    %cst_528 = arith.constant 1.000000e+00 : f32
    %1213 = vector.broadcast %cst_528 : f32 to vector<2x16xf32>
    %1214 = arith.addf %1213, %1212 : vector<2x16xf32>
    %1215 = arith.divf %1213, %1214 : vector<2x16xf32>
    %1216 = arith.mulf %1207, %1145 : vector<2x16xf32>
    %1217 = arith.mulf %1201, %1209 : vector<2x16xf32>
    %1218 = arith.addf %1216, %1217 : vector<2x16xf32>
    %1219 = math.tanh %1218 : vector<2x16xf32>
    %1220 = arith.mulf %1215, %1219 : vector<2x16xf32>
    %1221 = arith.index_cast %1185 : i32 to index
    %c0_529 = arith.constant 0 : index
    %c0_530 = arith.constant 0 : index
    %1222 = vector.load %arg30[%1221, %c0_529, %c0_530] : memref<8x2x64xf32, #tpu.memory_space<vmem>>, vector<1x2x64xf32>
    %1223 = vector.shape_cast %1222 : vector<1x2x64xf32> to vector<2x64xf32>
    %1224 = arith.addf %1191, %1223 : vector<2x64xf32>
    %1225 = vector.extract_strided_slice %1224 {offsets = [0, 0], sizes = [2, 16], strides = [1, 1]} : vector<2x64xf32> to vector<2x16xf32>
    %1226 = arith.negf %1225 : vector<2x16xf32>
    %1227 = math.exp %1226 : vector<2x16xf32>
    %cst_531 = arith.constant 1.000000e+00 : f32
    %1228 = vector.broadcast %cst_531 : f32 to vector<2x16xf32>
    %1229 = arith.addf %1228, %1227 : vector<2x16xf32>
    %1230 = arith.divf %1228, %1229 : vector<2x16xf32>
    %1231 = vector.extract_strided_slice %1224 {offsets = [0, 16], sizes = [2, 16], strides = [1, 1]} : vector<2x64xf32> to vector<2x16xf32>
    %1232 = arith.negf %1231 : vector<2x16xf32>
    %1233 = math.exp %1232 : vector<2x16xf32>
    %cst_532 = arith.constant 1.000000e+00 : f32
    %1234 = vector.broadcast %cst_532 : f32 to vector<2x16xf32>
    %1235 = arith.addf %1234, %1233 : vector<2x16xf32>
    %1236 = arith.divf %1234, %1235 : vector<2x16xf32>
    %1237 = vector.extract_strided_slice %1224 {offsets = [0, 32], sizes = [2, 16], strides = [1, 1]} : vector<2x64xf32> to vector<2x16xf32>
    %1238 = math.tanh %1237 : vector<2x16xf32>
    %1239 = vector.extract_strided_slice %1224 {offsets = [0, 48], sizes = [2, 16], strides = [1, 1]} : vector<2x64xf32> to vector<2x16xf32>
    %1240 = arith.negf %1239 : vector<2x16xf32>
    %1241 = math.exp %1240 : vector<2x16xf32>
    %cst_533 = arith.constant 1.000000e+00 : f32
    %1242 = vector.broadcast %cst_533 : f32 to vector<2x16xf32>
    %1243 = arith.addf %1242, %1241 : vector<2x16xf32>
    %1244 = arith.divf %1242, %1243 : vector<2x16xf32>
    %1245 = arith.mulf %1236, %1174 : vector<2x16xf32>
    %1246 = arith.mulf %1230, %1238 : vector<2x16xf32>
    %1247 = arith.addf %1245, %1246 : vector<2x16xf32>
    %1248 = math.tanh %1247 : vector<2x16xf32>
    %1249 = arith.mulf %1244, %1248 : vector<2x16xf32>
    %1250 = arith.index_cast %c3_i32_516 : i32 to index
    %c0_534 = arith.constant 0 : index
    %c0_535 = arith.constant 0 : index
    %1251 = vector.load %arg31[%1250, %c0_534, %c0_535] : memref<8x2x16xf32, #tpu.memory_space<vmem>>, vector<1x2x16xf32>
    %1252 = vector.shape_cast %1251 : vector<1x2x16xf32> to vector<2x16xf32>
    %1253 = vector.shape_cast %1220 : vector<2x16xf32> to vector<1x2x16xf32>
    tpu.vector_store %arg31[%1250, %c0_534, %c0_535], %1253 {strides = array<i32>} : memref<8x2x16xf32, #tpu.memory_space<vmem>>, vector<1x2x16xf32>,
    %1254 = arith.index_cast %1185 : i32 to index
    %c0_536 = arith.constant 0 : index
    %c0_537 = arith.constant 0 : index
    %1255 = vector.load %arg32[%1254, %c0_536, %c0_537] : memref<8x2x16xf32, #tpu.memory_space<vmem>>, vector<1x2x16xf32>
    %1256 = vector.shape_cast %1255 : vector<1x2x16xf32> to vector<2x16xf32>
    %1257 = vector.shape_cast %1249 : vector<2x16xf32> to vector<1x2x16xf32>
    tpu.vector_store %arg32[%1254, %c0_536, %c0_537], %1257 {strides = array<i32>} : memref<8x2x16xf32, #tpu.memory_space<vmem>>, vector<1x2x16xf32>,
    %c4_i32_538 = arith.constant 4 : i32
    %c7_i32_539 = arith.constant 7 : i32
    %1258 = arith.subi %c7_i32_539, %c4_i32_538 : i32
    %1259 = arith.truncf %1220 : vector<2x16xf32> to vector<2x16xbf16>
    %c0_540 = arith.constant 0 : index
    %c0_541 = arith.constant 0 : index
    %1260 = vector.load %arg12[%c0_540, %c0_541] : memref<16x64xbf16, #tpu.memory_space<vmem>>, vector<16x64xbf16>
    %cst_542 = arith.constant dense<0.000000e+00> : vector<2x64xf32>
    %1261 = tpu.matmul %1259, %1260, %cst_542 {dimension_numbers = #tpu.dot_dimension_numbers<[1], [0], [0], [1], [0, 0, 1, 1], [], []>} : vector<2x16xbf16>, vector<16x64xbf16>, vector<2x64xf32> -> vector<2x64xf32>
    %1262 = arith.truncf %1249 : vector<2x16xf32> to vector<2x16xbf16>
    %c0_543 = arith.constant 0 : index
    %c0_544 = arith.constant 0 : index
    %1263 = vector.load %arg13[%c0_543, %c0_544] : memref<16x64xbf16, #tpu.memory_space<vmem>>, vector<16x64xbf16>
    %cst_545 = arith.constant dense<0.000000e+00> : vector<2x64xf32>
    %1264 = tpu.matmul %1262, %1263, %cst_545 {dimension_numbers = #tpu.dot_dimension_numbers<[1], [0], [0], [1], [0, 0, 1, 1], [], []>} : vector<2x16xbf16>, vector<16x64xbf16>, vector<2x64xf32> -> vector<2x64xf32>
    %1265 = arith.index_cast %c4_i32_538 : i32 to index
    %c0_546 = arith.constant 0 : index
    %c0_547 = arith.constant 0 : index
    %1266 = vector.load %arg29[%1265, %c0_546, %c0_547] : memref<8x2x64xf32, #tpu.memory_space<vmem>>, vector<1x2x64xf32>
    %1267 = vector.shape_cast %1266 : vector<1x2x64xf32> to vector<2x64xf32>
    %1268 = arith.addf %1261, %1267 : vector<2x64xf32>
    %1269 = vector.extract_strided_slice %1268 {offsets = [0, 0], sizes = [2, 16], strides = [1, 1]} : vector<2x64xf32> to vector<2x16xf32>
    %1270 = arith.negf %1269 : vector<2x16xf32>
    %1271 = math.exp %1270 : vector<2x16xf32>
    %cst_548 = arith.constant 1.000000e+00 : f32
    %1272 = vector.broadcast %cst_548 : f32 to vector<2x16xf32>
    %1273 = arith.addf %1272, %1271 : vector<2x16xf32>
    %1274 = arith.divf %1272, %1273 : vector<2x16xf32>
    %1275 = vector.extract_strided_slice %1268 {offsets = [0, 16], sizes = [2, 16], strides = [1, 1]} : vector<2x64xf32> to vector<2x16xf32>
    %1276 = arith.negf %1275 : vector<2x16xf32>
    %1277 = math.exp %1276 : vector<2x16xf32>
    %cst_549 = arith.constant 1.000000e+00 : f32
    %1278 = vector.broadcast %cst_549 : f32 to vector<2x16xf32>
    %1279 = arith.addf %1278, %1277 : vector<2x16xf32>
    %1280 = arith.divf %1278, %1279 : vector<2x16xf32>
    %1281 = vector.extract_strided_slice %1268 {offsets = [0, 32], sizes = [2, 16], strides = [1, 1]} : vector<2x64xf32> to vector<2x16xf32>
    %1282 = math.tanh %1281 : vector<2x16xf32>
    %1283 = vector.extract_strided_slice %1268 {offsets = [0, 48], sizes = [2, 16], strides = [1, 1]} : vector<2x64xf32> to vector<2x16xf32>
    %1284 = arith.negf %1283 : vector<2x16xf32>
    %1285 = math.exp %1284 : vector<2x16xf32>
    %cst_550 = arith.constant 1.000000e+00 : f32
    %1286 = vector.broadcast %cst_550 : f32 to vector<2x16xf32>
    %1287 = arith.addf %1286, %1285 : vector<2x16xf32>
    %1288 = arith.divf %1286, %1287 : vector<2x16xf32>
    %1289 = arith.mulf %1280, %1218 : vector<2x16xf32>
    %1290 = arith.mulf %1274, %1282 : vector<2x16xf32>
    %1291 = arith.addf %1289, %1290 : vector<2x16xf32>
    %1292 = math.tanh %1291 : vector<2x16xf32>
    %1293 = arith.mulf %1288, %1292 : vector<2x16xf32>
    %1294 = arith.index_cast %1258 : i32 to index
    %c0_551 = arith.constant 0 : index
    %c0_552 = arith.constant 0 : index
    %1295 = vector.load %arg30[%1294, %c0_551, %c0_552] : memref<8x2x64xf32, #tpu.memory_space<vmem>>, vector<1x2x64xf32>
    %1296 = vector.shape_cast %1295 : vector<1x2x64xf32> to vector<2x64xf32>
    %1297 = arith.addf %1264, %1296 : vector<2x64xf32>
    %1298 = vector.extract_strided_slice %1297 {offsets = [0, 0], sizes = [2, 16], strides = [1, 1]} : vector<2x64xf32> to vector<2x16xf32>
    %1299 = arith.negf %1298 : vector<2x16xf32>
    %1300 = math.exp %1299 : vector<2x16xf32>
    %cst_553 = arith.constant 1.000000e+00 : f32
    %1301 = vector.broadcast %cst_553 : f32 to vector<2x16xf32>
    %1302 = arith.addf %1301, %1300 : vector<2x16xf32>
    %1303 = arith.divf %1301, %1302 : vector<2x16xf32>
    %1304 = vector.extract_strided_slice %1297 {offsets = [0, 16], sizes = [2, 16], strides = [1, 1]} : vector<2x64xf32> to vector<2x16xf32>
    %1305 = arith.negf %1304 : vector<2x16xf32>
    %1306 = math.exp %1305 : vector<2x16xf32>
    %cst_554 = arith.constant 1.000000e+00 : f32
    %1307 = vector.broadcast %cst_554 : f32 to vector<2x16xf32>
    %1308 = arith.addf %1307, %1306 : vector<2x16xf32>
    %1309 = arith.divf %1307, %1308 : vector<2x16xf32>
    %1310 = vector.extract_strided_slice %1297 {offsets = [0, 32], sizes = [2, 16], strides = [1, 1]} : vector<2x64xf32> to vector<2x16xf32>
    %1311 = math.tanh %1310 : vector<2x16xf32>
    %1312 = vector.extract_strided_slice %1297 {offsets = [0, 48], sizes = [2, 16], strides = [1, 1]} : vector<2x64xf32> to vector<2x16xf32>
    %1313 = arith.negf %1312 : vector<2x16xf32>
    %1314 = math.exp %1313 : vector<2x16xf32>
    %cst_555 = arith.constant 1.000000e+00 : f32
    %1315 = vector.broadcast %cst_555 : f32 to vector<2x16xf32>
    %1316 = arith.addf %1315, %1314 : vector<2x16xf32>
    %1317 = arith.divf %1315, %1316 : vector<2x16xf32>
    %1318 = arith.mulf %1309, %1247 : vector<2x16xf32>
    %1319 = arith.mulf %1303, %1311 : vector<2x16xf32>
    %1320 = arith.addf %1318, %1319 : vector<2x16xf32>
    %1321 = math.tanh %1320 : vector<2x16xf32>
    %1322 = arith.mulf %1317, %1321 : vector<2x16xf32>
    %1323 = arith.index_cast %c4_i32_538 : i32 to index
    %c0_556 = arith.constant 0 : index
    %c0_557 = arith.constant 0 : index
    %1324 = vector.load %arg31[%1323, %c0_556, %c0_557] : memref<8x2x16xf32, #tpu.memory_space<vmem>>, vector<1x2x16xf32>
    %1325 = vector.shape_cast %1324 : vector<1x2x16xf32> to vector<2x16xf32>
    %1326 = vector.shape_cast %1293 : vector<2x16xf32> to vector<1x2x16xf32>
    tpu.vector_store %arg31[%1323, %c0_556, %c0_557], %1326 {strides = array<i32>} : memref<8x2x16xf32, #tpu.memory_space<vmem>>, vector<1x2x16xf32>,
    %1327 = arith.index_cast %1258 : i32 to index
    %c0_558 = arith.constant 0 : index
    %c0_559 = arith.constant 0 : index
    %1328 = vector.load %arg32[%1327, %c0_558, %c0_559] : memref<8x2x16xf32, #tpu.memory_space<vmem>>, vector<1x2x16xf32>
    %1329 = vector.shape_cast %1328 : vector<1x2x16xf32> to vector<2x16xf32>
    %1330 = vector.shape_cast %1322 : vector<2x16xf32> to vector<1x2x16xf32>
    tpu.vector_store %arg32[%1327, %c0_558, %c0_559], %1330 {strides = array<i32>} : memref<8x2x16xf32, #tpu.memory_space<vmem>>, vector<1x2x16xf32>,
    %c5_i32_560 = arith.constant 5 : i32
    %c7_i32_561 = arith.constant 7 : i32
    %1331 = arith.subi %c7_i32_561, %c5_i32_560 : i32
    %1332 = arith.truncf %1293 : vector<2x16xf32> to vector<2x16xbf16>
    %c0_562 = arith.constant 0 : index
    %c0_563 = arith.constant 0 : index
    %1333 = vector.load %arg12[%c0_562, %c0_563] : memref<16x64xbf16, #tpu.memory_space<vmem>>, vector<16x64xbf16>
    %cst_564 = arith.constant dense<0.000000e+00> : vector<2x64xf32>
    %1334 = tpu.matmul %1332, %1333, %cst_564 {dimension_numbers = #tpu.dot_dimension_numbers<[1], [0], [0], [1], [0, 0, 1, 1], [], []>} : vector<2x16xbf16>, vector<16x64xbf16>, vector<2x64xf32> -> vector<2x64xf32>
    %1335 = arith.truncf %1322 : vector<2x16xf32> to vector<2x16xbf16>
    %c0_565 = arith.constant 0 : index
    %c0_566 = arith.constant 0 : index
    %1336 = vector.load %arg13[%c0_565, %c0_566] : memref<16x64xbf16, #tpu.memory_space<vmem>>, vector<16x64xbf16>
    %cst_567 = arith.constant dense<0.000000e+00> : vector<2x64xf32>
    %1337 = tpu.matmul %1335, %1336, %cst_567 {dimension_numbers = #tpu.dot_dimension_numbers<[1], [0], [0], [1], [0, 0, 1, 1], [], []>} : vector<2x16xbf16>, vector<16x64xbf16>, vector<2x64xf32> -> vector<2x64xf32>
    %1338 = arith.index_cast %c5_i32_560 : i32 to index
    %c0_568 = arith.constant 0 : index
    %c0_569 = arith.constant 0 : index
    %1339 = vector.load %arg29[%1338, %c0_568, %c0_569] : memref<8x2x64xf32, #tpu.memory_space<vmem>>, vector<1x2x64xf32>
    %1340 = vector.shape_cast %1339 : vector<1x2x64xf32> to vector<2x64xf32>
    %1341 = arith.addf %1334, %1340 : vector<2x64xf32>
    %1342 = vector.extract_strided_slice %1341 {offsets = [0, 0], sizes = [2, 16], strides = [1, 1]} : vector<2x64xf32> to vector<2x16xf32>
    %1343 = arith.negf %1342 : vector<2x16xf32>
    %1344 = math.exp %1343 : vector<2x16xf32>
    %cst_570 = arith.constant 1.000000e+00 : f32
    %1345 = vector.broadcast %cst_570 : f32 to vector<2x16xf32>
    %1346 = arith.addf %1345, %1344 : vector<2x16xf32>
    %1347 = arith.divf %1345, %1346 : vector<2x16xf32>
    %1348 = vector.extract_strided_slice %1341 {offsets = [0, 16], sizes = [2, 16], strides = [1, 1]} : vector<2x64xf32> to vector<2x16xf32>
    %1349 = arith.negf %1348 : vector<2x16xf32>
    %1350 = math.exp %1349 : vector<2x16xf32>
    %cst_571 = arith.constant 1.000000e+00 : f32
    %1351 = vector.broadcast %cst_571 : f32 to vector<2x16xf32>
    %1352 = arith.addf %1351, %1350 : vector<2x16xf32>
    %1353 = arith.divf %1351, %1352 : vector<2x16xf32>
    %1354 = vector.extract_strided_slice %1341 {offsets = [0, 32], sizes = [2, 16], strides = [1, 1]} : vector<2x64xf32> to vector<2x16xf32>
    %1355 = math.tanh %1354 : vector<2x16xf32>
    %1356 = vector.extract_strided_slice %1341 {offsets = [0, 48], sizes = [2, 16], strides = [1, 1]} : vector<2x64xf32> to vector<2x16xf32>
    %1357 = arith.negf %1356 : vector<2x16xf32>
    %1358 = math.exp %1357 : vector<2x16xf32>
    %cst_572 = arith.constant 1.000000e+00 : f32
    %1359 = vector.broadcast %cst_572 : f32 to vector<2x16xf32>
    %1360 = arith.addf %1359, %1358 : vector<2x16xf32>
    %1361 = arith.divf %1359, %1360 : vector<2x16xf32>
    %1362 = arith.mulf %1353, %1291 : vector<2x16xf32>
    %1363 = arith.mulf %1347, %1355 : vector<2x16xf32>
    %1364 = arith.addf %1362, %1363 : vector<2x16xf32>
    %1365 = math.tanh %1364 : vector<2x16xf32>
    %1366 = arith.mulf %1361, %1365 : vector<2x16xf32>
    %1367 = arith.index_cast %1331 : i32 to index
    %c0_573 = arith.constant 0 : index
    %c0_574 = arith.constant 0 : index
    %1368 = vector.load %arg30[%1367, %c0_573, %c0_574] : memref<8x2x64xf32, #tpu.memory_space<vmem>>, vector<1x2x64xf32>
    %1369 = vector.shape_cast %1368 : vector<1x2x64xf32> to vector<2x64xf32>
    %1370 = arith.addf %1337, %1369 : vector<2x64xf32>
    %1371 = vector.extract_strided_slice %1370 {offsets = [0, 0], sizes = [2, 16], strides = [1, 1]} : vector<2x64xf32> to vector<2x16xf32>
    %1372 = arith.negf %1371 : vector<2x16xf32>
    %1373 = math.exp %1372 : vector<2x16xf32>
    %cst_575 = arith.constant 1.000000e+00 : f32
    %1374 = vector.broadcast %cst_575 : f32 to vector<2x16xf32>
    %1375 = arith.addf %1374, %1373 : vector<2x16xf32>
    %1376 = arith.divf %1374, %1375 : vector<2x16xf32>
    %1377 = vector.extract_strided_slice %1370 {offsets = [0, 16], sizes = [2, 16], strides = [1, 1]} : vector<2x64xf32> to vector<2x16xf32>
    %1378 = arith.negf %1377 : vector<2x16xf32>
    %1379 = math.exp %1378 : vector<2x16xf32>
    %cst_576 = arith.constant 1.000000e+00 : f32
    %1380 = vector.broadcast %cst_576 : f32 to vector<2x16xf32>
    %1381 = arith.addf %1380, %1379 : vector<2x16xf32>
    %1382 = arith.divf %1380, %1381 : vector<2x16xf32>
    %1383 = vector.extract_strided_slice %1370 {offsets = [0, 32], sizes = [2, 16], strides = [1, 1]} : vector<2x64xf32> to vector<2x16xf32>
    %1384 = math.tanh %1383 : vector<2x16xf32>
    %1385 = vector.extract_strided_slice %1370 {offsets = [0, 48], sizes = [2, 16], strides = [1, 1]} : vector<2x64xf32> to vector<2x16xf32>
    %1386 = arith.negf %1385 : vector<2x16xf32>
    %1387 = math.exp %1386 : vector<2x16xf32>
    %cst_577 = arith.constant 1.000000e+00 : f32
    %1388 = vector.broadcast %cst_577 : f32 to vector<2x16xf32>
    %1389 = arith.addf %1388, %1387 : vector<2x16xf32>
    %1390 = arith.divf %1388, %1389 : vector<2x16xf32>
    %1391 = arith.mulf %1382, %1320 : vector<2x16xf32>
    %1392 = arith.mulf %1376, %1384 : vector<2x16xf32>
    %1393 = arith.addf %1391, %1392 : vector<2x16xf32>
    %1394 = math.tanh %1393 : vector<2x16xf32>
    %1395 = arith.mulf %1390, %1394 : vector<2x16xf32>
    %1396 = arith.index_cast %c5_i32_560 : i32 to index
    %c0_578 = arith.constant 0 : index
    %c0_579 = arith.constant 0 : index
    %1397 = vector.load %arg31[%1396, %c0_578, %c0_579] : memref<8x2x16xf32, #tpu.memory_space<vmem>>, vector<1x2x16xf32>
    %1398 = vector.shape_cast %1397 : vector<1x2x16xf32> to vector<2x16xf32>
    %1399 = vector.shape_cast %1366 : vector<2x16xf32> to vector<1x2x16xf32>
    tpu.vector_store %arg31[%1396, %c0_578, %c0_579], %1399 {strides = array<i32>} : memref<8x2x16xf32, #tpu.memory_space<vmem>>, vector<1x2x16xf32>,
    %1400 = arith.index_cast %1331 : i32 to index
    %c0_580 = arith.constant 0 : index
    %c0_581 = arith.constant 0 : index
    %1401 = vector.load %arg32[%1400, %c0_580, %c0_581] : memref<8x2x16xf32, #tpu.memory_space<vmem>>, vector<1x2x16xf32>
    %1402 = vector.shape_cast %1401 : vector<1x2x16xf32> to vector<2x16xf32>
    %1403 = vector.shape_cast %1395 : vector<2x16xf32> to vector<1x2x16xf32>
    tpu.vector_store %arg32[%1400, %c0_580, %c0_581], %1403 {strides = array<i32>} : memref<8x2x16xf32, #tpu.memory_space<vmem>>, vector<1x2x16xf32>,
    %c6_i32_582 = arith.constant 6 : i32
    %c7_i32_583 = arith.constant 7 : i32
    %1404 = arith.subi %c7_i32_583, %c6_i32_582 : i32
    %1405 = arith.truncf %1366 : vector<2x16xf32> to vector<2x16xbf16>
    %c0_584 = arith.constant 0 : index
    %c0_585 = arith.constant 0 : index
    %1406 = vector.load %arg12[%c0_584, %c0_585] : memref<16x64xbf16, #tpu.memory_space<vmem>>, vector<16x64xbf16>
    %cst_586 = arith.constant dense<0.000000e+00> : vector<2x64xf32>
    %1407 = tpu.matmul %1405, %1406, %cst_586 {dimension_numbers = #tpu.dot_dimension_numbers<[1], [0], [0], [1], [0, 0, 1, 1], [], []>} : vector<2x16xbf16>, vector<16x64xbf16>, vector<2x64xf32> -> vector<2x64xf32>
    %1408 = arith.truncf %1395 : vector<2x16xf32> to vector<2x16xbf16>
    %c0_587 = arith.constant 0 : index
    %c0_588 = arith.constant 0 : index
    %1409 = vector.load %arg13[%c0_587, %c0_588] : memref<16x64xbf16, #tpu.memory_space<vmem>>, vector<16x64xbf16>
    %cst_589 = arith.constant dense<0.000000e+00> : vector<2x64xf32>
    %1410 = tpu.matmul %1408, %1409, %cst_589 {dimension_numbers = #tpu.dot_dimension_numbers<[1], [0], [0], [1], [0, 0, 1, 1], [], []>} : vector<2x16xbf16>, vector<16x64xbf16>, vector<2x64xf32> -> vector<2x64xf32>
    %1411 = arith.index_cast %c6_i32_582 : i32 to index
    %c0_590 = arith.constant 0 : index
    %c0_591 = arith.constant 0 : index
    %1412 = vector.load %arg29[%1411, %c0_590, %c0_591] : memref<8x2x64xf32, #tpu.memory_space<vmem>>, vector<1x2x64xf32>
    %1413 = vector.shape_cast %1412 : vector<1x2x64xf32> to vector<2x64xf32>
    %1414 = arith.addf %1407, %1413 : vector<2x64xf32>
    %1415 = vector.extract_strided_slice %1414 {offsets = [0, 0], sizes = [2, 16], strides = [1, 1]} : vector<2x64xf32> to vector<2x16xf32>
    %1416 = arith.negf %1415 : vector<2x16xf32>
    %1417 = math.exp %1416 : vector<2x16xf32>
    %cst_592 = arith.constant 1.000000e+00 : f32
    %1418 = vector.broadcast %cst_592 : f32 to vector<2x16xf32>
    %1419 = arith.addf %1418, %1417 : vector<2x16xf32>
    %1420 = arith.divf %1418, %1419 : vector<2x16xf32>
    %1421 = vector.extract_strided_slice %1414 {offsets = [0, 16], sizes = [2, 16], strides = [1, 1]} : vector<2x64xf32> to vector<2x16xf32>
    %1422 = arith.negf %1421 : vector<2x16xf32>
    %1423 = math.exp %1422 : vector<2x16xf32>
    %cst_593 = arith.constant 1.000000e+00 : f32
    %1424 = vector.broadcast %cst_593 : f32 to vector<2x16xf32>
    %1425 = arith.addf %1424, %1423 : vector<2x16xf32>
    %1426 = arith.divf %1424, %1425 : vector<2x16xf32>
    %1427 = vector.extract_strided_slice %1414 {offsets = [0, 32], sizes = [2, 16], strides = [1, 1]} : vector<2x64xf32> to vector<2x16xf32>
    %1428 = math.tanh %1427 : vector<2x16xf32>
    %1429 = vector.extract_strided_slice %1414 {offsets = [0, 48], sizes = [2, 16], strides = [1, 1]} : vector<2x64xf32> to vector<2x16xf32>
    %1430 = arith.negf %1429 : vector<2x16xf32>
    %1431 = math.exp %1430 : vector<2x16xf32>
    %cst_594 = arith.constant 1.000000e+00 : f32
    %1432 = vector.broadcast %cst_594 : f32 to vector<2x16xf32>
    %1433 = arith.addf %1432, %1431 : vector<2x16xf32>
    %1434 = arith.divf %1432, %1433 : vector<2x16xf32>
    %1435 = arith.mulf %1426, %1364 : vector<2x16xf32>
    %1436 = arith.mulf %1420, %1428 : vector<2x16xf32>
    %1437 = arith.addf %1435, %1436 : vector<2x16xf32>
    %1438 = math.tanh %1437 : vector<2x16xf32>
    %1439 = arith.mulf %1434, %1438 : vector<2x16xf32>
    %1440 = arith.index_cast %1404 : i32 to index
    %c0_595 = arith.constant 0 : index
    %c0_596 = arith.constant 0 : index
    %1441 = vector.load %arg30[%1440, %c0_595, %c0_596] : memref<8x2x64xf32, #tpu.memory_space<vmem>>, vector<1x2x64xf32>
    %1442 = vector.shape_cast %1441 : vector<1x2x64xf32> to vector<2x64xf32>
    %1443 = arith.addf %1410, %1442 : vector<2x64xf32>
    %1444 = vector.extract_strided_slice %1443 {offsets = [0, 0], sizes = [2, 16], strides = [1, 1]} : vector<2x64xf32> to vector<2x16xf32>
    %1445 = arith.negf %1444 : vector<2x16xf32>
    %1446 = math.exp %1445 : vector<2x16xf32>
    %cst_597 = arith.constant 1.000000e+00 : f32
    %1447 = vector.broadcast %cst_597 : f32 to vector<2x16xf32>
    %1448 = arith.addf %1447, %1446 : vector<2x16xf32>
    %1449 = arith.divf %1447, %1448 : vector<2x16xf32>
    %1450 = vector.extract_strided_slice %1443 {offsets = [0, 16], sizes = [2, 16], strides = [1, 1]} : vector<2x64xf32> to vector<2x16xf32>
    %1451 = arith.negf %1450 : vector<2x16xf32>
    %1452 = math.exp %1451 : vector<2x16xf32>
    %cst_598 = arith.constant 1.000000e+00 : f32
    %1453 = vector.broadcast %cst_598 : f32 to vector<2x16xf32>
    %1454 = arith.addf %1453, %1452 : vector<2x16xf32>
    %1455 = arith.divf %1453, %1454 : vector<2x16xf32>
    %1456 = vector.extract_strided_slice %1443 {offsets = [0, 32], sizes = [2, 16], strides = [1, 1]} : vector<2x64xf32> to vector<2x16xf32>
    %1457 = math.tanh %1456 : vector<2x16xf32>
    %1458 = vector.extract_strided_slice %1443 {offsets = [0, 48], sizes = [2, 16], strides = [1, 1]} : vector<2x64xf32> to vector<2x16xf32>
    %1459 = arith.negf %1458 : vector<2x16xf32>
    %1460 = math.exp %1459 : vector<2x16xf32>
    %cst_599 = arith.constant 1.000000e+00 : f32
    %1461 = vector.broadcast %cst_599 : f32 to vector<2x16xf32>
    %1462 = arith.addf %1461, %1460 : vector<2x16xf32>
    %1463 = arith.divf %1461, %1462 : vector<2x16xf32>
    %1464 = arith.mulf %1455, %1393 : vector<2x16xf32>
    %1465 = arith.mulf %1449, %1457 : vector<2x16xf32>
    %1466 = arith.addf %1464, %1465 : vector<2x16xf32>
    %1467 = math.tanh %1466 : vector<2x16xf32>
    %1468 = arith.mulf %1463, %1467 : vector<2x16xf32>
    %1469 = arith.index_cast %c6_i32_582 : i32 to index
    %c0_600 = arith.constant 0 : index
    %c0_601 = arith.constant 0 : index
    %1470 = vector.load %arg31[%1469, %c0_600, %c0_601] : memref<8x2x16xf32, #tpu.memory_space<vmem>>, vector<1x2x16xf32>
    %1471 = vector.shape_cast %1470 : vector<1x2x16xf32> to vector<2x16xf32>
    %1472 = vector.shape_cast %1439 : vector<2x16xf32> to vector<1x2x16xf32>
    tpu.vector_store %arg31[%1469, %c0_600, %c0_601], %1472 {strides = array<i32>} : memref<8x2x16xf32, #tpu.memory_space<vmem>>, vector<1x2x16xf32>,
    %1473 = arith.index_cast %1404 : i32 to index
    %c0_602 = arith.constant 0 : index
    %c0_603 = arith.constant 0 : index
    %1474 = vector.load %arg32[%1473, %c0_602, %c0_603] : memref<8x2x16xf32, #tpu.memory_space<vmem>>, vector<1x2x16xf32>
    %1475 = vector.shape_cast %1474 : vector<1x2x16xf32> to vector<2x16xf32>
    %1476 = vector.shape_cast %1468 : vector<2x16xf32> to vector<1x2x16xf32>
    tpu.vector_store %arg32[%1473, %c0_602, %c0_603], %1476 {strides = array<i32>} : memref<8x2x16xf32, #tpu.memory_space<vmem>>, vector<1x2x16xf32>,
    %c7_i32_604 = arith.constant 7 : i32
    %c7_i32_605 = arith.constant 7 : i32
    %1477 = arith.subi %c7_i32_605, %c7_i32_604 : i32
    %1478 = arith.truncf %1439 : vector<2x16xf32> to vector<2x16xbf16>
    %c0_606 = arith.constant 0 : index
    %c0_607 = arith.constant 0 : index
    %1479 = vector.load %arg12[%c0_606, %c0_607] : memref<16x64xbf16, #tpu.memory_space<vmem>>, vector<16x64xbf16>
    %cst_608 = arith.constant dense<0.000000e+00> : vector<2x64xf32>
    %1480 = tpu.matmul %1478, %1479, %cst_608 {dimension_numbers = #tpu.dot_dimension_numbers<[1], [0], [0], [1], [0, 0, 1, 1], [], []>} : vector<2x16xbf16>, vector<16x64xbf16>, vector<2x64xf32> -> vector<2x64xf32>
    %1481 = arith.truncf %1468 : vector<2x16xf32> to vector<2x16xbf16>
    %c0_609 = arith.constant 0 : index
    %c0_610 = arith.constant 0 : index
    %1482 = vector.load %arg13[%c0_609, %c0_610] : memref<16x64xbf16, #tpu.memory_space<vmem>>, vector<16x64xbf16>
    %cst_611 = arith.constant dense<0.000000e+00> : vector<2x64xf32>
    %1483 = tpu.matmul %1481, %1482, %cst_611 {dimension_numbers = #tpu.dot_dimension_numbers<[1], [0], [0], [1], [0, 0, 1, 1], [], []>} : vector<2x16xbf16>, vector<16x64xbf16>, vector<2x64xf32> -> vector<2x64xf32>
    %1484 = arith.index_cast %c7_i32_604 : i32 to index
    %c0_612 = arith.constant 0 : index
    %c0_613 = arith.constant 0 : index
    %1485 = vector.load %arg29[%1484, %c0_612, %c0_613] : memref<8x2x64xf32, #tpu.memory_space<vmem>>, vector<1x2x64xf32>
    %1486 = vector.shape_cast %1485 : vector<1x2x64xf32> to vector<2x64xf32>
    %1487 = arith.addf %1480, %1486 : vector<2x64xf32>
    %1488 = vector.extract_strided_slice %1487 {offsets = [0, 0], sizes = [2, 16], strides = [1, 1]} : vector<2x64xf32> to vector<2x16xf32>
    %1489 = arith.negf %1488 : vector<2x16xf32>
    %1490 = math.exp %1489 : vector<2x16xf32>
    %cst_614 = arith.constant 1.000000e+00 : f32
    %1491 = vector.broadcast %cst_614 : f32 to vector<2x16xf32>
    %1492 = arith.addf %1491, %1490 : vector<2x16xf32>
    %1493 = arith.divf %1491, %1492 : vector<2x16xf32>
    %1494 = vector.extract_strided_slice %1487 {offsets = [0, 16], sizes = [2, 16], strides = [1, 1]} : vector<2x64xf32> to vector<2x16xf32>
    %1495 = arith.negf %1494 : vector<2x16xf32>
    %1496 = math.exp %1495 : vector<2x16xf32>
    %cst_615 = arith.constant 1.000000e+00 : f32
    %1497 = vector.broadcast %cst_615 : f32 to vector<2x16xf32>
    %1498 = arith.addf %1497, %1496 : vector<2x16xf32>
    %1499 = arith.divf %1497, %1498 : vector<2x16xf32>
    %1500 = vector.extract_strided_slice %1487 {offsets = [0, 32], sizes = [2, 16], strides = [1, 1]} : vector<2x64xf32> to vector<2x16xf32>
    %1501 = math.tanh %1500 : vector<2x16xf32>
    %1502 = vector.extract_strided_slice %1487 {offsets = [0, 48], sizes = [2, 16], strides = [1, 1]} : vector<2x64xf32> to vector<2x16xf32>
    %1503 = arith.negf %1502 : vector<2x16xf32>
    %1504 = math.exp %1503 : vector<2x16xf32>
    %cst_616 = arith.constant 1.000000e+00 : f32
    %1505 = vector.broadcast %cst_616 : f32 to vector<2x16xf32>
    %1506 = arith.addf %1505, %1504 : vector<2x16xf32>
    %1507 = arith.divf %1505, %1506 : vector<2x16xf32>
    %1508 = arith.mulf %1499, %1437 : vector<2x16xf32>
    %1509 = arith.mulf %1493, %1501 : vector<2x16xf32>
    %1510 = arith.addf %1508, %1509 : vector<2x16xf32>
    %1511 = math.tanh %1510 : vector<2x16xf32>
    %1512 = arith.mulf %1507, %1511 : vector<2x16xf32>
    %1513 = arith.index_cast %1477 : i32 to index
    %c0_617 = arith.constant 0 : index
    %c0_618 = arith.constant 0 : index
    %1514 = vector.load %arg30[%1513, %c0_617, %c0_618] : memref<8x2x64xf32, #tpu.memory_space<vmem>>, vector<1x2x64xf32>
    %1515 = vector.shape_cast %1514 : vector<1x2x64xf32> to vector<2x64xf32>
    %1516 = arith.addf %1483, %1515 : vector<2x64xf32>
    %1517 = vector.extract_strided_slice %1516 {offsets = [0, 0], sizes = [2, 16], strides = [1, 1]} : vector<2x64xf32> to vector<2x16xf32>
    %1518 = arith.negf %1517 : vector<2x16xf32>
    %1519 = math.exp %1518 : vector<2x16xf32>
    %cst_619 = arith.constant 1.000000e+00 : f32
    %1520 = vector.broadcast %cst_619 : f32 to vector<2x16xf32>
    %1521 = arith.addf %1520, %1519 : vector<2x16xf32>
    %1522 = arith.divf %1520, %1521 : vector<2x16xf32>
    %1523 = vector.extract_strided_slice %1516 {offsets = [0, 16], sizes = [2, 16], strides = [1, 1]} : vector<2x64xf32> to vector<2x16xf32>
    %1524 = arith.negf %1523 : vector<2x16xf32>
    %1525 = math.exp %1524 : vector<2x16xf32>
    %cst_620 = arith.constant 1.000000e+00 : f32
    %1526 = vector.broadcast %cst_620 : f32 to vector<2x16xf32>
    %1527 = arith.addf %1526, %1525 : vector<2x16xf32>
    %1528 = arith.divf %1526, %1527 : vector<2x16xf32>
    %1529 = vector.extract_strided_slice %1516 {offsets = [0, 32], sizes = [2, 16], strides = [1, 1]} : vector<2x64xf32> to vector<2x16xf32>
    %1530 = math.tanh %1529 : vector<2x16xf32>
    %1531 = vector.extract_strided_slice %1516 {offsets = [0, 48], sizes = [2, 16], strides = [1, 1]} : vector<2x64xf32> to vector<2x16xf32>
    %1532 = arith.negf %1531 : vector<2x16xf32>
    %1533 = math.exp %1532 : vector<2x16xf32>
    %cst_621 = arith.constant 1.000000e+00 : f32
    %1534 = vector.broadcast %cst_621 : f32 to vector<2x16xf32>
    %1535 = arith.addf %1534, %1533 : vector<2x16xf32>
    %1536 = arith.divf %1534, %1535 : vector<2x16xf32>
    %1537 = arith.mulf %1528, %1466 : vector<2x16xf32>
    %1538 = arith.mulf %1522, %1530 : vector<2x16xf32>
    %1539 = arith.addf %1537, %1538 : vector<2x16xf32>
    %1540 = math.tanh %1539 : vector<2x16xf32>
    %1541 = arith.mulf %1536, %1540 : vector<2x16xf32>
    %1542 = arith.index_cast %c7_i32_604 : i32 to index
    %c0_622 = arith.constant 0 : index
    %c0_623 = arith.constant 0 : index
    %1543 = vector.load %arg31[%1542, %c0_622, %c0_623] : memref<8x2x16xf32, #tpu.memory_space<vmem>>, vector<1x2x16xf32>
    %1544 = vector.shape_cast %1543 : vector<1x2x16xf32> to vector<2x16xf32>
    %1545 = vector.shape_cast %1512 : vector<2x16xf32> to vector<1x2x16xf32>
    tpu.vector_store %arg31[%1542, %c0_622, %c0_623], %1545 {strides = array<i32>} : memref<8x2x16xf32, #tpu.memory_space<vmem>>, vector<1x2x16xf32>,
    %1546 = arith.index_cast %1477 : i32 to index
    %c0_624 = arith.constant 0 : index
    %c0_625 = arith.constant 0 : index
    %1547 = vector.load %arg32[%1546, %c0_624, %c0_625] : memref<8x2x16xf32, #tpu.memory_space<vmem>>, vector<1x2x16xf32>
    %1548 = vector.shape_cast %1547 : vector<1x2x16xf32> to vector<2x16xf32>
    %1549 = vector.shape_cast %1541 : vector<2x16xf32> to vector<1x2x16xf32>
    tpu.vector_store %arg32[%1546, %c0_624, %c0_625], %1549 {strides = array<i32>} : memref<8x2x16xf32, #tpu.memory_space<vmem>>, vector<1x2x16xf32>,
    %c8_i32_626 = arith.constant 8 : i32
    %c0_627 = arith.constant 0 : index
    %c0_628 = arith.constant 0 : index
    %c0_629 = arith.constant 0 : index
    %1550 = vector.load %arg31[%c0_627, %c0_628, %c0_629] : memref<8x2x16xf32, #tpu.memory_space<vmem>>, vector<8x2x16xf32>
    %c0_630 = arith.constant 0 : index
    %c0_631 = arith.constant 0 : index
    %c0_632 = arith.constant 0 : index
    %1551 = vector.load %arg32[%c0_630, %c0_631, %c0_632] : memref<8x2x16xf32, #tpu.memory_space<vmem>>, vector<8x2x16xf32>
    %c0_633 = arith.constant 0 : index
    %c0_634 = arith.constant 0 : index
    %c0_635 = arith.constant 0 : index
    %1552 = vector.load %arg16[%c0_633, %c0_634, %c0_635] : memref<1x1x16xf32, #tpu.memory_space<vmem>>, vector<1x1x16xf32>
    %1553 = vector.broadcast %1552 : vector<1x1x16xf32> to vector<8x2x16xf32>
    %1554 = arith.mulf %1550, %1553 : vector<8x2x16xf32>
    %cst_636 = arith.constant dense<0.000000e+00> : vector<8x2xf32>
    %1555 = vector.multi_reduction <add>, %1554, %cst_636 [2] : vector<8x2x16xf32> to vector<8x2xf32>
    %1556 = vector.shape_cast %1555 : vector<8x2xf32> to vector<8x2x1xf32>
    %c0_637 = arith.constant 0 : index
    %c0_638 = arith.constant 0 : index
    %c0_639 = arith.constant 0 : index
    %1557 = vector.load %arg17[%c0_637, %c0_638, %c0_639] : memref<1x1x16xf32, #tpu.memory_space<vmem>>, vector<1x1x16xf32>
    %1558 = vector.broadcast %1557 : vector<1x1x16xf32> to vector<8x2x16xf32>
    %1559 = arith.mulf %1551, %1558 : vector<8x2x16xf32>
    %cst_640 = arith.constant dense<0.000000e+00> : vector<8x2xf32>
    %1560 = vector.multi_reduction <add>, %1559, %cst_640 [2] : vector<8x2x16xf32> to vector<8x2xf32>
    %1561 = vector.shape_cast %1560 : vector<8x2xf32> to vector<8x2x1xf32>
    %1562 = arith.addf %1556, %1561 : vector<8x2x1xf32>
    %c0_641 = arith.constant 0 : index
    %c0_642 = arith.constant 0 : index
    %c0_643 = arith.constant 0 : index
    %1563 = vector.load %arg18[%c0_641, %c0_642, %c0_643] : memref<8x1x1xf32, #tpu.memory_space<vmem>>, vector<8x1x1xf32>
    %1564 = vector.broadcast %1563 : vector<8x1x1xf32> to vector<8x2x1xf32>
    %1565 = arith.addf %1562, %1564 : vector<8x2x1xf32>
    %1566 = math.tanh %1565 : vector<8x2x1xf32>
    %1567 = math.exp %1566 : vector<8x2x1xf32>
    %cst_644 = arith.constant dense<0.000000e+00> : vector<2x1xf32>
    %1568 = vector.multi_reduction <add>, %1567, %cst_644 [0] : vector<8x2x1xf32> to vector<2x1xf32>
    %1569 = vector.shape_cast %1568 : vector<2x1xf32> to vector<1x2x1xf32>
    %cst_645 = arith.constant 1.000000e-10 : f32
    %1570 = vector.broadcast %cst_645 : f32 to vector<1x2x1xf32>
    %1571 = arith.addf %1569, %1570 : vector<1x2x1xf32>
    %1572 = vector.broadcast %1571 : vector<1x2x1xf32> to vector<8x2x1xf32>
    %1573 = arith.divf %1567, %1572 : vector<8x2x1xf32>
    %1574 = vector.broadcast %1573 : vector<8x2x1xf32> to vector<8x2x16xf32>
    %1575 = arith.mulf %1550, %1574 : vector<8x2x16xf32>
    %cst_646 = arith.constant dense<0.000000e+00> : vector<2x16xf32>
    %1576 = vector.multi_reduction <add>, %1575, %cst_646 [0] : vector<8x2x16xf32> to vector<2x16xf32>
    %1577 = vector.broadcast %1573 : vector<8x2x1xf32> to vector<8x2x16xf32>
    %1578 = arith.mulf %1551, %1577 : vector<8x2x16xf32>
    %cst_647 = arith.constant dense<0.000000e+00> : vector<2x16xf32>
    %1579 = vector.multi_reduction <add>, %1578, %cst_647 [0] : vector<8x2x16xf32> to vector<2x16xf32>
    %1580 = arith.truncf %1576 : vector<2x16xf32> to vector<2x16xbf16>
    %c0_648 = arith.constant 0 : index
    %c0_649 = arith.constant 0 : index
    %1581 = vector.load %arg19[%c0_648, %c0_649] : memref<16x32xbf16, #tpu.memory_space<vmem>>, vector<16x32xbf16>
    %cst_650 = arith.constant dense<0.000000e+00> : vector<2x32xf32>
    %1582 = tpu.matmul %1580, %1581, %cst_650 {dimension_numbers = #tpu.dot_dimension_numbers<[1], [0], [0], [1], [0, 0, 1, 1], [], []>} : vector<2x16xbf16>, vector<16x32xbf16>, vector<2x32xf32> -> vector<2x32xf32>
    %1583 = arith.truncf %1579 : vector<2x16xf32> to vector<2x16xbf16>
    %c0_651 = arith.constant 0 : index
    %c0_652 = arith.constant 0 : index
    %1584 = vector.load %arg20[%c0_651, %c0_652] : memref<16x32xbf16, #tpu.memory_space<vmem>>, vector<16x32xbf16>
    %cst_653 = arith.constant dense<0.000000e+00> : vector<2x32xf32>
    %1585 = tpu.matmul %1583, %1584, %cst_653 {dimension_numbers = #tpu.dot_dimension_numbers<[1], [0], [0], [1], [0, 0, 1, 1], [], []>} : vector<2x16xbf16>, vector<16x32xbf16>, vector<2x32xf32> -> vector<2x32xf32>
    %1586 = arith.addf %1582, %1585 : vector<2x32xf32>
    %c0_654 = arith.constant 0 : index
    %c0_655 = arith.constant 0 : index
    %1587 = vector.load %arg21[%c0_654, %c0_655] : memref<1x32xf32, #tpu.memory_space<vmem>>, vector<1x32xf32>
    %1588 = vector.broadcast %1587 : vector<1x32xf32> to vector<2x32xf32>
    %1589 = arith.addf %1586, %1588 : vector<2x32xf32>
    %cst_656 = arith.constant 0.000000e+00 : f32
    %1590 = vector.broadcast %cst_656 : f32 to vector<2x32xf32>
    %1591 = arith.maximumf %1589, %1590 : vector<2x32xf32>
    %1592 = arith.truncf %1591 : vector<2x32xf32> to vector<2x32xbf16>
    %c0_657 = arith.constant 0 : index
    %c0_658 = arith.constant 0 : index
    %1593 = vector.load %arg22[%c0_657, %c0_658] : memref<32x1xbf16, #tpu.memory_space<vmem>>, vector<32x1xbf16>
    %cst_659 = arith.constant dense<0.000000e+00> : vector<2x1xf32>
    %1594 = tpu.matmul %1592, %1593, %cst_659 {dimension_numbers = #tpu.dot_dimension_numbers<[1], [0], [0], [1], [0, 0, 1, 1], [], []>} : vector<2x32xbf16>, vector<32x1xbf16>, vector<2x1xf32> -> vector<2x1xf32>
    %c0_660 = arith.constant 0 : index
    %c0_661 = arith.constant 0 : index
    %1595 = vector.load %arg23[%c0_660, %c0_661] : memref<1x1xf32, #tpu.memory_space<vmem>>, vector<1x1xf32>
    %1596 = vector.broadcast %1595 : vector<1x1xf32> to vector<2x1xf32>
    %1597 = arith.addf %1594, %1596 : vector<2x1xf32>
    %c0_662 = arith.constant 0 : index
    %c0_663 = arith.constant 0 : index
    %1598 = vector.load %arg24[%c0_662, %c0_663] : memref<2x1xf32, #tpu.memory_space<vmem>>, vector<2x1xf32>
    tpu.vector_store %arg24[%c0_662, %c0_663], %1597 {strides = array<i32>} : memref<2x1xf32, #tpu.memory_space<vmem>>, vector<2x1xf32>,
    return
  }
  func.func @transform_0(%arg0: i32) -> (i32, i32, i32) {
    %c0_i32 = arith.constant 0 : i32
    %c0_i32_0 = arith.constant 0 : i32
    %c0_i32_1 = arith.constant 0 : i32
    return %c0_i32, %arg0, %c0_i32_0 : i32, i32, i32
  }
  func.func @transform_1(%arg0: i32) -> (i32, i32) {
    %c0_i32 = arith.constant 0 : i32
    %c0_i32_0 = arith.constant 0 : i32
    %c0_i32_1 = arith.constant 0 : i32
    return %c0_i32, %c0_i32_0 : i32, i32
  }
  func.func @transform_2(%arg0: i32) -> (i32, i32) {
    %c0_i32 = arith.constant 0 : i32
    %c0_i32_0 = arith.constant 0 : i32
    %c0_i32_1 = arith.constant 0 : i32
    return %c0_i32, %c0_i32_0 : i32, i32
  }
  func.func @transform_3(%arg0: i32) -> (i32, i32) {
    %c0_i32 = arith.constant 0 : i32
    %c0_i32_0 = arith.constant 0 : i32
    %c0_i32_1 = arith.constant 0 : i32
    return %c0_i32, %c0_i32_0 : i32, i32
  }
  func.func @transform_4(%arg0: i32) -> (i32, i32) {
    %c0_i32 = arith.constant 0 : i32
    %c0_i32_0 = arith.constant 0 : i32
    %c0_i32_1 = arith.constant 0 : i32
    return %c0_i32, %c0_i32_0 : i32, i32
  }
  func.func @transform_5(%arg0: i32) -> (i32, i32) {
    %c0_i32 = arith.constant 0 : i32
    %c0_i32_0 = arith.constant 0 : i32
    %c0_i32_1 = arith.constant 0 : i32
    return %c0_i32, %c0_i32_0 : i32, i32
  }
  func.func @transform_6(%arg0: i32) -> (i32, i32) {
    %c0_i32 = arith.constant 0 : i32
    %c0_i32_0 = arith.constant 0 : i32
    %c0_i32_1 = arith.constant 0 : i32
    return %c0_i32, %c0_i32_0 : i32, i32
  }
  func.func @transform_7(%arg0: i32) -> (i32, i32) {
    %c0_i32 = arith.constant 0 : i32
    %c0_i32_0 = arith.constant 0 : i32
    %c0_i32_1 = arith.constant 0 : i32
    return %c0_i32, %c0_i32_0 : i32, i32
  }
  func.func @transform_8(%arg0: i32) -> (i32, i32) {
    %c0_i32 = arith.constant 0 : i32
    %c0_i32_0 = arith.constant 0 : i32
    %c0_i32_1 = arith.constant 0 : i32
    return %c0_i32, %c0_i32_0 : i32, i32
  }
  func.func @transform_9(%arg0: i32) -> (i32, i32) {
    %c0_i32 = arith.constant 0 : i32
    %c0_i32_0 = arith.constant 0 : i32
    %c0_i32_1 = arith.constant 0 : i32
    return %c0_i32, %c0_i32_0 : i32, i32
  }
  func.func @transform_10(%arg0: i32) -> (i32, i32) {
    %c0_i32 = arith.constant 0 : i32
    %c0_i32_0 = arith.constant 0 : i32
    %c0_i32_1 = arith.constant 0 : i32
    return %c0_i32, %c0_i32_0 : i32, i32
  }
  func.func @transform_11(%arg0: i32) -> (i32, i32) {
    %c0_i32 = arith.constant 0 : i32
    %c0_i32_0 = arith.constant 0 : i32
    %c0_i32_1 = arith.constant 0 : i32
    return %c0_i32, %c0_i32_0 : i32, i32
  }
  func.func @transform_12(%arg0: i32) -> (i32, i32) {
    %c0_i32 = arith.constant 0 : i32
    %c0_i32_0 = arith.constant 0 : i32
    %c0_i32_1 = arith.constant 0 : i32
    return %c0_i32, %c0_i32_0 : i32, i32
  }
  func.func @transform_13(%arg0: i32) -> (i32, i32) {
    %c0_i32 = arith.constant 0 : i32
    %c0_i32_0 = arith.constant 0 : i32
    %c0_i32_1 = arith.constant 0 : i32
    return %c0_i32, %c0_i32_0 : i32, i32
  }
  func.func @transform_14(%arg0: i32) -> (i32, i32) {
    %c0_i32 = arith.constant 0 : i32
    %c0_i32_0 = arith.constant 0 : i32
    %c0_i32_1 = arith.constant 0 : i32
    return %c0_i32, %c0_i32_0 : i32, i32
  }
  func.func @transform_15(%arg0: i32) -> (i32, i32, i32) {
    %c0_i32 = arith.constant 0 : i32
    %c0_i32_0 = arith.constant 0 : i32
    %c0_i32_1 = arith.constant 0 : i32
    %c0_i32_2 = arith.constant 0 : i32
    return %c0_i32, %c0_i32_0, %c0_i32_1 : i32, i32, i32
  }
  func.func @transform_16(%arg0: i32) -> (i32, i32, i32) {
    %c0_i32 = arith.constant 0 : i32
    %c0_i32_0 = arith.constant 0 : i32
    %c0_i32_1 = arith.constant 0 : i32
    %c0_i32_2 = arith.constant 0 : i32
    return %c0_i32, %c0_i32_0, %c0_i32_1 : i32, i32, i32
  }
  func.func @transform_17(%arg0: i32) -> (i32, i32, i32) {
    %c0_i32 = arith.constant 0 : i32
    %c0_i32_0 = arith.constant 0 : i32
    %c0_i32_1 = arith.constant 0 : i32
    %c0_i32_2 = arith.constant 0 : i32
    return %c0_i32, %c0_i32_0, %c0_i32_1 : i32, i32, i32
  }
  func.func @transform_18(%arg0: i32) -> (i32, i32) {
    %c0_i32 = arith.constant 0 : i32
    %c0_i32_0 = arith.constant 0 : i32
    %c0_i32_1 = arith.constant 0 : i32
    return %c0_i32, %c0_i32_0 : i32, i32
  }
  func.func @transform_19(%arg0: i32) -> (i32, i32) {
    %c0_i32 = arith.constant 0 : i32
    %c0_i32_0 = arith.constant 0 : i32
    %c0_i32_1 = arith.constant 0 : i32
    return %c0_i32, %c0_i32_0 : i32, i32
  }
  func.func @transform_20(%arg0: i32) -> (i32, i32) {
    %c0_i32 = arith.constant 0 : i32
    %c0_i32_0 = arith.constant 0 : i32
    %c0_i32_1 = arith.constant 0 : i32
    return %c0_i32, %c0_i32_0 : i32, i32
  }
  func.func @transform_21(%arg0: i32) -> (i32, i32) {
    %c0_i32 = arith.constant 0 : i32
    %c0_i32_0 = arith.constant 0 : i32
    %c0_i32_1 = arith.constant 0 : i32
    return %c0_i32, %c0_i32_0 : i32, i32
  }
  func.func @transform_22(%arg0: i32) -> (i32, i32) {
    %c0_i32 = arith.constant 0 : i32
    %c0_i32_0 = arith.constant 0 : i32
    %c0_i32_1 = arith.constant 0 : i32
    return %c0_i32, %c0_i32_0 : i32, i32
  }
  func.func @transform_23(%arg0: i32) -> (i32, i32) {
    %c0_i32 = arith.constant 0 : i32
    %c0_i32_0 = arith.constant 0 : i32
    return %arg0, %c0_i32 : i32, i32
  }
}

</mosaic_0001>

<bundles_post_ra>
// kernel: lstm_attention_net.1
= control target key start
LH: loop header
LB: loop body
LE: loop exit
PB: predicated region body
PF: predicated region fallthrough
CT: control target
= control target key end

     0   :  { %v7722_v0 = vmov 0.0   ;;  %vm101_vm0 = vcmask 130048   ;;  %vm7723_vm1 = vmmov 0   ;;  %v7724_v4 = vmov 0   ;;  %s7726_s30 = smov 32   ;;  %s7729_s25 = smov 80   ;;  %s9376_s1 = inlined_call_operand.vmem [shape: bf16[16,128], index: 1, kind: input, shape index: {}]   ;;  %s9377_s2 = inlined_call_operand.vmem [shape: bf16[16,128], index: 2, kind: input, shape index: {}]   ;;  %s9378_s0 = inlined_call_operand.vmem [shape: f32[8,2,16], index: 0, kind: input, shape index: {}]   ;;  %s9379_s3 = inlined_call_operand.vmem [shape: bf16[32,128], index: 3, kind: input, shape index: {}]   ;;  %s9380_s4 = inlined_call_operand.vmem [shape: bf16[32,128], index: 4, kind: input, shape index: {}]   ;;  %s9381_s5 = inlined_call_operand.vmem [shape: f32[1,128], index: 5, kind: input, shape index: {}]   ;;  %s9382_s6 = inlined_call_operand.vmem [shape: f32[1,128], index: 6, kind: input, shape index: {}]   ;;  %s9383_s7 = inlined_call_operand.vmem [shape: bf16[32,64], index: 7, kind: input, shape index: {}]   ;;  %s9384_s9 = inlined_call_operand.vmem [shape: bf16[32,64], index: 9, kind: input, shape index: {}]   ;;  %s9385_s8 = inlined_call_operand.vmem [shape: bf16[32,64], index: 8, kind: input, shape index: {}]   ;;  %s9386_s10 = inlined_call_operand.vmem [shape: bf16[32,64], index: 10, kind: input, shape index: {}]   ;;  %s9387_s12 = inlined_call_operand.vmem [shape: bf16[16,64], index: 12, kind: input, shape index: {}]   ;;  %s9388_s11 = inlined_call_operand.vmem [shape: bf16[16,64], index: 11, kind: input, shape index: {}]   ;;  %s9389_s13 = inlined_call_operand.vmem [shape: f32[1,64], index: 13, kind: input, shape index: {}]   ;;  %s9390_s14 = inlined_call_operand.vmem [shape: f32[1,64], index: 14, kind: input, shape index: {}]   ;;  %s9391_s15 = inlined_call_operand.vmem [shape: f32[1,1,16], index: 15, kind: input, shape index: {}]   ;;  %s9392_s16 = inlined_call_operand.vmem [shape: f32[1,1,16], index: 16, kind: input, shape index: {}]   ;;  %s9393_s17 = inlined_call_operand.vmem [shape: f32[8,1,1], index: 17, kind: input, shape index: {}]   ;;  %s9394_s19 = inlined_call_operand.vmem [shape: bf16[16,32], index: 19, kind: input, shape index: {}]   ;;  %s9395_s18 = inlined_call_operand.vmem [shape: bf16[16,32], index: 18, kind: input, shape index: {}]   ;;  %s9396_s21 = inlined_call_operand.vmem [shape: bf16[32,1], index: 21, kind: input, shape index: {}]   ;;  %s9397_s22 = inlined_call_operand.<no memory space> [shape: f32[1,1], index: 22, kind: input, shape index: {}]   ;;  %s9398_s20 = inlined_call_operand.vmem [shape: f32[1,32], index: 20, kind: input, shape index: {}]   ;;  %s9399_s23 = inlined_call_operand.vmem [shape: f32[2,1], index: 23, kind: output, shape index: {}]  }
   0x1   :  { %9406 = sst [smem:[#allocation11_spill]] %s9376_s1  ;;  %6694 = vmatprep.subr.bf16.mxu0 %v7722_v0  ;;  %6700 = vmatprep.subr.bf16.mxu1 %v7722_v0  ;;  %vm958_vm2 = vcmask 261120   ;;  %vm1107_vm3 = vcmask 254976   ;;  %vm2567_vm4 = vcmask 517120   ;;  %vm4515_vm5 = vcmask 123904  }
   0x2   :  { %9407 = sst [smem:[#allocation12_spill]] %s9377_s2  ;;  %6696 = vmatprep.mubr.msk.bf16.mxu0 %vm7723_vm1, %v7722_v0  ;;  %6702 = vmatprep.mubr.msk.bf16.mxu1 %vm7723_vm1, %v7722_v0  ;;  %vm5916_vm6 = vcmask 1024  }
   0x3   :  { %9408 = sst [smem:[#allocation13_spill]] %s9378_s0  ;;  %7299 = vset.pattern.permute.xlu0 %v7724_v4  ;;  %7298 = vset.pattern.permute.xlu1 %v7724_v4 }
   0x4   :  { %9409 = sst [smem:[#allocation14_spill]] %s9379_s3 }
   0x5   :  { %9410 = sst [smem:[#allocation15_spill]] %s9380_s4 }
   0x6   :  { %9411 = sst [smem:[#allocation16_spill]] %s9381_s5 }
   0x7   :  { %9412 = sst [smem:[#allocation17_spill]] %s9382_s6 }
   0x8   :  { %9413 = sst [smem:[#allocation18_spill]] %s9383_s7 }
   0x9   :  { %s9414_s24 = sld [smem:[#allocation11_spill]] }
   0xa   :  { %s9415_s2 = sld [smem:[#allocation12_spill]] }
   0xb   :  { %s9416_s6 = sld [smem:[#allocation13_spill]] }
   0xc   :  { %s9417_s4 = sld [smem:[#allocation14_spill]] }
   0xd   :  { %s9418_s5 = sld [smem:[#allocation15_spill]] }
   0xe   :  { %s9419_s29 = sld [smem:[#allocation16_spill]] }
   0xf   :  { %v7300_v1 = vld [vmem:[%s9414_s24] sm:$0xff]  }
  0x10   :  { %v7301_v2 = vld [vmem:[%s9415_s2] sm:$0xff]   ;;  %6695 = vmatpush3.bf16.msra.mxu0 %v7300_v1 }
  0x11   :  { %v91_v3 = vld [vmem:[%s9416_s6] sm:$0x3]  ;;  %6701 = vmatpush3.bf16.msra.mxu1 %v7301_v2  ;;  %6706 = vmatprep.subr.bf16.mxu0 %v7722_v0  ;;  %v6219_v8 = vld [vmem:[%s9416_s6 + $0x2] sm:$0x3]  ;;  %v6224_v12 = vld [vmem:[%s9416_s6 + $0x4] sm:$0x3] }
  0x12   :  { %v92_v5 = vpack.c.bf16 %v91_v3, %v91_v3  ;;  %v7302_v6 = vld [vmem:[%s9415_s2] sm:$0xff]   ;;  %6712 = vmatprep.subr.bf16.mxu1 %v7722_v0  ;;  %v197_v9 = vpack.c.bf16 %v6219_v8, %v6219_v8  ;;  %v303_v13 = vpack.c.bf16 %v6224_v12, %v6224_v12  ;;  %v6234_v20 = vld [vmem:[%s9416_s6 + $0x8] sm:$0x3]  ;;  %v6239_v24 = vld [vmem:[%s9416_s6 + $0xa] sm:$0x3] }
  0x13   :  { %v7303_v7 = vld [vmem:[%s9414_s24] sm:$0xff]   ;;  %v515_v22 = vpack.c.bf16 %v6234_v20, %v6234_v20  ;;  %v621_v25 = vpack.c.bf16 %v6239_v24, %v6239_v24  ;;  %v6244_v28 = vld [vmem:[%s9416_s6 + $0xc] sm:$0x3]  ;;  %v6249_v32 = vld [vmem:[%s9416_s6 + $0xe] sm:$0x3] }
  0x14   :  { %6697 = vmatmul.mubr.msk.bf16.vlgmr.msra.gmra.mxu0 %vm101_vm0, %v92_v5  ;;  %6703 = vmatmul.mubr.msk.bf16.vlgmr.msra.gmra.mxu1 %vm101_vm0, %v92_v5  ;;  %v7305_v10 = vld [vmem:[%s9414_s24] sm:$0xff]   ;;  %v727_v29 = vpack.c.bf16 %v6244_v28, %v6244_v28  ;;  %v833_v33 = vpack.c.bf16 %v6249_v32, %v6249_v32  ;;  %v7316_v34 = vld [vmem:[%s9417_s4 + $0x8] sm:$0xff]  }
  0x15   :  { %6707 = vmatpush3.bf16.msra.mxu0 %v7303_v7  ;;  %6713 = vmatpush3.bf16.msra.mxu1 %v7302_v6  ;;  %v7304_v11 = vld [vmem:[%s9415_s2] sm:$0xff]   ;;  %v7317_v35 = vld [vmem:[%s9418_s5 + $0x8] sm:$0xff]  }
  0x16   :  { %6708 = vmatprep.mubr.msk.bf16.mxu0 %vm7723_vm1, %v7722_v0  ;;  %6714 = vmatprep.mubr.msk.bf16.mxu1 %vm7723_vm1, %v7722_v0  ;;  %v7307_v14 = vld [vmem:[%s9414_s24] sm:$0xff]  }
  0x17   :  { %6724 = vmatprep.subr.bf16.mxu1 %v7722_v0  ;;  %6718 = vmatprep.subr.bf16.mxu0 %v7722_v0  ;;  %v7306_v15 = vld [vmem:[%s9415_s2] sm:$0xff]  }
  0x18   :  { %v6229_v16 = vld [vmem:[%s9416_s6 + $0x6] sm:$0x3]  ;;  %v8019_v38 = vld [vmem:[%s9419_s29] ss:$0 sm:$0xff]  ;;  %s9421_s6 = sld [smem:[#allocation18_spill]] }
  0x19   :  { %v7309_v17 = vld [vmem:[%s9414_s24] sm:$0xff]   ;;  %v409_v18 = vpack.c.bf16 %v6229_v16, %v6229_v16 }
  0x1a   :  { %v7308_v19 = vld [vmem:[%s9415_s2] sm:$0xff]  }
  0x1b   :  { %v7311_v21 = vld [vmem:[%s9414_s24] sm:$0xff]  }
  0x1c   :  { %6709 = vmatmul.mubr.msk.bf16.vlgmr.msra.gmra.mxu0 %vm101_vm0, %v197_v9  ;;  %6715 = vmatmul.mubr.msk.bf16.vlgmr.msra.gmra.mxu1 %vm101_vm0, %v197_v9  ;;  %v7310_v23 = vld [vmem:[%s9415_s2] sm:$0xff]  }
  0x1d   :  { %6719 = vmatpush3.bf16.msra.mxu0 %v7305_v10  ;;  %6725 = vmatpush3.bf16.msra.mxu1 %v7304_v11  ;;  %v7313_v26 = vld [vmem:[%s9414_s24] sm:$0xff]  }
  0x1e   :  { %6720 = vmatprep.mubr.msk.bf16.mxu0 %vm7723_vm1, %v7722_v0  ;;  %6726 = vmatprep.mubr.msk.bf16.mxu1 %vm7723_vm1, %v7722_v0  ;;  %v7312_v27 = vld [vmem:[%s9415_s2] sm:$0xff]  }
  0x1f   :  { %6736 = vmatprep.subr.bf16.mxu1 %v7722_v0  ;;  %6730 = vmatprep.subr.bf16.mxu0 %v7722_v0  ;;  %v7315_v30 = vld [vmem:[%s9414_s24] sm:$0xff]   ;;  %s9420_s24 = sld [smem:[#allocation17_spill]] }
  0x20   :  { %v7314_v31 = vld [vmem:[%s9415_s2] sm:$0xff]   ;;  %s7725_s2 = smov 64  }
  0x21   :  { %v7318_v36 = vld [vmem:[%s9417_s4] sm:$0xff]  }
  0x22   :  { %v7319_v37 = vld [vmem:[%s9418_s5] sm:$0xff]  }
  0x24   :  { %6721 = vmatmul.mubr.msk.bf16.vlgmr.msra.gmra.mxu0 %vm101_vm0, %v303_v13  ;;  %6727 = vmatmul.mubr.msk.bf16.vlgmr.msra.gmra.mxu1 %vm101_vm0, %v303_v13 }
  0x25   :  { %6731 = vmatpush3.bf16.msra.mxu0 %v7307_v14  ;;  %6737 = vmatpush3.bf16.msra.mxu1 %v7306_v15  ;;  %v8024_v39 = vld [vmem:[%s9420_s24] ss:$0 sm:$0xff] }
  0x26   :  { %6732 = vmatprep.mubr.msk.bf16.mxu0 %vm7723_vm1, %v7722_v0  ;;  %6738 = vmatprep.mubr.msk.bf16.mxu1 %vm7723_vm1, %v7722_v0 }
  0x27   :  { %6748 = vmatprep.subr.bf16.mxu1 %v7722_v0  ;;  %6742 = vmatprep.subr.bf16.mxu0 %v7722_v0 }
  0x2c   :  { %6733 = vmatmul.mubr.msk.bf16.vlgmr.msra.gmra.mxu0 %vm101_vm0, %v409_v18  ;;  %6739 = vmatmul.mubr.msk.bf16.vlgmr.msra.gmra.mxu1 %vm101_vm0, %v409_v18 }
  0x2d   :  { %6743 = vmatpush3.bf16.msra.mxu0 %v7309_v17  ;;  %6749 = vmatpush3.bf16.msra.mxu1 %v7308_v19 }
  0x2e   :  { %6744 = vmatprep.mubr.msk.bf16.mxu0 %vm7723_vm1, %v7722_v0  ;;  %6750 = vmatprep.mubr.msk.bf16.mxu1 %vm7723_vm1, %v7722_v0 }
  0x2f   :  { %6760 = vmatprep.subr.bf16.mxu1 %v7722_v0  ;;  %6754 = vmatprep.subr.bf16.mxu0 %v7722_v0 }
  0x34   :  { %6745 = vmatmul.mubr.msk.bf16.vlgmr.msra.gmra.mxu0 %vm101_vm0, %v515_v22  ;;  %6751 = vmatmul.mubr.msk.bf16.vlgmr.msra.gmra.mxu1 %vm101_vm0, %v515_v22 }
  0x35   :  { %6755 = vmatpush3.bf16.msra.mxu0 %v7311_v21  ;;  %6761 = vmatpush3.bf16.msra.mxu1 %v7310_v23 }
  0x36   :  { %6756 = vmatprep.mubr.msk.bf16.mxu0 %vm7723_vm1, %v7722_v0  ;;  %6762 = vmatprep.mubr.msk.bf16.mxu1 %vm7723_vm1, %v7722_v0 }
  0x37   :  { %6772 = vmatprep.subr.bf16.mxu1 %v7722_v0  ;;  %6766 = vmatprep.subr.bf16.mxu0 %v7722_v0 }
  0x3c   :  { %6757 = vmatmul.mubr.msk.bf16.vlgmr.msra.gmra.mxu0 %vm101_vm0, %v621_v25  ;;  %6763 = vmatmul.mubr.msk.bf16.vlgmr.msra.gmra.mxu1 %vm101_vm0, %v621_v25 }
  0x3d   :  { %6767 = vmatpush3.bf16.msra.mxu0 %v7313_v26  ;;  %6773 = vmatpush3.bf16.msra.mxu1 %v7312_v27 }
  0x3e   :  { %6768 = vmatprep.mubr.msk.bf16.mxu0 %vm7723_vm1, %v7722_v0  ;;  %6774 = vmatprep.mubr.msk.bf16.mxu1 %vm7723_vm1, %v7722_v0 }
  0x3f   :  { %6784 = vmatprep.subr.bf16.mxu1 %v7722_v0  ;;  %6778 = vmatprep.subr.bf16.mxu0 %v7722_v0 }
  0x44   :  { %6769 = vmatmul.mubr.msk.bf16.vlgmr.msra.gmra.mxu0 %vm101_vm0, %v727_v29  ;;  %6775 = vmatmul.mubr.msk.bf16.vlgmr.msra.gmra.mxu1 %vm101_vm0, %v727_v29 }
  0x45   :  { %6779 = vmatpush3.bf16.msra.mxu0 %v7315_v30  ;;  %6785 = vmatpush3.bf16.msra.mxu1 %v7314_v31 }
  0x46   :  { %6780 = vmatprep.mubr.msk.bf16.mxu0 %vm7723_vm1, %v7722_v0  ;;  %6786 = vmatprep.mubr.msk.bf16.mxu1 %vm7723_vm1, %v7722_v0 }
  0x47   :  { %6790 = vmatprep.subr.bf16.mxu0 %v7722_v0  ;;  %6798 = vmatprep.subr.bf16.mxu1 %v7722_v0 }
  0x4c   :  { %6781 = vmatmul.mubr.msk.bf16.vlgmr.msra.gmra.mxu0 %vm101_vm0, %v833_v33  ;;  %6787 = vmatmul.mubr.msk.bf16.vlgmr.msra.gmra.mxu1 %vm101_vm0, %v833_v33 }
  0x4d   :  { %6791 = vmatpush3.bf16.msra.mxu0 %v7316_v34  ;;  %6799 = vmatpush3.bf16.msra.mxu1 %v7317_v35 }
  0x4e   :  { %6792 = vmatprep.subr.bf16.mxu0 %v7722_v0  ;;  %6800 = vmatprep.subr.bf16.mxu1 %v7722_v0 }
  0x4f   :  { %6794 = vmatprep.mubr.msk.bf16.mxu0 %vm7723_vm1, %v7722_v0  ;;  %6802 = vmatprep.mubr.msk.bf16.mxu1 %vm7723_vm1, %v7722_v0 }
  0x51   :  { %6793 = vmatpush3.bf16.msra.mxu0 %v7318_v36  ;;  %6801 = vmatpush3.bf16.msra.mxu1 %v7319_v37 }
  0x52   :  { %6806 = vmatprep.subr.bf16.mxu0 %v7722_v0  ;;  %6814 = vmatprep.subr.bf16.mxu1 %v7722_v0 }
  0x54   :  { %6795 = vmatmul.mubr.bf16.vlgmr.msra.gmra.mxu0 %v7724_v4  ;;  %6803 = vmatmul.mubr.bf16.vlgmr.msra.gmra.mxu1 %v7724_v4 }
  0x55   :  { %6810 = vmatprep.mubr.msk.bf16.mxu0 %vm7723_vm1, %v7722_v0  ;;  %6818 = vmatprep.mubr.msk.bf16.mxu1 %vm7723_vm1, %v7722_v0 }
  0xd4   :  { %v139_v40 = vpop.f32.mrf.mxu0  ;;  %v188_v42 = vpop.f32.mrf.mxu1 }
  0xd5   :  { %v140_v41 = vadd.f32 %v8019_v38, %v139_v40  ;;  %v189_v43 = vadd.f32 %v8024_v39, %v188_v42 }
  0xd6   :  { %v6698_v44 = vpop.f32.mrf.mxu0  ;;  %v6704_v45 = vpop.f32.mrf.mxu1 }
  0xd7   :  { %145 = vst [vmem:[#allocation2] sm:$0x3] %v140_v41  ;;  %194 = vst [vmem:[#allocation3] sm:$0x3] %v189_v43 }
  0xd8   :  { %v142_v46 = vpop.f32.mrf.mxu0  ;;  %v191_v47 = vpop.f32.mrf.mxu1 }
  0xda   :  { %v6699_v48 = vpop.f32.mrf.mxu0  ;;  %v6705_v49 = vpop.f32.mrf.mxu1 }
  0xdc   :  { %v243_v50 = vpop.f32.mrf.mxu0  ;;  %v293_v52 = vpop.f32.mrf.mxu1 }
  0xdd   :  { %v244_v51 = vadd.f32 %v8019_v38, %v243_v50  ;;  %v294_v53 = vadd.f32 %v8024_v39, %v293_v52 }
  0xde   :  { %v6710_v54 = vpop.f32.mrf.mxu0  ;;  %v6716_v55 = vpop.f32.mrf.mxu1 }
  0xdf   :  { %250 = vst [vmem:[#allocation2 + $0x2] sm:$0x3] %v244_v51  ;;  %300 = vst [vmem:[#allocation3 + $0x2] sm:$0x3] %v294_v53 }
  0xe0   :  { %v246_v56 = vpop.f32.mrf.mxu0  ;;  %v296_v57 = vpop.f32.mrf.mxu1 }
  0xe2   :  { %v6711_v58 = vpop.f32.mrf.mxu0  ;;  %v6717_v59 = vpop.f32.mrf.mxu1 }
  0xe3   :  { %v945_v59 = vld [vmem:[#allocation2] sm:$0x3] }
  0xe4   :  { %v349_v60 = vpop.f32.mrf.mxu0  ;;  %v399_v62 = vpop.f32.mrf.mxu1 }
  0xe5   :  { %v350_v61 = vadd.f32 %v8019_v38, %v349_v60  ;;  %v400_v63 = vadd.f32 %v8024_v39, %v399_v62 }
  0xe6   :  { %v6722_v1 = vpop.f32.mrf.mxu0  ;;  %v6728_v2 = vpop.f32.mrf.mxu1 }
  0xe7   :  { %356 = vst [vmem:[#allocation2 + $0x4] sm:$0x3] %v350_v61  ;;  %406 = vst [vmem:[#allocation3 + $0x4] sm:$0x3] %v400_v63 }
  0xe8   :  { %v352_v3 = vpop.f32.mrf.mxu0  ;;  %v402_v5 = vpop.f32.mrf.mxu1 }
  0xea   :  { %v6723_v6 = vpop.f32.mrf.mxu0  ;;  %v6729_v7 = vpop.f32.mrf.mxu1 }
  0xec   :  { %v455_v8 = vpop.f32.mrf.mxu0  ;;  %v505_v10 = vpop.f32.mrf.mxu1 }
  0xed   :  { %v456_v9 = vadd.f32 %v8019_v38, %v455_v8  ;;  %v506_v11 = vadd.f32 %v8024_v39, %v505_v10 }
  0xee   :  { %v6734_v12 = vpop.f32.mrf.mxu0  ;;  %v6740_v13 = vpop.f32.mrf.mxu1 }
  0xef   :  { %462 = vst [vmem:[#allocation2 + $0x6] sm:$0x3] %v456_v9  ;;  %512 = vst [vmem:[#allocation3 + $0x6] sm:$0x3] %v506_v11 }
  0xf0   :  { %v458_v14 = vpop.f32.mrf.mxu0  ;;  %v508_v15 = vpop.f32.mrf.mxu1 }
  0xf2   :  { %v6735_v16 = vpop.f32.mrf.mxu0  ;;  %v6741_v17 = vpop.f32.mrf.mxu1 }
  0xf4   :  { %v561_v18 = vpop.f32.mrf.mxu0  ;;  %v611_v20 = vpop.f32.mrf.mxu1 }
  0xf5   :  { %v562_v19 = vadd.f32 %v8019_v38, %v561_v18  ;;  %v612_v21 = vadd.f32 %v8024_v39, %v611_v20 }
  0xf6   :  { %v6746_v22 = vpop.f32.mrf.mxu0  ;;  %v6752_v23 = vpop.f32.mrf.mxu1 }
  0xf7   :  { %568 = vst [vmem:[#allocation2 + $0x8] sm:$0x3] %v562_v19  ;;  %618 = vst [vmem:[#allocation3 + $0x8] sm:$0x3] %v612_v21 }
  0xf8   :  { %v564_v24 = vpop.f32.mrf.mxu0  ;;  %v614_v25 = vpop.f32.mrf.mxu1 }
  0xfa   :  { %v6747_v26 = vpop.f32.mrf.mxu0  ;;  %v6753_v27 = vpop.f32.mrf.mxu1 }
  0xfc   :  { %v667_v28 = vpop.f32.mrf.mxu0  ;;  %v717_v30 = vpop.f32.mrf.mxu1 }
  0xfd   :  { %v668_v29 = vadd.f32 %v8019_v38, %v667_v28  ;;  %v718_v31 = vadd.f32 %v8024_v39, %v717_v30  ;;  %v7320_v28 = vld [vmem:[%s9418_s5 + $0x8] sm:$0xff]   ;;  %v7322_v30 = vld [vmem:[%s9418_s5] sm:$0xff]  }
  0xfe   :  { %v6758_v32 = vpop.f32.mrf.mxu0  ;;  %v6764_v33 = vpop.f32.mrf.mxu1  ;;  %6815 = vmatpush3.bf16.msra.mxu1 %v7320_v28 }
  0xff   :  { %674 = vst [vmem:[#allocation2 + $0xa] sm:$0x3] %v668_v29  ;;  %724 = vst [vmem:[#allocation3 + $0xa] sm:$0x3] %v718_v31  ;;  %v7321_v29 = vld [vmem:[%s9417_s4 + $0x8] sm:$0xff]   ;;  %6816 = vmatprep.subr.bf16.mxu1 %v7722_v0  ;;  %v7323_v33 = vld [vmem:[%s9417_s4] sm:$0xff]  }
 0x100   :  { %v670_v34 = vpop.f32.mrf.mxu0  ;;  %v720_v35 = vpop.f32.mrf.mxu1  ;;  %6807 = vmatpush3.bf16.msra.mxu0 %v7321_v29 }
 0x101   :  { %6808 = vmatprep.subr.bf16.mxu0 %v7722_v0 }
 0x102   :  { %v6759_v36 = vpop.f32.mrf.mxu0  ;;  %v6765_v37 = vpop.f32.mrf.mxu1  ;;  %6817 = vmatpush3.bf16.msra.mxu1 %v7322_v30  ;;  %v1313_v30 = vld [vmem:[#allocation2 + $0x4] sm:$0x3] }
 0x103   :  { %6830 = vmatprep.subr.bf16.mxu1 %v7722_v0 }
 0x104   :  { %v773_v40 = vpop.f32.mrf.mxu0  ;;  %v823_v42 = vpop.f32.mrf.mxu1  ;;  %6809 = vmatpush3.bf16.msra.mxu0 %v7323_v33 }
 0x105   :  { %v774_v41 = vadd.f32 %v8019_v38, %v773_v40  ;;  %v824_v43 = vadd.f32 %v8024_v39, %v823_v42  ;;  %6822 = vmatprep.subr.bf16.mxu0 %v7722_v0 }
 0x106   :  { %v6770_v44 = vpop.f32.mrf.mxu0  ;;  %v6776_v45 = vpop.f32.mrf.mxu1 }
 0x107   :  { %780 = vst [vmem:[#allocation2 + $0xc] sm:$0x3] %v774_v41  ;;  %830 = vst [vmem:[#allocation3 + $0xc] sm:$0x3] %v824_v43 }
 0x108   :  { %v776_v46 = vpop.f32.mrf.mxu0  ;;  %v826_v47 = vpop.f32.mrf.mxu1 }
 0x10a   :  { %v6771_v48 = vpop.f32.mrf.mxu0  ;;  %v6777_v49 = vpop.f32.mrf.mxu1 }
 0x10b   :  { %v1125_v48 = vld [vmem:[#allocation2 + $0x2] sm:$0x3] }
 0x10c   :  { %v879_v50 = vpop.f32.mrf.mxu0  ;;  %v929_v52 = vpop.f32.mrf.mxu1 }
 0x10d   :  { %v880_v51 = vadd.f32 %v8019_v38, %v879_v50  ;;  %v930_v53 = vadd.f32 %v8024_v39, %v929_v52 }
 0x10e   :  { %v6782_v54 = vpop.f32.mrf.mxu0  ;;  %v6788_v55 = vpop.f32.mrf.mxu1  ;;  %v1208_v44 = vld [vmem:[#allocation3 + $0xc] sm:$0x3] }
 0x10f   :  { %886 = vst [vmem:[#allocation2 + $0xe] sm:$0x3] %v880_v51  ;;  %936 = vst [vmem:[#allocation3 + $0xe] sm:$0x3] %v930_v53 }
 0x110   :  { %v882_v56 = vpop.f32.mrf.mxu0  ;;  %v932_v57 = vpop.f32.mrf.mxu1 }
 0x112   :  { %v6783_v58 = vpop.f32.mrf.mxu0  ;;  %v6789_v60 = vpop.f32.mrf.mxu1 }
 0x114   :  { %v996_v61 = vpop.f32.mrf.mxu0  ;;  %v1073_v63 = vpop.f32.mrf.mxu1 }
 0x115   :  { %v997_v62 = vadd.f32 %v996_v61, %v945_v59 }
 0x116   :  { %v6796_v1 = vpop.f32.mrf.mxu0  ;;  %v1026_v2 = vld [vmem:[#allocation3 + $0xe] sm:$0x3]  ;;  %v6804_v3 = vpop.f32.mrf.mxu1 }
 0x117   :  { %7432 = vtanh.f32 %v997_v62  ;;  %v1074_v38 = vadd.f32 %v1073_v63, %v1026_v2  ;;  %v6256_v11 = vmul.f32 -1.442695, %v997_v62 }
 0x118   :  { %v999_v5 = vpop.f32.mrf.mxu0  ;;  %v1076_v6 = vpop.f32.mrf.mxu1 }
 0x119   :  { %7434 = vtanh.f32 %v1074_v38  ;;  %v6259_v10 = vmul.f32 -1.442695, %v1074_v38 }
 0x11a   :  { %v6797_v39 = vpop.f32.mrf.mxu0  ;;  %v6805_v7 = vpop.f32.mrf.mxu1 }
 0x11b   :  { %7436 = vpow2.f32 %v6259_v10 }
 0x11c   :  { %7438 = vpow2.f32 %v6256_v11 }
 0x124   :  { %v7433_v8 = vpop.eup %7432 }
 0x125   :  { %1011 = vrot.lane.b32.xlu1 %v7433_v8, %s7725_s2 }
 0x126   :  { %v7435_v9 = vpop.eup %7434 }
 0x127   :  { %1088 = vrot.lane.b32.xlu0 %v7435_v9, %s7725_s2 }
 0x128   :  { %v7437_v12 = vpop.eup %7436 }
 0x129   :  { %v1082_v13 = vadd.f32 1.0, %v7437_v12  ;;  %v7439_v14 = vpop.eup %7438  ;;  %v7324_v12 = vld [vmem:[%s9418_s5 + $0x8] sm:$0xff]  }
 0x12a   :  { %v1005_v15 = vadd.f32 1.0, %v7439_v14  ;;  %v7326_v14 = vld [vmem:[%s9418_s5] sm:$0xff]  }
 0x12b   :  { %7440 = vrcp.f32 %v1082_v13  ;;  %v7325_v13 = vld [vmem:[%s9417_s4 + $0x8] sm:$0xff]  }
 0x12c   :  { %7442 = vrcp.f32 %v1005_v15 }
 0x138   :  { %v7441_v16 = vpop.eup %7440 }
 0x139   :  { %v7443_v20 = vpop.eup %7442  ;;  %v1086_v22 = vmul.f32 0.0, %v7441_v16 }
 0x13a   :  { %v1009_v25 = vmul.f32 0.0, %v7443_v20 }
 0x197   :  { %v1012_v19 = vpop.permute.xlu1 %1011 }
 0x198   :  { %v1014_v21 = vmul.f32 %v7443_v20, %v1012_v19 }
 0x199   :  { %v1089_v17 = vpop.permute.xlu0 %1088 }
 0x19a   :  { %v1091_v18 = vmul.f32 %v7441_v16, %v1089_v17  ;;  %v7327_v17 = vld [vmem:[%s9417_s4] sm:$0xff]  }
 0x19c   :  { %1093 = vrot.lane.b32.xlu0 %v1091_v18, %s7726_s30 }
 0x1a0   :  { %1016 = vrot.lane.b32.xlu0 %v1014_v21, %s7726_s30 }
 0x20e   :  { %v1094_v23 = vpop.permute.xlu0 %1093 }
 0x20f   :  { %v8046_v24 = vadd.f32 %v1094_v23, %v1086_v22 }
 0x211   :  { %7444 = vtanh.f32 %v8046_v24 }
 0x212   :  { %v1017_v26 = vpop.permute.xlu0 %1016 }
 0x213   :  { %v8049_v27 = vadd.f32 %v1017_v26, %v1009_v25  ;;  %v1396_v26 = vld [vmem:[#allocation3 + $0xa] sm:$0x3] }
 0x215   :  { %7446 = vtanh.f32 %v8049_v27 }
 0x21e   :  { %v7445_v31 = vpop.eup %7444 }
 0x21f   :  { %1099 = vrot.lane.b32.xlu1 %v7445_v31, %s7725_s2 }
 0x222   :  { %v7447_v32 = vpop.eup %7446 }
 0x223   :  { %1022 = vrot.lane.b32.xlu0 %v7447_v32, %s7725_s2 }
 0x291   :  { %v1100_v34 = vpop.permute.xlu1 %1099 }
 0x292   :  { %v8070_v35 = vmul.f32 %v7441_v16, %v1100_v34 }
 0x294   :  { %v1120_v36 = vpack.c.bf16 %v8070_v35, %v8070_v35 }
 0x295   :  { %v1023_v37 = vpop.permute.xlu0 %1022 }
 0x296   :  { %v8074_v40 = vmul.f32 %v7443_v20, %v1023_v37  ;;  %1210 = vrot.lane.b32.xlu1 %v1120_v36, %s7726_s30 }
 0x298   :  { %v1115_v41 = vpack.c.bf16 %v8074_v40, %v8074_v40 }
 0x29a   :  { %1127 = vrot.lane.b32.xlu1 %v1115_v41, %s7726_s30 }
 0x308   :  { %v1211_v42 = vpop.permute.xlu1 %1210 }
 0x309   :  { %6819 = vmatmul.mubr.msk.bf16.vlgmr.msra.gmra.mxu1 %vm958_vm2, %v1211_v42 }
 0x30a   :  { %6834 = vmatprep.mubr.msk.bf16.mxu1 %vm7723_vm1, %v7722_v0  ;;  %6831 = vmatpush3.bf16.msra.mxu1 %v7324_v12  ;;  %v1584_v12 = vld [vmem:[#allocation3 + $0x8] sm:$0x3] }
 0x30b   :  { %6832 = vmatprep.subr.bf16.mxu1 %v7722_v0 }
 0x30c   :  { %v1128_v43 = vpop.permute.xlu1 %1127 }
 0x30d   :  { %6811 = vmatmul.mubr.msk.bf16.vlgmr.msra.gmra.mxu0 %vm958_vm2, %v1128_v43 }
 0x30e   :  { %6826 = vmatprep.mubr.msk.bf16.mxu0 %vm7723_vm1, %v7722_v0  ;;  %6823 = vmatpush3.bf16.msra.mxu0 %v7325_v13 }
 0x30f   :  { %6824 = vmatprep.subr.bf16.mxu0 %v7722_v0  ;;  %6833 = vmatpush3.bf16.msra.mxu1 %v7326_v14 }
 0x310   :  { %6846 = vmatprep.subr.bf16.mxu1 %v7722_v0 }
 0x312   :  { %6825 = vmatpush3.bf16.msra.mxu0 %v7327_v17 }
 0x313   :  { %6838 = vmatprep.subr.bf16.mxu0 %v7722_v0 }
 0x3c9   :  { %v1261_v45 = vpop.f32.mrf.mxu1 }
 0x3ca   :  { %v1262_v46 = vadd.f32 %v1261_v45, %v1208_v44 }
 0x3cb   :  { %v6820_v47 = vpop.f32.mrf.mxu1 }
 0x3cc   :  { %7448 = vtanh.f32 %v1262_v46  ;;  %v6267_v58 = vmul.f32 -1.442695, %v1262_v46 }
 0x3cd   :  { %v1178_v49 = vpop.f32.mrf.mxu0  ;;  %v1264_v50 = vpop.f32.mrf.mxu1 }
 0x3ce   :  { %v1179_v51 = vadd.f32 %v1178_v49, %v1125_v48 }
 0x3cf   :  { %v6812_v52 = vpop.f32.mrf.mxu0  ;;  %v6821_v53 = vpop.f32.mrf.mxu1 }
 0x3d0   :  { %7450 = vtanh.f32 %v1179_v51  ;;  %v6263_v59 = vmul.f32 -1.442695, %v1179_v51 }
 0x3d1   :  { %v1181_v54 = vpop.f32.mrf.mxu0  ;;  %7452 = vpow2.f32 %v6267_v58 }
 0x3d2   :  { %7454 = vpow2.f32 %v6263_v59 }
 0x3d3   :  { %v6813_v55 = vpop.f32.mrf.mxu0 }
 0x3d9   :  { %v7449_v56 = vpop.eup %7448 }
 0x3da   :  { %1276 = vrot.lane.b32.xlu0 %v7449_v56, %s7725_s2 }
 0x3dd   :  { %v7451_v57 = vpop.eup %7450 }
 0x3de   :  { %1193 = vrot.lane.b32.xlu0 %v7451_v57, %s7725_s2  ;;  %v7453_v60 = vpop.eup %7452 }
 0x3df   :  { %v1270_v61 = vadd.f32 1.0, %v7453_v60  ;;  %v7455_v62 = vpop.eup %7454 }
 0x3e0   :  { %v1187_v63 = vadd.f32 1.0, %v7455_v62  ;;  %v7328_v62 = vld [vmem:[%s9418_s5 + $0x8] sm:$0xff]  }
 0x3e1   :  { %7456 = vrcp.f32 %v1270_v61 }
 0x3e2   :  { %7458 = vrcp.f32 %v1187_v63  ;;  %v7329_v63 = vld [vmem:[%s9417_s4 + $0x8] sm:$0xff]  }
 0x3ee   :  { %v7457_v1 = vpop.eup %7456 }
 0x3ef   :  { %v7459_v38 = vpop.eup %7458  ;;  %v1274_v39 = vmul.f32 %v7457_v1, %v8046_v24 }
 0x3f0   :  { %v1191_v9 = vmul.f32 %v7459_v38, %v8049_v27 }
 0x44c   :  { %v1277_v2 = vpop.permute.xlu0 %1276 }
 0x44d   :  { %v1279_v3 = vmul.f32 %v7457_v1, %v1277_v2 }
 0x44f   :  { %1281 = vrot.lane.b32.xlu1 %v1279_v3, %s7726_s30 }
 0x450   :  { %v1194_v5 = vpop.permute.xlu0 %1193 }
 0x451   :  { %v1196_v6 = vmul.f32 %v7459_v38, %v1194_v5 }
 0x453   :  { %1198 = vrot.lane.b32.xlu0 %v1196_v6, %s7726_s30 }
 0x4c1   :  { %v1282_v7 = vpop.permute.xlu1 %1281 }
 0x4c2   :  { %v8091_v8 = vadd.f32 %v1282_v7, %v1274_v39 }
 0x4c4   :  { %7460 = vtanh.f32 %v8091_v8 }
 0x4c5   :  { %v1199_v10 = vpop.permute.xlu0 %1198 }
 0x4c6   :  { %v8095_v11 = vadd.f32 %v1199_v10, %v1191_v9 }
 0x4c8   :  { %7462 = vtanh.f32 %v8095_v11 }
 0x4d1   :  { %v7461_v15 = vpop.eup %7460 }
 0x4d2   :  { %1287 = vrot.lane.b32.xlu1 %v7461_v15, %s7725_s2 }
 0x4d5   :  { %v7463_v16 = vpop.eup %7462 }
 0x4d6   :  { %1204 = vrot.lane.b32.xlu0 %v7463_v16, %s7725_s2  ;;  %v1501_v16 = vld [vmem:[#allocation2 + $0x6] sm:$0x3] }
 0x544   :  { %v1288_v18 = vpop.permute.xlu1 %1287 }
 0x545   :  { %v8116_v19 = vmul.f32 %v7457_v1, %v1288_v18  ;;  %v7330_v1 = vld [vmem:[%s9418_s5] sm:$0xff]  }
 0x547   :  { %v1308_v20 = vpack.c.bf16 %v8116_v19, %v8116_v19 }
 0x548   :  { %v1205_v21 = vpop.permute.xlu0 %1204 }
 0x549   :  { %v8120_v22 = vmul.f32 %v7459_v38, %v1205_v21  ;;  %1398 = vrot.lane.b32.xlu1 %v1308_v20, %s7726_s30  ;;  %v7331_v38 = vld [vmem:[%s9417_s4] sm:$0xff]  }
 0x54b   :  { %v1303_v23 = vpack.c.bf16 %v8120_v22, %v8120_v22 }
 0x54d   :  { %1315 = vrot.lane.b32.xlu1 %v1303_v23, %s7726_s30 }
 0x5bb   :  { %v1399_v24 = vpop.permute.xlu1 %1398 }
 0x5bc   :  { %6835 = vmatmul.mubr.msk.bf16.vlgmr.msra.gmra.mxu1 %vm958_vm2, %v1399_v24 }
 0x5bd   :  { %6850 = vmatprep.mubr.msk.bf16.mxu1 %vm7723_vm1, %v7722_v0  ;;  %6847 = vmatpush3.bf16.msra.mxu1 %v7328_v62 }
 0x5be   :  { %6848 = vmatprep.subr.bf16.mxu1 %v7722_v0 }
 0x5bf   :  { %v1316_v25 = vpop.permute.xlu1 %1315 }
 0x5c0   :  { %6827 = vmatmul.mubr.msk.bf16.vlgmr.msra.gmra.mxu0 %vm958_vm2, %v1316_v25 }
 0x5c1   :  { %6842 = vmatprep.mubr.msk.bf16.mxu0 %vm7723_vm1, %v7722_v0  ;;  %6839 = vmatpush3.bf16.msra.mxu0 %v7329_v63 }
 0x5c2   :  { %6840 = vmatprep.subr.bf16.mxu0 %v7722_v0  ;;  %6849 = vmatpush3.bf16.msra.mxu1 %v7330_v1  ;;  %v1772_v1 = vld [vmem:[#allocation3 + $0x6] sm:$0x3] }
 0x5c3   :  { %6862 = vmatprep.subr.bf16.mxu1 %v7722_v0 }
 0x5c5   :  { %6841 = vmatpush3.bf16.msra.mxu0 %v7331_v38 }
 0x5c6   :  { %6854 = vmatprep.subr.bf16.mxu0 %v7722_v0 }
 0x67c   :  { %v1449_v27 = vpop.f32.mrf.mxu1 }
 0x67d   :  { %v1450_v28 = vadd.f32 %v1449_v27, %v1396_v26 }
 0x67e   :  { %v6836_v29 = vpop.f32.mrf.mxu1 }
 0x67f   :  { %7464 = vtanh.f32 %v1450_v28  ;;  %v6275_v44 = vmul.f32 -1.442695, %v1450_v28 }
 0x680   :  { %v1366_v31 = vpop.f32.mrf.mxu0  ;;  %v1452_v32 = vpop.f32.mrf.mxu1 }
 0x681   :  { %v1367_v33 = vadd.f32 %v1366_v31, %v1313_v30 }
 0x682   :  { %v6828_v34 = vpop.f32.mrf.mxu0  ;;  %v6837_v36 = vpop.f32.mrf.mxu1 }
 0x683   :  { %7466 = vtanh.f32 %v1367_v33  ;;  %v6271_v45 = vmul.f32 -1.442695, %v1367_v33 }
 0x684   :  { %v1369_v37 = vpop.f32.mrf.mxu0  ;;  %7468 = vpow2.f32 %v6275_v44 }
 0x685   :  { %7470 = vpow2.f32 %v6271_v45 }
 0x686   :  { %v6829_v41 = vpop.f32.mrf.mxu0 }
 0x68c   :  { %v7465_v42 = vpop.eup %7464 }
 0x68d   :  { %1464 = vrot.lane.b32.xlu0 %v7465_v42, %s7725_s2 }
 0x690   :  { %v7467_v43 = vpop.eup %7466 }
 0x691   :  { %1381 = vrot.lane.b32.xlu0 %v7467_v43, %s7725_s2  ;;  %v7469_v46 = vpop.eup %7468 }
 0x692   :  { %v1458_v47 = vadd.f32 1.0, %v7469_v46  ;;  %v7471_v48 = vpop.eup %7470 }
 0x693   :  { %v1375_v49 = vadd.f32 1.0, %v7471_v48 }
 0x694   :  { %7472 = vrcp.f32 %v1458_v47 }
 0x695   :  { %7474 = vrcp.f32 %v1375_v49 }
 0x6a1   :  { %v7473_v50 = vpop.eup %7472 }
 0x6a2   :  { %v7475_v53 = vpop.eup %7474  ;;  %v1462_v56 = vmul.f32 %v7473_v50, %v8091_v8 }
 0x6a3   :  { %v1379_v59 = vmul.f32 %v7475_v53, %v8095_v11 }
 0x6ff   :  { %v1465_v51 = vpop.permute.xlu0 %1464 }
 0x700   :  { %v1467_v52 = vmul.f32 %v7473_v50, %v1465_v51  ;;  %v7333_v51 = vld [vmem:[%s9417_s4 + $0x8] sm:$0xff]  }
 0x702   :  { %1469 = vrot.lane.b32.xlu1 %v1467_v52, %s7726_s30  ;;  %v7334_v52 = vld [vmem:[%s9418_s5] sm:$0xff]  }
 0x703   :  { %v1382_v54 = vpop.permute.xlu0 %1381 }
 0x704   :  { %v1384_v55 = vmul.f32 %v7475_v53, %v1382_v54 }
 0x706   :  { %1386 = vrot.lane.b32.xlu0 %v1384_v55, %s7726_s30  ;;  %v7335_v55 = vld [vmem:[%s9417_s4] sm:$0xff]  }
 0x774   :  { %v1470_v57 = vpop.permute.xlu1 %1469 }
 0x775   :  { %v8137_v58 = vadd.f32 %v1470_v57, %v1462_v56 }
 0x777   :  { %7476 = vtanh.f32 %v8137_v58 }
 0x778   :  { %v1387_v60 = vpop.permute.xlu0 %1386 }
 0x779   :  { %v8141_v61 = vadd.f32 %v1387_v60, %v1379_v59 }
 0x77b   :  { %7478 = vtanh.f32 %v8141_v61 }
 0x784   :  { %v7477_v2 = vpop.eup %7476 }
 0x785   :  { %1475 = vrot.lane.b32.xlu1 %v7477_v2, %s7725_s2 }
 0x788   :  { %v7479_v3 = vpop.eup %7478 }
 0x789   :  { %1392 = vrot.lane.b32.xlu0 %v7479_v3, %s7725_s2 }
 0x7f7   :  { %v1476_v5 = vpop.permute.xlu1 %1475 }
 0x7f8   :  { %v8162_v6 = vmul.f32 %v7473_v50, %v1476_v5  ;;  %v7332_v50 = vld [vmem:[%s9418_s5 + $0x8] sm:$0xff]  }
 0x7f9   :  { %v1689_v5 = vld [vmem:[#allocation2 + $0x8] sm:$0x3] }
 0x7fa   :  { %v1496_v39 = vpack.c.bf16 %v8162_v6, %v8162_v6 }
 0x7fb   :  { %v1393_v7 = vpop.permute.xlu0 %1392 }
 0x7fc   :  { %v8166_v8 = vmul.f32 %v7475_v53, %v1393_v7  ;;  %1586 = vrot.lane.b32.xlu1 %v1496_v39, %s7726_s30 }
 0x7fe   :  { %v1491_v9 = vpack.c.bf16 %v8166_v8, %v8166_v8 }
 0x800   :  { %1503 = vrot.lane.b32.xlu1 %v1491_v9, %s7726_s30 }
 0x86e   :  { %v1587_v10 = vpop.permute.xlu1 %1586 }
 0x86f   :  { %6851 = vmatmul.mubr.msk.bf16.vlgmr.msra.gmra.mxu1 %vm958_vm2, %v1587_v10 }
 0x870   :  { %6866 = vmatprep.mubr.msk.bf16.mxu1 %vm7723_vm1, %v7722_v0  ;;  %6863 = vmatpush3.bf16.msra.mxu1 %v7332_v50 }
 0x871   :  { %6864 = vmatprep.subr.bf16.mxu1 %v7722_v0 }
 0x872   :  { %v1504_v11 = vpop.permute.xlu1 %1503 }
 0x873   :  { %6843 = vmatmul.mubr.msk.bf16.vlgmr.msra.gmra.mxu0 %vm958_vm2, %v1504_v11 }
 0x874   :  { %6858 = vmatprep.mubr.msk.bf16.mxu0 %vm7723_vm1, %v7722_v0  ;;  %6855 = vmatpush3.bf16.msra.mxu0 %v7333_v51 }
 0x875   :  { %6856 = vmatprep.subr.bf16.mxu0 %v7722_v0  ;;  %6865 = vmatpush3.bf16.msra.mxu1 %v7334_v52 }
 0x876   :  { %6878 = vmatprep.subr.bf16.mxu1 %v7722_v0 }
 0x878   :  { %6857 = vmatpush3.bf16.msra.mxu0 %v7335_v55 }
 0x879   :  { %6870 = vmatprep.subr.bf16.mxu0 %v7722_v0 }
 0x92f   :  { %v1637_v13 = vpop.f32.mrf.mxu1 }
 0x930   :  { %v1638_v14 = vadd.f32 %v1637_v13, %v1584_v12 }
 0x931   :  { %v6852_v15 = vpop.f32.mrf.mxu1 }
 0x932   :  { %7480 = vtanh.f32 %v1638_v14  ;;  %v6283_v28 = vmul.f32 -1.442695, %v1638_v14 }
 0x933   :  { %v1554_v17 = vpop.f32.mrf.mxu0  ;;  %v1640_v18 = vpop.f32.mrf.mxu1 }
 0x934   :  { %v1555_v20 = vadd.f32 %v1554_v17, %v1501_v16 }
 0x935   :  { %v6844_v21 = vpop.f32.mrf.mxu0  ;;  %v6853_v23 = vpop.f32.mrf.mxu1 }
 0x936   :  { %7482 = vtanh.f32 %v1555_v20  ;;  %v6279_v29 = vmul.f32 -1.442695, %v1555_v20 }
 0x937   :  { %v1557_v24 = vpop.f32.mrf.mxu0  ;;  %7484 = vpow2.f32 %v6283_v28 }
 0x938   :  { %7486 = vpow2.f32 %v6279_v29 }
 0x939   :  { %v6845_v25 = vpop.f32.mrf.mxu0 }
 0x93f   :  { %v7481_v26 = vpop.eup %7480 }
 0x940   :  { %1652 = vrot.lane.b32.xlu0 %v7481_v26, %s7725_s2 }
 0x943   :  { %v7483_v27 = vpop.eup %7482 }
 0x944   :  { %1569 = vrot.lane.b32.xlu0 %v7483_v27, %s7725_s2  ;;  %v7485_v30 = vpop.eup %7484 }
 0x945   :  { %v1646_v31 = vadd.f32 1.0, %v7485_v30  ;;  %v7487_v32 = vpop.eup %7486 }
 0x946   :  { %v1563_v33 = vadd.f32 1.0, %v7487_v32 }
 0x947   :  { %7488 = vrcp.f32 %v1646_v31 }
 0x948   :  { %7490 = vrcp.f32 %v1563_v33 }
 0x954   :  { %v7489_v34 = vpop.eup %7488 }
 0x955   :  { %v7491_v41 = vpop.eup %7490  ;;  %v1650_v44 = vmul.f32 %v7489_v34, %v8137_v58 }
 0x956   :  { %v1567_v47 = vmul.f32 %v7491_v41, %v8141_v61 }
 0x9b2   :  { %v1653_v36 = vpop.permute.xlu0 %1652 }
 0x9b3   :  { %v1655_v37 = vmul.f32 %v7489_v34, %v1653_v36 }
 0x9b5   :  { %1657 = vrot.lane.b32.xlu1 %v1655_v37, %s7726_s30  ;;  %v7336_v37 = vld [vmem:[%s9418_s5 + $0x8] sm:$0xff]  }
 0x9b6   :  { %v1570_v42 = vpop.permute.xlu0 %1569 }
 0x9b7   :  { %v1572_v43 = vmul.f32 %v7491_v41, %v1570_v42  ;;  %v7338_v42 = vld [vmem:[%s9418_s5] sm:$0xff]  }
 0x9b9   :  { %1574 = vrot.lane.b32.xlu0 %v1572_v43, %s7726_s30 }
 0xa27   :  { %v1658_v45 = vpop.permute.xlu1 %1657 }
 0xa28   :  { %v8183_v46 = vadd.f32 %v1658_v45, %v1650_v44  ;;  %v7339_v45 = vld [vmem:[%s9417_s4] sm:$0xff]  }
 0xa2a   :  { %7492 = vtanh.f32 %v8183_v46 }
 0xa2b   :  { %v1575_v48 = vpop.permute.xlu0 %1574 }
 0xa2c   :  { %v8187_v49 = vadd.f32 %v1575_v48, %v1567_v47 }
 0xa2e   :  { %7494 = vtanh.f32 %v8187_v49 }
 0xa37   :  { %v7493_v53 = vpop.eup %7492 }
 0xa38   :  { %1663 = vrot.lane.b32.xlu1 %v7493_v53, %s7725_s2 }
 0xa3b   :  { %v7495_v54 = vpop.eup %7494 }
 0xa3c   :  { %1580 = vrot.lane.b32.xlu0 %v7495_v54, %s7725_s2  ;;  %v1960_v54 = vld [vmem:[#allocation3 + $0x4] sm:$0x3] }
 0xaaa   :  { %v1664_v56 = vpop.permute.xlu1 %1663 }
 0xaab   :  { %v8208_v57 = vmul.f32 %v7489_v34, %v1664_v56 }
 0xaad   :  { %v1684_v58 = vpack.c.bf16 %v8208_v57, %v8208_v57 }
 0xaae   :  { %v1581_v59 = vpop.permute.xlu0 %1580 }
 0xaaf   :  { %v8212_v60 = vmul.f32 %v7491_v41, %v1581_v59  ;;  %1774 = vrot.lane.b32.xlu1 %v1684_v58, %s7726_s30  ;;  %v7337_v41 = vld [vmem:[%s9417_s4 + $0x8] sm:$0xff]  }
 0xab0   :  { %v1877_v59 = vld [vmem:[#allocation2 + $0xa] sm:$0x3] }
 0xab1   :  { %v1679_v61 = vpack.c.bf16 %v8212_v60, %v8212_v60 }
 0xab3   :  { %1691 = vrot.lane.b32.xlu1 %v1679_v61, %s7726_s30 }
 0xb21   :  { %v1775_v62 = vpop.permute.xlu1 %1774 }
 0xb22   :  { %6867 = vmatmul.mubr.msk.bf16.vlgmr.msra.gmra.mxu1 %vm958_vm2, %v1775_v62 }
 0xb23   :  { %6882 = vmatprep.mubr.msk.bf16.mxu1 %vm7723_vm1, %v7722_v0  ;;  %6879 = vmatpush3.bf16.msra.mxu1 %v7336_v37 }
 0xb24   :  { %6880 = vmatprep.subr.bf16.mxu1 %v7722_v0 }
 0xb25   :  { %v1692_v63 = vpop.permute.xlu1 %1691 }
 0xb26   :  { %6859 = vmatmul.mubr.msk.bf16.vlgmr.msra.gmra.mxu0 %vm958_vm2, %v1692_v63 }
 0xb27   :  { %6874 = vmatprep.mubr.msk.bf16.mxu0 %vm7723_vm1, %v7722_v0  ;;  %6871 = vmatpush3.bf16.msra.mxu0 %v7337_v41 }
 0xb28   :  { %6872 = vmatprep.subr.bf16.mxu0 %v7722_v0  ;;  %6881 = vmatpush3.bf16.msra.mxu1 %v7338_v42 }
 0xb29   :  { %6894 = vmatprep.subr.bf16.mxu1 %v7722_v0 }
 0xb2b   :  { %6873 = vmatpush3.bf16.msra.mxu0 %v7339_v45 }
 0xb2c   :  { %6886 = vmatprep.subr.bf16.mxu0 %v7722_v0 }
 0xbe2   :  { %v1825_v2 = vpop.f32.mrf.mxu1 }
 0xbe3   :  { %v1826_v3 = vadd.f32 %v1825_v2, %v1772_v1 }
 0xbe4   :  { %v6868_v38 = vpop.f32.mrf.mxu1 }
 0xbe5   :  { %7496 = vtanh.f32 %v1826_v3  ;;  %v6291_v16 = vmul.f32 -1.442695, %v1826_v3 }
 0xbe6   :  { %v1742_v39 = vpop.f32.mrf.mxu0  ;;  %v1828_v7 = vpop.f32.mrf.mxu1 }
 0xbe7   :  { %v1743_v9 = vadd.f32 %v1742_v39, %v1689_v5 }
 0xbe8   :  { %v6860_v10 = vpop.f32.mrf.mxu0  ;;  %v6869_v11 = vpop.f32.mrf.mxu1 }
 0xbe9   :  { %7498 = vtanh.f32 %v1743_v9  ;;  %v6287_v17 = vmul.f32 -1.442695, %v1743_v9 }
 0xbea   :  { %v1745_v12 = vpop.f32.mrf.mxu0  ;;  %7500 = vpow2.f32 %v6291_v16 }
 0xbeb   :  { %7502 = vpow2.f32 %v6287_v17 }
 0xbec   :  { %v6861_v13 = vpop.f32.mrf.mxu0 }
 0xbf2   :  { %v7497_v14 = vpop.eup %7496 }
 0xbf3   :  { %1840 = vrot.lane.b32.xlu0 %v7497_v14, %s7725_s2 }
 0xbf6   :  { %v7499_v15 = vpop.eup %7498 }
 0xbf7   :  { %1757 = vrot.lane.b32.xlu0 %v7499_v15, %s7725_s2  ;;  %v7501_v18 = vpop.eup %7500 }
 0xbf8   :  { %v1834_v20 = vadd.f32 1.0, %v7501_v18  ;;  %v7503_v21 = vpop.eup %7502 }
 0xbf9   :  { %v1751_v23 = vadd.f32 1.0, %v7503_v21 }
 0xbfa   :  { %7504 = vrcp.f32 %v1834_v20 }
 0xbfb   :  { %7506 = vrcp.f32 %v1751_v23 }
 0xc07   :  { %v7505_v24 = vpop.eup %7504 }
 0xc08   :  { %v7507_v27 = vpop.eup %7506  ;;  %v1838_v30 = vmul.f32 %v7505_v24, %v8183_v46 }
 0xc09   :  { %v1755_v33 = vmul.f32 %v7507_v27, %v8187_v49 }
 0xc65   :  { %v1841_v25 = vpop.permute.xlu0 %1840 }
 0xc66   :  { %v1843_v26 = vmul.f32 %v7505_v24, %v1841_v25 }
 0xc68   :  { %1845 = vrot.lane.b32.xlu1 %v1843_v26, %s7726_s30 }
 0xc69   :  { %v1758_v28 = vpop.permute.xlu0 %1757 }
 0xc6a   :  { %v1760_v29 = vmul.f32 %v7507_v27, %v1758_v28  ;;  %v7340_v28 = vld [vmem:[%s9418_s5 + $0x8] sm:$0xff]  }
 0xc6c   :  { %1762 = vrot.lane.b32.xlu0 %v1760_v29, %s7726_s30  ;;  %v7341_v29 = vld [vmem:[%s9417_s4 + $0x8] sm:$0xff]  }
 0xcda   :  { %v1846_v31 = vpop.permute.xlu1 %1845 }
 0xcdb   :  { %v8229_v32 = vadd.f32 %v1846_v31, %v1838_v30  ;;  %v7342_v30 = vld [vmem:[%s9418_s5] sm:$0xff]  }
 0xcdd   :  { %7508 = vtanh.f32 %v8229_v32 }
 0xcde   :  { %v1763_v34 = vpop.permute.xlu0 %1762 }
 0xcdf   :  { %v8233_v36 = vadd.f32 %v1763_v34, %v1755_v33  ;;  %v7343_v33 = vld [vmem:[%s9417_s4] sm:$0xff]  }
 0xce1   :  { %7510 = vtanh.f32 %v8233_v36 }
 0xcea   :  { %v7509_v43 = vpop.eup %7508 }
 0xceb   :  { %1851 = vrot.lane.b32.xlu1 %v7509_v43, %s7725_s2 }
 0xcee   :  { %v7511_v44 = vpop.eup %7510 }
 0xcef   :  { %1768 = vrot.lane.b32.xlu0 %v7511_v44, %s7725_s2 }
 0xd5d   :  { %v1852_v46 = vpop.permute.xlu1 %1851 }
 0xd5e   :  { %v8254_v47 = vmul.f32 %v7505_v24, %v1852_v46  ;;  %v2148_v46 = vld [vmem:[#allocation3 + $0x2] sm:$0x3] }
 0xd60   :  { %v1872_v48 = vpack.c.bf16 %v8254_v47, %v8254_v47 }
 0xd61   :  { %v1769_v49 = vpop.permute.xlu0 %1768 }
 0xd62   :  { %v8258_v50 = vmul.f32 %v7507_v27, %v1769_v49  ;;  %1962 = vrot.lane.b32.xlu1 %v1872_v48, %s7726_s30 }
 0xd64   :  { %v1867_v51 = vpack.c.bf16 %v8258_v50, %v8258_v50 }
 0xd66   :  { %1879 = vrot.lane.b32.xlu1 %v1867_v51, %s7726_s30 }
 0xdd4   :  { %v1963_v52 = vpop.permute.xlu1 %1962 }
 0xdd5   :  { %6883 = vmatmul.mubr.msk.bf16.vlgmr.msra.gmra.mxu1 %vm958_vm2, %v1963_v52  ;;  %v2065_v52 = vld [vmem:[#allocation2 + $0xc] sm:$0x3] }
 0xdd6   :  { %6898 = vmatprep.mubr.msk.bf16.mxu1 %vm7723_vm1, %v7722_v0  ;;  %6895 = vmatpush3.bf16.msra.mxu1 %v7340_v28 }
 0xdd7   :  { %6896 = vmatprep.subr.bf16.mxu1 %v7722_v0 }
 0xdd8   :  { %v1880_v53 = vpop.permute.xlu1 %1879 }
 0xdd9   :  { %6875 = vmatmul.mubr.msk.bf16.vlgmr.msra.gmra.mxu0 %vm958_vm2, %v1880_v53 }
 0xdda   :  { %6890 = vmatprep.mubr.msk.bf16.mxu0 %vm7723_vm1, %v7722_v0  ;;  %6887 = vmatpush3.bf16.msra.mxu0 %v7341_v29 }
 0xddb   :  { %6888 = vmatprep.subr.bf16.mxu0 %v7722_v0  ;;  %6897 = vmatpush3.bf16.msra.mxu1 %v7342_v30 }
 0xddc   :  { %6910 = vmatprep.subr.bf16.mxu1 %v7722_v0 }
 0xdde   :  { %6889 = vmatpush3.bf16.msra.mxu0 %v7343_v33 }
 0xddf   :  { %6902 = vmatprep.subr.bf16.mxu0 %v7722_v0 }
 0xe95   :  { %v2013_v55 = vpop.f32.mrf.mxu1 }
 0xe96   :  { %v2014_v56 = vadd.f32 %v2013_v55, %v1960_v54 }
 0xe97   :  { %v6884_v58 = vpop.f32.mrf.mxu1 }
 0xe98   :  { %7512 = vtanh.f32 %v2014_v56  ;;  %v6299_v7 = vmul.f32 -1.442695, %v2014_v56 }
 0xe99   :  { %v1930_v61 = vpop.f32.mrf.mxu0  ;;  %v2016_v62 = vpop.f32.mrf.mxu1 }
 0xe9a   :  { %v1931_v63 = vadd.f32 %v1930_v61, %v1877_v59 }
 0xe9b   :  { %v6876_v1 = vpop.f32.mrf.mxu0  ;;  %v6885_v2 = vpop.f32.mrf.mxu1 }
 0xe9c   :  { %7514 = vtanh.f32 %v1931_v63  ;;  %v6295_v9 = vmul.f32 -1.442695, %v1931_v63 }
 0xe9d   :  { %v1933_v3 = vpop.f32.mrf.mxu0  ;;  %7516 = vpow2.f32 %v6299_v7 }
 0xe9e   :  { %7518 = vpow2.f32 %v6295_v9 }
 0xe9f   :  { %v6877_v38 = vpop.f32.mrf.mxu0 }
 0xea5   :  { %v7513_v5 = vpop.eup %7512 }
 0xea6   :  { %2028 = vrot.lane.b32.xlu0 %v7513_v5, %s7725_s2 }
 0xea9   :  { %v7515_v39 = vpop.eup %7514 }
 0xeaa   :  { %1945 = vrot.lane.b32.xlu0 %v7515_v39, %s7725_s2  ;;  %v7517_v10 = vpop.eup %7516 }
 0xeab   :  { %v2022_v11 = vadd.f32 1.0, %v7517_v10  ;;  %v7519_v12 = vpop.eup %7518 }
 0xeac   :  { %v1939_v13 = vadd.f32 1.0, %v7519_v12 }
 0xead   :  { %7520 = vrcp.f32 %v2022_v11 }
 0xeae   :  { %7522 = vrcp.f32 %v1939_v13 }
 0xeba   :  { %v7521_v14 = vpop.eup %7520 }
 0xebb   :  { %v7523_v17 = vpop.eup %7522  ;;  %v2026_v21 = vmul.f32 %v7521_v14, %v8229_v32 }
 0xebc   :  { %v1943_v25 = vmul.f32 %v7523_v17, %v8233_v36 }
 0xf18   :  { %v2029_v15 = vpop.permute.xlu0 %2028 }
 0xf19   :  { %v2031_v16 = vmul.f32 %v7521_v14, %v2029_v15 }
 0xf1b   :  { %2033 = vrot.lane.b32.xlu1 %v2031_v16, %s7726_s30 }
 0xf1c   :  { %v1946_v18 = vpop.permute.xlu0 %1945 }
 0xf1d   :  { %v1948_v20 = vmul.f32 %v7523_v17, %v1946_v18 }
 0xf1f   :  { %1950 = vrot.lane.b32.xlu0 %v1948_v20, %s7726_s30 }
 0xf8d   :  { %v2034_v23 = vpop.permute.xlu1 %2033 }
 0xf8e   :  { %v8275_v24 = vadd.f32 %v2034_v23, %v2026_v21  ;;  %v7344_v21 = vld [vmem:[%s9418_s5 + $0x8] sm:$0xff]  }
 0xf8f   :  { %v7345_v23 = vld [vmem:[%s9417_s4 + $0x8] sm:$0xff]  }
 0xf90   :  { %7524 = vtanh.f32 %v8275_v24 }
 0xf91   :  { %v1951_v26 = vpop.permute.xlu0 %1950 }
 0xf92   :  { %v8279_v27 = vadd.f32 %v1951_v26, %v1943_v25 }
 0xf94   :  { %7526 = vtanh.f32 %v8279_v27 }
 0xf9d   :  { %v7525_v31 = vpop.eup %7524 }
 0xf9e   :  { %2039 = vrot.lane.b32.xlu1 %v7525_v31, %s7725_s2 }
 0xfa1   :  { %v7527_v32 = vpop.eup %7526 }
 0xfa2   :  { %1956 = vrot.lane.b32.xlu0 %v7527_v32, %s7725_s2 }
0x1010   :  { %v2040_v34 = vpop.permute.xlu1 %2039 }
0x1011   :  { %v8300_v36 = vmul.f32 %v7521_v14, %v2040_v34 }
0x1013   :  { %v2060_v37 = vpack.c.bf16 %v8300_v36, %v8300_v36 }
0x1014   :  { %v1957_v41 = vpop.permute.xlu0 %1956 }
0x1015   :  { %v8304_v42 = vmul.f32 %v7523_v17, %v1957_v41  ;;  %2150 = vrot.lane.b32.xlu1 %v2060_v37, %s7726_s30  ;;  %v2336_v41 = vld [vmem:[#allocation3] sm:$0x3] }
0x1017   :  { %v2055_v43 = vpack.c.bf16 %v8304_v42, %v8304_v42 }
0x1019   :  { %2067 = vrot.lane.b32.xlu1 %v2055_v43, %s7726_s30 }
0x1087   :  { %v2151_v44 = vpop.permute.xlu1 %2150 }
0x1088   :  { %6899 = vmatmul.mubr.msk.bf16.vlgmr.msra.gmra.mxu1 %vm958_vm2, %v2151_v44 }
0x1089   :  { %6914 = vmatprep.mubr.msk.bf16.mxu1 %vm7723_vm1, %v7722_v0  ;;  %6911 = vmatpush3.bf16.msra.mxu1 %v7344_v21 }
0x108a   :  { %6912 = vmatprep.subr.bf16.mxu1 %v7722_v0 }
0x108b   :  { %v2068_v45 = vpop.permute.xlu1 %2067 }
0x108c   :  { %6891 = vmatmul.mubr.msk.bf16.vlgmr.msra.gmra.mxu0 %vm958_vm2, %v2068_v45 }
0x108d   :  { %6906 = vmatprep.mubr.msk.bf16.mxu0 %vm7723_vm1, %v7722_v0  ;;  %6903 = vmatpush3.bf16.msra.mxu0 %v7345_v23 }
0x108e   :  { %6904 = vmatprep.subr.bf16.mxu0 %v7722_v0 }
0x1148   :  { %v2201_v48 = vpop.f32.mrf.mxu1 }
0x1149   :  { %v2202_v49 = vadd.f32 %v2201_v48, %v2148_v46  ;;  %v2253_v46 = vld [vmem:[#allocation2 + $0xe] sm:$0x3] }
0x114a   :  { %v6900_v51 = vpop.f32.mrf.mxu1 }
0x114b   :  { %7528 = vtanh.f32 %v2202_v49  ;;  %v6307_v1 = vmul.f32 -1.442695, %v2202_v49 }
0x114c   :  { %v2118_v53 = vpop.f32.mrf.mxu0  ;;  %v2204_v54 = vpop.f32.mrf.mxu1 }
0x114d   :  { %v2119_v55 = vadd.f32 %v2118_v53, %v2065_v52 }
0x114e   :  { %v6892_v56 = vpop.f32.mrf.mxu0  ;;  %v6901_v58 = vpop.f32.mrf.mxu1 }
0x114f   :  { %7530 = vtanh.f32 %v2119_v55  ;;  %v6303_v2 = vmul.f32 -1.442695, %v2119_v55 }
0x1150   :  { %v2121_v59 = vpop.f32.mrf.mxu0  ;;  %7532 = vpow2.f32 %v6307_v1 }
0x1151   :  { %7534 = vpow2.f32 %v6303_v2 }
0x1152   :  { %v6893_v61 = vpop.f32.mrf.mxu0 }
0x1158   :  { %v7529_v62 = vpop.eup %7528 }
0x1159   :  { %2216 = vrot.lane.b32.xlu0 %v7529_v62, %s7725_s2 }
0x115c   :  { %v7531_v63 = vpop.eup %7530 }
0x115d   :  { %2133 = vrot.lane.b32.xlu0 %v7531_v63, %s7725_s2  ;;  %v7533_v3 = vpop.eup %7532 }
0x115e   :  { %v2210_v38 = vadd.f32 1.0, %v7533_v3  ;;  %v7535_v5 = vpop.eup %7534 }
0x115f   :  { %v2127_v39 = vadd.f32 1.0, %v7535_v5 }
0x1160   :  { %7536 = vrcp.f32 %v2210_v38 }
0x1161   :  { %7538 = vrcp.f32 %v2127_v39 }
0x116d   :  { %v7537_v7 = vpop.eup %7536 }
0x116e   :  { %v7539_v11 = vpop.eup %7538  ;;  %v2214_v14 = vmul.f32 %v7537_v7, %v8275_v24  ;;  %v7346_v24 = vld [vmem:[%s9418_s5] sm:$0xff]  }
0x116f   :  { %v2131_v17 = vmul.f32 %v7539_v11, %v8279_v27  ;;  %6913 = vmatpush3.bf16.msra.mxu1 %v7346_v24  ;;  %v7347_v27 = vld [vmem:[%s9417_s4] sm:$0xff]   ;;  %v7350_v24 = vld [vmem:[%s9384_s9 + $0x8] sm:$0xff]  }
0x1170   :  { %6926 = vmatprep.subr.bf16.mxu1 %v7722_v0  ;;  %6905 = vmatpush3.bf16.msra.mxu0 %v7347_v27 }
0x1171   :  { %6918 = vmatprep.subr.bf16.mxu0 %v7722_v0 }
0x11cb   :  { %v2217_v9 = vpop.permute.xlu0 %2216 }
0x11cc   :  { %v2219_v10 = vmul.f32 %v7537_v7, %v2217_v9 }
0x11ce   :  { %2221 = vrot.lane.b32.xlu1 %v2219_v10, %s7726_s30 }
0x11cf   :  { %v2134_v12 = vpop.permute.xlu0 %2133 }
0x11d0   :  { %v2136_v13 = vmul.f32 %v7539_v11, %v2134_v12 }
0x11d2   :  { %2138 = vrot.lane.b32.xlu0 %v2136_v13, %s7726_s30  ;;  %v7348_v13 = vld [vmem:[%s9421_s6 + $0x8] sm:$0xff]  }
0x1240   :  { %v2222_v15 = vpop.permute.xlu1 %2221 }
0x1241   :  { %v8321_v16 = vadd.f32 %v2222_v15, %v2214_v14  ;;  %v7349_v14 = vld [vmem:[%s9421_s6] sm:$0xff]  }
0x1243   :  { %7540 = vtanh.f32 %v8321_v16 }
0x1244   :  { %v2139_v18 = vpop.permute.xlu0 %2138 }
0x1245   :  { %v8325_v20 = vadd.f32 %v2139_v18, %v2131_v17 }
0x1247   :  { %7542 = vtanh.f32 %v8325_v20 }
0x1250   :  { %v7541_v25 = vpop.eup %7540 }
0x1251   :  { %2227 = vrot.lane.b32.xlu1 %v7541_v25, %s7725_s2 }
0x1254   :  { %v7543_v26 = vpop.eup %7542 }
0x1255   :  { %2144 = vrot.lane.b32.xlu0 %v7543_v26, %s7725_s2 }
0x12c3   :  { %v2228_v28 = vpop.permute.xlu1 %2227 }
0x12c4   :  { %v8346_v29 = vmul.f32 %v7537_v7, %v2228_v28 }
0x12c6   :  { %v2248_v30 = vpack.c.bf16 %v8346_v29, %v8346_v29 }
0x12c7   :  { %v2145_v31 = vpop.permute.xlu0 %2144 }
0x12c8   :  { %v8350_v32 = vmul.f32 %v7539_v11, %v2145_v31  ;;  %2338 = vrot.lane.b32.xlu1 %v2248_v30, %s7726_s30  ;;  %v7354_v31 = vld [vmem:[%s9384_s9 + $0x8] sm:$0xff]  }
0x12ca   :  { %v2243_v33 = vpack.c.bf16 %v8350_v32, %v8350_v32 }
0x12cc   :  { %2255 = vrot.lane.b32.xlu1 %v2243_v33, %s7726_s30 }
0x133a   :  { %v2339_v34 = vpop.permute.xlu1 %2338 }
0x133b   :  { %6915 = vmatmul.mubr.msk.bf16.vlgmr.msra.gmra.mxu1 %vm958_vm2, %v2339_v34  ;;  %v7356_v34 = vld [vmem:[%s9421_s6 + $0x8] sm:$0xff]  }
0x133c   :  { %6930 = vmatprep.mubr.msk.bf16.mxu1 %vm7723_vm1, %v7722_v0  ;;  %6927 = vmatpush3.bf16.msra.mxu1 %v7348_v13  ;;  %v7384_v13 = vld [vmem:[%s9421_s6] sm:$0xff]  }
0x133d   :  { %6928 = vmatprep.subr.bf16.mxu1 %v7722_v0 }
0x133e   :  { %v2256_v37 = vpop.permute.xlu1 %2255 }
0x133f   :  { %6907 = vmatmul.mubr.msk.bf16.vlgmr.msra.gmra.mxu0 %vm958_vm2, %v2256_v37 }
0x1340   :  { %6922 = vmatprep.mubr.msk.bf16.mxu0 %vm7723_vm1, %v7722_v0  ;;  %6929 = vmatpush3.bf16.msra.mxu1 %v7349_v14 }
0x1341   :  { %6942 = vmatprep.subr.bf16.mxu1 %v7722_v0 }
0x13fb   :  { %v2389_v43 = vpop.f32.mrf.mxu1 }
0x13fc   :  { %v2390_v44 = vadd.f32 %v2389_v43, %v2336_v41  ;;  %v7358_v41 = vld [vmem:[%s9384_s9 + $0x8] sm:$0xff]  }
0x13fd   :  { %v6916_v45 = vpop.f32.mrf.mxu1 }
0x13fe   :  { %7544 = vtanh.f32 %v2390_v44  ;;  %v6315_v59 = vmul.f32 -1.442695, %v2390_v44  ;;  %v7359_v44 = vld [vmem:[%s9384_s9] sm:$0xff]   ;;  %v7360_v45 = vld [vmem:[%s9421_s6 + $0x8] sm:$0xff]  }
0x13ff   :  { %v2306_v48 = vpop.f32.mrf.mxu0  ;;  %v2392_v49 = vpop.f32.mrf.mxu1 }
0x1400   :  { %v2307_v51 = vadd.f32 %v2306_v48, %v2253_v46  ;;  %v7361_v46 = vld [vmem:[%s9421_s6] sm:$0xff]   ;;  %v7362_v49 = vld [vmem:[%s9384_s9 + $0x8] sm:$0xff]  }
0x1401   :  { %v6908_v52 = vpop.f32.mrf.mxu0  ;;  %v6917_v53 = vpop.f32.mrf.mxu1 }
0x1402   :  { %7546 = vtanh.f32 %v2307_v51  ;;  %v6311_v61 = vmul.f32 -1.442695, %v2307_v51  ;;  %v7363_v52 = vld [vmem:[%s9384_s9] sm:$0xff]   ;;  %v7364_v53 = vld [vmem:[%s9421_s6 + $0x8] sm:$0xff]  }
0x1403   :  { %v2309_v54 = vpop.f32.mrf.mxu0  ;;  %7548 = vpow2.f32 %v6315_v59  ;;  %v7367_v59 = vld [vmem:[%s9384_s9] sm:$0xff]  }
0x1404   :  { %7550 = vpow2.f32 %v6311_v61  ;;  %v7365_v54 = vld [vmem:[%s9421_s6] sm:$0xff]   ;;  %v7368_v61 = vld [vmem:[%s9421_s6 + $0x8] sm:$0xff]  }
0x1405   :  { %v6909_v55 = vpop.f32.mrf.mxu0 }
0x140b   :  { %v7545_v56 = vpop.eup %7544 }
0x140c   :  { %2404 = vrot.lane.b32.xlu0 %v7545_v56, %s7725_s2  ;;  %v7366_v56 = vld [vmem:[%s9384_s9 + $0x8] sm:$0xff]  }
0x140f   :  { %v7547_v58 = vpop.eup %7546 }
0x1410   :  { %2321 = vrot.lane.b32.xlu0 %v7547_v58, %s7725_s2  ;;  %v7549_v62 = vpop.eup %7548 }
0x1411   :  { %v2398_v63 = vadd.f32 1.0, %v7549_v62  ;;  %v7551_v1 = vpop.eup %7550  ;;  %v7369_v62 = vld [vmem:[%s9421_s6] sm:$0xff]  }
0x1412   :  { %v2315_v2 = vadd.f32 1.0, %v7551_v1  ;;  %v7370_v1 = vld [vmem:[%s9384_s9 + $0x8] sm:$0xff]  }
0x1413   :  { %7552 = vrcp.f32 %v2398_v63 }
0x1414   :  { %7554 = vrcp.f32 %v2315_v2 }
0x1420   :  { %v7553_v3 = vpop.eup %7552 }
0x1421   :  { %v8365_v39 = vpop.eup %7554  ;;  %v2402_v10 = vmul.f32 %v7553_v3, %v8321_v16 }
0x1422   :  { %v2319_v16 = vmul.f32 %v8365_v39, %v8325_v20 }
0x147e   :  { %v2405_v38 = vpop.permute.xlu0 %2404 }
0x147f   :  { %v2407_v5 = vmul.f32 %v7553_v3, %v2405_v38  ;;  %v7372_v38 = vld [vmem:[%s9421_s6 + $0x8] sm:$0xff]  }
0x1481   :  { %2409 = vrot.lane.b32.xlu1 %v2407_v5, %s7726_s30  ;;  %v7373_v5 = vld [vmem:[%s9421_s6] sm:$0xff]  }
0x1482   :  { %v2322_v7 = vpop.permute.xlu0 %2321 }
0x1483   :  { %v2324_v9 = vmul.f32 %v8365_v39, %v2322_v7  ;;  %v7374_v7 = vld [vmem:[%s9384_s9 + $0x8] sm:$0xff]  }
0x1485   :  { %2326 = vrot.lane.b32.xlu0 %v2324_v9, %s7726_s30 }
0x14f3   :  { %v2410_v11 = vpop.permute.xlu1 %2409 }
0x14f4   :  { %v2412_v12 = vadd.f32 %v2410_v11, %v2402_v10  ;;  %v7375_v10 = vld [vmem:[%s9384_s9] sm:$0xff]   ;;  %v7382_v11 = vld [vmem:[%s9421_s6 + $0x8] sm:$0xff]  }
0x14f6   :  { %7556 = vtanh.f32 %v2412_v12 }
0x14f7   :  { %v2327_v17 = vpop.permute.xlu0 %2326 }
0x14f8   :  { %v2329_v18 = vadd.f32 %v2327_v17, %v2319_v16 }
0x14fa   :  { %7558 = vtanh.f32 %v2329_v18 }
0x1503   :  { %v7557_v15 = vpop.eup %7556 }
0x1504   :  { %2415 = vrot.lane.b32.xlu1 %v7557_v15, %s7725_s2  ;;  %v7378_v15 = vld [vmem:[%s9386_s10 + $0x8] sm:$0xff]  }
0x1507   :  { %v7559_v21 = vpop.eup %7558 }
0x1508   :  { %1104 = vrot.lane.b32.xlu1 %v8074_v40, %s7726_s30  ;;  %v7376_v40 = vld [vmem:[%s9385_s8 + $0x8] sm:$0xff]  }
0x1509   :  { %6919 = vmatpush3.bf16.msra.mxu0 %v7376_v40  ;;  %v7379_v40 = vld [vmem:[%s9386_s10] sm:$0xff]  }
0x150a   :  { %6920 = vmatprep.subr.bf16.mxu0 %v7722_v0 }
0x150c   :  { %1292 = vrot.lane.b32.xlu1 %v8120_v22, %s7726_s30  ;;  %v7377_v22 = vld [vmem:[%s9385_s8] sm:$0xff]  }
0x150d   :  { %6921 = vmatpush3.bf16.msra.mxu0 %v7377_v22 }
0x150e   :  { %6934 = vmatprep.subr.bf16.mxu0 %v7722_v0 }
0x1510   :  { %1480 = vrot.lane.b32.xlu1 %v8166_v8, %s7726_s30 }
0x1514   :  { %1668 = vrot.lane.b32.xlu1 %v8212_v60, %s7726_s30 }
0x1518   :  { %2332 = vrot.lane.b32.xlu1 %v7559_v21, %s7725_s2 }
0x151c   :  { %1856 = vrot.lane.b32.xlu1 %v8258_v50, %s7726_s30 }
0x1520   :  { %2044 = vrot.lane.b32.xlu1 %v8304_v42, %s7726_s30 }
0x1524   :  { %2232 = vrot.lane.b32.xlu1 %v8350_v32, %s7726_s30 }
0x1576   :  { %v2416_v8 = vpop.permute.xlu1 %2415 }
0x1577   :  { %v2418_v60 = vmul.f32 %v7553_v3, %v2416_v8  ;;  %v7371_v3 = vld [vmem:[%s9384_s9] sm:$0xff]   ;;  %v7380_v8 = vld [vmem:[%s9385_s8 + $0x8] sm:$0xff]  }
0x1579   :  { %2426 = vrot.lane.b32.xlu0 %v2418_v60, %s7726_s30 }
0x157a   :  { %v1105_v50 = vpop.permute.xlu1 %1104 }
0x157b   :  { %1108 = vst.msk [vmem:[#allocation4] sm:$0x3] %vm1107_vm3, %v1105_v50  ;;  %v7381_v50 = vld [vmem:[%s9385_s8] sm:$0xff]  }
0x157d   :  { %2238 = vrot.lane.b32.xlu0 %v8346_v29, %s7726_s30 }
0x157e   :  { %v1293_v42 = vpop.permute.xlu1 %1292 }
0x157f   :  { %1296 = vst.msk [vmem:[#allocation4 + $0x2] sm:$0x3] %vm1107_vm3, %v1293_v42 }
0x1581   :  { %2050 = vrot.lane.b32.xlu0 %v8300_v36, %s7726_s30  ;;  %v7351_v36 = vld [vmem:[%s9384_s9] sm:$0xff]  }
0x1582   :  { %v1481_v20 = vpop.permute.xlu1 %1480  ;;  %v2444_v23 = vld [vmem:[#allocation4] sm:$0x3] }
0x1583   :  { %1484 = vst.msk [vmem:[#allocation4 + $0x4] sm:$0x3] %vm1107_vm3, %v1481_v20  ;;  %v2445_v25 = vpack.c.bf16 %v2444_v23, %v2444_v23 }
0x1585   :  { %6931 = vmatmul.mubr.msk.bf16.vlgmr.msra.gmra.mxu1 %vm958_vm2, %v2445_v25  ;;  %1862 = vrot.lane.b32.xlu0 %v8254_v47, %s7726_s30  ;;  %v7352_v47 = vld [vmem:[%s9421_s6 + $0x8] sm:$0xff]  }
0x1586   :  { %6943 = vmatpush3.bf16.msra.mxu1 %v7350_v24  ;;  %v1669_v26 = vpop.permute.xlu1 %1668  ;;  %6946 = vmatprep.mubr.msk.bf16.mxu1 %vm7723_vm1, %v7722_v0  ;;  %v2683_v30 = vld [vmem:[#allocation4 + $0x2] sm:$0x3]  ;;  %v7383_v24 = vld [vmem:[%s9386_s10 + $0x8] sm:$0xff]  }
0x1587   :  { %1672 = vst.msk [vmem:[#allocation4 + $0x6] sm:$0x3] %vm1107_vm3, %v1669_v26  ;;  %6944 = vmatprep.subr.bf16.mxu1 %v7722_v0  ;;  %v2684_v32 = vpack.c.bf16 %v2683_v30, %v2683_v30  ;;  %v7389_v30 = vld [vmem:[%s9385_s8] sm:$0xff]  }
0x1589   :  { %1674 = vrot.lane.b32.xlu0 %v8208_v57, %s7726_s30  ;;  %v7353_v57 = vld [vmem:[%s9421_s6] sm:$0xff]  }
0x158a   :  { %6945 = vmatpush3.bf16.msra.mxu1 %v7351_v36  ;;  %v2333_v27 = vpop.permute.xlu1 %2332  ;;  %v2923_v37 = vld [vmem:[#allocation4 + $0x4] sm:$0x3] }
0x158b   :  { %v2335_v28 = vmul.f32 %v8365_v39, %v2333_v27  ;;  %6958 = vmatprep.subr.bf16.mxu1 %v7722_v0  ;;  %v2924_v43 = vpack.c.bf16 %v2923_v37, %v2923_v37  ;;  %v7385_v36 = vld [vmem:[%s9386_s10] sm:$0xff]  }
0x158d   :  { %6947 = vmatmul.mubr.msk.bf16.vlgmr.msra.gmra.mxu1 %vm958_vm2, %v2445_v25  ;;  %1486 = vrot.lane.b32.xlu0 %v8162_v6, %s7726_s30 }
0x158e   :  { %2420 = vrot.lane.b32.xlu1 %v2335_v28, %s7726_s30  ;;  %6959 = vmatpush3.bf16.msra.mxu1 %v7352_v47  ;;  %v1857_v29 = vpop.permute.xlu1 %1856  ;;  %v3163_v48 = vld [vmem:[#allocation4 + $0x6] sm:$0x3]  ;;  %v7386_v47 = vld [vmem:[%s9384_s9 + $0x8] sm:$0xff]  }
0x158f   :  { %1860 = vst.msk [vmem:[#allocation4 + $0x8] sm:$0x3] %vm1107_vm3, %v1857_v29  ;;  %6960 = vmatprep.subr.bf16.mxu1 %v7722_v0  ;;  %6962 = vmatprep.mubr.msk.bf16.mxu1 %vm7723_vm1, %v7722_v0  ;;  %v3164_v51 = vpack.c.bf16 %v3163_v48, %v3163_v48  ;;  %v7387_v29 = vld [vmem:[%s9385_s8 + $0x8] sm:$0xff]  }
0x1591   :  { %1298 = vrot.lane.b32.xlu0 %v8116_v19, %s7726_s30  ;;  %v7355_v19 = vld [vmem:[%s9384_s9] sm:$0xff]  }
0x1592   :  { %6961 = vmatpush3.bf16.msra.mxu1 %v7353_v57  ;;  %v2045_v6 = vpop.permute.xlu1 %2044  ;;  %v7388_v57 = vld [vmem:[%s9384_s9] sm:$0xff]  }
0x1593   :  { %2048 = vst.msk [vmem:[#allocation4 + $0xa] sm:$0x3] %vm1107_vm3, %v2045_v6  ;;  %6974 = vmatprep.subr.bf16.mxu1 %v7722_v0  ;;  %v7412_v6 = vld [vmem:[%s9387_s12] sm:$0xff]  }
0x1595   :  { %6963 = vmatmul.mubr.msk.bf16.vlgmr.msra.gmra.mxu1 %vm958_vm2, %v2684_v32  ;;  %1110 = vrot.lane.b32.xlu0 %v8070_v35, %s7726_s30  ;;  %v7357_v35 = vld [vmem:[%s9421_s6] sm:$0xff]  }
0x1596   :  { %6975 = vmatpush3.bf16.msra.mxu1 %v7354_v31  ;;  %v2233_v33 = vpop.permute.xlu1 %2232  ;;  %6978 = vmatprep.mubr.msk.bf16.mxu1 %vm7723_vm1, %v7722_v0  ;;  %v3403_v55 = vld [vmem:[#allocation4 + $0x8] sm:$0x3] }
0x1597   :  { %2236 = vst.msk [vmem:[#allocation4 + $0xc] sm:$0x3] %vm1107_vm3, %v2233_v33  ;;  %6976 = vmatprep.subr.bf16.mxu1 %v7722_v0  ;;  %v3404_v58 = vpack.c.bf16 %v3403_v55, %v3403_v55 }
0x159a   :  { %6977 = vmatpush3.bf16.msra.mxu1 %v7355_v19  ;;  %v3643_v63 = vld [vmem:[#allocation4 + $0xa] sm:$0x3]  ;;  %v7391_v19 = vld [vmem:[%s9386_s10] sm:$0xff]  }
0x159b   :  { %6990 = vmatprep.subr.bf16.mxu1 %v7722_v0  ;;  %v3644_v2 = vpack.c.bf16 %v3643_v63, %v3643_v63 }
0x159d   :  { %6979 = vmatmul.mubr.msk.bf16.vlgmr.msra.gmra.mxu1 %vm958_vm2, %v2684_v32  ;;  %v7390_v32 = vld [vmem:[%s9386_s10 + $0x8] sm:$0xff]  }
0x159e   :  { %6991 = vmatpush3.bf16.msra.mxu1 %v7356_v34  ;;  %6994 = vmatprep.mubr.msk.bf16.mxu1 %vm7723_vm1, %v7722_v0  ;;  %v3883_v39 = vld [vmem:[#allocation4 + $0xc] sm:$0x3] }
0x159f   :  { %6992 = vmatprep.subr.bf16.mxu1 %v7722_v0  ;;  %v3884_v9 = vpack.c.bf16 %v3883_v39, %v3883_v39  ;;  %v7392_v34 = vld [vmem:[%s9385_s8 + $0x8] sm:$0xff]  }
0x15a2   :  { %6993 = vmatpush3.bf16.msra.mxu1 %v7357_v35  ;;  %v7393_v35 = vld [vmem:[%s9385_s8] sm:$0xff]  }
0x15a3   :  { %7006 = vmatprep.subr.bf16.mxu1 %v7722_v0 }
0x15a5   :  { %6995 = vmatmul.mubr.msk.bf16.vlgmr.msra.gmra.mxu1 %vm958_vm2, %v2924_v43 }
0x15a6   :  { %7007 = vmatpush3.bf16.msra.mxu1 %v7358_v41  ;;  %7010 = vmatprep.mubr.msk.bf16.mxu1 %vm7723_vm1, %v7722_v0  ;;  %v7394_v41 = vld [vmem:[%s9386_s10 + $0x8] sm:$0xff]  }
0x15a7   :  { %7008 = vmatprep.subr.bf16.mxu1 %v7722_v0 }
0x15aa   :  { %7009 = vmatpush3.bf16.msra.mxu1 %v7359_v44  ;;  %v7395_v44 = vld [vmem:[%s9386_s10] sm:$0xff]  }
0x15ab   :  { %7022 = vmatprep.subr.bf16.mxu1 %v7722_v0 }
0x15ad   :  { %7011 = vmatmul.mubr.msk.bf16.vlgmr.msra.gmra.mxu1 %vm958_vm2, %v2924_v43 }
0x15ae   :  { %7023 = vmatpush3.bf16.msra.mxu1 %v7360_v45  ;;  %7026 = vmatprep.mubr.msk.bf16.mxu1 %vm7723_vm1, %v7722_v0  ;;  %v7396_v45 = vld [vmem:[%s9385_s8 + $0x8] sm:$0xff]  }
0x15af   :  { %7024 = vmatprep.subr.bf16.mxu1 %v7722_v0 }
0x15b2   :  { %7025 = vmatpush3.bf16.msra.mxu1 %v7361_v46  ;;  %v7397_v46 = vld [vmem:[%s9385_s8] sm:$0xff]  }
0x15b3   :  { %7038 = vmatprep.subr.bf16.mxu1 %v7722_v0 }
0x15b5   :  { %7027 = vmatmul.mubr.msk.bf16.vlgmr.msra.gmra.mxu1 %vm958_vm2, %v3164_v51 }
0x15b6   :  { %7039 = vmatpush3.bf16.msra.mxu1 %v7362_v49  ;;  %7042 = vmatprep.mubr.msk.bf16.mxu1 %vm7723_vm1, %v7722_v0  ;;  %v7398_v49 = vld [vmem:[%s9386_s10 + $0x8] sm:$0xff]  }
0x15b7   :  { %7040 = vmatprep.subr.bf16.mxu1 %v7722_v0 }
0x15ba   :  { %7041 = vmatpush3.bf16.msra.mxu1 %v7363_v52  ;;  %v7399_v52 = vld [vmem:[%s9386_s10] sm:$0xff]  }
0x15bb   :  { %7054 = vmatprep.subr.bf16.mxu1 %v7722_v0 }
0x15bd   :  { %7043 = vmatmul.mubr.msk.bf16.vlgmr.msra.gmra.mxu1 %vm958_vm2, %v3164_v51 }
0x15be   :  { %7055 = vmatpush3.bf16.msra.mxu1 %v7364_v53  ;;  %7058 = vmatprep.mubr.msk.bf16.mxu1 %vm7723_vm1, %v7722_v0  ;;  %v7400_v53 = vld [vmem:[%s9385_s8 + $0x8] sm:$0xff]  }
0x15bf   :  { %7056 = vmatprep.subr.bf16.mxu1 %v7722_v0 }
0x15c2   :  { %7057 = vmatpush3.bf16.msra.mxu1 %v7365_v54  ;;  %v7401_v54 = vld [vmem:[%s9385_s8] sm:$0xff]  }
0x15c3   :  { %7070 = vmatprep.subr.bf16.mxu1 %v7722_v0 }
0x15c5   :  { %7059 = vmatmul.mubr.msk.bf16.vlgmr.msra.gmra.mxu1 %vm958_vm2, %v3404_v58 }
0x15c6   :  { %7071 = vmatpush3.bf16.msra.mxu1 %v7366_v56  ;;  %7074 = vmatprep.mubr.msk.bf16.mxu1 %vm7723_vm1, %v7722_v0  ;;  %v7402_v56 = vld [vmem:[%s9386_s10 + $0x8] sm:$0xff]  }
0x15c7   :  { %7072 = vmatprep.subr.bf16.mxu1 %v7722_v0 }
0x15ca   :  { %7073 = vmatpush3.bf16.msra.mxu1 %v7367_v59 }
0x15cb   :  { %7086 = vmatprep.subr.bf16.mxu1 %v7722_v0 }
0x15cd   :  { %7075 = vmatmul.mubr.msk.bf16.vlgmr.msra.gmra.mxu1 %vm958_vm2, %v3404_v58 }
0x15ce   :  { %7087 = vmatpush3.bf16.msra.mxu1 %v7368_v61  ;;  %7090 = vmatprep.mubr.msk.bf16.mxu1 %vm7723_vm1, %v7722_v0 }
0x15cf   :  { %7088 = vmatprep.subr.bf16.mxu1 %v7722_v0 }
0x15d2   :  { %7089 = vmatpush3.bf16.msra.mxu1 %v7369_v62  ;;  %v7403_v62 = vld [vmem:[%s9386_s10] sm:$0xff]  }
0x15d3   :  { %7102 = vmatprep.subr.bf16.mxu1 %v7722_v0 }
0x15d5   :  { %7091 = vmatmul.mubr.msk.bf16.vlgmr.msra.gmra.mxu1 %vm958_vm2, %v3644_v2 }
0x15d6   :  { %7103 = vmatpush3.bf16.msra.mxu1 %v7370_v1  ;;  %7106 = vmatprep.mubr.msk.bf16.mxu1 %vm7723_vm1, %v7722_v0 }
0x15d7   :  { %7104 = vmatprep.subr.bf16.mxu1 %v7722_v0 }
0x15da   :  { %7105 = vmatpush3.bf16.msra.mxu1 %v7371_v3 }
0x15db   :  { %7118 = vmatprep.subr.bf16.mxu1 %v7722_v0 }
0x15dd   :  { %7107 = vmatmul.mubr.msk.bf16.vlgmr.msra.gmra.mxu1 %vm958_vm2, %v3644_v2  ;;  %v7404_v2 = vld [vmem:[%s9385_s8 + $0x8] sm:$0xff]  }
0x15de   :  { %7119 = vmatpush3.bf16.msra.mxu1 %v7372_v38  ;;  %7122 = vmatprep.mubr.msk.bf16.mxu1 %vm7723_vm1, %v7722_v0 }
0x15df   :  { %7120 = vmatprep.subr.bf16.mxu1 %v7722_v0 }
0x15e2   :  { %7121 = vmatpush3.bf16.msra.mxu1 %v7373_v5  ;;  %v7405_v5 = vld [vmem:[%s9385_s8] sm:$0xff]  }
0x15e3   :  { %7134 = vmatprep.subr.bf16.mxu1 %v7722_v0 }
0x15e5   :  { %7123 = vmatmul.mubr.msk.bf16.vlgmr.msra.gmra.mxu1 %vm958_vm2, %v3884_v9 }
0x15e6   :  { %7135 = vmatpush3.bf16.msra.mxu1 %v7374_v7  ;;  %7138 = vmatprep.mubr.msk.bf16.mxu1 %vm7723_vm1, %v7722_v0 }
0x15e7   :  { %7136 = vmatprep.subr.bf16.mxu1 %v7722_v0 }
0x15ea   :  { %7137 = vmatpush3.bf16.msra.mxu1 %v7375_v10  ;;  %v7406_v10 = vld [vmem:[%s9386_s10 + $0x8] sm:$0xff]  }
0x15eb   :  { %v2427_v12 = vpop.permute.xlu0 %2426  ;;  %7150 = vmatprep.subr.bf16.mxu1 %v7722_v0 }
0x15ec   :  { %2429 = vst.msk [vmem:[#allocation5] sm:$0x3] %vm1107_vm3, %v2427_v12 }
0x15ed   :  { %7139 = vmatmul.mubr.msk.bf16.vlgmr.msra.gmra.mxu1 %vm958_vm2, %v3884_v9 }
0x15ee   :  { %7151 = vmatpush3.bf16.msra.mxu1 %v7382_v11  ;;  %7154 = vmatprep.mubr.msk.bf16.mxu1 %vm7723_vm1, %v7722_v0 }
0x15ef   :  { %v2239_v14 = vpop.permute.xlu0 %2238  ;;  %7152 = vmatprep.subr.bf16.mxu1 %v7722_v0 }
0x15f0   :  { %2242 = vst.msk [vmem:[#allocation5 + $0x2] sm:$0x3] %vm1107_vm3, %v2239_v14  ;;  %v7407_v14 = vld [vmem:[%s9386_s10] sm:$0xff]  }
0x15f2   :  { %7153 = vmatpush3.bf16.msra.mxu1 %v7384_v13 }
0x15f3   :  { %v2051_v17 = vpop.permute.xlu0 %2050  ;;  %v2446_v16 = vld [vmem:[#allocation5] sm:$0x3]  ;;  %7166 = vmatprep.subr.bf16.mxu1 %v7722_v0 }
0x15f4   :  { %2054 = vst.msk [vmem:[#allocation5 + $0x4] sm:$0x3] %vm1107_vm3, %v2051_v17  ;;  %v2447_v18 = vpack.c.bf16 %v2446_v16, %v2446_v16  ;;  %v7408_v16 = vld [vmem:[%s9385_s8 + $0x8] sm:$0xff]  }
0x15f6   :  { %6923 = vmatmul.mubr.msk.bf16.vlgmr.msra.gmra.mxu0 %vm958_vm2, %v2447_v18 }
0x15f7   :  { %6935 = vmatpush3.bf16.msra.mxu0 %v7378_v15  ;;  %v1863_v21 = vpop.permute.xlu0 %1862  ;;  %6938 = vmatprep.mubr.msk.bf16.mxu0 %vm7723_vm1, %v7722_v0  ;;  %v2685_v20 = vld [vmem:[#allocation5 + $0x2] sm:$0x3] }
0x15f8   :  { %1866 = vst.msk [vmem:[#allocation5 + $0x6] sm:$0x3] %vm1107_vm3, %v1863_v21  ;;  %6936 = vmatprep.subr.bf16.mxu0 %v7722_v0  ;;  %v2686_v25 = vpack.c.bf16 %v2685_v20, %v2685_v20 }
0x15fb   :  { %6937 = vmatpush3.bf16.msra.mxu0 %v7379_v40  ;;  %v1675_v22 = vpop.permute.xlu0 %1674  ;;  %v2925_v31 = vld [vmem:[#allocation5 + $0x4] sm:$0x3]  ;;  %v7409_v40 = vld [vmem:[%s9385_s8] sm:$0xff]  }
0x15fc   :  { %1678 = vst.msk [vmem:[#allocation5 + $0x8] sm:$0x3] %vm1107_vm3, %v1675_v22  ;;  %6950 = vmatprep.subr.bf16.mxu0 %v7722_v0  ;;  %v2926_v33 = vpack.c.bf16 %v2925_v31, %v2925_v31 }
0x15fe   :  { %6939 = vmatmul.mubr.msk.bf16.vlgmr.msra.gmra.mxu0 %vm958_vm2, %v2447_v18 }
0x15ff   :  { %6951 = vmatpush3.bf16.msra.mxu0 %v7380_v8  ;;  %v1487_v60 = vpop.permute.xlu0 %1486  ;;  %6954 = vmatprep.mubr.msk.bf16.mxu0 %vm7723_vm1, %v7722_v0  ;;  %v3165_v37 = vld [vmem:[#allocation5 + $0x6] sm:$0x3] }
0x1600   :  { %1490 = vst.msk [vmem:[#allocation5 + $0xa] sm:$0x3] %vm1107_vm3, %v1487_v60  ;;  %v2421_v42 = vpop.permute.xlu1 %2420  ;;  %6952 = vmatprep.subr.bf16.mxu0 %v7722_v0  ;;  %v3166_v43 = vpack.c.bf16 %v3165_v37, %v3165_v37 }
0x1601   :  { %2424 = vst.msk [vmem:[#allocation4 + $0xe] sm:$0x3] %vm1107_vm3, %v2421_v42 }
0x1603   :  { %6953 = vmatpush3.bf16.msra.mxu0 %v7381_v50  ;;  %v1299_v23 = vpop.permute.xlu0 %1298  ;;  %v3405_v48 = vld [vmem:[#allocation5 + $0x8] sm:$0x3]  ;;  %v7410_v50 = vld [vmem:[%s9386_s10 + $0x8] sm:$0xff]  }
0x1604   :  { %1302 = vst.msk [vmem:[#allocation5 + $0xc] sm:$0x3] %vm1107_vm3, %v1299_v23  ;;  %6966 = vmatprep.subr.bf16.mxu0 %v7722_v0  ;;  %v3406_v51 = vpack.c.bf16 %v3405_v48, %v3405_v48 }
0x1606   :  { %6955 = vmatmul.mubr.msk.bf16.vlgmr.msra.gmra.mxu0 %vm958_vm2, %v2686_v25 }
0x1607   :  { %6967 = vmatpush3.bf16.msra.mxu0 %v7383_v24  ;;  %v1111_v26 = vpop.permute.xlu0 %1110  ;;  %6970 = vmatprep.mubr.msk.bf16.mxu0 %vm7723_vm1, %v7722_v0  ;;  %v3645_v55 = vld [vmem:[#allocation5 + $0xa] sm:$0x3]  ;;  %v7411_v24 = vld [vmem:[%s9386_s10] sm:$0xff]  }
0x1608   :  { %1114 = vst.msk [vmem:[#allocation5 + $0xe] sm:$0x3] %vm1107_vm3, %v1111_v26  ;;  %6968 = vmatprep.subr.bf16.mxu0 %v7722_v0  ;;  %v4123_v27 = vld [vmem:[#allocation4 + $0xe] sm:$0x3]  ;;  %v3646_v58 = vpack.c.bf16 %v3645_v55, %v3645_v55 }
0x1609   :  { %v4124_v28 = vpack.c.bf16 %v4123_v27, %v4123_v27 }
0x160b   :  { %7155 = vmatmul.mubr.msk.bf16.vlgmr.msra.gmra.mxu1 %vm958_vm2, %v4124_v28  ;;  %6969 = vmatpush3.bf16.msra.mxu0 %v7385_v36  ;;  %v3885_v7 = vld [vmem:[#allocation5 + $0xc] sm:$0x3]  ;;  %v7413_v36 = vld [vmem:[%s9388_s11] sm:$0xff]  }
0x160c   :  { %7167 = vmatpush3.bf16.msra.mxu1 %v7386_v47  ;;  %6982 = vmatprep.subr.bf16.mxu0 %v7722_v0  ;;  %v3886_v11 = vpack.c.bf16 %v3885_v7, %v3885_v7 }
0x160d   :  { %7168 = vmatprep.subr.bf16.mxu1 %v7722_v0  ;;  %7170 = vmatprep.mubr.msk.bf16.mxu1 %vm7723_vm1, %v7722_v0 }
0x160e   :  { %6971 = vmatmul.mubr.msk.bf16.vlgmr.msra.gmra.mxu0 %vm958_vm2, %v2686_v25 }
0x160f   :  { %6983 = vmatpush3.bf16.msra.mxu0 %v7387_v29  ;;  %6986 = vmatprep.mubr.msk.bf16.mxu0 %vm7723_vm1, %v7722_v0  ;;  %v4125_v8 = vld [vmem:[#allocation5 + $0xe] sm:$0x3] }
0x1610   :  { %7169 = vmatpush3.bf16.msra.mxu1 %v7388_v57  ;;  %6984 = vmatprep.subr.bf16.mxu0 %v7722_v0  ;;  %v4126_v42 = vpack.c.bf16 %v4125_v8, %v4125_v8 }
0x1611   :  { %7180 = vmatprep.subr.bf16.mxu1 %v7722_v0 }
0x1613   :  { %7171 = vmatmul.mubr.msk.bf16.vlgmr.msra.gmra.mxu1 %vm958_vm2, %v4124_v28  ;;  %6985 = vmatpush3.bf16.msra.mxu0 %v7389_v30 }
0x1614   :  { %6998 = vmatprep.subr.bf16.mxu0 %v7722_v0  ;;  %7181 = vmatpush3.bf16.msra.mxu1 %v7412_v6 }
0x1615   :  { %7182 = vmatprep.mubr.msk.bf16.mxu1 %vm7723_vm1, %v7722_v0  ;;  %7192 = vmatprep.subr.bf16.mxu1 %v7722_v0 }
0x1616   :  { %6987 = vmatmul.mubr.msk.bf16.vlgmr.msra.gmra.mxu0 %vm958_vm2, %v2926_v33 }
0x1617   :  { %6999 = vmatpush3.bf16.msra.mxu0 %v7390_v32  ;;  %7002 = vmatprep.mubr.msk.bf16.mxu0 %vm7723_vm1, %v7722_v0 }
0x1618   :  { %7000 = vmatprep.subr.bf16.mxu0 %v7722_v0 }
0x161b   :  { %7001 = vmatpush3.bf16.msra.mxu0 %v7391_v19  ;;  %7183 = vmatmul.mubr.bf16.vlgmr.msra.gmra.mxu1 %v7724_v4 }
0x161c   :  { %7014 = vmatprep.subr.bf16.mxu0 %v7722_v0  ;;  %7194 = vmatprep.mubr.msk.bf16.mxu1 %vm7723_vm1, %v7722_v0 }
0x161e   :  { %7003 = vmatmul.mubr.msk.bf16.vlgmr.msra.gmra.mxu0 %vm958_vm2, %v2926_v33 }
0x161f   :  { %7015 = vmatpush3.bf16.msra.mxu0 %v7392_v34  ;;  %7018 = vmatprep.mubr.msk.bf16.mxu0 %vm7723_vm1, %v7722_v0 }
0x1620   :  { %7016 = vmatprep.subr.bf16.mxu0 %v7722_v0 }
0x1623   :  { %7017 = vmatpush3.bf16.msra.mxu0 %v7393_v35 }
0x1624   :  { %7030 = vmatprep.subr.bf16.mxu0 %v7722_v0 }
0x1626   :  { %7019 = vmatmul.mubr.msk.bf16.vlgmr.msra.gmra.mxu0 %vm958_vm2, %v3166_v43 }
0x1627   :  { %7031 = vmatpush3.bf16.msra.mxu0 %v7394_v41  ;;  %7034 = vmatprep.mubr.msk.bf16.mxu0 %vm7723_vm1, %v7722_v0 }
0x1628   :  { %7032 = vmatprep.subr.bf16.mxu0 %v7722_v0 }
0x162b   :  { %7033 = vmatpush3.bf16.msra.mxu0 %v7395_v44 }
0x162c   :  { %7046 = vmatprep.subr.bf16.mxu0 %v7722_v0 }
0x162e   :  { %7035 = vmatmul.mubr.msk.bf16.vlgmr.msra.gmra.mxu0 %vm958_vm2, %v3166_v43 }
0x162f   :  { %7047 = vmatpush3.bf16.msra.mxu0 %v7396_v45  ;;  %7050 = vmatprep.mubr.msk.bf16.mxu0 %vm7723_vm1, %v7722_v0 }
0x1630   :  { %7048 = vmatprep.subr.bf16.mxu0 %v7722_v0 }
0x1633   :  { %7049 = vmatpush3.bf16.msra.mxu0 %v7397_v46 }
0x1634   :  { %7062 = vmatprep.subr.bf16.mxu0 %v7722_v0 }
0x1636   :  { %7051 = vmatmul.mubr.msk.bf16.vlgmr.msra.gmra.mxu0 %vm958_vm2, %v3406_v51 }
0x1637   :  { %7063 = vmatpush3.bf16.msra.mxu0 %v7398_v49  ;;  %7066 = vmatprep.mubr.msk.bf16.mxu0 %vm7723_vm1, %v7722_v0 }
0x1638   :  { %7064 = vmatprep.subr.bf16.mxu0 %v7722_v0 }
0x163b   :  { %7065 = vmatpush3.bf16.msra.mxu0 %v7399_v52 }
0x163c   :  { %7078 = vmatprep.subr.bf16.mxu0 %v7722_v0 }
0x163e   :  { %7067 = vmatmul.mubr.msk.bf16.vlgmr.msra.gmra.mxu0 %vm958_vm2, %v3406_v51 }
0x163f   :  { %7079 = vmatpush3.bf16.msra.mxu0 %v7400_v53  ;;  %7082 = vmatprep.mubr.msk.bf16.mxu0 %vm7723_vm1, %v7722_v0 }
0x1640   :  { %7080 = vmatprep.subr.bf16.mxu0 %v7722_v0 }
0x1643   :  { %7081 = vmatpush3.bf16.msra.mxu0 %v7401_v54 }
0x1644   :  { %7094 = vmatprep.subr.bf16.mxu0 %v7722_v0 }
0x1645   :  { %v8725_v59 = vpop.f32.mrf.mxu1 }
0x1646   :  { %7083 = vmatmul.mubr.msk.bf16.vlgmr.msra.gmra.mxu0 %vm958_vm2, %v3646_v58 }
0x1647   :  { %v6932_v61 = vpop.f32.mrf.mxu1  ;;  %7095 = vmatpush3.bf16.msra.mxu0 %v7402_v56  ;;  %7098 = vmatprep.mubr.msk.bf16.mxu0 %vm7723_vm1, %v7722_v0 }
0x1648   :  { %7096 = vmatprep.subr.bf16.mxu0 %v7722_v0 }
0x1649   :  { %v2563_v63 = vpop.f32.mrf.mxu1 }
0x164b   :  { %v6933_v1 = vpop.f32.mrf.mxu1  ;;  %7097 = vmatpush3.bf16.msra.mxu0 %v7403_v62 }
0x164c   :  { %7110 = vmatprep.subr.bf16.mxu0 %v7722_v0 }
0x164d   :  { %v8738_v3 = vpop.f32.mrf.mxu1 }
0x164e   :  { %7099 = vmatmul.mubr.msk.bf16.vlgmr.msra.gmra.mxu0 %vm958_vm2, %v3646_v58 }
0x164f   :  { %v6948_v38 = vpop.f32.mrf.mxu1  ;;  %7111 = vmatpush3.bf16.msra.mxu0 %v7404_v2  ;;  %7114 = vmatprep.mubr.msk.bf16.mxu0 %vm7723_vm1, %v7722_v0 }
0x1650   :  { %7112 = vmatprep.subr.bf16.mxu0 %v7722_v0 }
0x1651   :  { %v2678_v39 = vpop.f32.mrf.mxu1 }
0x1652   :  { %v8818_v39 = vld [vmem:[%s9389_s13] ss:$0 sm:$0xff]  ;;  %s7727_s13 = smov 96  }
0x1653   :  { %v6949_v9 = vpop.f32.mrf.mxu1  ;;  %7113 = vmatpush3.bf16.msra.mxu0 %v7405_v5 }
0x1654   :  { %7126 = vmatprep.subr.bf16.mxu0 %v7722_v0 }
0x1655   :  { %v8751_v12 = vpop.f32.mrf.mxu1 }
0x1656   :  { %7115 = vmatmul.mubr.msk.bf16.vlgmr.msra.gmra.mxu0 %vm958_vm2, %v3886_v11 }
0x1657   :  { %v6964_v13 = vpop.f32.mrf.mxu1  ;;  %7127 = vmatpush3.bf16.msra.mxu0 %v7406_v10  ;;  %7130 = vmatprep.mubr.msk.bf16.mxu0 %vm7723_vm1, %v7722_v0 }
0x1658   :  { %7128 = vmatprep.subr.bf16.mxu0 %v7722_v0 }
0x1659   :  { %v2802_v15 = vpop.f32.mrf.mxu1 }
0x165a   :  { %v8826_v15 = vld [vmem:[%s9390_s14] ss:$0 sm:$0xff]  ;;  %s7728_s14 = smov 16  }
0x165b   :  { %v6965_v17 = vpop.f32.mrf.mxu1  ;;  %7129 = vmatpush3.bf16.msra.mxu0 %v7407_v14 }
0x165c   :  { %7142 = vmatprep.subr.bf16.mxu0 %v7722_v0 }
0x165d   :  { %v8764_v18 = vpop.f32.mrf.mxu1 }
0x165e   :  { %7131 = vmatmul.mubr.msk.bf16.vlgmr.msra.gmra.mxu0 %vm958_vm2, %v3886_v11 }
0x165f   :  { %v6980_v21 = vpop.f32.mrf.mxu1  ;;  %7143 = vmatpush3.bf16.msra.mxu0 %v7408_v16  ;;  %7146 = vmatprep.mubr.msk.bf16.mxu0 %vm7723_vm1, %v7722_v0 }
0x1660   :  { %7144 = vmatprep.subr.bf16.mxu0 %v7722_v0 }
0x1661   :  { %v2917_v22 = vpop.f32.mrf.mxu1 }
0x1663   :  { %v6981_v60 = vpop.f32.mrf.mxu1  ;;  %7145 = vmatpush3.bf16.msra.mxu0 %v7409_v40 }
0x1664   :  { %7158 = vmatprep.subr.bf16.mxu0 %v7722_v0 }
0x1665   :  { %v8777_v20 = vpop.f32.mrf.mxu1 }
0x1666   :  { %7147 = vmatmul.mubr.msk.bf16.vlgmr.msra.gmra.mxu0 %vm958_vm2, %v4126_v42 }
0x1667   :  { %v6996_v23 = vpop.f32.mrf.mxu1  ;;  %7159 = vmatpush3.bf16.msra.mxu0 %v7410_v50  ;;  %7162 = vmatprep.mubr.msk.bf16.mxu0 %vm7723_vm1, %v7722_v0 }
0x1668   :  { %7160 = vmatprep.subr.bf16.mxu0 %v7722_v0 }
0x1669   :  { %v3042_v25 = vpop.f32.mrf.mxu1 }
0x166b   :  { %v6997_v26 = vpop.f32.mrf.mxu1  ;;  %7161 = vmatpush3.bf16.msra.mxu0 %v7411_v24 }
0x166c   :  { %7174 = vmatprep.subr.bf16.mxu0 %v7722_v0 }
0x166d   :  { %v8790_v27 = vpop.f32.mrf.mxu1 }
0x166e   :  { %7163 = vmatmul.mubr.msk.bf16.vlgmr.msra.gmra.mxu0 %vm958_vm2, %v4126_v42 }
0x166f   :  { %v7012_v47 = vpop.f32.mrf.mxu1  ;;  %7175 = vmatpush3.bf16.msra.mxu0 %v7413_v36  ;;  %7176 = vmatprep.mubr.msk.bf16.mxu0 %vm7723_vm1, %v7722_v0 }
0x1670   :  { %7186 = vmatprep.subr.bf16.mxu0 %v7722_v0 }
0x1671   :  { %v3157_v28 = vpop.f32.mrf.mxu1 }
0x1673   :  { %v7013_v29 = vpop.f32.mrf.mxu1 }
0x1675   :  { %v8796_v57 = vpop.f32.mrf.mxu1 }
0x1676   :  { %7177 = vmatmul.mubr.bf16.vlgmr.msra.gmra.mxu0 %v7724_v4 }
0x1677   :  { %v7028_v30 = vpop.f32.mrf.mxu1  ;;  %7188 = vmatprep.mubr.msk.bf16.mxu0 %vm7723_vm1, %v7722_v0 }
0x1679   :  { %v3282_v6 = vpop.f32.mrf.mxu1 }
0x167b   :  { %v7029_v31 = vpop.f32.mrf.mxu1 }
0x167d   :  { %v8801_v32 = vpop.f32.mrf.mxu1 }
0x167f   :  { %v7044_v33 = vpop.f32.mrf.mxu1 }
0x1681   :  { %v3397_v19 = vpop.f32.mrf.mxu1 }
0x1683   :  { %v7045_v34 = vpop.f32.mrf.mxu1 }
0x1685   :  { %v8803_v35 = vpop.f32.mrf.mxu1 }
0x1687   :  { %v7060_v37 = vpop.f32.mrf.mxu1 }
0x1689   :  { %v3522_v41 = vpop.f32.mrf.mxu1 }
0x168b   :  { %v7061_v43 = vpop.f32.mrf.mxu1 }
0x168d   :  { %v8805_v44 = vpop.f32.mrf.mxu1 }
0x168f   :  { %v7076_v45 = vpop.f32.mrf.mxu1 }
0x1691   :  { %v3637_v4 = vpop.f32.mrf.mxu1 }
0x1693   :  { %v7077_v46 = vpop.f32.mrf.mxu1 }
0x1695   :  { %v8807_v48 = vpop.f32.mrf.mxu1 }
0x1697   :  { %v7092_v49 = vpop.f32.mrf.mxu1 }
0x1699   :  { %v3762_v51 = vpop.f32.mrf.mxu1 }
0x169b   :  { %v7093_v52 = vpop.f32.mrf.mxu1 }
0x169d   :  { %v8809_v53 = vpop.f32.mrf.mxu1 }
0x169f   :  { %v7108_v54 = vpop.f32.mrf.mxu1 }
0x16a1   :  { %v3877_v55 = vpop.f32.mrf.mxu1 }
0x16a3   :  { %v7109_v56 = vpop.f32.mrf.mxu1 }
0x16a5   :  { %v8811_v58 = vpop.f32.mrf.mxu1 }
0x16a7   :  { %v7124_v61 = vpop.f32.mrf.mxu1 }
0x16a9   :  { %v4002_v62 = vpop.f32.mrf.mxu1 }
0x16ab   :  { %v7125_v63 = vpop.f32.mrf.mxu1 }
0x16ad   :  { %v8813_v1 = vpop.f32.mrf.mxu1 }
0x16af   :  { %v7140_v2 = vpop.f32.mrf.mxu1 }
0x16b1   :  { %v4117_v38 = vpop.f32.mrf.mxu1 }
0x16b3   :  { %v7141_v5 = vpop.f32.mrf.mxu1 }
0x16b6   :  { %v2505_v7 = vpop.f32.mrf.mxu0 }
0x16b7   :  { %v2561_v9 = vadd.f32 %v8725_v59, %v2505_v7 }
0x16b8   :  { %v6924_v10 = vpop.f32.mrf.mxu0 }
0x16b9   :  { %v2566_v11 = vadd.f32 %v8818_v39, %v2561_v9 }
0x16ba   :  { %v2508_v13 = vpop.f32.mrf.mxu0 }
0x16bb   :  { %2568 = vst.msk [vmem:[#allocation6] sm:$0x3] %vm2567_vm4, %v2566_v11 }
0x16bc   :  { %v6925_v14 = vpop.f32.mrf.mxu0 }
0x16be   :  { %v2623_v17 = vpop.f32.mrf.mxu0 }
0x16bf   :  { %v2676_v16 = vadd.f32 %v8738_v3, %v2623_v17 }
0x16c0   :  { %v6940_v21 = vpop.f32.mrf.mxu0 }
0x16c1   :  { %v2681_v40 = vadd.f32 %v8826_v15, %v2676_v16 }
0x16c2   :  { %v2626_v59 = vpop.f32.mrf.mxu0 }
0x16c3   :  { %2682 = vst.msk [vmem:[#allocation7] sm:$0x3] %vm2567_vm4, %v2681_v40 }
0x16c4   :  { %v6941_v22 = vpop.f32.mrf.mxu0 }
0x16c6   :  { %v2744_v8 = vpop.f32.mrf.mxu0 }
0x16c7   :  { %v2800_v60 = vadd.f32 %v8751_v12, %v2744_v8 }
0x16c8   :  { %v6956_v50 = vpop.f32.mrf.mxu0 }
0x16c9   :  { %v2805_v42 = vadd.f32 %v8818_v39, %v2800_v60 }
0x16ca   :  { %v2747_v23 = vpop.f32.mrf.mxu0 }
0x16cb   :  { %2807 = vst.msk [vmem:[#allocation6 + $0x2] sm:$0x3] %vm2567_vm4, %v2805_v42  ;;  %v8834_v24 = vpop.f32.mrf.mxu1 }
0x16cc   :  { %v6957_v25 = vpop.f32.mrf.mxu0 }
0x16cd   :  { %v7156_v3 = vpop.f32.mrf.mxu1 }
0x16ce   :  { %v2862_v26 = vpop.f32.mrf.mxu0 }
0x16cf   :  { %v2915_v36 = vadd.f32 %v8764_v18, %v2862_v26  ;;  %v4242_v47 = vpop.f32.mrf.mxu1 }
0x16d0   :  { %v6972_v28 = vpop.f32.mrf.mxu0 }
0x16d1   :  { %v2920_v29 = vadd.f32 %v8826_v15, %v2915_v36  ;;  %v7157_v30 = vpop.f32.mrf.mxu1 }
0x16d2   :  { %v2865_v6 = vpop.f32.mrf.mxu0 }
0x16d3   :  { %2922 = vst.msk [vmem:[#allocation7 + $0x2] sm:$0x3] %vm2567_vm4, %v2920_v29  ;;  %v8839_v12 = vpop.f32.mrf.mxu1 }
0x16d4   :  { %v6973_v31 = vpop.f32.mrf.mxu0 }
0x16d5   :  { %v7172_v33 = vpop.f32.mrf.mxu1 }
0x16d6   :  { %v2984_v19 = vpop.f32.mrf.mxu0 }
0x16d7   :  { %v3040_v34 = vadd.f32 %v8777_v20, %v2984_v19  ;;  %v4357_v37 = vpop.f32.mrf.mxu1 }
0x16d8   :  { %v6988_v41 = vpop.f32.mrf.mxu0 }
0x16d9   :  { %v3045_v43 = vadd.f32 %v8818_v39, %v3040_v34  ;;  %v7173_v18 = vpop.f32.mrf.mxu1 }
0x16da   :  { %v2987_v45 = vpop.f32.mrf.mxu0 }
0x16db   :  { %3047 = vst.msk [vmem:[#allocation6 + $0x4] sm:$0x3] %vm2567_vm4, %v3045_v43  ;;  %v8844_v4 = vpop.f32.mrf.mxu1 }
0x16dc   :  { %v6989_v46 = vpop.f32.mrf.mxu0 }
0x16dd   :  { %v7184_v49 = vpop.f32.mrf.mxu1 }
0x16de   :  { %v3102_v51 = vpop.f32.mrf.mxu0 }
0x16df   :  { %v3155_v52 = vadd.f32 %v8790_v27, %v3102_v51  ;;  %v4484_v54 = vpop.f32.mrf.mxu1 }
0x16e0   :  { %v7004_v55 = vpop.f32.mrf.mxu0 }
0x16e1   :  { %v3160_v56 = vadd.f32 %v8826_v15, %v3155_v52  ;;  %v7185_v20 = vpop.f32.mrf.mxu1 }
0x16e2   :  { %v3105_v61 = vpop.f32.mrf.mxu0 }
0x16e3   :  { %3162 = vst.msk [vmem:[#allocation7 + $0x4] sm:$0x3] %vm2567_vm4, %v3160_v56 }
0x16e4   :  { %v7005_v62 = vpop.f32.mrf.mxu0 }
0x16e6   :  { %v3224_v63 = vpop.f32.mrf.mxu0 }
0x16e7   :  { %v3280_v2 = vadd.f32 %v8796_v57, %v3224_v63 }
0x16e8   :  { %v7020_v38 = vpop.f32.mrf.mxu0 }
0x16e9   :  { %v3285_v5 = vadd.f32 %v8818_v39, %v3280_v2  ;;  %v4367_v38 = vld [vmem:[#allocation6] sm:$0x3] }
0x16ea   :  { %v3227_v7 = vpop.f32.mrf.mxu0 }
0x16eb   :  { %3287 = vst.msk [vmem:[#allocation6 + $0x6] sm:$0x3] %vm2567_vm4, %v3285_v5 }
0x16ec   :  { %v7021_v9 = vpop.f32.mrf.mxu0 }
0x16ee   :  { %v3342_v27 = vpop.f32.mrf.mxu0 }
0x16ef   :  { %v3395_v10 = vadd.f32 %v8801_v32, %v3342_v27 }
0x16f0   :  { %v7036_v11 = vpop.f32.mrf.mxu0 }
0x16f1   :  { %v3400_v13 = vadd.f32 %v8826_v15, %v3395_v10 }
0x16f2   :  { %v3345_v14 = vpop.f32.mrf.mxu0 }
0x16f3   :  { %3402 = vst.msk [vmem:[#allocation7 + $0x6] sm:$0x3] %vm2567_vm4, %v3400_v13 }
0x16f4   :  { %v7037_v17 = vpop.f32.mrf.mxu0 }
0x16f6   :  { %v3464_v16 = vpop.f32.mrf.mxu0 }
0x16f7   :  { %v3520_v57 = vadd.f32 %v8803_v35, %v3464_v16 }
0x16f8   :  { %v7052_v21 = vpop.f32.mrf.mxu0 }
0x16f9   :  { %v3525_v40 = vadd.f32 %v8818_v39, %v3520_v57 }
0x16fa   :  { %v3467_v59 = vpop.f32.mrf.mxu0 }
0x16fb   :  { %3527 = vst.msk [vmem:[#allocation6 + $0x8] sm:$0x3] %vm2567_vm4, %v3525_v40 }
0x16fc   :  { %v7053_v22 = vpop.f32.mrf.mxu0 }
0x16fe   :  { %v3582_v8 = vpop.f32.mrf.mxu0 }
0x16ff   :  { %v3635_v32 = vadd.f32 %v8805_v44, %v3582_v8 }
0x1700   :  { %v7068_v60 = vpop.f32.mrf.mxu0 }
0x1701   :  { %v3640_v50 = vadd.f32 %v8826_v15, %v3635_v32 }
0x1702   :  { %v3585_v42 = vpop.f32.mrf.mxu0 }
0x1703   :  { %3642 = vst.msk [vmem:[#allocation7 + $0x8] sm:$0x3] %vm2567_vm4, %v3640_v50 }
0x1704   :  { %v7069_v23 = vpop.f32.mrf.mxu0 }
0x1706   :  { %v3704_v25 = vpop.f32.mrf.mxu0 }
0x1707   :  { %v3760_v35 = vadd.f32 %v8807_v48, %v3704_v25 }
0x1708   :  { %v7084_v3 = vpop.f32.mrf.mxu0 }
0x1709   :  { %v3765_v26 = vadd.f32 %v8818_v39, %v3760_v35  ;;  %v7414_v35 = vld [vmem:[%s9388_s11] sm:$0xff]  }
0x170a   :  { %v3707_v36 = vpop.f32.mrf.mxu0  ;;  %v7415_v3 = vld [vmem:[%s9387_s12] sm:$0xff]   ;;  %7187 = vmatpush3.bf16.msra.mxu0 %v7414_v35 }
0x170b   :  { %3767 = vst.msk [vmem:[#allocation6 + $0xa] sm:$0x3] %vm2567_vm4, %v3765_v26  ;;  %7193 = vmatpush3.bf16.msra.mxu1 %v7415_v3  ;;  %7198 = vmatprep.subr.bf16.mxu0 %v7722_v0 }
0x170c   :  { %v7085_v47 = vpop.f32.mrf.mxu0  ;;  %7204 = vmatprep.subr.bf16.mxu1 %v7722_v0 }
0x170e   :  { %v3822_v28 = vpop.f32.mrf.mxu0 }
0x170f   :  { %v3875_v44 = vadd.f32 %v8809_v53, %v3822_v28 }
0x1710   :  { %v7100_v29 = vpop.f32.mrf.mxu0 }
0x1711   :  { %v3880_v30 = vadd.f32 %v8826_v15, %v3875_v44 }
0x1712   :  { %v3825_v6 = vpop.f32.mrf.mxu0 }
0x1713   :  { %3882 = vst.msk [vmem:[#allocation7 + $0xa] sm:$0x3] %vm2567_vm4, %v3880_v30 }
0x1714   :  { %v7101_v31 = vpop.f32.mrf.mxu0 }
0x1716   :  { %v3944_v33 = vpop.f32.mrf.mxu0 }
0x1717   :  { %v4000_v48 = vadd.f32 %v8811_v58, %v3944_v33 }
0x1718   :  { %v7116_v19 = vpop.f32.mrf.mxu0 }
0x1719   :  { %v4005_v34 = vadd.f32 %v8818_v39, %v4000_v48  ;;  %v4529_v48 = vld [vmem:[#allocation6 + $0x2] sm:$0x3] }
0x171a   :  { %v3947_v37 = vpop.f32.mrf.mxu0 }
0x171b   :  { %4007 = vst.msk [vmem:[#allocation6 + $0xc] sm:$0x3] %vm2567_vm4, %v4005_v34 }
0x171c   :  { %v7117_v41 = vpop.f32.mrf.mxu0 }
0x171e   :  { %v4062_v43 = vpop.f32.mrf.mxu0 }
0x171f   :  { %v4115_v53 = vadd.f32 %v8813_v1, %v4062_v43 }
0x1720   :  { %v7132_v18 = vpop.f32.mrf.mxu0 }
0x1721   :  { %v4120_v45 = vadd.f32 %v8826_v15, %v4115_v53 }
0x1722   :  { %v4065_v46 = vpop.f32.mrf.mxu0 }
0x1723   :  { %4122 = vst.msk [vmem:[#allocation7 + $0xc] sm:$0x3] %vm2567_vm4, %v4120_v45 }
0x1724   :  { %v7133_v49 = vpop.f32.mrf.mxu0 }
0x1726   :  { %v4184_v51 = vpop.f32.mrf.mxu0 }
0x1727   :  { %v4240_v58 = vadd.f32 %v8834_v24, %v4184_v51 }
0x1728   :  { %v7148_v52 = vpop.f32.mrf.mxu0 }
0x1729   :  { %v4245_v54 = vadd.f32 %v8818_v39, %v4240_v58 }
0x172a   :  { %v4187_v55 = vpop.f32.mrf.mxu0  ;;  %v4606_v43 = vld [vmem:[#allocation7 + $0xc] sm:$0x3] }
0x172b   :  { %4247 = vst.msk [vmem:[#allocation6 + $0xe] sm:$0x3] %vm2567_vm4, %v4245_v54 }
0x172c   :  { %v7149_v56 = vpop.f32.mrf.mxu0 }
0x172e   :  { %v4302_v20 = vpop.f32.mrf.mxu0 }
0x172f   :  { %v4355_v1 = vadd.f32 %v8839_v12, %v4302_v20 }
0x1730   :  { %v7164_v61 = vpop.f32.mrf.mxu0 }
0x1731   :  { %v4360_v62 = vadd.f32 %v8826_v15, %v4355_v1 }
0x1732   :  { %v4305_v63 = vpop.f32.mrf.mxu0 }
0x1733   :  { %4362 = vst.msk [vmem:[#allocation7 + $0xe] sm:$0x3] %vm2567_vm4, %v4360_v62 }
0x1734   :  { %v7165_v2 = vpop.f32.mrf.mxu0 }
0x1736   :  { %v4410_v5 = vpop.f32.mrf.mxu0 }
0x1737   :  { %v4411_v24 = vadd.f32 %v4410_v5, %v4367_v38 }
0x1738   :  { %v7178_v7 = vpop.f32.mrf.mxu0 }
0x1739   :  { %7560 = vtanh.f32 %v4411_v24  ;;  %v6415_v12 = vmul.f32 -1.442695, %v4411_v24 }
0x173a   :  { %v4440_v39 = vld [vmem:[#allocation7 + $0xe] sm:$0x3]  ;;  %v4413_v9 = vpop.f32.mrf.mxu0 }
0x173b   :  { %v4482_v27 = vadd.f32 %v8844_v4, %v4440_v39 }
0x173c   :  { %v7179_v10 = vpop.f32.mrf.mxu0 }
0x173d   :  { %7562 = vtanh.f32 %v4482_v27  ;;  %v6417_v13 = vmul.f32 -1.442695, %v4482_v27 }
0x173e   :  { %7564 = vpow2.f32 %v6415_v12  ;;  %v7417_v12 = vld [vmem:[%s9387_s12] sm:$0xff]  }
0x173f   :  { %7566 = vpow2.f32 %v6417_v13 }
0x1746   :  { %v7561_v11 = vpop.eup %7560 }
0x1747   :  { %4425 = vrot.lane.b32.xlu1 %v7561_v11, %s7727_s13 }
0x174a   :  { %v7563_v15 = vpop.eup %7562 }
0x174b   :  { %4496 = vrot.lane.b32.xlu0 %v7563_v15, %s7727_s13  ;;  %v7565_v14 = vpop.eup %7564  ;;  %v7416_v15 = vld [vmem:[%s9388_s11] sm:$0xff]  }
0x174c   :  { %v4419_v17 = vadd.f32 1.0, %v7565_v14  ;;  %v7567_v16 = vpop.eup %7566 }
0x174d   :  { %v4490_v57 = vadd.f32 1.0, %v7567_v16 }
0x174e   :  { %7568 = vrcp.f32 %v4419_v17 }
0x174f   :  { %7570 = vrcp.f32 %v4490_v57 }
0x175b   :  { %v7569_v4 = vpop.eup %7568 }
0x175c   :  { %v7571_v59 = vpop.eup %7570  ;;  %v4423_v32 = vmul.f32 0.0, %v7569_v4 }
0x175d   :  { %v4494_v42 = vmul.f32 0.0, %v7571_v59 }
0x17b9   :  { %v4426_v21 = vpop.permute.xlu1 %4425 }
0x17ba   :  { %v4428_v40 = vmul.f32 %v7569_v4, %v4426_v21 }
0x17bc   :  { %4430 = vrot.lane.b32.xlu1 %v4428_v40, %s7728_s14 }
0x17bd   :  { %v4497_v22 = vpop.permute.xlu0 %4496 }
0x17be   :  { %v4499_v8 = vmul.f32 %v7571_v59, %v4497_v22 }
0x17c0   :  { %4501 = vrot.lane.b32.xlu0 %v4499_v8, %s7728_s14  ;;  %v4701_v8 = vld [vmem:[#allocation6 + $0x4] sm:$0x3] }
0x182e   :  { %v4431_v60 = vpop.permute.xlu1 %4430 }
0x182f   :  { %v8884_v50 = vadd.f32 %v4431_v60, %v4423_v32 }
0x1831   :  { %7572 = vtanh.f32 %v8884_v50 }
0x1832   :  { %v4502_v23 = vpop.permute.xlu0 %4501 }
0x1833   :  { %v8887_v25 = vadd.f32 %v4502_v23, %v4494_v42  ;;  %v4778_v23 = vld [vmem:[#allocation7 + $0xa] sm:$0x3] }
0x1835   :  { %7574 = vtanh.f32 %v8887_v25 }
0x183e   :  { %v7573_v26 = vpop.eup %7572 }
0x183f   :  { %4436 = vrot.lane.b32.xlu1 %v7573_v26, %s7726_s30 }
0x1842   :  { %v7575_v36 = vpop.eup %7574 }
0x1843   :  { %4507 = vrot.lane.b32.xlu0 %v7575_v36, %s7726_s30 }
0x18b1   :  { %v4437_v47 = vpop.permute.xlu1 %4436 }
0x18b2   :  { %v8900_v28 = vmul.f32 %v7569_v4, %v4437_v47 }
0x18b4   :  { %v4523_v44 = vpack.c.bf16 %v8900_v28, %v8900_v28 }
0x18b5   :  { %v4508_v29 = vpop.permute.xlu0 %4507 }
0x18b6   :  { %v8904_v30 = vmul.f32 %v7571_v59, %v4508_v29  ;;  %4531 = vrot.lane.b32.xlu1 %v4523_v44, %s7729_s25 }
0x18b8   :  { %v4526_v6 = vpack.c.bf16 %v8904_v30, %v8904_v30 }
0x18ba   :  { %4608 = vrot.lane.b32.xlu0 %v4526_v6, %s7729_s25 }
0x1928   :  { %v4532_v31 = vpop.permute.xlu1 %4531 }
0x1929   :  { %7189 = vmatmul.mubr.msk.bf16.vlgmr.msra.gmra.mxu0 %vm101_vm0, %v4532_v31 }
0x192a   :  { %7200 = vmatprep.mubr.msk.bf16.mxu0 %vm7723_vm1, %v7722_v0  ;;  %7199 = vmatpush3.bf16.msra.mxu0 %v7416_v15  ;;  %v4950_v15 = vld [vmem:[#allocation7 + $0x8] sm:$0x3] }
0x192b   :  { %7210 = vmatprep.subr.bf16.mxu0 %v7722_v0 }
0x192c   :  { %v4609_v33 = vpop.permute.xlu0 %4608 }
0x192d   :  { %7195 = vmatmul.mubr.msk.bf16.vlgmr.msra.gmra.mxu1 %vm101_vm0, %v4609_v33 }
0x192e   :  { %7206 = vmatprep.mubr.msk.bf16.mxu1 %vm7723_vm1, %v7722_v0  ;;  %7205 = vmatpush3.bf16.msra.mxu1 %v7417_v12 }
0x192f   :  { %7216 = vmatprep.subr.bf16.mxu1 %v7722_v0 }
0x19e9   :  { %v4576_v19 = vpop.f32.mrf.mxu0 }
0x19ea   :  { %v4577_v34 = vadd.f32 %v4576_v19, %v4529_v48 }
0x19eb   :  { %v7190_v37 = vpop.f32.mrf.mxu0 }
0x19ec   :  { %7576 = vtanh.f32 %v4577_v34  ;;  %v6420_v54 = vmul.f32 -1.442695, %v4577_v34 }
0x19ed   :  { %v4579_v41 = vpop.f32.mrf.mxu0  ;;  %v4653_v53 = vpop.f32.mrf.mxu1 }
0x19ee   :  { %v4654_v18 = vadd.f32 %v4653_v53, %v4606_v43 }
0x19ef   :  { %v7191_v45 = vpop.f32.mrf.mxu0  ;;  %v7196_v46 = vpop.f32.mrf.mxu1 }
0x19f0   :  { %7578 = vtanh.f32 %v4654_v18  ;;  %v6423_v55 = vmul.f32 -1.442695, %v4654_v18 }
0x19f1   :  { %v4656_v49 = vpop.f32.mrf.mxu1  ;;  %7580 = vpow2.f32 %v6420_v54 }
0x19f2   :  { %7582 = vpow2.f32 %v6423_v55  ;;  %v7418_v55 = vld [vmem:[%s9388_s11] sm:$0xff]  }
0x19f3   :  { %v7197_v51 = vpop.f32.mrf.mxu1 }
0x19f9   :  { %v7577_v58 = vpop.eup %7576 }
0x19fa   :  { %4591 = vrot.lane.b32.xlu1 %v7577_v58, %s7727_s13 }
0x19fd   :  { %v7579_v52 = vpop.eup %7578 }
0x19fe   :  { %4668 = vrot.lane.b32.xlu0 %v7579_v52, %s7727_s13  ;;  %v7581_v56 = vpop.eup %7580 }
0x19ff   :  { %v4585_v20 = vadd.f32 1.0, %v7581_v56  ;;  %v7583_v1 = vpop.eup %7582  ;;  %v7419_v56 = vld [vmem:[%s9387_s12] sm:$0xff]  }
0x1a00   :  { %v4662_v61 = vadd.f32 1.0, %v7583_v1 }
0x1a01   :  { %7584 = vrcp.f32 %v4585_v20 }
0x1a02   :  { %7586 = vrcp.f32 %v4662_v61 }
0x1a0e   :  { %v7585_v62 = vpop.eup %7584 }
0x1a0f   :  { %v7587_v38 = vpop.eup %7586  ;;  %v4589_v7 = vmul.f32 %v7585_v62, %v8884_v50 }
0x1a10   :  { %v4666_v27 = vmul.f32 %v7587_v38, %v8887_v25 }
0x1a6c   :  { %v4592_v63 = vpop.permute.xlu1 %4591 }
0x1a6d   :  { %v4594_v2 = vmul.f32 %v7585_v62, %v4592_v63 }
0x1a6f   :  { %4596 = vrot.lane.b32.xlu1 %v4594_v2, %s7728_s14 }
0x1a70   :  { %v4669_v5 = vpop.permute.xlu0 %4668 }
0x1a71   :  { %v4671_v24 = vmul.f32 %v7587_v38, %v4669_v5 }
0x1a73   :  { %4673 = vrot.lane.b32.xlu0 %v4671_v24, %s7728_s14 }
0x1ae1   :  { %v4597_v39 = vpop.permute.xlu1 %4596 }
0x1ae2   :  { %v8921_v9 = vadd.f32 %v4597_v39, %v4589_v7  ;;  %v4873_v39 = vld [vmem:[#allocation6 + $0x6] sm:$0x3] }
0x1ae4   :  { %7588 = vtanh.f32 %v8921_v9 }
0x1ae5   :  { %v4674_v10 = vpop.permute.xlu0 %4673 }
0x1ae6   :  { %v8925_v11 = vadd.f32 %v4674_v10, %v4666_v27 }
0x1ae8   :  { %7590 = vtanh.f32 %v8925_v11 }
0x1af1   :  { %v7589_v13 = vpop.eup %7588 }
0x1af2   :  { %4602 = vrot.lane.b32.xlu1 %v7589_v13, %s7726_s30 }
0x1af5   :  { %v7591_v14 = vpop.eup %7590 }
0x1af6   :  { %4679 = vrot.lane.b32.xlu0 %v7591_v14, %s7726_s30 }
0x1b64   :  { %v4603_v17 = vpop.permute.xlu1 %4602 }
0x1b65   :  { %v8938_v16 = vmul.f32 %v7585_v62, %v4603_v17 }
0x1b67   :  { %v4695_v57 = vpack.c.bf16 %v8938_v16, %v8938_v16 }
0x1b68   :  { %v4680_v4 = vpop.permute.xlu0 %4679 }
0x1b69   :  { %v8942_v21 = vmul.f32 %v7587_v38, %v4680_v4  ;;  %4703 = vrot.lane.b32.xlu1 %v4695_v57, %s7729_s25 }
0x1b6b   :  { %v4698_v40 = vpack.c.bf16 %v8942_v21, %v8942_v21 }
0x1b6d   :  { %4780 = vrot.lane.b32.xlu0 %v4698_v40, %s7729_s25 }
0x1bdb   :  { %v4704_v59 = vpop.permute.xlu1 %4703 }
0x1bdc   :  { %7201 = vmatmul.mubr.msk.bf16.vlgmr.msra.gmra.mxu0 %vm101_vm0, %v4704_v59 }
0x1bdd   :  { %7212 = vmatprep.mubr.msk.bf16.mxu0 %vm7723_vm1, %v7722_v0  ;;  %7211 = vmatpush3.bf16.msra.mxu0 %v7418_v55 }
0x1bde   :  { %7222 = vmatprep.subr.bf16.mxu0 %v7722_v0 }
0x1bdf   :  { %v4781_v22 = vpop.permute.xlu0 %4780 }
0x1be0   :  { %7207 = vmatmul.mubr.msk.bf16.vlgmr.msra.gmra.mxu1 %vm101_vm0, %v4781_v22 }
0x1be1   :  { %7218 = vmatprep.mubr.msk.bf16.mxu1 %vm7723_vm1, %v7722_v0  ;;  %7217 = vmatpush3.bf16.msra.mxu1 %v7419_v56 }
0x1be2   :  { %7228 = vmatprep.subr.bf16.mxu1 %v7722_v0 }
0x1c9c   :  { %v4748_v32 = vpop.f32.mrf.mxu0 }
0x1c9d   :  { %v4749_v60 = vadd.f32 %v4748_v32, %v4701_v8 }
0x1c9e   :  { %v7202_v50 = vpop.f32.mrf.mxu0 }
0x1c9f   :  { %7592 = vtanh.f32 %v4749_v60  ;;  %v6426_v6 = vmul.f32 -1.442695, %v4749_v60 }
0x1ca0   :  { %v4751_v42 = vpop.f32.mrf.mxu0  ;;  %v4825_v25 = vpop.f32.mrf.mxu1 }
0x1ca1   :  { %v4826_v35 = vadd.f32 %v4825_v25, %v4778_v23 }
0x1ca2   :  { %v7203_v3 = vpop.f32.mrf.mxu0  ;;  %v7208_v26 = vpop.f32.mrf.mxu1 }
0x1ca3   :  { %7594 = vtanh.f32 %v4826_v35  ;;  %v6429_v31 = vmul.f32 -1.442695, %v4826_v35 }
0x1ca4   :  { %v4828_v36 = vpop.f32.mrf.mxu1  ;;  %7596 = vpow2.f32 %v6426_v6 }
0x1ca5   :  { %7598 = vpow2.f32 %v6429_v31 }
0x1ca6   :  { %v7209_v47 = vpop.f32.mrf.mxu1 }
0x1cac   :  { %v7593_v44 = vpop.eup %7592 }
0x1cad   :  { %4763 = vrot.lane.b32.xlu1 %v7593_v44, %s7727_s13 }
0x1cb0   :  { %v7595_v29 = vpop.eup %7594 }
0x1cb1   :  { %4840 = vrot.lane.b32.xlu0 %v7595_v29, %s7727_s13  ;;  %v7597_v33 = vpop.eup %7596 }
0x1cb2   :  { %v4757_v48 = vadd.f32 1.0, %v7597_v33  ;;  %v7599_v19 = vpop.eup %7598 }
0x1cb3   :  { %v4834_v34 = vadd.f32 1.0, %v7599_v19  ;;  %v7421_v19 = vld [vmem:[%s9387_s12] sm:$0xff]  }
0x1cb4   :  { %7600 = vrcp.f32 %v4757_v48  ;;  %v7420_v48 = vld [vmem:[%s9388_s11] sm:$0xff]  }
0x1cb5   :  { %7602 = vrcp.f32 %v4834_v34 }
0x1cc1   :  { %v7601_v37 = vpop.eup %7600 }
0x1cc2   :  { %v7603_v53 = vpop.eup %7602  ;;  %v4761_v46 = vmul.f32 %v7601_v37, %v8921_v9 }
0x1cc3   :  { %v4838_v58 = vmul.f32 %v7603_v53, %v8925_v11 }
0x1d1f   :  { %v4764_v41 = vpop.permute.xlu1 %4763 }
0x1d20   :  { %v4766_v43 = vmul.f32 %v7601_v37, %v4764_v41 }
0x1d22   :  { %4768 = vrot.lane.b32.xlu1 %v4766_v43, %s7728_s14 }
0x1d23   :  { %v4841_v18 = vpop.permute.xlu0 %4840 }
0x1d24   :  { %v4843_v45 = vmul.f32 %v7603_v53, %v4841_v18 }
0x1d26   :  { %4845 = vrot.lane.b32.xlu0 %v4843_v45, %s7728_s14 }
0x1d94   :  { %v4769_v49 = vpop.permute.xlu1 %4768 }
0x1d95   :  { %v8959_v51 = vadd.f32 %v4769_v49, %v4761_v46 }
0x1d97   :  { %7604 = vtanh.f32 %v8959_v51 }
0x1d98   :  { %v4846_v52 = vpop.permute.xlu0 %4845 }
0x1d99   :  { %v8963_v54 = vadd.f32 %v4846_v52, %v4838_v58  ;;  %v5045_v58 = vld [vmem:[#allocation6 + $0x8] sm:$0x3] }
0x1d9b   :  { %7606 = vtanh.f32 %v8963_v54 }
0x1da4   :  { %v7605_v20 = vpop.eup %7604 }
0x1da5   :  { %4774 = vrot.lane.b32.xlu1 %v7605_v20, %s7726_s30  ;;  %v5122_v20 = vld [vmem:[#allocation7 + $0x6] sm:$0x3] }
0x1da8   :  { %v7607_v1 = vpop.eup %7606 }
0x1da9   :  { %4851 = vrot.lane.b32.xlu0 %v7607_v1, %s7726_s30 }
0x1e17   :  { %v4775_v61 = vpop.permute.xlu1 %4774 }
0x1e18   :  { %v8976_v62 = vmul.f32 %v7601_v37, %v4775_v61 }
0x1e1a   :  { %v4867_v63 = vpack.c.bf16 %v8976_v62, %v8976_v62 }
0x1e1b   :  { %v4852_v2 = vpop.permute.xlu0 %4851 }
0x1e1c   :  { %v8980_v38 = vmul.f32 %v7603_v53, %v4852_v2  ;;  %4875 = vrot.lane.b32.xlu1 %v4867_v63, %s7729_s25 }
0x1e1e   :  { %v4870_v5 = vpack.c.bf16 %v8980_v38, %v8980_v38 }
0x1e20   :  { %4952 = vrot.lane.b32.xlu0 %v4870_v5, %s7729_s25 }
0x1e8e   :  { %v4876_v24 = vpop.permute.xlu1 %4875 }
0x1e8f   :  { %7213 = vmatmul.mubr.msk.bf16.vlgmr.msra.gmra.mxu0 %vm101_vm0, %v4876_v24 }
0x1e90   :  { %7224 = vmatprep.mubr.msk.bf16.mxu0 %vm7723_vm1, %v7722_v0  ;;  %7223 = vmatpush3.bf16.msra.mxu0 %v7420_v48 }
0x1e91   :  { %7234 = vmatprep.subr.bf16.mxu0 %v7722_v0 }
0x1e92   :  { %v4953_v7 = vpop.permute.xlu0 %4952 }
0x1e93   :  { %7219 = vmatmul.mubr.msk.bf16.vlgmr.msra.gmra.mxu1 %vm101_vm0, %v4953_v7 }
0x1e94   :  { %7230 = vmatprep.mubr.msk.bf16.mxu1 %vm7723_vm1, %v7722_v0  ;;  %7229 = vmatpush3.bf16.msra.mxu1 %v7421_v19 }
0x1e95   :  { %7240 = vmatprep.subr.bf16.mxu1 %v7722_v0 }
0x1f4f   :  { %v4920_v9 = vpop.f32.mrf.mxu0 }
0x1f50   :  { %v4921_v27 = vadd.f32 %v4920_v9, %v4873_v39 }
0x1f51   :  { %v7214_v10 = vpop.f32.mrf.mxu0 }
0x1f52   :  { %7608 = vtanh.f32 %v4921_v27  ;;  %v6432_v22 = vmul.f32 -1.442695, %v4921_v27 }
0x1f53   :  { %v4923_v11 = vpop.f32.mrf.mxu0  ;;  %v4997_v12 = vpop.f32.mrf.mxu1 }
0x1f54   :  { %v4998_v13 = vadd.f32 %v4997_v12, %v4950_v15 }
0x1f55   :  { %v7215_v14 = vpop.f32.mrf.mxu0  ;;  %v7220_v17 = vpop.f32.mrf.mxu1 }
0x1f56   :  { %7610 = vtanh.f32 %v4998_v13  ;;  %v6435_v8 = vmul.f32 -1.442695, %v4998_v13 }
0x1f57   :  { %v5000_v57 = vpop.f32.mrf.mxu1  ;;  %7612 = vpow2.f32 %v6432_v22 }
0x1f58   :  { %7614 = vpow2.f32 %v6435_v8 }
0x1f59   :  { %v7221_v4 = vpop.f32.mrf.mxu1 }
0x1f5f   :  { %v7609_v40 = vpop.eup %7608 }
0x1f60   :  { %4935 = vrot.lane.b32.xlu1 %v7609_v40, %s7727_s13 }
0x1f63   :  { %v7611_v59 = vpop.eup %7610 }
0x1f64   :  { %5012 = vrot.lane.b32.xlu0 %v7611_v59, %s7727_s13  ;;  %v7613_v32 = vpop.eup %7612 }
0x1f65   :  { %v4929_v60 = vadd.f32 1.0, %v7613_v32  ;;  %v7615_v50 = vpop.eup %7614 }
0x1f66   :  { %v5006_v42 = vadd.f32 1.0, %v7615_v50 }
0x1f67   :  { %7616 = vrcp.f32 %v4929_v60 }
0x1f68   :  { %7618 = vrcp.f32 %v5006_v42  ;;  %v7422_v42 = vld [vmem:[%s9388_s11] sm:$0xff]  }
0x1f74   :  { %v7617_v23 = vpop.eup %7616 }
0x1f75   :  { %v7619_v3 = vpop.eup %7618  ;;  %v4933_v47 = vmul.f32 %v7617_v23, %v8959_v51 }
0x1f76   :  { %v5010_v6 = vmul.f32 %v7619_v3, %v8963_v54 }
0x1fd2   :  { %v4936_v25 = vpop.permute.xlu1 %4935 }
0x1fd3   :  { %v4938_v35 = vmul.f32 %v7617_v23, %v4936_v25 }
0x1fd5   :  { %4940 = vrot.lane.b32.xlu1 %v4938_v35, %s7728_s14 }
0x1fd6   :  { %v5013_v26 = vpop.permute.xlu0 %5012 }
0x1fd7   :  { %v5015_v36 = vmul.f32 %v7619_v3, %v5013_v26 }
0x1fd9   :  { %5017 = vrot.lane.b32.xlu0 %v5015_v36, %s7728_s14 }
0x2047   :  { %v4941_v44 = vpop.permute.xlu1 %4940 }
0x2048   :  { %v8997_v29 = vadd.f32 %v4941_v44, %v4933_v47 }
0x204a   :  { %7620 = vtanh.f32 %v8997_v29 }
0x204b   :  { %v5018_v31 = vpop.permute.xlu0 %5017 }
0x204c   :  { %v9001_v33 = vadd.f32 %v5018_v31, %v5010_v6 }
0x204e   :  { %7622 = vtanh.f32 %v9001_v33 }
0x2057   :  { %v7621_v34 = vpop.eup %7620 }
0x2058   :  { %4946 = vrot.lane.b32.xlu1 %v7621_v34, %s7726_s30 }
0x205b   :  { %v7623_v37 = vpop.eup %7622 }
0x205c   :  { %5023 = vrot.lane.b32.xlu0 %v7623_v37, %s7726_s30 }
0x20ca   :  { %v4947_v41 = vpop.permute.xlu1 %4946 }
0x20cb   :  { %v9014_v43 = vmul.f32 %v7617_v23, %v4947_v41  ;;  %v7423_v23 = vld [vmem:[%s9387_s12] sm:$0xff]   ;;  %v5294_v41 = vld [vmem:[#allocation7 + $0x4] sm:$0x3] }
0x20cd   :  { %v5039_v53 = vpack.c.bf16 %v9014_v43, %v9014_v43 }
0x20ce   :  { %v5024_v18 = vpop.permute.xlu0 %5023 }
0x20cf   :  { %v9018_v45 = vmul.f32 %v7619_v3, %v5024_v18  ;;  %5047 = vrot.lane.b32.xlu1 %v5039_v53, %s7729_s25 }
0x20d1   :  { %v5042_v46 = vpack.c.bf16 %v9018_v45, %v9018_v45 }
0x20d3   :  { %5124 = vrot.lane.b32.xlu0 %v5042_v46, %s7729_s25 }
0x2141   :  { %v5048_v49 = vpop.permute.xlu1 %5047 }
0x2142   :  { %7225 = vmatmul.mubr.msk.bf16.vlgmr.msra.gmra.mxu0 %vm101_vm0, %v5048_v49 }
0x2143   :  { %7236 = vmatprep.mubr.msk.bf16.mxu0 %vm7723_vm1, %v7722_v0  ;;  %7235 = vmatpush3.bf16.msra.mxu0 %v7422_v42 }
0x2144   :  { %7246 = vmatprep.subr.bf16.mxu0 %v7722_v0 }
0x2145   :  { %v5125_v51 = vpop.permute.xlu0 %5124 }
0x2146   :  { %7231 = vmatmul.mubr.msk.bf16.vlgmr.msra.gmra.mxu1 %vm101_vm0, %v5125_v51 }
0x2147   :  { %7242 = vmatprep.mubr.msk.bf16.mxu1 %vm7723_vm1, %v7722_v0  ;;  %7241 = vmatpush3.bf16.msra.mxu1 %v7423_v23  ;;  %v5389_v23 = vld [vmem:[#allocation6 + $0xc] sm:$0x3] }
0x2148   :  { %7252 = vmatprep.subr.bf16.mxu1 %v7722_v0 }
0x2202   :  { %v5092_v52 = vpop.f32.mrf.mxu0 }
0x2203   :  { %v5093_v54 = vadd.f32 %v5092_v52, %v5045_v58 }
0x2204   :  { %v7226_v55 = vpop.f32.mrf.mxu0 }
0x2205   :  { %7624 = vtanh.f32 %v5093_v54  ;;  %v6438_v9 = vmul.f32 -1.442695, %v5093_v54 }
0x2206   :  { %v5095_v56 = vpop.f32.mrf.mxu0  ;;  %v5169_v1 = vpop.f32.mrf.mxu1 }
0x2207   :  { %v5170_v61 = vadd.f32 %v5169_v1, %v5122_v20 }
0x2208   :  { %v7227_v63 = vpop.f32.mrf.mxu0  ;;  %v7232_v2 = vpop.f32.mrf.mxu1 }
0x2209   :  { %7626 = vtanh.f32 %v5170_v61  ;;  %v6441_v27 = vmul.f32 -1.442695, %v5170_v61 }
0x220a   :  { %v5172_v5 = vpop.f32.mrf.mxu1  ;;  %7628 = vpow2.f32 %v6438_v9 }
0x220b   :  { %7630 = vpow2.f32 %v6441_v27 }
0x220c   :  { %v7233_v24 = vpop.f32.mrf.mxu1 }
0x2212   :  { %v7625_v7 = vpop.eup %7624 }
0x2213   :  { %5107 = vrot.lane.b32.xlu1 %v7625_v7, %s7727_s13 }
0x2216   :  { %v7627_v39 = vpop.eup %7626 }
0x2217   :  { %5184 = vrot.lane.b32.xlu0 %v7627_v39, %s7727_s13  ;;  %v7629_v10 = vpop.eup %7628 }
0x2218   :  { %v5101_v11 = vadd.f32 1.0, %v7629_v10  ;;  %v7631_v15 = vpop.eup %7630 }
0x2219   :  { %v5178_v12 = vadd.f32 1.0, %v7631_v15 }
0x221a   :  { %7632 = vrcp.f32 %v5101_v11 }
0x221b   :  { %7634 = vrcp.f32 %v5178_v12 }
0x2227   :  { %v7633_v13 = vpop.eup %7632 }
0x2228   :  { %v7635_v57 = vpop.eup %7634  ;;  %v5105_v59 = vmul.f32 %v7633_v13, %v8997_v29 }
0x2229   :  { %v5182_v32 = vmul.f32 %v7635_v57, %v9001_v33  ;;  %v5217_v33 = vld [vmem:[#allocation6 + $0xa] sm:$0x3] }
0x2285   :  { %v5108_v14 = vpop.permute.xlu1 %5107 }
0x2286   :  { %v5110_v17 = vmul.f32 %v7633_v13, %v5108_v14  ;;  %v7424_v14 = vld [vmem:[%s9388_s11] sm:$0xff]  }
0x2288   :  { %5112 = vrot.lane.b32.xlu1 %v5110_v17, %s7728_s14  ;;  %v7425_v17 = vld [vmem:[%s9387_s12] sm:$0xff]  }
0x2289   :  { %v5185_v4 = vpop.permute.xlu0 %5184 }
0x228a   :  { %v5187_v40 = vmul.f32 %v7635_v57, %v5185_v4 }
0x228c   :  { %5189 = vrot.lane.b32.xlu0 %v5187_v40, %s7728_s14 }
0x22fa   :  { %v5113_v22 = vpop.permute.xlu1 %5112 }
0x22fb   :  { %v9035_v8 = vadd.f32 %v5113_v22, %v5105_v59 }
0x22fd   :  { %7636 = vtanh.f32 %v9035_v8 }
0x22fe   :  { %v5190_v60 = vpop.permute.xlu0 %5189 }
0x22ff   :  { %v9039_v50 = vadd.f32 %v5190_v60, %v5182_v32 }
0x2301   :  { %7638 = vtanh.f32 %v9039_v50 }
0x230a   :  { %v7637_v25 = vpop.eup %7636 }
0x230b   :  { %5118 = vrot.lane.b32.xlu1 %v7637_v25, %s7726_s30 }
0x230e   :  { %v7639_v35 = vpop.eup %7638 }
0x230f   :  { %5195 = vrot.lane.b32.xlu0 %v7639_v35, %s7726_s30 }
0x237d   :  { %v5119_v3 = vpop.permute.xlu1 %5118 }
0x237e   :  { %v9052_v26 = vmul.f32 %v7633_v13, %v5119_v3 }
0x2380   :  { %v5211_v36 = vpack.c.bf16 %v9052_v26, %v9052_v26 }
0x2381   :  { %v5196_v47 = vpop.permute.xlu0 %5195 }
0x2382   :  { %v9056_v44 = vmul.f32 %v7635_v57, %v5196_v47  ;;  %5219 = vrot.lane.b32.xlu1 %v5211_v36, %s7729_s25  ;;  %v5466_v47 = vld [vmem:[#allocation7 + $0x2] sm:$0x3] }
0x2384   :  { %v5214_v29 = vpack.c.bf16 %v9056_v44, %v9056_v44 }
0x2386   :  { %5296 = vrot.lane.b32.xlu0 %v5214_v29, %s7729_s25 }
0x23f4   :  { %v5220_v6 = vpop.permute.xlu1 %5219 }
0x23f5   :  { %7237 = vmatmul.mubr.msk.bf16.vlgmr.msra.gmra.mxu0 %vm101_vm0, %v5220_v6 }
0x23f6   :  { %7248 = vmatprep.mubr.msk.bf16.mxu0 %vm7723_vm1, %v7722_v0  ;;  %7247 = vmatpush3.bf16.msra.mxu0 %v7424_v14 }
0x23f7   :  { %7258 = vmatprep.subr.bf16.mxu0 %v7722_v0 }
0x23f8   :  { %v5297_v31 = vpop.permute.xlu0 %5296 }
0x23f9   :  { %7243 = vmatmul.mubr.msk.bf16.vlgmr.msra.gmra.mxu1 %vm101_vm0, %v5297_v31 }
0x23fa   :  { %7254 = vmatprep.mubr.msk.bf16.mxu1 %vm7723_vm1, %v7722_v0  ;;  %7253 = vmatpush3.bf16.msra.mxu1 %v7425_v17 }
0x23fb   :  { %7264 = vmatprep.subr.bf16.mxu1 %v7722_v0 }
0x24b5   :  { %v5264_v48 = vpop.f32.mrf.mxu0 }
0x24b6   :  { %v5265_v19 = vadd.f32 %v5264_v48, %v5217_v33 }
0x24b7   :  { %v7238_v34 = vpop.f32.mrf.mxu0 }
0x24b8   :  { %7640 = vtanh.f32 %v5265_v19  ;;  %v6444_v55 = vmul.f32 -1.442695, %v5265_v19 }
0x24b9   :  { %v5267_v37 = vpop.f32.mrf.mxu0  ;;  %v5341_v53 = vpop.f32.mrf.mxu1 }
0x24ba   :  { %v5342_v18 = vadd.f32 %v5341_v53, %v5294_v41 }
0x24bb   :  { %v7239_v46 = vpop.f32.mrf.mxu0  ;;  %v7244_v49 = vpop.f32.mrf.mxu1 }
0x24bc   :  { %7642 = vtanh.f32 %v5342_v18  ;;  %v6447_v56 = vmul.f32 -1.442695, %v5342_v18 }
0x24bd   :  { %v5344_v51 = vpop.f32.mrf.mxu1  ;;  %7644 = vpow2.f32 %v6444_v55 }
0x24be   :  { %7646 = vpow2.f32 %v6447_v56 }
0x24bf   :  { %v7245_v58 = vpop.f32.mrf.mxu1 }
0x24c5   :  { %v7641_v52 = vpop.eup %7640 }
0x24c6   :  { %5279 = vrot.lane.b32.xlu1 %v7641_v52, %s7727_s13 }
0x24c9   :  { %v7643_v54 = vpop.eup %7642 }
0x24ca   :  { %5356 = vrot.lane.b32.xlu0 %v7643_v54, %s7727_s13  ;;  %v7645_v20 = vpop.eup %7644 }
0x24cb   :  { %v5273_v1 = vadd.f32 1.0, %v7645_v20  ;;  %v7647_v61 = vpop.eup %7646 }
0x24cc   :  { %v5350_v63 = vadd.f32 1.0, %v7647_v61 }
0x24cd   :  { %7648 = vrcp.f32 %v5273_v1 }
0x24ce   :  { %7650 = vrcp.f32 %v5350_v63 }
0x24da   :  { %v7649_v2 = vpop.eup %7648 }
0x24db   :  { %v7651_v7 = vpop.eup %7650  ;;  %v5277_v27 = vmul.f32 %v7649_v2, %v9035_v8 }
0x24dc   :  { %v5354_v15 = vmul.f32 %v7651_v7, %v9039_v50 }
0x2538   :  { %v5280_v5 = vpop.permute.xlu1 %5279 }
0x2539   :  { %v5282_v24 = vmul.f32 %v7649_v2, %v5280_v5 }
0x253b   :  { %5284 = vrot.lane.b32.xlu1 %v5282_v24, %s7728_s14 }
0x253c   :  { %v5357_v39 = vpop.permute.xlu0 %5356 }
0x253d   :  { %v5359_v9 = vmul.f32 %v7651_v7, %v5357_v39  ;;  %v7427_v39 = vld [vmem:[%s9387_s12] sm:$0xff]  }
0x253f   :  { %5361 = vrot.lane.b32.xlu0 %v5359_v9, %s7728_s14 }
0x25ad   :  { %v5285_v10 = vpop.permute.xlu1 %5284 }
0x25ae   :  { %v9073_v11 = vadd.f32 %v5285_v10, %v5277_v27 }
0x25b0   :  { %7652 = vtanh.f32 %v9073_v11 }
0x25b1   :  { %v5362_v12 = vpop.permute.xlu0 %5361 }
0x25b2   :  { %v9077_v13 = vadd.f32 %v5362_v12, %v5354_v15 }
0x25b4   :  { %7654 = vtanh.f32 %v9077_v13 }
0x25bd   :  { %v7653_v57 = vpop.eup %7652 }
0x25be   :  { %5290 = vrot.lane.b32.xlu1 %v7653_v57, %s7726_s30 }
0x25c1   :  { %v7655_v4 = vpop.eup %7654 }
0x25c2   :  { %5367 = vrot.lane.b32.xlu0 %v7655_v4, %s7726_s30  ;;  %v5561_v4 = vld [vmem:[#allocation6 + $0xe] sm:$0x3] }
0x2630   :  { %v5291_v40 = vpop.permute.xlu1 %5290 }
0x2631   :  { %v9090_v59 = vmul.f32 %v7649_v2, %v5291_v40 }
0x2633   :  { %v5383_v22 = vpack.c.bf16 %v9090_v59, %v9090_v59 }
0x2634   :  { %v5368_v8 = vpop.permute.xlu0 %5367 }
0x2635   :  { %v9094_v32 = vmul.f32 %v7651_v7, %v5368_v8  ;;  %5391 = vrot.lane.b32.xlu1 %v5383_v22, %s7729_s25  ;;  %v7426_v7 = vld [vmem:[%s9388_s11] sm:$0xff]  }
0x2637   :  { %v5386_v60 = vpack.c.bf16 %v9094_v32, %v9094_v32 }
0x2639   :  { %5468 = vrot.lane.b32.xlu0 %v5386_v60, %s7729_s25 }
0x26a7   :  { %v5392_v50 = vpop.permute.xlu1 %5391 }
0x26a8   :  { %7249 = vmatmul.mubr.msk.bf16.vlgmr.msra.gmra.mxu0 %vm101_vm0, %v5392_v50  ;;  %v5638_v50 = vld [vmem:[#allocation7] sm:$0x3] }
0x26a9   :  { %7260 = vmatprep.mubr.msk.bf16.mxu0 %vm7723_vm1, %v7722_v0  ;;  %7259 = vmatpush3.bf16.msra.mxu0 %v7426_v7  ;;  %v9199_v7 = vld [vmem:[%s9392_s16] ss:$0 sm:$0xff] }
0x26aa   :  { %7270 = vmatprep.subr.bf16.mxu0 %v7722_v0 }
0x26ab   :  { %v5469_v42 = vpop.permute.xlu0 %5468 }
0x26ac   :  { %7255 = vmatmul.mubr.msk.bf16.vlgmr.msra.gmra.mxu1 %vm101_vm0, %v5469_v42 }
0x26ad   :  { %7266 = vmatprep.mubr.msk.bf16.mxu1 %vm7723_vm1, %v7722_v0  ;;  %7265 = vmatpush3.bf16.msra.mxu1 %v7427_v39 }
0x26ae   :  { %7276 = vmatprep.subr.bf16.mxu1 %v7722_v0 }
0x2768   :  { %v5436_v25 = vpop.f32.mrf.mxu0 }
0x2769   :  { %v5437_v35 = vadd.f32 %v5436_v25, %v5389_v23 }
0x276a   :  { %v7250_v3 = vpop.f32.mrf.mxu0 }
0x276b   :  { %7656 = vtanh.f32 %v5437_v35  ;;  %v6450_v41 = vmul.f32 -1.442695, %v5437_v35 }
0x276c   :  { %v5439_v36 = vpop.f32.mrf.mxu0  ;;  %v5513_v29 = vpop.f32.mrf.mxu1 }
0x276d   :  { %v5514_v6 = vadd.f32 %v5513_v29, %v5466_v47 }
0x276e   :  { %v7251_v31 = vpop.f32.mrf.mxu0  ;;  %v7256_v33 = vpop.f32.mrf.mxu1 }
0x276f   :  { %7658 = vtanh.f32 %v5514_v6  ;;  %v6453_v53 = vmul.f32 -1.442695, %v5514_v6 }
0x2770   :  { %v5516_v48 = vpop.f32.mrf.mxu1  ;;  %7660 = vpow2.f32 %v6450_v41 }
0x2771   :  { %7662 = vpow2.f32 %v6453_v53 }
0x2772   :  { %v7257_v19 = vpop.f32.mrf.mxu1 }
0x2778   :  { %v7657_v34 = vpop.eup %7656 }
0x2779   :  { %5451 = vrot.lane.b32.xlu1 %v7657_v34, %s7727_s13 }
0x277c   :  { %v7659_v37 = vpop.eup %7658 }
0x277d   :  { %5528 = vrot.lane.b32.xlu0 %v7659_v37, %s7727_s13  ;;  %v7661_v18 = vpop.eup %7660 }
0x277e   :  { %v5445_v46 = vadd.f32 1.0, %v7661_v18  ;;  %v7663_v49 = vpop.eup %7662 }
0x277f   :  { %v5522_v51 = vadd.f32 1.0, %v7663_v49 }
0x2780   :  { %7664 = vrcp.f32 %v5445_v46 }
0x2781   :  { %7666 = vrcp.f32 %v5522_v51 }
0x278d   :  { %v7665_v58 = vpop.eup %7664 }
0x278e   :  { %v7667_v55 = vpop.eup %7666  ;;  %v5449_v1 = vmul.f32 %v7665_v58, %v9073_v11 }
0x278f   :  { %v5526_v2 = vmul.f32 %v7667_v55, %v9077_v13 }
0x27eb   :  { %v5452_v52 = vpop.permute.xlu1 %5451 }
0x27ec   :  { %v5454_v54 = vmul.f32 %v7665_v58, %v5452_v52 }
0x27ee   :  { %5456 = vrot.lane.b32.xlu1 %v5454_v54, %s7728_s14 }
0x27ef   :  { %v5529_v56 = vpop.permute.xlu0 %5528 }
0x27f0   :  { %v5531_v20 = vmul.f32 %v7667_v55, %v5529_v56 }
0x27f2   :  { %5533 = vrot.lane.b32.xlu0 %v5531_v20, %s7728_s14 }
0x2860   :  { %v5457_v61 = vpop.permute.xlu1 %5456 }
0x2861   :  { %v9111_v63 = vadd.f32 %v5457_v61, %v5449_v1  ;;  %v9186_v61 = vld [vmem:[%s9391_s15] ss:$0 sm:$0xff] }
0x2863   :  { %7668 = vtanh.f32 %v9111_v63 }
0x2864   :  { %v5534_v5 = vpop.permute.xlu0 %5533 }
0x2865   :  { %v9115_v24 = vadd.f32 %v5534_v5, %v5526_v2 }
0x2867   :  { %7670 = vtanh.f32 %v9115_v24 }
0x2870   :  { %v7669_v9 = vpop.eup %7668 }
0x2871   :  { %5462 = vrot.lane.b32.xlu1 %v7669_v9, %s7726_s30 }
0x2874   :  { %v7671_v27 = vpop.eup %7670 }
0x2875   :  { %5539 = vrot.lane.b32.xlu0 %v7671_v27, %s7726_s30 }
0x28e3   :  { %v5463_v10 = vpop.permute.xlu1 %5462 }
0x28e4   :  { %v9128_v11 = vmul.f32 %v7665_v58, %v5463_v10 }
0x28e6   :  { %v5555_v15 = vpack.c.bf16 %v9128_v11, %v9128_v11 }
0x28e7   :  { %v5540_v12 = vpop.permute.xlu0 %5539 }
0x28e8   :  { %v5542_v13 = vmul.f32 %v7667_v55, %v5540_v12  ;;  %5563 = vrot.lane.b32.xlu1 %v5555_v15, %s7729_s25 }
0x28ea   :  { %v5558_v14 = vpack.c.bf16 %v5542_v13, %v5542_v13 }
0x28ec   :  { %5640 = vrot.lane.b32.xlu0 %v5558_v14, %s7729_s25 }
0x295a   :  { %v5564_v17 = vpop.permute.xlu1 %5563 }
0x295b   :  { %7261 = vmatmul.mubr.msk.bf16.vlgmr.msra.gmra.mxu0 %vm101_vm0, %v5564_v17 }
0x295c   :  { %7272 = vmatprep.mubr.msk.bf16.mxu0 %vm7723_vm1, %v7722_v0 }
0x295e   :  { %v5641_v57 = vpop.permute.xlu0 %5640 }
0x295f   :  { %7267 = vmatmul.mubr.msk.bf16.vlgmr.msra.gmra.mxu1 %vm101_vm0, %v5641_v57 }
0x2960   :  { %7278 = vmatprep.mubr.msk.bf16.mxu1 %vm7723_vm1, %v7722_v0 }
0x2a1b   :  { %v5608_v40 = vpop.f32.mrf.mxu0 }
0x2a1c   :  { %v5609_v22 = vadd.f32 %v5608_v40, %v5561_v4 }
0x2a1d   :  { %v7262_v8 = vpop.f32.mrf.mxu0 }
0x2a1e   :  { %7672 = vtanh.f32 %v5609_v22  ;;  %v6456_v6 = vmul.f32 -1.442695, %v5609_v22 }
0x2a1f   :  { %v5611_v60 = vpop.f32.mrf.mxu0  ;;  %v5685_v42 = vpop.f32.mrf.mxu1 }
0x2a20   :  { %v5686_v23 = vadd.f32 %v5685_v42, %v5638_v50 }
0x2a21   :  { %v7263_v25 = vpop.f32.mrf.mxu0  ;;  %v7268_v35 = vpop.f32.mrf.mxu1 }
0x2a22   :  { %7674 = vtanh.f32 %v5686_v23  ;;  %v6459_v31 = vmul.f32 -1.442695, %v5686_v23 }
0x2a23   :  { %v5688_v3 = vpop.f32.mrf.mxu1  ;;  %7676 = vpow2.f32 %v6456_v6 }
0x2a24   :  { %7678 = vpow2.f32 %v6459_v31 }
0x2a25   :  { %v7269_v36 = vpop.f32.mrf.mxu1 }
0x2a2b   :  { %v7673_v47 = vpop.eup %7672 }
0x2a2c   :  { %5623 = vrot.lane.b32.xlu1 %v7673_v47, %s7727_s13 }
0x2a2f   :  { %v7675_v29 = vpop.eup %7674 }
0x2a30   :  { %5700 = vrot.lane.b32.xlu0 %v7675_v29, %s7727_s13  ;;  %v7677_v33 = vpop.eup %7676 }
0x2a31   :  { %v5617_v48 = vadd.f32 1.0, %v7677_v33  ;;  %v7679_v19 = vpop.eup %7678 }
0x2a32   :  { %v5694_v34 = vadd.f32 1.0, %v7679_v19 }
0x2a33   :  { %7680 = vrcp.f32 %v5617_v48 }
0x2a34   :  { %7682 = vrcp.f32 %v5694_v34 }
0x2a40   :  { %v7681_v37 = vpop.eup %7680 }
0x2a41   :  { %v7683_v18 = vpop.eup %7682  ;;  %v5621_v51 = vmul.f32 %v7681_v37, %v9111_v63 }
0x2a42   :  { %v5698_v54 = vmul.f32 %v7683_v18, %v9115_v24 }
0x2a9e   :  { %v5624_v41 = vpop.permute.xlu1 %5623 }
0x2a9f   :  { %v5626_v53 = vmul.f32 %v7681_v37, %v5624_v41 }
0x2aa1   :  { %5628 = vrot.lane.b32.xlu1 %v5626_v53, %s7728_s14 }
0x2aa2   :  { %v5701_v46 = vpop.permute.xlu0 %5700 }
0x2aa3   :  { %v5703_v49 = vmul.f32 %v7683_v18, %v5701_v46 }
0x2aa5   :  { %5705 = vrot.lane.b32.xlu0 %v5703_v49, %s7728_s14 }
0x2b13   :  { %v5629_v58 = vpop.permute.xlu1 %5628 }
0x2b14   :  { %v5631_v52 = vadd.f32 %v5629_v58, %v5621_v51 }
0x2b16   :  { %7684 = vtanh.f32 %v5631_v52 }
0x2b17   :  { %v5706_v55 = vpop.permute.xlu0 %5705 }
0x2b18   :  { %v5708_v56 = vadd.f32 %v5706_v55, %v5698_v54 }
0x2b1a   :  { %7686 = vtanh.f32 %v5708_v56 }
0x2b23   :  { %v7685_v20 = vpop.eup %7684 }
0x2b24   :  { %5634 = vrot.lane.b32.xlu1 %v7685_v20, %s7726_s30 }
0x2b27   :  { %v7687_v1 = vpop.eup %7686 }
0x2b28   :  { %5711 = vrot.lane.b32.xlu0 %v7687_v1, %s7726_s30  ;;  %4684 = vrot.lane.b32.xlu1 %v8938_v16, %s7729_s25 }
0x2b2c   :  { %4512 = vrot.lane.b32.xlu0 %v8900_v28, %s7729_s25  ;;  %5378 = vrot.lane.b32.xlu1 %v9094_v32, %s7729_s25 }
0x2b30   :  { %5550 = vrot.lane.b32.xlu0 %v5542_v13, %s7729_s25  ;;  %5206 = vrot.lane.b32.xlu1 %v9056_v44, %s7729_s25 }
0x2b34   :  { %4856 = vrot.lane.b32.xlu0 %v8976_v62, %s7729_s25  ;;  %5200 = vrot.lane.b32.xlu1 %v9052_v26, %s7729_s25 }
0x2b38   :  { %5028 = vrot.lane.b32.xlu0 %v9014_v43, %s7729_s25 }
0x2b3c   :  { %5034 = vrot.lane.b32.xlu0 %v9018_v45, %s7729_s25 }
0x2b40   :  { %4862 = vrot.lane.b32.xlu0 %v8980_v38, %s7729_s25 }
0x2b44   :  { %4690 = vrot.lane.b32.xlu0 %v8942_v21, %s7729_s25 }
0x2b48   :  { %4518 = vrot.lane.b32.xlu0 %v8904_v30, %s7729_s25 }
0x2b96   :  { %v5635_v28 = vpop.permute.xlu1 %5634 }
0x2b97   :  { %v5637_v63 = vmul.f32 %v7681_v37, %v5635_v28 }
0x2b9a   :  { %v5712_v16 = vpop.permute.xlu0 %5711  ;;  %v4685_v62 = vpop.permute.xlu1 %4684 }
0x2b9b   :  { %v5714_v26 = vmul.f32 %v7683_v18, %v5712_v16  ;;  %4688 = vst.msk [vmem:[#allocation8 + $0x2] sm:$0x3] %vm4515_vm5, %v4685_v62 }
0x2b9d   :  { %5722 = vrot.lane.b32.xlu1 %v5714_v26, %s7729_s25 }
0x2b9e   :  { %v4513_v43 = vpop.permute.xlu0 %4512  ;;  %v5379_v45 = vpop.permute.xlu1 %5378 }
0x2b9f   :  { %4516 = vst.msk [vmem:[#allocation8] sm:$0x3] %vm4515_vm5, %v4513_v43  ;;  %5382 = vst.msk [vmem:[#allocation9 + $0x4] sm:$0x3] %vm4515_vm5, %v5379_v45 }
0x2ba1   :  { %5372 = vrot.lane.b32.xlu1 %v9090_v59, %s7729_s25 }
0x2ba2   :  { %v5551_v21 = vpop.permute.xlu0 %5550  ;;  %v5207_v30 = vpop.permute.xlu1 %5206  ;;  %v9224_v60 = vld [vmem:[#allocation8 + $0x2] sm:$0x3] }
0x2ba3   :  { %5554 = vst.msk [vmem:[#allocation9 + $0x2] sm:$0x3] %vm4515_vm5, %v5551_v21  ;;  %5210 = vst.msk [vmem:[#allocation9 + $0x6] sm:$0x3] %vm4515_vm5, %v5207_v30  ;;  %v5750_v50 = vmul.f32 %v9186_v61, %v9224_v60 }
0x2ba5   :  { %5544 = vrot.lane.b32.xlu1 %v9128_v11, %s7729_s25  ;;  %v5760_v23 = vsel %vm4515_vm5, %v5750_v50, 0.0  ;;  %v6462_v50 = vld [vmem:[%s9393_s17] ss:$0 sm:$0xff] }
0x2ba6   :  { %v4857_v38 = vpop.permute.xlu0 %4856  ;;  %v5201_v44 = vpop.permute.xlu1 %5200  ;;  %v9181_v32 = vld [vmem:[#allocation8] sm:$0x3]  ;;  %v9201_v39 = vld [vmem:[#allocation9 + $0x4] sm:$0x3] }
0x2ba7   :  { %4860 = vst.msk [vmem:[#allocation8 + $0x4] sm:$0x3] %vm4515_vm5, %v4857_v38  ;;  %5204 = vst.msk [vmem:[#allocation8 + $0x8] sm:$0x3] %vm4515_vm5, %v5201_v44  ;;  %v5749_v59 = vmul.f32 %v9186_v61, %v9181_v32  ;;  %v5790_v10 = vmul.f32 %v9199_v7, %v9201_v39 }
0x2ba9   :  { %5716 = vrot.lane.b32.xlu1 %v5637_v63, %s7729_s25  ;;  %v5757_v2 = vsel %vm4515_vm5, %v5749_v59, 0.0  ;;  %v5802_v12 = vsel %vm4515_vm5, %v5790_v10, 0.0 }
0x2baa   :  { %5758 = vadd.xlane.f32.xlu0 %v5757_v2  ;;  %v5029_v5 = vpop.permute.xlu0 %5028  ;;  %v9194_v24 = vld [vmem:[#allocation9 + $0x2] sm:$0x3]  ;;  %v9209_v15 = vld [vmem:[#allocation9 + $0x6] sm:$0x3] }
0x2bab   :  { %5032 = vst.msk [vmem:[#allocation8 + $0x6] sm:$0x3] %vm4515_vm5, %v5029_v5  ;;  %v5789_v9 = vmul.f32 %v9199_v7, %v9194_v24  ;;  %v5791_v13 = vmul.f32 %v9199_v7, %v9209_v15 }
0x2bad   :  { %v5799_v27 = vsel %vm4515_vm5, %v5789_v9, 0.0  ;;  %v5805_v17 = vsel %vm4515_vm5, %v5791_v13, 0.0  ;;  %v6463_v9 = vld [vmem:[%s9393_s17 + $0x1] ss:$0 sm:$0xff] }
0x2bae   :  { %5800 = vadd.xlane.f32.xlu0 %v5799_v27  ;;  %v5035_v11 = vpop.permute.xlu0 %5034  ;;  %v9228_v42 = vld [vmem:[#allocation8 + $0x4] sm:$0x3]  ;;  %v9238_v47 = vld [vmem:[#allocation8 + $0x8] sm:$0x3] }
0x2baf   :  { %5038 = vst.msk [vmem:[#allocation9 + $0x8] sm:$0x3] %vm4515_vm5, %v5035_v11  ;;  %v5751_v25 = vmul.f32 %v9186_v61, %v9228_v42  ;;  %v5753_v6 = vmul.f32 %v9186_v61, %v9238_v47 }
0x2bb1   :  { %v5763_v3 = vsel %vm4515_vm5, %v5751_v25, 0.0  ;;  %v5769_v31 = vsel %vm4515_vm5, %v5753_v6, 0.0 }
0x2bb2   :  { %v4863_v14 = vpop.permute.xlu0 %4862  ;;  %5803 = vadd.xlane.f32.xlu0 %v5802_v12  ;;  %v9233_v35 = vld [vmem:[#allocation8 + $0x6] sm:$0x3] }
0x2bb3   :  { %4866 = vst.msk [vmem:[#allocation9 + $0xa] sm:$0x3] %vm4515_vm5, %v4863_v14  ;;  %v5752_v36 = vmul.f32 %v9186_v61, %v9233_v35 }
0x2bb5   :  { %v5766_v29 = vsel %vm4515_vm5, %v5752_v36, 0.0 }
0x2bb6   :  { %v4691_v57 = vpop.permute.xlu0 %4690  ;;  %5806 = vadd.xlane.f32.xlu0 %v5805_v17  ;;  %v9217_v4 = vld [vmem:[#allocation9 + $0x8] sm:$0x3]  ;;  %v6465_v17 = vld [vmem:[%s9393_s17 + $0x3] ss:$0 sm:$0xff] }
0x2bb7   :  { %4694 = vst.msk [vmem:[#allocation9 + $0xc] sm:$0x3] %vm4515_vm5, %v4691_v57  ;;  %v5792_v40 = vmul.f32 %v9199_v7, %v9217_v4 }
0x2bb9   :  { %v5808_v22 = vsel %vm4515_vm5, %v5792_v40, 0.0  ;;  %v6466_v40 = vld [vmem:[%s9393_s17 + $0x4] ss:$0 sm:$0xff] }
0x2bba   :  { %v4519_v8 = vpop.permute.xlu0 %4518  ;;  %5809 = vadd.xlane.f32.xlu0 %v5808_v22  ;;  %v9248_v37 = vld [vmem:[#allocation9 + $0xa] sm:$0x3] }
0x2bbb   :  { %4522 = vst.msk [vmem:[#allocation9 + $0xe] sm:$0x3] %vm4515_vm5, %v4519_v8  ;;  %v5793_v18 = vmul.f32 %v9199_v7, %v9248_v37 }
0x2bbd   :  { %v5811_v52 = vsel %vm4515_vm5, %v5793_v18, 0.0 }
0x2bbe   :  { %v9258_v51 = vld [vmem:[#allocation9 + $0xc] sm:$0x3] }
0x2bbf   :  { %v5794_v55 = vmul.f32 %v9199_v7, %v9258_v51 }
0x2bc1   :  { %v5814_v28 = vsel %vm4515_vm5, %v5794_v55, 0.0 }
0x2bc2   :  { %v9269_v20 = vld [vmem:[#allocation9 + $0xe] sm:$0x3] }
0x2bc3   :  { %v5795_v62 = vmul.f32 %v9199_v7, %v9269_v20 }
0x2bc5   :  { %v5817_v45 = vsel %vm4515_vm5, %v5795_v62, 0.0 }
0x2bcd   :  { %5761 = vadd.xlane.f32.xlu1 %v5760_v23 }
0x2bd1   :  { %5764 = vadd.xlane.f32.xlu1 %v5763_v3 }
0x2bd5   :  { %5767 = vadd.xlane.f32.xlu1 %v5766_v29  ;;  %v6467_v29 = vld [vmem:[%s9393_s17 + $0x5] ss:$0 sm:$0xff] }
0x2bd9   :  { %5770 = vadd.xlane.f32.xlu1 %v5769_v31 }
0x2c0f   :  { %v5723_v33 = vpop.permute.xlu1 %5722 }
0x2c10   :  { %5725 = vst.msk [vmem:[#allocation9] sm:$0x3] %vm4515_vm5, %v5723_v33 }
0x2c13   :  { %v5373_v48 = vpop.permute.xlu1 %5372 }
0x2c14   :  { %5376 = vst.msk [vmem:[#allocation8 + $0xa] sm:$0x3] %vm4515_vm5, %v5373_v48 }
0x2c17   :  { %v5545_v19 = vpop.permute.xlu1 %5544  ;;  %v9246_v34 = vld [vmem:[#allocation9] sm:$0x3] }
0x2c18   :  { %5548 = vst.msk [vmem:[#allocation8 + $0xc] sm:$0x3] %vm4515_vm5, %v5545_v19  ;;  %v5788_v41 = vmul.f32 %v9199_v7, %v9246_v34  ;;  %v6468_v19 = vld [vmem:[%s9393_s17 + $0x6] ss:$0 sm:$0xff] }
0x2c1a   :  { %v5796_v53 = vsel %vm4515_vm5, %v5788_v41, 0.0 }
0x2c1b   :  { %5797 = vadd.xlane.f32.xlu0 %v5796_v53  ;;  %v5717_v46 = vpop.permute.xlu1 %5716  ;;  %v9256_v49 = vld [vmem:[#allocation8 + $0xa] sm:$0x3] }
0x2c1c   :  { %5720 = vst.msk [vmem:[#allocation8 + $0xe] sm:$0x3] %vm4515_vm5, %v5717_v46  ;;  %v5754_v58 = vmul.f32 %v9186_v61, %v9256_v49 }
0x2c1e   :  { %v5772_v54 = vsel %vm4515_vm5, %v5754_v58, 0.0 }
0x2c1f   :  { %5812 = vadd.xlane.f32.xlu0 %v5811_v52  ;;  %5773 = vadd.xlane.f32.xlu1 %v5772_v54  ;;  %v9267_v56 = vld [vmem:[#allocation8 + $0xc] sm:$0x3]  ;;  %v6469_v52 = vld [vmem:[%s9393_s17 + $0x7] ss:$0 sm:$0xff] }
0x2c20   :  { %v5755_v1 = vmul.f32 %v9186_v61, %v9267_v56 }
0x2c22   :  { %v5775_v16 = vsel %vm4515_vm5, %v5755_v1, 0.0 }
0x2c23   :  { %5815 = vadd.xlane.f32.xlu0 %v5814_v28  ;;  %5776 = vadd.xlane.f32.xlu1 %v5775_v16  ;;  %v9277_v26 = vld [vmem:[#allocation8 + $0xe] sm:$0x3] }
0x2c24   :  { %v5756_v43 = vmul.f32 %v9186_v61, %v9277_v26  ;;  %v6464_v61 = vld [vmem:[%s9393_s17 + $0x2] ss:$0 sm:$0xff] }
0x2c26   :  { %v5778_v21 = vsel %vm4515_vm5, %v5756_v43, 0.0 }
0x2c27   :  { %5818 = vadd.xlane.f32.xlu0 %v5817_v45  ;;  %5779 = vadd.xlane.f32.xlu1 %v5778_v21 }
0x2c33   :  { %v5759_v30 = vpop.xlane.xlu0 %5758 }
0x2c37   :  { %v5801_v44 = vpop.xlane.xlu0 %5800 }
0x2c3b   :  { %v5804_v59 = vpop.xlane.xlu0 %5803 }
0x2c3f   :  { %v5807_v5 = vpop.xlane.xlu0 %5806 }
0x2c43   :  { %v5810_v11 = vpop.xlane.xlu0 %5809 }
0x2c56   :  { %v5762_v38 = vpop.xlane.xlu1 %5761 }
0x2c57   :  { %v5821_v7 = vadd.f32 %v5801_v44, %v5762_v38 }
0x2c59   :  { %v5885_v12 = vadd.f32 %v6463_v9, %v5821_v7 }
0x2c5a   :  { %v5765_v63 = vpop.xlane.xlu1 %5764 }
0x2c5b   :  { %v5822_v27 = vadd.f32 %v5804_v59, %v5765_v63  ;;  %7688 = vtanh.f32 %v5885_v12 }
0x2c5d   :  { %v5886_v14 = vadd.f32 %v6464_v61, %v5822_v27 }
0x2c5e   :  { %v5768_v2 = vpop.xlane.xlu1 %5767 }
0x2c5f   :  { %v5823_v13 = vadd.f32 %v5807_v5, %v5768_v2  ;;  %7690 = vtanh.f32 %v5886_v14 }
0x2c61   :  { %v5887_v22 = vadd.f32 %v6465_v17, %v5823_v13 }
0x2c62   :  { %v5771_v10 = vpop.xlane.xlu1 %5770 }
0x2c63   :  { %v5824_v57 = vadd.f32 %v5810_v11, %v5771_v10  ;;  %7692 = vtanh.f32 %v5887_v22 }
0x2c65   :  { %v5888_v8 = vadd.f32 %v6466_v40, %v5824_v57 }
0x2c67   :  { %7694 = vtanh.f32 %v5888_v8 }
0x2c68   :  { %v7689_v46 = vpop.eup %7688 }
0x2c69   :  { %v5902_v28 = vmul.f32 1.442695, %v7689_v46 }
0x2c6c   :  { %v7691_v55 = vpop.eup %7690 }
0x2c6d   :  { %v5904_v43 = vmul.f32 1.442695, %v7691_v55 }
0x2c70   :  { %v7693_v62 = vpop.eup %7692 }
0x2c74   :  { %v7695_v45 = vpop.eup %7694 }
0x2c75   :  { %v5908_v44 = vmul.f32 1.442695, %v7695_v45 }
0x2ca4   :  { %v5798_v23 = vpop.xlane.xlu0 %5797 }
0x2ca5   :  { %v5820_v25 = vadd.f32 %v5798_v23, %v5759_v30  ;;  %v5906_v30 = vmul.f32 1.442695, %v7693_v62  ;;  %v7429_v62 = vld [vmem:[%s9395_s18] sm:$0xff]  }
0x2ca6   :  { %7277 = vmatpush3.bf16.msra.mxu1 %v7429_v62 }
0x2ca7   :  { %v5884_v3 = vadd.f32 %v6462_v50, %v5820_v25 }
0x2ca8   :  { %v5813_v36 = vpop.xlane.xlu0 %5812  ;;  %v5774_v6 = vpop.xlane.xlu1 %5773 }
0x2ca9   :  { %7696 = vtanh.f32 %v5884_v3  ;;  %v5825_v31 = vadd.f32 %v5813_v36, %v5774_v6 }
0x2cab   :  { %v5889_v33 = vadd.f32 %v6467_v29, %v5825_v31 }
0x2cac   :  { %v5816_v48 = vpop.xlane.xlu0 %5815  ;;  %v5777_v41 = vpop.xlane.xlu1 %5776 }
0x2cad   :  { %7698 = vtanh.f32 %v5889_v33  ;;  %v5826_v53 = vadd.f32 %v5816_v48, %v5777_v41 }
0x2caf   :  { %v5890_v18 = vadd.f32 %v6468_v19, %v5826_v53 }
0x2cb0   :  { %v5819_v58 = vpop.xlane.xlu0 %5818  ;;  %v5780_v54 = vpop.xlane.xlu1 %5779 }
0x2cb1   :  { %7700 = vtanh.f32 %v5890_v18  ;;  %v5827_v1 = vadd.f32 %v5819_v58, %v5780_v54 }
0x2cb3   :  { %v5891_v16 = vadd.f32 %v6469_v52, %v5827_v1 }
0x2cb5   :  { %7702 = vtanh.f32 %v5891_v16  ;;  %v7428_v16 = vld [vmem:[%s9394_s19] sm:$0xff]  }
0x2cb6   :  { %v7697_v21 = vpop.eup %7696  ;;  %7704 = vpow2.f32 %v5902_v28  ;;  %7271 = vmatpush3.bf16.msra.mxu0 %v7428_v16  ;;  %v6474_v16 = vld [vmem:[%s9398_s20] ss:$0 sm:$0xff] }
0x2cb7   :  { %v5900_v38 = vmul.f32 1.442695, %v7697_v21  ;;  %7706 = vpow2.f32 %v5904_v43  ;;  %7282 = vmatprep.subr.bf16.mxu0 %v7722_v0 }
0x2cb9   :  { %7708 = vpow2.f32 %v5900_v38 }
0x2cba   :  { %v7699_v63 = vpop.eup %7698  ;;  %7710 = vpow2.f32 %v5906_v30 }
0x2cbb   :  { %v5910_v59 = vmul.f32 1.442695, %v7699_v63  ;;  %7712 = vpow2.f32 %v5908_v44 }
0x2cbd   :  { %7714 = vpow2.f32 %v5910_v59 }
0x2cbe   :  { %v7701_v2 = vpop.eup %7700 }
0x2cbf   :  { %v5912_v5 = vmul.f32 1.442695, %v7701_v2 }
0x2cc1   :  { %7716 = vpow2.f32 %v5912_v5 }
0x2cc2   :  { %v7703_v7 = vpop.eup %7702 }
0x2cc3   :  { %v5914_v9 = vmul.f32 1.442695, %v7703_v7  ;;  %v7705_v27 = vpop.eup %7704 }
0x2cc4   :  { %v7707_v61 = vpop.eup %7706  ;;  %v5918_v11 = vsel %vm5916_vm6, %v7705_v27, 0.0 }
0x2cc5   :  { %7718 = vpow2.f32 %v5914_v9  ;;  %v5920_v17 = vsel %vm5916_vm6, %v7707_v61, 0.0 }
0x2cc6   :  { %v7709_v10 = vpop.eup %7708 }
0x2cc7   :  { %v5917_v12 = vsel %vm5916_vm6, %v7709_v10, 0.0  ;;  %v7711_v13 = vpop.eup %7710 }
0x2cc8   :  { %v5919_v14 = vadd.f32 %v5918_v11, %v5917_v12  ;;  %v7713_v57 = vpop.eup %7712  ;;  %v5922_v22 = vsel %vm5916_vm6, %v7711_v13, 0.0 }
0x2cc9   :  { %v5924_v23 = vsel %vm5916_vm6, %v7713_v57, 0.0 }
0x2cca   :  { %v5921_v40 = vadd.f32 %v5920_v17, %v5919_v14  ;;  %v7715_v8 = vpop.eup %7714 }
0x2ccb   :  { %v5926_v36 = vsel %vm5916_vm6, %v7715_v8, 0.0 }
0x2ccc   :  { %v5923_v50 = vadd.f32 %v5922_v22, %v5921_v40 }
0x2cce   :  { %v7717_v25 = vpop.eup %7716  ;;  %v5925_v3 = vadd.f32 %v5924_v23, %v5923_v50 }
0x2ccf   :  { %v5928_v6 = vsel %vm5916_vm6, %v7717_v25, 0.0 }
0x2cd0   :  { %v5927_v29 = vadd.f32 %v5926_v36, %v5925_v3 }
0x2cd2   :  { %v7719_v31 = vpop.eup %7718  ;;  %v5929_v33 = vadd.f32 %v5928_v6, %v5927_v29 }
0x2cd3   :  { %v5930_v48 = vsel %vm5916_vm6, %v7719_v31, 0.0 }
0x2cd4   :  { %v5931_v19 = vadd.f32 %v5930_v48, %v5929_v33 }
0x2cd6   :  { %v5932_v41 = vadd.f32 1e-10, %v5931_v19 }
0x2cd8   :  { %7720 = vrcp.f32 %v5932_v41 }
0x2ce5   :  { %v7721_v53 = vpop.eup %7720 }
0x2ce6   :  { %v5935_v18 = vmul.f32 %v7721_v53, %v7705_v27  ;;  %v5934_v46 = vmul.f32 %v7721_v53, %v7709_v10  ;;  %v5936_v58 = vmul.f32 %v7721_v53, %v7707_v61  ;;  %v5937_v52 = vmul.f32 %v7721_v53, %v7711_v13 }
0x2ce7   :  { %v5938_v54 = vmul.f32 %v7721_v53, %v7713_v57  ;;  %v5939_v55 = vmul.f32 %v7721_v53, %v7715_v8  ;;  %v5940_v1 = vmul.f32 %v7721_v53, %v7717_v25  ;;  %v5941_v28 = vmul.f32 %v7721_v53, %v7719_v31 }
0x2ce8   :  { %5949 = vperm.xlu0 %7299, %v5935_v18   ;;  %5944 = vperm.xlu1 %7298, %v5934_v46  }
0x2cec   :  { %5954 = vperm.xlu1 %7298, %v5936_v58  }
0x2cf0   :  { %5959 = vperm.xlu1 %7298, %v5937_v52  }
0x2cf4   :  { %5964 = vperm.xlu1 %7298, %v5938_v54  }
0x2cf8   :  { %5969 = vperm.xlu1 %7298, %v5939_v55   ;;  %v28_v55 = vstv %s9397_s22 }
0x2cf9   :  { %29 = vst [vmem:[#allocation10] sm:$0x1] %v28_v55 }
0x2cfc   :  { %5974 = vperm.xlu1 %7298, %v5940_v1  }
0x2d00   :  { %5979 = vperm.xlu1 %7298, %v5941_v28  }
0x2d63   :  { %v5945_v43 = vpop.permute.xlu1 %5944  ;;  %v5950_v21 = vpop.permute.xlu0 %5949 }
0x2d64   :  { %v5983_v30 = vmul.f32 %v5950_v21, %v9224_v60  ;;  %v6006_v38 = vmul.f32 %v5950_v21, %v9194_v24  ;;  %v5982_v63 = vmul.f32 %v5945_v43, %v9181_v32  ;;  %v6005_v59 = vmul.f32 %v5945_v43, %v9246_v34 }
0x2d66   :  { %v5991_v7 = vsel %vm4515_vm5, %v5983_v30, 0.0  ;;  %v6014_v9 = vsel %vm4515_vm5, %v6006_v38, 0.0  ;;  %v5990_v61 = vsel %vm4515_vm5, %v5982_v63, 0.0  ;;  %v6013_v60 = vsel %vm4515_vm5, %v6005_v59, 0.0 }
0x2d67   :  { %v5955_v45 = vpop.permute.xlu1 %5954  ;;  %v5992_v11 = vadd.f32 %v5991_v7, %v5990_v61  ;;  %v6015_v12 = vadd.f32 %v6014_v9, %v6013_v60 }
0x2d68   :  { %v5984_v2 = vmul.f32 %v5955_v45, %v9228_v42  ;;  %v6007_v5 = vmul.f32 %v5955_v45, %v9201_v39 }
0x2d6a   :  { %v5993_v32 = vsel %vm4515_vm5, %v5984_v2, 0.0  ;;  %v6016_v34 = vsel %vm4515_vm5, %v6007_v5, 0.0  ;;  %v6475_v2 = vld [vmem:[#allocation10] ss:$0 sm:$0xff] }
0x2d6b   :  { %v5960_v44 = vpop.permute.xlu1 %5959  ;;  %v6017_v40 = vadd.f32 %v6016_v34, %v6015_v12 }
0x2d6c   :  { %v5985_v24 = vmul.f32 %v5960_v44, %v9233_v35  ;;  %v6008_v10 = vmul.f32 %v5960_v44, %v9209_v15  ;;  %v5994_v15 = vadd.f32 %v5993_v32, %v5992_v11 }
0x2d6e   :  { %v5995_v14 = vsel %vm4515_vm5, %v5985_v24, 0.0  ;;  %v6018_v17 = vsel %vm4515_vm5, %v6008_v10, 0.0 }
0x2d6f   :  { %v5965_v27 = vpop.permute.xlu1 %5964  ;;  %v6019_v50 = vadd.f32 %v6018_v17, %v6017_v40 }
0x2d70   :  { %v5986_v42 = vmul.f32 %v5965_v27, %v9238_v47  ;;  %v6009_v39 = vmul.f32 %v5965_v27, %v9217_v4  ;;  %v5996_v47 = vadd.f32 %v5995_v14, %v5994_v15 }
0x2d72   :  { %v5997_v22 = vsel %vm4515_vm5, %v5986_v42, 0.0  ;;  %v6020_v8 = vsel %vm4515_vm5, %v6009_v39, 0.0 }
0x2d73   :  { %v5970_v13 = vpop.permute.xlu1 %5969  ;;  %v6021_v29 = vadd.f32 %v6020_v8, %v6019_v50 }
0x2d74   :  { %v5987_v57 = vmul.f32 %v5970_v13, %v9256_v49  ;;  %v6010_v35 = vmul.f32 %v5970_v13, %v9248_v37  ;;  %v5998_v49 = vadd.f32 %v5997_v22, %v5996_v47 }
0x2d76   :  { %v5999_v23 = vsel %vm4515_vm5, %v5987_v57, 0.0  ;;  %v6022_v25 = vsel %vm4515_vm5, %v6010_v35, 0.0 }
0x2d77   :  { %v5975_v4 = vpop.permute.xlu1 %5974  ;;  %v6000_v31 = vadd.f32 %v5999_v23, %v5998_v49  ;;  %v6023_v33 = vadd.f32 %v6022_v25, %v6021_v29 }
0x2d78   :  { %v5988_v3 = vmul.f32 %v5975_v4, %v9267_v56  ;;  %v6011_v36 = vmul.f32 %v5975_v4, %v9258_v51 }
0x2d7a   :  { %v6001_v37 = vsel %vm4515_vm5, %v5988_v3, 0.0  ;;  %v6024_v6 = vsel %vm4515_vm5, %v6011_v36, 0.0 }
0x2d7b   :  { %v5980_v48 = vpop.permute.xlu1 %5979  ;;  %v6002_v53 = vadd.f32 %v6001_v37, %v6000_v31  ;;  %v6025_v18 = vadd.f32 %v6024_v6, %v6023_v33 }
0x2d7c   :  { %v5989_v19 = vmul.f32 %v5980_v48, %v9277_v26  ;;  %v6012_v41 = vmul.f32 %v5980_v48, %v9269_v20  ;;  %v7430_v20 = vld [vmem:[%s9396_s21 + $0x8] sm:$0xff]   ;;  %v7431_v26 = vld [vmem:[%s9396_s21] sm:$0xff]  }
0x2d7e   :  { %v6003_v46 = vsel %vm4515_vm5, %v5989_v19, 0.0  ;;  %v6026_v56 = vsel %vm4515_vm5, %v6012_v41, 0.0 }
0x2d7f   :  { %v6004_v51 = vadd.f32 %v6003_v46, %v6002_v53  ;;  %v6027_v58 = vadd.f32 %v6026_v56, %v6025_v18 }
0x2d81   :  { %v6028_v52 = vpack.c.bf16 %v6004_v51, %v6004_v51  ;;  %v6031_v54 = vpack.c.bf16 %v6027_v58, %v6027_v58 }
0x2d83   :  { %7273 = vmatmul.mubr.msk.bf16.vlgmr.msra.gmra.mxu0 %vm101_vm0, %v6031_v54  ;;  %7279 = vmatmul.mubr.msk.bf16.vlgmr.msra.gmra.mxu1 %vm101_vm0, %v6028_v52 }
0x2d84   :  { %7286 = vmatprep.mubr.msk.bf16.mxu0 %vm7723_vm1, %v7722_v0  ;;  %7283 = vmatpush3.bf16.msra.mxu0 %v7430_v20 }
0x2d85   :  { %7284 = vmatprep.subr.bf16.mxu0 %v7722_v0 }
0x2d88   :  { %7285 = vmatpush3.bf16.msra.mxu0 %v7431_v26 }
0x2e43   :  { %v6077_v1 = vpop.f32.mrf.mxu0  ;;  %v6126_v28 = vpop.f32.mrf.mxu1 }
0x2e44   :  { %v6127_v62 = vadd.f32 %v6126_v28, %v6077_v1 }
0x2e45   :  { %v7274_v43 = vpop.f32.mrf.mxu0  ;;  %v7280_v45 = vpop.f32.mrf.mxu1 }
0x2e46   :  { %v6139_v0 = vadd.f32 %v6474_v16, %v6127_v62 }
0x2e47   :  { %v6080_v21 = vpop.f32.mrf.mxu0  ;;  %v6129_v30 = vpop.f32.mrf.mxu1 }
0x2e48   :  { %v6140_v38 = vmax.f32 %v6139_v0, 0.0 }
0x2e49   :  { %v7275_v44 = vpop.f32.mrf.mxu0  ;;  %v7281_v63 = vpop.f32.mrf.mxu1 }
0x2e4a   :  { %v6141_v59 = vpack.c.bf16 %v6140_v38, %v6140_v38 }
0x2e4c   :  { %7287 = vmatmul.mubr.msk.bf16.vlgmr.msra.gmra.mxu0 %vm958_vm2, %v6141_v59 }
0x2f0c   :  { %v6202_v5 = vpop.f32.mrf.mxu0 }
0x2f0d   :  { %v6203_v7 = vadd.f32 %v6475_v2, %v6202_v5 }
0x2f0e   :  { %v7288_v9 = vpop.f32.mrf.mxu0 }
0x2f0f   :  { %6208 = vst.msk [vmem:[%s9399_s23] sm:$0x3] %vm5916_vm6, %v6203_v7 }
0x2f10   :  { %v6205_v27 = vpop.f32.mrf.mxu0 }
0x2f12   :  { %v7289_v61 = vpop.f32.mrf.mxu0 }

</bundles_post_ra>
